<compile_context>
chip_gen: v7x
topology: tpu7x:2x2x1
jax: 0.10.0
libtpu: 0.0.40
codegen_flags: <defaults>
</compile_context>

<pallas_src>
from functools import partial

import jax
import jax.numpy as jnp
from jax import lax
from jax.experimental import pallas as pl
from jax.experimental.pallas import tpu as pltpu


# ----------------------------------------------------------------------------
# Fused Pallas kernel
# ----------------------------------------------------------------------------
def fused_tagger_kernel(tok_ref,                                  # (L, 1) int32
                        emb_ref,                                  # (Vp, E)
                        l0_wih_ref, l0_uf_ref, l0_ub_ref, l0_b_ref,   # (E,8H),(H,4H),(H,4H),(1,8H)
                        l1_wih_ref, l1_uf_ref, l1_ub_ref, l1_b_ref,   # (2H,8H),(H,4H),(H,4H),(1,8H)
                        tag_w_ref, tag_b_ref,                     # (2H, Tp), (1, Tp)
                        out_ref):                                 # (L, Tp)
    L = out_ref.shape[0]
    Vp = emb_ref.shape[0]
    H = l0_uf_ref.shape[0]
    G = 4 * H                                                     # per-direction gate width

    # ---- embedding lookup as a one-hot matmul (rides the otherwise-idle MXU) ----
    onehot = (tok_ref[...] ==
              lax.broadcasted_iota(jnp.int32, (L, Vp), 1)).astype(jnp.float32)
    x = jnp.dot(onehot, emb_ref[...], preferred_element_type=jnp.float32)   # (L, E)

    # ---- one bidirectional LSTM layer --------------------------------------
    # Packed layouts (built offline in pack_params):
    #   wih : (in, 8H)  columns = [fwd: i,f,o,g | bwd: i,f,o,g]
    #   uf  : (H, 4H)   fwd recurrent weights, columns [i,f,o,g]  (dense, no zeros)
    #   ub  : (H, 4H)   bwd recurrent weights
    #   b   : (1, 8H)   combined (b_ih + b_hh), same column layout as wih
    def bilstm_layer(xin, wih_ref, uf_ref, ub_ref, b_ref):
        # Batched input projection for all timesteps and both directions (MXU).
        xg = jnp.dot(xin, wih_ref[...],
                     preferred_element_type=jnp.float32) + b_ref[...]       # (L, 8H)

        def cell(x_row, h, c, u_ref):
            # x_row, h, c : (1, 4H)/(1, H)/(1, H); gates columns [i | f | o | g].
            gates = x_row + jnp.dot(h, u_ref[...],
                                    preferred_element_type=jnp.float32)     # (1, 4H)
            s = jax.nn.sigmoid(gates[:, :3 * H])                            # [i | f | o]
            g = jnp.tanh(gates[:, 3 * H:])                                  # g
            c = s[:, H:2 * H] * c + s[:, :H] * g
            h = s[:, 2 * H:] * jnp.tanh(c)
            return h, c

        hf = jnp.zeros((1, H), jnp.float32)
        cf = jnp.zeros((1, H), jnp.float32)
        hb = jnp.zeros((1, H), jnp.float32)
        cb = jnp.zeros((1, H), jnp.float32)
        hf_rows, hb_rows = [], []
        for t in range(L):                       # static unroll (L is small)
            rt = L - 1 - t
            hf, cf = cell(xg[t:t + 1, :G], hf, cf, uf_ref)     # fwd: input time t
            hb, cb = cell(xg[rt:rt + 1, G:], hb, cb, ub_ref)   # bwd: input time L-1-t
            hf_rows.append(hf)
            hb_rows.append(hb)

        fwd = jnp.concatenate(hf_rows, axis=0)                 # (L, H), time order
        bwd = jnp.concatenate(hb_rows[::-1], axis=0)           # (L, H), back to time order
        return jnp.concatenate([fwd, bwd], axis=-1)            # (L, 2H)

    h1 = bilstm_layer(x, l0_wih_ref, l0_uf_ref, l0_ub_ref, l0_b_ref)
    h2 = bilstm_layer(h1, l1_wih_ref, l1_uf_ref, l1_ub_ref, l1_b_ref)

    # ---- tag projection + row-wise log_softmax (lane-dense, Tp = 128) ------
    logits = jnp.dot(h2, tag_w_ref[...],
                     preferred_element_type=jnp.float32) + tag_b_ref[...]   # (L, Tp)
    m = jnp.max(logits, axis=-1, keepdims=True)
    z = logits - m
    out_ref[...] = z - jnp.log(jnp.sum(jnp.exp(z), axis=-1, keepdims=True))


# ----------------------------------------------------------------------------
# Wrapper
# ----------------------------------------------------------------------------
@partial(jax.jit, static_argnames=("tagset_size",))
def sequence_tagging_forward(params, tokens, *, tagset_size):
    L = tokens.shape[0]
    Vp, E = params["emb"].shape
    H = params["l0_uf"].shape[0]
    Tp = params["tag_w_t"].shape[1]
    tok2d = tokens.reshape(L, 1).astype(jnp.int32)

    out = pl.pallas_call(
        fused_tagger_kernel,
        out_shape=jax.ShapeDtypeStruct((L, Tp), jnp.float32),
        grid=(1,),
        in_specs=[
            pl.BlockSpec((L, 1), lambda i: (0, 0)),
            pl.BlockSpec((Vp, E), lambda i: (0, 0)),
            pl.BlockSpec((E, 8 * H), lambda i: (0, 0)),
            pl.BlockSpec((H, 4 * H), lambda i: (0, 0)),
            pl.BlockSpec((H, 4 * H), lambda i: (0, 0)),
            pl.BlockSpec((1, 8 * H), lambda i: (0, 0)),
            pl.BlockSpec((2 * H, 8 * H), lambda i: (0, 0)),
            pl.BlockSpec((H, 4 * H), lambda i: (0, 0)),
            pl.BlockSpec((H, 4 * H), lambda i: (0, 0)),
            pl.BlockSpec((1, 8 * H), lambda i: (0, 0)),
            pl.BlockSpec((2 * H, Tp), lambda i: (0, 0)),
            pl.BlockSpec((1, Tp), lambda i: (0, 0)),
        ],
        out_specs=pl.BlockSpec((L, Tp), lambda i: (0, 0)),
        compiler_params=pltpu.CompilerParams(
            dimension_semantics=("arbitrary",),
            vmem_limit_bytes=32 * 1024 * 1024),
    )(tok2d, params["emb"],
      params["l0_wih"], params["l0_uf"], params["l0_ub"], params["l0_bias"],
      params["l1_wih"], params["l1_uf"], params["l1_ub"], params["l1_bias"],
      params["tag_w_t"], params["tag_b"])

    return out[:, :tagset_size]


# ----------------------------------------------------------------------------
# Parameters: raw PyTorch-layout params, then packed into the kernel layout
# ----------------------------------------------------------------------------
def make_raw_params(key, vocab, tagset, emb_dim, hidden):
    """PyTorch-layout parameters: w_ih (4H,in), w_hh (4H,H), biases (4H,), gates [i,f,g,o]."""
    def uni(k, shape, scale):
        return jax.random.uniform(k, shape, jnp.float32, -scale, scale)

    H = hidden
    s = 1.0 / (H ** 0.5)
    s_tag = 1.0 / ((2 * H) ** 0.5)
    keys = iter(jax.random.split(key, 20))

    def lstm_dir(in_dim):
        return (uni(next(keys), (4 * H, in_dim), s),
                uni(next(keys), (4 * H, H), s),
                uni(next(keys), (4 * H,), s),
                uni(next(keys), (4 * H,), s))

    return {
        "emb": jax.random.normal(next(keys), (vocab, emb_dim), jnp.float32),
        "l0_f": lstm_dir(emb_dim),
        "l0_b": lstm_dir(emb_dim),
        "l1_f": lstm_dir(2 * H),
        "l1_b": lstm_dir(2 * H),
        "tag_w": uni(next(keys), (tagset, 2 * H), s_tag),
        "tag_b": uni(next(keys), (tagset,), s_tag),
    }


def _reorder_ifgo_to_ifog(w):
    """Reorder PyTorch gate blocks [i, f, g, o] -> kernel order [i, f, o, g] (axis 0)."""
    i, f, g, o = jnp.split(w, 4, axis=0)
    return jnp.concatenate([i, f, o, g], axis=0)


def _pack_direction(w_ih, w_hh, b_ih, b_hh):
    wih_t = _reorder_ifgo_to_ifog(w_ih).T                       # (in, 4H)
    whh_t = _reorder_ifgo_to_ifog(w_hh).T                       # (H, 4H), dense
    b = (_reorder_ifgo_to_ifog(b_ih) + _reorder_ifgo_to_ifog(b_hh))[None, :]  # (1, 4H)
    return wih_t, whh_t, b


def _pack_layer(fwd_raw, bwd_raw):
    wf, uf, bf = _pack_direction(*fwd_raw)
    wb, ub, bb = _pack_direction(*bwd_raw)
    wih = jnp.concatenate([wf, wb], axis=1)                     # (in, 8H) = [fwd | bwd]
    b = jnp.concatenate([bf, bb], axis=1)                       # (1, 8H)
    return wih, uf, ub, b


def pack_params(raw, hidden, lane=128):
    H = hidden
    l0_wih, l0_uf, l0_ub, l0_bias = _pack_layer(raw["l0_f"], raw["l0_b"])
    l1_wih, l1_uf, l1_ub, l1_bias = _pack_layer(raw["l1_f"], raw["l1_b"])

    # Pad vocab to a lane multiple so the one-hot gather matmul is fully aligned.
    V, E = raw["emb"].shape
    Vp = ((V + lane - 1) // lane) * lane
    emb_p = jnp.zeros((Vp, E), jnp.float32).at[:V].set(raw["emb"])

    # Pad tagset to a full lane: zero weight columns, -1e30 bias so softmax ignores them.
    T = raw["tag_w"].shape[0]
    Tp = ((T + lane - 1) // lane) * lane
    tag_w_t = jnp.zeros((2 * H, Tp), jnp.float32).at[:, :T].set(raw["tag_w"].T)
    tag_b = jnp.full((1, Tp), -1e30, jnp.float32).at[0, :T].set(raw["tag_b"])

    return {
        "emb": emb_p,
        "l0_wih": l0_wih, "l0_uf": l0_uf, "l0_ub": l0_ub, "l0_bias": l0_bias,
        "l1_wih": l1_wih, "l1_uf": l1_uf, "l1_ub": l1_ub, "l1_bias": l1_bias,
        "tag_w_t": tag_w_t,
        "tag_b": tag_b,
    }


# ----------------------------------------------------------------------------
# Pure-JAX reference (PyTorch semantics, independent of the packed layout)
# ----------------------------------------------------------------------------
def _ref_lstm_direction(x, w_ih, w_hh, b_ih, b_hh):
    H = w_hh.shape[1]

    def step(carry, x_t):
        h, c = carry
        gates = (jnp.dot(x_t, w_ih.T, precision=lax.Precision.HIGHEST)
                 + jnp.dot(h, w_hh.T, precision=lax.Precision.HIGHEST)
                 + b_ih + b_hh)
        i = jax.nn.sigmoid(gates[0:H])
        f = jax.nn.sigmoid(gates[H:2 * H])
        g = jnp.tanh(gates[2 * H:3 * H])
        o = jax.nn.sigmoid(gates[3 * H:4 * H])
        c = f * c + i * g
        h = o * jnp.tanh(c)
        return (h, c), h

    init = (jnp.zeros((H,), jnp.float32), jnp.zeros((H,), jnp.float32))
    _, hs = lax.scan(step, init, x)
    return hs


def reference_forward(raw, tokens):
    x = raw["emb"][tokens]
    for lf, lb in (("l0_f", "l0_b"), ("l1_f", "l1_b")):
        hf = _ref_lstm_direction(x, *raw[lf])
        hb = _ref_lstm_direction(x[::-1], *raw[lb])[::-1]
        x = jnp.concatenate([hf, hb], axis=-1)
    logits = jnp.dot(x, raw["tag_w"].T, precision=lax.Precision.HIGHEST) + raw["tag_b"]
    return jax.nn.log_softmax(logits, axis=-1)


# ----------------------------------------------------------------------------
if __name__ == "__main__":
    DICT_SIZE = 50
    TAGSET_SIZE = 12
    EMBEDDING_DIM = 128   # module default is 300; lane-aligned small shape for the demo
    HIDDEN = 128          # module hard-codes 300; lane-aligned small shape for the demo
    SEQ_LEN = 8

    key = jax.random.PRNGKey(0)
    k_params, k_tok = jax.random.split(key)
    raw = make_raw_params(k_params, DICT_SIZE, TAGSET_SIZE, EMBEDDING_DIM, HIDDEN)
    params = pack_params(raw, HIDDEN)
    tokens = jax.random.randint(k_tok, (SEQ_LEN,), 0, DICT_SIZE, dtype=jnp.int32)

    tag_scores = sequence_tagging_forward(params, tokens, tagset_size=TAGSET_SIZE)
    jax.block_until_ready(tag_scores)

    assert tag_scores.shape == (SEQ_LEN, TAGSET_SIZE)
    assert tag_scores.dtype == jnp.float32
    # log_softmax rows must sum (in prob space) to ~1.
    assert bool(jnp.all(jnp.abs(jnp.sum(jnp.exp(tag_scores), axis=1) - 1.0) < 1e-4))
    # Match the pure-JAX / PyTorch-semantics reference.
    ref = reference_forward(raw, tokens)
    max_err = float(jnp.max(jnp.abs(tag_scores - ref)))
    assert max_err < 1e-3, f"mismatch vs pure-JAX reference: {max_err}"
    print("KERNEL_OK")
</pallas_src>

<mosaic_0001>
module attributes {stable_mosaic.version = 11 : i64} {
  func.func @fused_tagger_kernel(%arg0: i32, %arg1: memref<8x1xi32, #tpu.memory_space<vmem>>, %arg2: memref<128x128xf32, #tpu.memory_space<vmem>>, %arg3: memref<128x1024xf32, #tpu.memory_space<vmem>>, %arg4: memref<128x512xf32, #tpu.memory_space<vmem>>, %arg5: memref<128x512xf32, #tpu.memory_space<vmem>>, %arg6: memref<1x1024xf32, #tpu.memory_space<vmem>>, %arg7: memref<256x1024xf32, #tpu.memory_space<vmem>>, %arg8: memref<128x512xf32, #tpu.memory_space<vmem>>, %arg9: memref<128x512xf32, #tpu.memory_space<vmem>>, %arg10: memref<1x1024xf32, #tpu.memory_space<vmem>>, %arg11: memref<256x128xf32, #tpu.memory_space<vmem>>, %arg12: memref<1x128xf32, #tpu.memory_space<vmem>>, %arg13: memref<8x128xf32, #tpu.memory_space<vmem>>) attributes {dimension_semantics = [#tpu.dimension_semantics<arbitrary>], iteration_bounds = array<i64: 1>, scalar_prefetch = 0 : i64, scratch_operands = 0 : i64, tpu.core_type = #tpu.core_type<tc>, window_params = [{pipeline_mode = #tpu.pipeline_mode<synchronous>, transform_indices = @transform_0, window_bounds = array<i64: 8, 1>}, {pipeline_mode = #tpu.pipeline_mode<synchronous>, transform_indices = @transform_1, window_bounds = array<i64: 128, 128>}, {pipeline_mode = #tpu.pipeline_mode<synchronous>, transform_indices = @transform_2, window_bounds = array<i64: 128, 1024>}, {pipeline_mode = #tpu.pipeline_mode<synchronous>, transform_indices = @transform_3, window_bounds = array<i64: 128, 512>}, {pipeline_mode = #tpu.pipeline_mode<synchronous>, transform_indices = @transform_4, window_bounds = array<i64: 128, 512>}, {pipeline_mode = #tpu.pipeline_mode<synchronous>, transform_indices = @transform_5, window_bounds = array<i64: 1, 1024>}, {pipeline_mode = #tpu.pipeline_mode<synchronous>, transform_indices = @transform_6, window_bounds = array<i64: 256, 1024>}, {pipeline_mode = #tpu.pipeline_mode<synchronous>, transform_indices = @transform_7, window_bounds = array<i64: 128, 512>}, {pipeline_mode = #tpu.pipeline_mode<synchronous>, transform_indices = @transform_8, window_bounds = array<i64: 128, 512>}, {pipeline_mode = #tpu.pipeline_mode<synchronous>, transform_indices = @transform_9, window_bounds = array<i64: 1, 1024>}, {pipeline_mode = #tpu.pipeline_mode<synchronous>, transform_indices = @transform_10, window_bounds = array<i64: 256, 128>}, {pipeline_mode = #tpu.pipeline_mode<synchronous>, transform_indices = @transform_11, window_bounds = array<i64: 1, 128>}, {pipeline_mode = #tpu.pipeline_mode<synchronous>, transform_indices = @transform_12, window_bounds = array<i64: 8, 128>}]} {
    %c0 = arith.constant 0 : index
    %c0_0 = arith.constant 0 : index
    %0 = vector.load %arg1[%c0, %c0_0] : memref<8x1xi32, #tpu.memory_space<vmem>>, vector<8x1xi32>
    %1 = tpu.iota {dimensions = array<i32: 1>} : vector<8x128xi32>
    %2 = vector.broadcast %0 : vector<8x1xi32> to vector<8x128xi32>
    %3 = arith.cmpi eq, %2, %1 : vector<8x128xi32>
    %4 = arith.extui %3 : vector<8x128xi1> to vector<8x128xi32>
    %5 = arith.sitofp %4 : vector<8x128xi32> to vector<8x128xf32>
    %c0_1 = arith.constant 0 : index
    %c0_2 = arith.constant 0 : index
    %6 = vector.load %arg2[%c0_1, %c0_2] : memref<128x128xf32, #tpu.memory_space<vmem>>, vector<128x128xf32>
    %cst = arith.constant dense<0.000000e+00> : vector<8x128xf32>
    %7 = tpu.matmul %5, %6, %cst {dimension_numbers = #tpu.dot_dimension_numbers<[1], [0], [0], [1], [0, 0, 1, 1], [], []>} : vector<8x128xf32>, vector<128x128xf32>, vector<8x128xf32> -> vector<8x128xf32>
    %c0_3 = arith.constant 0 : index
    %c0_4 = arith.constant 0 : index
    %8 = vector.load %arg3[%c0_3, %c0_4] : memref<128x1024xf32, #tpu.memory_space<vmem>>, vector<128x1024xf32>
    %cst_5 = arith.constant dense<0.000000e+00> : vector<8x1024xf32>
    %9 = tpu.matmul %7, %8, %cst_5 {dimension_numbers = #tpu.dot_dimension_numbers<[1], [0], [0], [1], [0, 0, 1, 1], [], []>} : vector<8x128xf32>, vector<128x1024xf32>, vector<8x1024xf32> -> vector<8x1024xf32>
    %c0_6 = arith.constant 0 : index
    %c0_7 = arith.constant 0 : index
    %10 = vector.load %arg6[%c0_6, %c0_7] : memref<1x1024xf32, #tpu.memory_space<vmem>>, vector<1x1024xf32>
    %11 = vector.broadcast %10 : vector<1x1024xf32> to vector<8x1024xf32>
    %12 = arith.addf %9, %11 : vector<8x1024xf32>
    %cst_8 = arith.constant 0.000000e+00 : f32
    %13 = vector.broadcast %cst_8 : f32 to vector<1x128xf32>
    %cst_9 = arith.constant 0.000000e+00 : f32
    %14 = vector.broadcast %cst_9 : f32 to vector<1x128xf32>
    %cst_10 = arith.constant 0.000000e+00 : f32
    %15 = vector.broadcast %cst_10 : f32 to vector<1x128xf32>
    %cst_11 = arith.constant 0.000000e+00 : f32
    %16 = vector.broadcast %cst_11 : f32 to vector<1x128xf32>
    %17 = vector.extract_strided_slice %12 {offsets = [0, 0], sizes = [1, 512], strides = [1, 1]} : vector<8x1024xf32> to vector<1x512xf32>
    %c0_12 = arith.constant 0 : index
    %c0_13 = arith.constant 0 : index
    %18 = vector.load %arg4[%c0_12, %c0_13] : memref<128x512xf32, #tpu.memory_space<vmem>>, vector<128x512xf32>
    %cst_14 = arith.constant dense<0.000000e+00> : vector<1x512xf32>
    %19 = tpu.matmul %13, %18, %cst_14 {dimension_numbers = #tpu.dot_dimension_numbers<[1], [0], [0], [1], [0, 0, 1, 1], [], []>} : vector<1x128xf32>, vector<128x512xf32>, vector<1x512xf32> -> vector<1x512xf32>
    %20 = arith.addf %17, %19 : vector<1x512xf32>
    %21 = vector.extract_strided_slice %20 {offsets = [0, 0], sizes = [1, 384], strides = [1, 1]} : vector<1x512xf32> to vector<1x384xf32>
    %22 = arith.negf %21 : vector<1x384xf32>
    %23 = math.exp %22 : vector<1x384xf32>
    %cst_15 = arith.constant 1.000000e+00 : f32
    %24 = vector.broadcast %cst_15 : f32 to vector<1x384xf32>
    %25 = arith.addf %24, %23 : vector<1x384xf32>
    %26 = arith.divf %24, %25 : vector<1x384xf32>
    %27 = vector.extract_strided_slice %20 {offsets = [0, 384], sizes = [1, 128], strides = [1, 1]} : vector<1x512xf32> to vector<1x128xf32>
    %28 = math.tanh %27 : vector<1x128xf32>
    %29 = vector.extract_strided_slice %26 {offsets = [0, 128], sizes = [1, 128], strides = [1, 1]} : vector<1x384xf32> to vector<1x128xf32>
    %30 = arith.mulf %29, %14 : vector<1x128xf32>
    %31 = vector.extract_strided_slice %26 {offsets = [0, 0], sizes = [1, 128], strides = [1, 1]} : vector<1x384xf32> to vector<1x128xf32>
    %32 = arith.mulf %31, %28 : vector<1x128xf32>
    %33 = arith.addf %30, %32 : vector<1x128xf32>
    %34 = vector.extract_strided_slice %26 {offsets = [0, 256], sizes = [1, 128], strides = [1, 1]} : vector<1x384xf32> to vector<1x128xf32>
    %35 = math.tanh %33 : vector<1x128xf32>
    %36 = arith.mulf %34, %35 : vector<1x128xf32>
    %37 = vector.extract_strided_slice %12 {offsets = [7, 512], sizes = [1, 512], strides = [1, 1]} : vector<8x1024xf32> to vector<1x512xf32>
    %c0_16 = arith.constant 0 : index
    %c0_17 = arith.constant 0 : index
    %38 = vector.load %arg5[%c0_16, %c0_17] : memref<128x512xf32, #tpu.memory_space<vmem>>, vector<128x512xf32>
    %cst_18 = arith.constant dense<0.000000e+00> : vector<1x512xf32>
    %39 = tpu.matmul %15, %38, %cst_18 {dimension_numbers = #tpu.dot_dimension_numbers<[1], [0], [0], [1], [0, 0, 1, 1], [], []>} : vector<1x128xf32>, vector<128x512xf32>, vector<1x512xf32> -> vector<1x512xf32>
    %40 = arith.addf %37, %39 : vector<1x512xf32>
    %41 = vector.extract_strided_slice %40 {offsets = [0, 0], sizes = [1, 384], strides = [1, 1]} : vector<1x512xf32> to vector<1x384xf32>
    %42 = arith.negf %41 : vector<1x384xf32>
    %43 = math.exp %42 : vector<1x384xf32>
    %cst_19 = arith.constant 1.000000e+00 : f32
    %44 = vector.broadcast %cst_19 : f32 to vector<1x384xf32>
    %45 = arith.addf %44, %43 : vector<1x384xf32>
    %46 = arith.divf %44, %45 : vector<1x384xf32>
    %47 = vector.extract_strided_slice %40 {offsets = [0, 384], sizes = [1, 128], strides = [1, 1]} : vector<1x512xf32> to vector<1x128xf32>
    %48 = math.tanh %47 : vector<1x128xf32>
    %49 = vector.extract_strided_slice %46 {offsets = [0, 128], sizes = [1, 128], strides = [1, 1]} : vector<1x384xf32> to vector<1x128xf32>
    %50 = arith.mulf %49, %16 : vector<1x128xf32>
    %51 = vector.extract_strided_slice %46 {offsets = [0, 0], sizes = [1, 128], strides = [1, 1]} : vector<1x384xf32> to vector<1x128xf32>
    %52 = arith.mulf %51, %48 : vector<1x128xf32>
    %53 = arith.addf %50, %52 : vector<1x128xf32>
    %54 = vector.extract_strided_slice %46 {offsets = [0, 256], sizes = [1, 128], strides = [1, 1]} : vector<1x384xf32> to vector<1x128xf32>
    %55 = math.tanh %53 : vector<1x128xf32>
    %56 = arith.mulf %54, %55 : vector<1x128xf32>
    %57 = vector.extract_strided_slice %12 {offsets = [1, 0], sizes = [1, 512], strides = [1, 1]} : vector<8x1024xf32> to vector<1x512xf32>
    %c0_20 = arith.constant 0 : index
    %c0_21 = arith.constant 0 : index
    %58 = vector.load %arg4[%c0_20, %c0_21] : memref<128x512xf32, #tpu.memory_space<vmem>>, vector<128x512xf32>
    %cst_22 = arith.constant dense<0.000000e+00> : vector<1x512xf32>
    %59 = tpu.matmul %36, %58, %cst_22 {dimension_numbers = #tpu.dot_dimension_numbers<[1], [0], [0], [1], [0, 0, 1, 1], [], []>} : vector<1x128xf32>, vector<128x512xf32>, vector<1x512xf32> -> vector<1x512xf32>
    %60 = arith.addf %57, %59 : vector<1x512xf32>
    %61 = vector.extract_strided_slice %60 {offsets = [0, 0], sizes = [1, 384], strides = [1, 1]} : vector<1x512xf32> to vector<1x384xf32>
    %62 = arith.negf %61 : vector<1x384xf32>
    %63 = math.exp %62 : vector<1x384xf32>
    %cst_23 = arith.constant 1.000000e+00 : f32
    %64 = vector.broadcast %cst_23 : f32 to vector<1x384xf32>
    %65 = arith.addf %64, %63 : vector<1x384xf32>
    %66 = arith.divf %64, %65 : vector<1x384xf32>
    %67 = vector.extract_strided_slice %60 {offsets = [0, 384], sizes = [1, 128], strides = [1, 1]} : vector<1x512xf32> to vector<1x128xf32>
    %68 = math.tanh %67 : vector<1x128xf32>
    %69 = vector.extract_strided_slice %66 {offsets = [0, 128], sizes = [1, 128], strides = [1, 1]} : vector<1x384xf32> to vector<1x128xf32>
    %70 = arith.mulf %69, %33 : vector<1x128xf32>
    %71 = vector.extract_strided_slice %66 {offsets = [0, 0], sizes = [1, 128], strides = [1, 1]} : vector<1x384xf32> to vector<1x128xf32>
    %72 = arith.mulf %71, %68 : vector<1x128xf32>
    %73 = arith.addf %70, %72 : vector<1x128xf32>
    %74 = vector.extract_strided_slice %66 {offsets = [0, 256], sizes = [1, 128], strides = [1, 1]} : vector<1x384xf32> to vector<1x128xf32>
    %75 = math.tanh %73 : vector<1x128xf32>
    %76 = arith.mulf %74, %75 : vector<1x128xf32>
    %77 = vector.extract_strided_slice %12 {offsets = [6, 512], sizes = [1, 512], strides = [1, 1]} : vector<8x1024xf32> to vector<1x512xf32>
    %c0_24 = arith.constant 0 : index
    %c0_25 = arith.constant 0 : index
    %78 = vector.load %arg5[%c0_24, %c0_25] : memref<128x512xf32, #tpu.memory_space<vmem>>, vector<128x512xf32>
    %cst_26 = arith.constant dense<0.000000e+00> : vector<1x512xf32>
    %79 = tpu.matmul %56, %78, %cst_26 {dimension_numbers = #tpu.dot_dimension_numbers<[1], [0], [0], [1], [0, 0, 1, 1], [], []>} : vector<1x128xf32>, vector<128x512xf32>, vector<1x512xf32> -> vector<1x512xf32>
    %80 = arith.addf %77, %79 : vector<1x512xf32>
    %81 = vector.extract_strided_slice %80 {offsets = [0, 0], sizes = [1, 384], strides = [1, 1]} : vector<1x512xf32> to vector<1x384xf32>
    %82 = arith.negf %81 : vector<1x384xf32>
    %83 = math.exp %82 : vector<1x384xf32>
    %cst_27 = arith.constant 1.000000e+00 : f32
    %84 = vector.broadcast %cst_27 : f32 to vector<1x384xf32>
    %85 = arith.addf %84, %83 : vector<1x384xf32>
    %86 = arith.divf %84, %85 : vector<1x384xf32>
    %87 = vector.extract_strided_slice %80 {offsets = [0, 384], sizes = [1, 128], strides = [1, 1]} : vector<1x512xf32> to vector<1x128xf32>
    %88 = math.tanh %87 : vector<1x128xf32>
    %89 = vector.extract_strided_slice %86 {offsets = [0, 128], sizes = [1, 128], strides = [1, 1]} : vector<1x384xf32> to vector<1x128xf32>
    %90 = arith.mulf %89, %53 : vector<1x128xf32>
    %91 = vector.extract_strided_slice %86 {offsets = [0, 0], sizes = [1, 128], strides = [1, 1]} : vector<1x384xf32> to vector<1x128xf32>
    %92 = arith.mulf %91, %88 : vector<1x128xf32>
    %93 = arith.addf %90, %92 : vector<1x128xf32>
    %94 = vector.extract_strided_slice %86 {offsets = [0, 256], sizes = [1, 128], strides = [1, 1]} : vector<1x384xf32> to vector<1x128xf32>
    %95 = math.tanh %93 : vector<1x128xf32>
    %96 = arith.mulf %94, %95 : vector<1x128xf32>
    %97 = vector.extract_strided_slice %12 {offsets = [2, 0], sizes = [1, 512], strides = [1, 1]} : vector<8x1024xf32> to vector<1x512xf32>
    %c0_28 = arith.constant 0 : index
    %c0_29 = arith.constant 0 : index
    %98 = vector.load %arg4[%c0_28, %c0_29] : memref<128x512xf32, #tpu.memory_space<vmem>>, vector<128x512xf32>
    %cst_30 = arith.constant dense<0.000000e+00> : vector<1x512xf32>
    %99 = tpu.matmul %76, %98, %cst_30 {dimension_numbers = #tpu.dot_dimension_numbers<[1], [0], [0], [1], [0, 0, 1, 1], [], []>} : vector<1x128xf32>, vector<128x512xf32>, vector<1x512xf32> -> vector<1x512xf32>
    %100 = arith.addf %97, %99 : vector<1x512xf32>
    %101 = vector.extract_strided_slice %100 {offsets = [0, 0], sizes = [1, 384], strides = [1, 1]} : vector<1x512xf32> to vector<1x384xf32>
    %102 = arith.negf %101 : vector<1x384xf32>
    %103 = math.exp %102 : vector<1x384xf32>
    %cst_31 = arith.constant 1.000000e+00 : f32
    %104 = vector.broadcast %cst_31 : f32 to vector<1x384xf32>
    %105 = arith.addf %104, %103 : vector<1x384xf32>
    %106 = arith.divf %104, %105 : vector<1x384xf32>
    %107 = vector.extract_strided_slice %100 {offsets = [0, 384], sizes = [1, 128], strides = [1, 1]} : vector<1x512xf32> to vector<1x128xf32>
    %108 = math.tanh %107 : vector<1x128xf32>
    %109 = vector.extract_strided_slice %106 {offsets = [0, 128], sizes = [1, 128], strides = [1, 1]} : vector<1x384xf32> to vector<1x128xf32>
    %110 = arith.mulf %109, %73 : vector<1x128xf32>
    %111 = vector.extract_strided_slice %106 {offsets = [0, 0], sizes = [1, 128], strides = [1, 1]} : vector<1x384xf32> to vector<1x128xf32>
    %112 = arith.mulf %111, %108 : vector<1x128xf32>
    %113 = arith.addf %110, %112 : vector<1x128xf32>
    %114 = vector.extract_strided_slice %106 {offsets = [0, 256], sizes = [1, 128], strides = [1, 1]} : vector<1x384xf32> to vector<1x128xf32>
    %115 = math.tanh %113 : vector<1x128xf32>
    %116 = arith.mulf %114, %115 : vector<1x128xf32>
    %117 = vector.extract_strided_slice %12 {offsets = [5, 512], sizes = [1, 512], strides = [1, 1]} : vector<8x1024xf32> to vector<1x512xf32>
    %c0_32 = arith.constant 0 : index
    %c0_33 = arith.constant 0 : index
    %118 = vector.load %arg5[%c0_32, %c0_33] : memref<128x512xf32, #tpu.memory_space<vmem>>, vector<128x512xf32>
    %cst_34 = arith.constant dense<0.000000e+00> : vector<1x512xf32>
    %119 = tpu.matmul %96, %118, %cst_34 {dimension_numbers = #tpu.dot_dimension_numbers<[1], [0], [0], [1], [0, 0, 1, 1], [], []>} : vector<1x128xf32>, vector<128x512xf32>, vector<1x512xf32> -> vector<1x512xf32>
    %120 = arith.addf %117, %119 : vector<1x512xf32>
    %121 = vector.extract_strided_slice %120 {offsets = [0, 0], sizes = [1, 384], strides = [1, 1]} : vector<1x512xf32> to vector<1x384xf32>
    %122 = arith.negf %121 : vector<1x384xf32>
    %123 = math.exp %122 : vector<1x384xf32>
    %cst_35 = arith.constant 1.000000e+00 : f32
    %124 = vector.broadcast %cst_35 : f32 to vector<1x384xf32>
    %125 = arith.addf %124, %123 : vector<1x384xf32>
    %126 = arith.divf %124, %125 : vector<1x384xf32>
    %127 = vector.extract_strided_slice %120 {offsets = [0, 384], sizes = [1, 128], strides = [1, 1]} : vector<1x512xf32> to vector<1x128xf32>
    %128 = math.tanh %127 : vector<1x128xf32>
    %129 = vector.extract_strided_slice %126 {offsets = [0, 128], sizes = [1, 128], strides = [1, 1]} : vector<1x384xf32> to vector<1x128xf32>
    %130 = arith.mulf %129, %93 : vector<1x128xf32>
    %131 = vector.extract_strided_slice %126 {offsets = [0, 0], sizes = [1, 128], strides = [1, 1]} : vector<1x384xf32> to vector<1x128xf32>
    %132 = arith.mulf %131, %128 : vector<1x128xf32>
    %133 = arith.addf %130, %132 : vector<1x128xf32>
    %134 = vector.extract_strided_slice %126 {offsets = [0, 256], sizes = [1, 128], strides = [1, 1]} : vector<1x384xf32> to vector<1x128xf32>
    %135 = math.tanh %133 : vector<1x128xf32>
    %136 = arith.mulf %134, %135 : vector<1x128xf32>
    %137 = vector.extract_strided_slice %12 {offsets = [3, 0], sizes = [1, 512], strides = [1, 1]} : vector<8x1024xf32> to vector<1x512xf32>
    %c0_36 = arith.constant 0 : index
    %c0_37 = arith.constant 0 : index
    %138 = vector.load %arg4[%c0_36, %c0_37] : memref<128x512xf32, #tpu.memory_space<vmem>>, vector<128x512xf32>
    %cst_38 = arith.constant dense<0.000000e+00> : vector<1x512xf32>
    %139 = tpu.matmul %116, %138, %cst_38 {dimension_numbers = #tpu.dot_dimension_numbers<[1], [0], [0], [1], [0, 0, 1, 1], [], []>} : vector<1x128xf32>, vector<128x512xf32>, vector<1x512xf32> -> vector<1x512xf32>
    %140 = arith.addf %137, %139 : vector<1x512xf32>
    %141 = vector.extract_strided_slice %140 {offsets = [0, 0], sizes = [1, 384], strides = [1, 1]} : vector<1x512xf32> to vector<1x384xf32>
    %142 = arith.negf %141 : vector<1x384xf32>
    %143 = math.exp %142 : vector<1x384xf32>
    %cst_39 = arith.constant 1.000000e+00 : f32
    %144 = vector.broadcast %cst_39 : f32 to vector<1x384xf32>
    %145 = arith.addf %144, %143 : vector<1x384xf32>
    %146 = arith.divf %144, %145 : vector<1x384xf32>
    %147 = vector.extract_strided_slice %140 {offsets = [0, 384], sizes = [1, 128], strides = [1, 1]} : vector<1x512xf32> to vector<1x128xf32>
    %148 = math.tanh %147 : vector<1x128xf32>
    %149 = vector.extract_strided_slice %146 {offsets = [0, 128], sizes = [1, 128], strides = [1, 1]} : vector<1x384xf32> to vector<1x128xf32>
    %150 = arith.mulf %149, %113 : vector<1x128xf32>
    %151 = vector.extract_strided_slice %146 {offsets = [0, 0], sizes = [1, 128], strides = [1, 1]} : vector<1x384xf32> to vector<1x128xf32>
    %152 = arith.mulf %151, %148 : vector<1x128xf32>
    %153 = arith.addf %150, %152 : vector<1x128xf32>
    %154 = vector.extract_strided_slice %146 {offsets = [0, 256], sizes = [1, 128], strides = [1, 1]} : vector<1x384xf32> to vector<1x128xf32>
    %155 = math.tanh %153 : vector<1x128xf32>
    %156 = arith.mulf %154, %155 : vector<1x128xf32>
    %157 = vector.extract_strided_slice %12 {offsets = [4, 512], sizes = [1, 512], strides = [1, 1]} : vector<8x1024xf32> to vector<1x512xf32>
    %c0_40 = arith.constant 0 : index
    %c0_41 = arith.constant 0 : index
    %158 = vector.load %arg5[%c0_40, %c0_41] : memref<128x512xf32, #tpu.memory_space<vmem>>, vector<128x512xf32>
    %cst_42 = arith.constant dense<0.000000e+00> : vector<1x512xf32>
    %159 = tpu.matmul %136, %158, %cst_42 {dimension_numbers = #tpu.dot_dimension_numbers<[1], [0], [0], [1], [0, 0, 1, 1], [], []>} : vector<1x128xf32>, vector<128x512xf32>, vector<1x512xf32> -> vector<1x512xf32>
    %160 = arith.addf %157, %159 : vector<1x512xf32>
    %161 = vector.extract_strided_slice %160 {offsets = [0, 0], sizes = [1, 384], strides = [1, 1]} : vector<1x512xf32> to vector<1x384xf32>
    %162 = arith.negf %161 : vector<1x384xf32>
    %163 = math.exp %162 : vector<1x384xf32>
    %cst_43 = arith.constant 1.000000e+00 : f32
    %164 = vector.broadcast %cst_43 : f32 to vector<1x384xf32>
    %165 = arith.addf %164, %163 : vector<1x384xf32>
    %166 = arith.divf %164, %165 : vector<1x384xf32>
    %167 = vector.extract_strided_slice %160 {offsets = [0, 384], sizes = [1, 128], strides = [1, 1]} : vector<1x512xf32> to vector<1x128xf32>
    %168 = math.tanh %167 : vector<1x128xf32>
    %169 = vector.extract_strided_slice %166 {offsets = [0, 128], sizes = [1, 128], strides = [1, 1]} : vector<1x384xf32> to vector<1x128xf32>
    %170 = arith.mulf %169, %133 : vector<1x128xf32>
    %171 = vector.extract_strided_slice %166 {offsets = [0, 0], sizes = [1, 128], strides = [1, 1]} : vector<1x384xf32> to vector<1x128xf32>
    %172 = arith.mulf %171, %168 : vector<1x128xf32>
    %173 = arith.addf %170, %172 : vector<1x128xf32>
    %174 = vector.extract_strided_slice %166 {offsets = [0, 256], sizes = [1, 128], strides = [1, 1]} : vector<1x384xf32> to vector<1x128xf32>
    %175 = math.tanh %173 : vector<1x128xf32>
    %176 = arith.mulf %174, %175 : vector<1x128xf32>
    %177 = vector.extract_strided_slice %12 {offsets = [4, 0], sizes = [1, 512], strides = [1, 1]} : vector<8x1024xf32> to vector<1x512xf32>
    %c0_44 = arith.constant 0 : index
    %c0_45 = arith.constant 0 : index
    %178 = vector.load %arg4[%c0_44, %c0_45] : memref<128x512xf32, #tpu.memory_space<vmem>>, vector<128x512xf32>
    %cst_46 = arith.constant dense<0.000000e+00> : vector<1x512xf32>
    %179 = tpu.matmul %156, %178, %cst_46 {dimension_numbers = #tpu.dot_dimension_numbers<[1], [0], [0], [1], [0, 0, 1, 1], [], []>} : vector<1x128xf32>, vector<128x512xf32>, vector<1x512xf32> -> vector<1x512xf32>
    %180 = arith.addf %177, %179 : vector<1x512xf32>
    %181 = vector.extract_strided_slice %180 {offsets = [0, 0], sizes = [1, 384], strides = [1, 1]} : vector<1x512xf32> to vector<1x384xf32>
    %182 = arith.negf %181 : vector<1x384xf32>
    %183 = math.exp %182 : vector<1x384xf32>
    %cst_47 = arith.constant 1.000000e+00 : f32
    %184 = vector.broadcast %cst_47 : f32 to vector<1x384xf32>
    %185 = arith.addf %184, %183 : vector<1x384xf32>
    %186 = arith.divf %184, %185 : vector<1x384xf32>
    %187 = vector.extract_strided_slice %180 {offsets = [0, 384], sizes = [1, 128], strides = [1, 1]} : vector<1x512xf32> to vector<1x128xf32>
    %188 = math.tanh %187 : vector<1x128xf32>
    %189 = vector.extract_strided_slice %186 {offsets = [0, 128], sizes = [1, 128], strides = [1, 1]} : vector<1x384xf32> to vector<1x128xf32>
    %190 = arith.mulf %189, %153 : vector<1x128xf32>
    %191 = vector.extract_strided_slice %186 {offsets = [0, 0], sizes = [1, 128], strides = [1, 1]} : vector<1x384xf32> to vector<1x128xf32>
    %192 = arith.mulf %191, %188 : vector<1x128xf32>
    %193 = arith.addf %190, %192 : vector<1x128xf32>
    %194 = vector.extract_strided_slice %186 {offsets = [0, 256], sizes = [1, 128], strides = [1, 1]} : vector<1x384xf32> to vector<1x128xf32>
    %195 = math.tanh %193 : vector<1x128xf32>
    %196 = arith.mulf %194, %195 : vector<1x128xf32>
    %197 = vector.extract_strided_slice %12 {offsets = [3, 512], sizes = [1, 512], strides = [1, 1]} : vector<8x1024xf32> to vector<1x512xf32>
    %c0_48 = arith.constant 0 : index
    %c0_49 = arith.constant 0 : index
    %198 = vector.load %arg5[%c0_48, %c0_49] : memref<128x512xf32, #tpu.memory_space<vmem>>, vector<128x512xf32>
    %cst_50 = arith.constant dense<0.000000e+00> : vector<1x512xf32>
    %199 = tpu.matmul %176, %198, %cst_50 {dimension_numbers = #tpu.dot_dimension_numbers<[1], [0], [0], [1], [0, 0, 1, 1], [], []>} : vector<1x128xf32>, vector<128x512xf32>, vector<1x512xf32> -> vector<1x512xf32>
    %200 = arith.addf %197, %199 : vector<1x512xf32>
    %201 = vector.extract_strided_slice %200 {offsets = [0, 0], sizes = [1, 384], strides = [1, 1]} : vector<1x512xf32> to vector<1x384xf32>
    %202 = arith.negf %201 : vector<1x384xf32>
    %203 = math.exp %202 : vector<1x384xf32>
    %cst_51 = arith.constant 1.000000e+00 : f32
    %204 = vector.broadcast %cst_51 : f32 to vector<1x384xf32>
    %205 = arith.addf %204, %203 : vector<1x384xf32>
    %206 = arith.divf %204, %205 : vector<1x384xf32>
    %207 = vector.extract_strided_slice %200 {offsets = [0, 384], sizes = [1, 128], strides = [1, 1]} : vector<1x512xf32> to vector<1x128xf32>
    %208 = math.tanh %207 : vector<1x128xf32>
    %209 = vector.extract_strided_slice %206 {offsets = [0, 128], sizes = [1, 128], strides = [1, 1]} : vector<1x384xf32> to vector<1x128xf32>
    %210 = arith.mulf %209, %173 : vector<1x128xf32>
    %211 = vector.extract_strided_slice %206 {offsets = [0, 0], sizes = [1, 128], strides = [1, 1]} : vector<1x384xf32> to vector<1x128xf32>
    %212 = arith.mulf %211, %208 : vector<1x128xf32>
    %213 = arith.addf %210, %212 : vector<1x128xf32>
    %214 = vector.extract_strided_slice %206 {offsets = [0, 256], sizes = [1, 128], strides = [1, 1]} : vector<1x384xf32> to vector<1x128xf32>
    %215 = math.tanh %213 : vector<1x128xf32>
    %216 = arith.mulf %214, %215 : vector<1x128xf32>
    %217 = vector.extract_strided_slice %12 {offsets = [5, 0], sizes = [1, 512], strides = [1, 1]} : vector<8x1024xf32> to vector<1x512xf32>
    %c0_52 = arith.constant 0 : index
    %c0_53 = arith.constant 0 : index
    %218 = vector.load %arg4[%c0_52, %c0_53] : memref<128x512xf32, #tpu.memory_space<vmem>>, vector<128x512xf32>
    %cst_54 = arith.constant dense<0.000000e+00> : vector<1x512xf32>
    %219 = tpu.matmul %196, %218, %cst_54 {dimension_numbers = #tpu.dot_dimension_numbers<[1], [0], [0], [1], [0, 0, 1, 1], [], []>} : vector<1x128xf32>, vector<128x512xf32>, vector<1x512xf32> -> vector<1x512xf32>
    %220 = arith.addf %217, %219 : vector<1x512xf32>
    %221 = vector.extract_strided_slice %220 {offsets = [0, 0], sizes = [1, 384], strides = [1, 1]} : vector<1x512xf32> to vector<1x384xf32>
    %222 = arith.negf %221 : vector<1x384xf32>
    %223 = math.exp %222 : vector<1x384xf32>
    %cst_55 = arith.constant 1.000000e+00 : f32
    %224 = vector.broadcast %cst_55 : f32 to vector<1x384xf32>
    %225 = arith.addf %224, %223 : vector<1x384xf32>
    %226 = arith.divf %224, %225 : vector<1x384xf32>
    %227 = vector.extract_strided_slice %220 {offsets = [0, 384], sizes = [1, 128], strides = [1, 1]} : vector<1x512xf32> to vector<1x128xf32>
    %228 = math.tanh %227 : vector<1x128xf32>
    %229 = vector.extract_strided_slice %226 {offsets = [0, 128], sizes = [1, 128], strides = [1, 1]} : vector<1x384xf32> to vector<1x128xf32>
    %230 = arith.mulf %229, %193 : vector<1x128xf32>
    %231 = vector.extract_strided_slice %226 {offsets = [0, 0], sizes = [1, 128], strides = [1, 1]} : vector<1x384xf32> to vector<1x128xf32>
    %232 = arith.mulf %231, %228 : vector<1x128xf32>
    %233 = arith.addf %230, %232 : vector<1x128xf32>
    %234 = vector.extract_strided_slice %226 {offsets = [0, 256], sizes = [1, 128], strides = [1, 1]} : vector<1x384xf32> to vector<1x128xf32>
    %235 = math.tanh %233 : vector<1x128xf32>
    %236 = arith.mulf %234, %235 : vector<1x128xf32>
    %237 = vector.extract_strided_slice %12 {offsets = [2, 512], sizes = [1, 512], strides = [1, 1]} : vector<8x1024xf32> to vector<1x512xf32>
    %c0_56 = arith.constant 0 : index
    %c0_57 = arith.constant 0 : index
    %238 = vector.load %arg5[%c0_56, %c0_57] : memref<128x512xf32, #tpu.memory_space<vmem>>, vector<128x512xf32>
    %cst_58 = arith.constant dense<0.000000e+00> : vector<1x512xf32>
    %239 = tpu.matmul %216, %238, %cst_58 {dimension_numbers = #tpu.dot_dimension_numbers<[1], [0], [0], [1], [0, 0, 1, 1], [], []>} : vector<1x128xf32>, vector<128x512xf32>, vector<1x512xf32> -> vector<1x512xf32>
    %240 = arith.addf %237, %239 : vector<1x512xf32>
    %241 = vector.extract_strided_slice %240 {offsets = [0, 0], sizes = [1, 384], strides = [1, 1]} : vector<1x512xf32> to vector<1x384xf32>
    %242 = arith.negf %241 : vector<1x384xf32>
    %243 = math.exp %242 : vector<1x384xf32>
    %cst_59 = arith.constant 1.000000e+00 : f32
    %244 = vector.broadcast %cst_59 : f32 to vector<1x384xf32>
    %245 = arith.addf %244, %243 : vector<1x384xf32>
    %246 = arith.divf %244, %245 : vector<1x384xf32>
    %247 = vector.extract_strided_slice %240 {offsets = [0, 384], sizes = [1, 128], strides = [1, 1]} : vector<1x512xf32> to vector<1x128xf32>
    %248 = math.tanh %247 : vector<1x128xf32>
    %249 = vector.extract_strided_slice %246 {offsets = [0, 128], sizes = [1, 128], strides = [1, 1]} : vector<1x384xf32> to vector<1x128xf32>
    %250 = arith.mulf %249, %213 : vector<1x128xf32>
    %251 = vector.extract_strided_slice %246 {offsets = [0, 0], sizes = [1, 128], strides = [1, 1]} : vector<1x384xf32> to vector<1x128xf32>
    %252 = arith.mulf %251, %248 : vector<1x128xf32>
    %253 = arith.addf %250, %252 : vector<1x128xf32>
    %254 = vector.extract_strided_slice %246 {offsets = [0, 256], sizes = [1, 128], strides = [1, 1]} : vector<1x384xf32> to vector<1x128xf32>
    %255 = math.tanh %253 : vector<1x128xf32>
    %256 = arith.mulf %254, %255 : vector<1x128xf32>
    %257 = vector.extract_strided_slice %12 {offsets = [6, 0], sizes = [1, 512], strides = [1, 1]} : vector<8x1024xf32> to vector<1x512xf32>
    %c0_60 = arith.constant 0 : index
    %c0_61 = arith.constant 0 : index
    %258 = vector.load %arg4[%c0_60, %c0_61] : memref<128x512xf32, #tpu.memory_space<vmem>>, vector<128x512xf32>
    %cst_62 = arith.constant dense<0.000000e+00> : vector<1x512xf32>
    %259 = tpu.matmul %236, %258, %cst_62 {dimension_numbers = #tpu.dot_dimension_numbers<[1], [0], [0], [1], [0, 0, 1, 1], [], []>} : vector<1x128xf32>, vector<128x512xf32>, vector<1x512xf32> -> vector<1x512xf32>
    %260 = arith.addf %257, %259 : vector<1x512xf32>
    %261 = vector.extract_strided_slice %260 {offsets = [0, 0], sizes = [1, 384], strides = [1, 1]} : vector<1x512xf32> to vector<1x384xf32>
    %262 = arith.negf %261 : vector<1x384xf32>
    %263 = math.exp %262 : vector<1x384xf32>
    %cst_63 = arith.constant 1.000000e+00 : f32
    %264 = vector.broadcast %cst_63 : f32 to vector<1x384xf32>
    %265 = arith.addf %264, %263 : vector<1x384xf32>
    %266 = arith.divf %264, %265 : vector<1x384xf32>
    %267 = vector.extract_strided_slice %260 {offsets = [0, 384], sizes = [1, 128], strides = [1, 1]} : vector<1x512xf32> to vector<1x128xf32>
    %268 = math.tanh %267 : vector<1x128xf32>
    %269 = vector.extract_strided_slice %266 {offsets = [0, 128], sizes = [1, 128], strides = [1, 1]} : vector<1x384xf32> to vector<1x128xf32>
    %270 = arith.mulf %269, %233 : vector<1x128xf32>
    %271 = vector.extract_strided_slice %266 {offsets = [0, 0], sizes = [1, 128], strides = [1, 1]} : vector<1x384xf32> to vector<1x128xf32>
    %272 = arith.mulf %271, %268 : vector<1x128xf32>
    %273 = arith.addf %270, %272 : vector<1x128xf32>
    %274 = vector.extract_strided_slice %266 {offsets = [0, 256], sizes = [1, 128], strides = [1, 1]} : vector<1x384xf32> to vector<1x128xf32>
    %275 = math.tanh %273 : vector<1x128xf32>
    %276 = arith.mulf %274, %275 : vector<1x128xf32>
    %277 = vector.extract_strided_slice %12 {offsets = [1, 512], sizes = [1, 512], strides = [1, 1]} : vector<8x1024xf32> to vector<1x512xf32>
    %c0_64 = arith.constant 0 : index
    %c0_65 = arith.constant 0 : index
    %278 = vector.load %arg5[%c0_64, %c0_65] : memref<128x512xf32, #tpu.memory_space<vmem>>, vector<128x512xf32>
    %cst_66 = arith.constant dense<0.000000e+00> : vector<1x512xf32>
    %279 = tpu.matmul %256, %278, %cst_66 {dimension_numbers = #tpu.dot_dimension_numbers<[1], [0], [0], [1], [0, 0, 1, 1], [], []>} : vector<1x128xf32>, vector<128x512xf32>, vector<1x512xf32> -> vector<1x512xf32>
    %280 = arith.addf %277, %279 : vector<1x512xf32>
    %281 = vector.extract_strided_slice %280 {offsets = [0, 0], sizes = [1, 384], strides = [1, 1]} : vector<1x512xf32> to vector<1x384xf32>
    %282 = arith.negf %281 : vector<1x384xf32>
    %283 = math.exp %282 : vector<1x384xf32>
    %cst_67 = arith.constant 1.000000e+00 : f32
    %284 = vector.broadcast %cst_67 : f32 to vector<1x384xf32>
    %285 = arith.addf %284, %283 : vector<1x384xf32>
    %286 = arith.divf %284, %285 : vector<1x384xf32>
    %287 = vector.extract_strided_slice %280 {offsets = [0, 384], sizes = [1, 128], strides = [1, 1]} : vector<1x512xf32> to vector<1x128xf32>
    %288 = math.tanh %287 : vector<1x128xf32>
    %289 = vector.extract_strided_slice %286 {offsets = [0, 128], sizes = [1, 128], strides = [1, 1]} : vector<1x384xf32> to vector<1x128xf32>
    %290 = arith.mulf %289, %253 : vector<1x128xf32>
    %291 = vector.extract_strided_slice %286 {offsets = [0, 0], sizes = [1, 128], strides = [1, 1]} : vector<1x384xf32> to vector<1x128xf32>
    %292 = arith.mulf %291, %288 : vector<1x128xf32>
    %293 = arith.addf %290, %292 : vector<1x128xf32>
    %294 = vector.extract_strided_slice %286 {offsets = [0, 256], sizes = [1, 128], strides = [1, 1]} : vector<1x384xf32> to vector<1x128xf32>
    %295 = math.tanh %293 : vector<1x128xf32>
    %296 = arith.mulf %294, %295 : vector<1x128xf32>
    %297 = vector.extract_strided_slice %12 {offsets = [7, 0], sizes = [1, 512], strides = [1, 1]} : vector<8x1024xf32> to vector<1x512xf32>
    %c0_68 = arith.constant 0 : index
    %c0_69 = arith.constant 0 : index
    %298 = vector.load %arg4[%c0_68, %c0_69] : memref<128x512xf32, #tpu.memory_space<vmem>>, vector<128x512xf32>
    %cst_70 = arith.constant dense<0.000000e+00> : vector<1x512xf32>
    %299 = tpu.matmul %276, %298, %cst_70 {dimension_numbers = #tpu.dot_dimension_numbers<[1], [0], [0], [1], [0, 0, 1, 1], [], []>} : vector<1x128xf32>, vector<128x512xf32>, vector<1x512xf32> -> vector<1x512xf32>
    %300 = arith.addf %297, %299 : vector<1x512xf32>
    %301 = vector.extract_strided_slice %300 {offsets = [0, 0], sizes = [1, 384], strides = [1, 1]} : vector<1x512xf32> to vector<1x384xf32>
    %302 = arith.negf %301 : vector<1x384xf32>
    %303 = math.exp %302 : vector<1x384xf32>
    %cst_71 = arith.constant 1.000000e+00 : f32
    %304 = vector.broadcast %cst_71 : f32 to vector<1x384xf32>
    %305 = arith.addf %304, %303 : vector<1x384xf32>
    %306 = arith.divf %304, %305 : vector<1x384xf32>
    %307 = vector.extract_strided_slice %300 {offsets = [0, 384], sizes = [1, 128], strides = [1, 1]} : vector<1x512xf32> to vector<1x128xf32>
    %308 = math.tanh %307 : vector<1x128xf32>
    %309 = vector.extract_strided_slice %306 {offsets = [0, 128], sizes = [1, 128], strides = [1, 1]} : vector<1x384xf32> to vector<1x128xf32>
    %310 = arith.mulf %309, %273 : vector<1x128xf32>
    %311 = vector.extract_strided_slice %306 {offsets = [0, 0], sizes = [1, 128], strides = [1, 1]} : vector<1x384xf32> to vector<1x128xf32>
    %312 = arith.mulf %311, %308 : vector<1x128xf32>
    %313 = arith.addf %310, %312 : vector<1x128xf32>
    %314 = vector.extract_strided_slice %306 {offsets = [0, 256], sizes = [1, 128], strides = [1, 1]} : vector<1x384xf32> to vector<1x128xf32>
    %315 = math.tanh %313 : vector<1x128xf32>
    %316 = arith.mulf %314, %315 : vector<1x128xf32>
    %317 = vector.extract_strided_slice %12 {offsets = [0, 512], sizes = [1, 512], strides = [1, 1]} : vector<8x1024xf32> to vector<1x512xf32>
    %c0_72 = arith.constant 0 : index
    %c0_73 = arith.constant 0 : index
    %318 = vector.load %arg5[%c0_72, %c0_73] : memref<128x512xf32, #tpu.memory_space<vmem>>, vector<128x512xf32>
    %cst_74 = arith.constant dense<0.000000e+00> : vector<1x512xf32>
    %319 = tpu.matmul %296, %318, %cst_74 {dimension_numbers = #tpu.dot_dimension_numbers<[1], [0], [0], [1], [0, 0, 1, 1], [], []>} : vector<1x128xf32>, vector<128x512xf32>, vector<1x512xf32> -> vector<1x512xf32>
    %320 = arith.addf %317, %319 : vector<1x512xf32>
    %321 = vector.extract_strided_slice %320 {offsets = [0, 0], sizes = [1, 384], strides = [1, 1]} : vector<1x512xf32> to vector<1x384xf32>
    %322 = arith.negf %321 : vector<1x384xf32>
    %323 = math.exp %322 : vector<1x384xf32>
    %cst_75 = arith.constant 1.000000e+00 : f32
    %324 = vector.broadcast %cst_75 : f32 to vector<1x384xf32>
    %325 = arith.addf %324, %323 : vector<1x384xf32>
    %326 = arith.divf %324, %325 : vector<1x384xf32>
    %327 = vector.extract_strided_slice %320 {offsets = [0, 384], sizes = [1, 128], strides = [1, 1]} : vector<1x512xf32> to vector<1x128xf32>
    %328 = math.tanh %327 : vector<1x128xf32>
    %329 = vector.extract_strided_slice %326 {offsets = [0, 128], sizes = [1, 128], strides = [1, 1]} : vector<1x384xf32> to vector<1x128xf32>
    %330 = arith.mulf %329, %293 : vector<1x128xf32>
    %331 = vector.extract_strided_slice %326 {offsets = [0, 0], sizes = [1, 128], strides = [1, 1]} : vector<1x384xf32> to vector<1x128xf32>
    %332 = arith.mulf %331, %328 : vector<1x128xf32>
    %333 = arith.addf %330, %332 : vector<1x128xf32>
    %334 = vector.extract_strided_slice %326 {offsets = [0, 256], sizes = [1, 128], strides = [1, 1]} : vector<1x384xf32> to vector<1x128xf32>
    %335 = math.tanh %333 : vector<1x128xf32>
    %336 = arith.mulf %334, %335 : vector<1x128xf32>
    %337 = tpu.concatenate %36, %76, %116, %156, %196, %236, %276, %316 in 0 : vector<1x128xf32>, vector<1x128xf32>, vector<1x128xf32>, vector<1x128xf32>, vector<1x128xf32>, vector<1x128xf32>, vector<1x128xf32>, vector<1x128xf32> -> vector<8x128xf32>
    %338 = tpu.concatenate %336, %296, %256, %216, %176, %136, %96, %56 in 0 : vector<1x128xf32>, vector<1x128xf32>, vector<1x128xf32>, vector<1x128xf32>, vector<1x128xf32>, vector<1x128xf32>, vector<1x128xf32>, vector<1x128xf32> -> vector<8x128xf32>
    %339 = tpu.concatenate %337, %338 in 1 : vector<8x128xf32>, vector<8x128xf32> -> vector<8x256xf32>
    %c0_76 = arith.constant 0 : index
    %c0_77 = arith.constant 0 : index
    %340 = vector.load %arg7[%c0_76, %c0_77] : memref<256x1024xf32, #tpu.memory_space<vmem>>, vector<256x1024xf32>
    %cst_78 = arith.constant dense<0.000000e+00> : vector<8x1024xf32>
    %341 = tpu.matmul %339, %340, %cst_78 {dimension_numbers = #tpu.dot_dimension_numbers<[1], [0], [0], [1], [0, 0, 1, 1], [], []>} : vector<8x256xf32>, vector<256x1024xf32>, vector<8x1024xf32> -> vector<8x1024xf32>
    %c0_79 = arith.constant 0 : index
    %c0_80 = arith.constant 0 : index
    %342 = vector.load %arg10[%c0_79, %c0_80] : memref<1x1024xf32, #tpu.memory_space<vmem>>, vector<1x1024xf32>
    %343 = vector.broadcast %342 : vector<1x1024xf32> to vector<8x1024xf32>
    %344 = arith.addf %341, %343 : vector<8x1024xf32>
    %cst_81 = arith.constant 0.000000e+00 : f32
    %345 = vector.broadcast %cst_81 : f32 to vector<1x128xf32>
    %cst_82 = arith.constant 0.000000e+00 : f32
    %346 = vector.broadcast %cst_82 : f32 to vector<1x128xf32>
    %cst_83 = arith.constant 0.000000e+00 : f32
    %347 = vector.broadcast %cst_83 : f32 to vector<1x128xf32>
    %cst_84 = arith.constant 0.000000e+00 : f32
    %348 = vector.broadcast %cst_84 : f32 to vector<1x128xf32>
    %349 = vector.extract_strided_slice %344 {offsets = [0, 0], sizes = [1, 512], strides = [1, 1]} : vector<8x1024xf32> to vector<1x512xf32>
    %c0_85 = arith.constant 0 : index
    %c0_86 = arith.constant 0 : index
    %350 = vector.load %arg8[%c0_85, %c0_86] : memref<128x512xf32, #tpu.memory_space<vmem>>, vector<128x512xf32>
    %cst_87 = arith.constant dense<0.000000e+00> : vector<1x512xf32>
    %351 = tpu.matmul %345, %350, %cst_87 {dimension_numbers = #tpu.dot_dimension_numbers<[1], [0], [0], [1], [0, 0, 1, 1], [], []>} : vector<1x128xf32>, vector<128x512xf32>, vector<1x512xf32> -> vector<1x512xf32>
    %352 = arith.addf %349, %351 : vector<1x512xf32>
    %353 = vector.extract_strided_slice %352 {offsets = [0, 0], sizes = [1, 384], strides = [1, 1]} : vector<1x512xf32> to vector<1x384xf32>
    %354 = arith.negf %353 : vector<1x384xf32>
    %355 = math.exp %354 : vector<1x384xf32>
    %cst_88 = arith.constant 1.000000e+00 : f32
    %356 = vector.broadcast %cst_88 : f32 to vector<1x384xf32>
    %357 = arith.addf %356, %355 : vector<1x384xf32>
    %358 = arith.divf %356, %357 : vector<1x384xf32>
    %359 = vector.extract_strided_slice %352 {offsets = [0, 384], sizes = [1, 128], strides = [1, 1]} : vector<1x512xf32> to vector<1x128xf32>
    %360 = math.tanh %359 : vector<1x128xf32>
    %361 = vector.extract_strided_slice %358 {offsets = [0, 128], sizes = [1, 128], strides = [1, 1]} : vector<1x384xf32> to vector<1x128xf32>
    %362 = arith.mulf %361, %346 : vector<1x128xf32>
    %363 = vector.extract_strided_slice %358 {offsets = [0, 0], sizes = [1, 128], strides = [1, 1]} : vector<1x384xf32> to vector<1x128xf32>
    %364 = arith.mulf %363, %360 : vector<1x128xf32>
    %365 = arith.addf %362, %364 : vector<1x128xf32>
    %366 = vector.extract_strided_slice %358 {offsets = [0, 256], sizes = [1, 128], strides = [1, 1]} : vector<1x384xf32> to vector<1x128xf32>
    %367 = math.tanh %365 : vector<1x128xf32>
    %368 = arith.mulf %366, %367 : vector<1x128xf32>
    %369 = vector.extract_strided_slice %344 {offsets = [7, 512], sizes = [1, 512], strides = [1, 1]} : vector<8x1024xf32> to vector<1x512xf32>
    %c0_89 = arith.constant 0 : index
    %c0_90 = arith.constant 0 : index
    %370 = vector.load %arg9[%c0_89, %c0_90] : memref<128x512xf32, #tpu.memory_space<vmem>>, vector<128x512xf32>
    %cst_91 = arith.constant dense<0.000000e+00> : vector<1x512xf32>
    %371 = tpu.matmul %347, %370, %cst_91 {dimension_numbers = #tpu.dot_dimension_numbers<[1], [0], [0], [1], [0, 0, 1, 1], [], []>} : vector<1x128xf32>, vector<128x512xf32>, vector<1x512xf32> -> vector<1x512xf32>
    %372 = arith.addf %369, %371 : vector<1x512xf32>
    %373 = vector.extract_strided_slice %372 {offsets = [0, 0], sizes = [1, 384], strides = [1, 1]} : vector<1x512xf32> to vector<1x384xf32>
    %374 = arith.negf %373 : vector<1x384xf32>
    %375 = math.exp %374 : vector<1x384xf32>
    %cst_92 = arith.constant 1.000000e+00 : f32
    %376 = vector.broadcast %cst_92 : f32 to vector<1x384xf32>
    %377 = arith.addf %376, %375 : vector<1x384xf32>
    %378 = arith.divf %376, %377 : vector<1x384xf32>
    %379 = vector.extract_strided_slice %372 {offsets = [0, 384], sizes = [1, 128], strides = [1, 1]} : vector<1x512xf32> to vector<1x128xf32>
    %380 = math.tanh %379 : vector<1x128xf32>
    %381 = vector.extract_strided_slice %378 {offsets = [0, 128], sizes = [1, 128], strides = [1, 1]} : vector<1x384xf32> to vector<1x128xf32>
    %382 = arith.mulf %381, %348 : vector<1x128xf32>
    %383 = vector.extract_strided_slice %378 {offsets = [0, 0], sizes = [1, 128], strides = [1, 1]} : vector<1x384xf32> to vector<1x128xf32>
    %384 = arith.mulf %383, %380 : vector<1x128xf32>
    %385 = arith.addf %382, %384 : vector<1x128xf32>
    %386 = vector.extract_strided_slice %378 {offsets = [0, 256], sizes = [1, 128], strides = [1, 1]} : vector<1x384xf32> to vector<1x128xf32>
    %387 = math.tanh %385 : vector<1x128xf32>
    %388 = arith.mulf %386, %387 : vector<1x128xf32>
    %389 = vector.extract_strided_slice %344 {offsets = [1, 0], sizes = [1, 512], strides = [1, 1]} : vector<8x1024xf32> to vector<1x512xf32>
    %c0_93 = arith.constant 0 : index
    %c0_94 = arith.constant 0 : index
    %390 = vector.load %arg8[%c0_93, %c0_94] : memref<128x512xf32, #tpu.memory_space<vmem>>, vector<128x512xf32>
    %cst_95 = arith.constant dense<0.000000e+00> : vector<1x512xf32>
    %391 = tpu.matmul %368, %390, %cst_95 {dimension_numbers = #tpu.dot_dimension_numbers<[1], [0], [0], [1], [0, 0, 1, 1], [], []>} : vector<1x128xf32>, vector<128x512xf32>, vector<1x512xf32> -> vector<1x512xf32>
    %392 = arith.addf %389, %391 : vector<1x512xf32>
    %393 = vector.extract_strided_slice %392 {offsets = [0, 0], sizes = [1, 384], strides = [1, 1]} : vector<1x512xf32> to vector<1x384xf32>
    %394 = arith.negf %393 : vector<1x384xf32>
    %395 = math.exp %394 : vector<1x384xf32>
    %cst_96 = arith.constant 1.000000e+00 : f32
    %396 = vector.broadcast %cst_96 : f32 to vector<1x384xf32>
    %397 = arith.addf %396, %395 : vector<1x384xf32>
    %398 = arith.divf %396, %397 : vector<1x384xf32>
    %399 = vector.extract_strided_slice %392 {offsets = [0, 384], sizes = [1, 128], strides = [1, 1]} : vector<1x512xf32> to vector<1x128xf32>
    %400 = math.tanh %399 : vector<1x128xf32>
    %401 = vector.extract_strided_slice %398 {offsets = [0, 128], sizes = [1, 128], strides = [1, 1]} : vector<1x384xf32> to vector<1x128xf32>
    %402 = arith.mulf %401, %365 : vector<1x128xf32>
    %403 = vector.extract_strided_slice %398 {offsets = [0, 0], sizes = [1, 128], strides = [1, 1]} : vector<1x384xf32> to vector<1x128xf32>
    %404 = arith.mulf %403, %400 : vector<1x128xf32>
    %405 = arith.addf %402, %404 : vector<1x128xf32>
    %406 = vector.extract_strided_slice %398 {offsets = [0, 256], sizes = [1, 128], strides = [1, 1]} : vector<1x384xf32> to vector<1x128xf32>
    %407 = math.tanh %405 : vector<1x128xf32>
    %408 = arith.mulf %406, %407 : vector<1x128xf32>
    %409 = vector.extract_strided_slice %344 {offsets = [6, 512], sizes = [1, 512], strides = [1, 1]} : vector<8x1024xf32> to vector<1x512xf32>
    %c0_97 = arith.constant 0 : index
    %c0_98 = arith.constant 0 : index
    %410 = vector.load %arg9[%c0_97, %c0_98] : memref<128x512xf32, #tpu.memory_space<vmem>>, vector<128x512xf32>
    %cst_99 = arith.constant dense<0.000000e+00> : vector<1x512xf32>
    %411 = tpu.matmul %388, %410, %cst_99 {dimension_numbers = #tpu.dot_dimension_numbers<[1], [0], [0], [1], [0, 0, 1, 1], [], []>} : vector<1x128xf32>, vector<128x512xf32>, vector<1x512xf32> -> vector<1x512xf32>
    %412 = arith.addf %409, %411 : vector<1x512xf32>
    %413 = vector.extract_strided_slice %412 {offsets = [0, 0], sizes = [1, 384], strides = [1, 1]} : vector<1x512xf32> to vector<1x384xf32>
    %414 = arith.negf %413 : vector<1x384xf32>
    %415 = math.exp %414 : vector<1x384xf32>
    %cst_100 = arith.constant 1.000000e+00 : f32
    %416 = vector.broadcast %cst_100 : f32 to vector<1x384xf32>
    %417 = arith.addf %416, %415 : vector<1x384xf32>
    %418 = arith.divf %416, %417 : vector<1x384xf32>
    %419 = vector.extract_strided_slice %412 {offsets = [0, 384], sizes = [1, 128], strides = [1, 1]} : vector<1x512xf32> to vector<1x128xf32>
    %420 = math.tanh %419 : vector<1x128xf32>
    %421 = vector.extract_strided_slice %418 {offsets = [0, 128], sizes = [1, 128], strides = [1, 1]} : vector<1x384xf32> to vector<1x128xf32>
    %422 = arith.mulf %421, %385 : vector<1x128xf32>
    %423 = vector.extract_strided_slice %418 {offsets = [0, 0], sizes = [1, 128], strides = [1, 1]} : vector<1x384xf32> to vector<1x128xf32>
    %424 = arith.mulf %423, %420 : vector<1x128xf32>
    %425 = arith.addf %422, %424 : vector<1x128xf32>
    %426 = vector.extract_strided_slice %418 {offsets = [0, 256], sizes = [1, 128], strides = [1, 1]} : vector<1x384xf32> to vector<1x128xf32>
    %427 = math.tanh %425 : vector<1x128xf32>
    %428 = arith.mulf %426, %427 : vector<1x128xf32>
    %429 = vector.extract_strided_slice %344 {offsets = [2, 0], sizes = [1, 512], strides = [1, 1]} : vector<8x1024xf32> to vector<1x512xf32>
    %c0_101 = arith.constant 0 : index
    %c0_102 = arith.constant 0 : index
    %430 = vector.load %arg8[%c0_101, %c0_102] : memref<128x512xf32, #tpu.memory_space<vmem>>, vector<128x512xf32>
    %cst_103 = arith.constant dense<0.000000e+00> : vector<1x512xf32>
    %431 = tpu.matmul %408, %430, %cst_103 {dimension_numbers = #tpu.dot_dimension_numbers<[1], [0], [0], [1], [0, 0, 1, 1], [], []>} : vector<1x128xf32>, vector<128x512xf32>, vector<1x512xf32> -> vector<1x512xf32>
    %432 = arith.addf %429, %431 : vector<1x512xf32>
    %433 = vector.extract_strided_slice %432 {offsets = [0, 0], sizes = [1, 384], strides = [1, 1]} : vector<1x512xf32> to vector<1x384xf32>
    %434 = arith.negf %433 : vector<1x384xf32>
    %435 = math.exp %434 : vector<1x384xf32>
    %cst_104 = arith.constant 1.000000e+00 : f32
    %436 = vector.broadcast %cst_104 : f32 to vector<1x384xf32>
    %437 = arith.addf %436, %435 : vector<1x384xf32>
    %438 = arith.divf %436, %437 : vector<1x384xf32>
    %439 = vector.extract_strided_slice %432 {offsets = [0, 384], sizes = [1, 128], strides = [1, 1]} : vector<1x512xf32> to vector<1x128xf32>
    %440 = math.tanh %439 : vector<1x128xf32>
    %441 = vector.extract_strided_slice %438 {offsets = [0, 128], sizes = [1, 128], strides = [1, 1]} : vector<1x384xf32> to vector<1x128xf32>
    %442 = arith.mulf %441, %405 : vector<1x128xf32>
    %443 = vector.extract_strided_slice %438 {offsets = [0, 0], sizes = [1, 128], strides = [1, 1]} : vector<1x384xf32> to vector<1x128xf32>
    %444 = arith.mulf %443, %440 : vector<1x128xf32>
    %445 = arith.addf %442, %444 : vector<1x128xf32>
    %446 = vector.extract_strided_slice %438 {offsets = [0, 256], sizes = [1, 128], strides = [1, 1]} : vector<1x384xf32> to vector<1x128xf32>
    %447 = math.tanh %445 : vector<1x128xf32>
    %448 = arith.mulf %446, %447 : vector<1x128xf32>
    %449 = vector.extract_strided_slice %344 {offsets = [5, 512], sizes = [1, 512], strides = [1, 1]} : vector<8x1024xf32> to vector<1x512xf32>
    %c0_105 = arith.constant 0 : index
    %c0_106 = arith.constant 0 : index
    %450 = vector.load %arg9[%c0_105, %c0_106] : memref<128x512xf32, #tpu.memory_space<vmem>>, vector<128x512xf32>
    %cst_107 = arith.constant dense<0.000000e+00> : vector<1x512xf32>
    %451 = tpu.matmul %428, %450, %cst_107 {dimension_numbers = #tpu.dot_dimension_numbers<[1], [0], [0], [1], [0, 0, 1, 1], [], []>} : vector<1x128xf32>, vector<128x512xf32>, vector<1x512xf32> -> vector<1x512xf32>
    %452 = arith.addf %449, %451 : vector<1x512xf32>
    %453 = vector.extract_strided_slice %452 {offsets = [0, 0], sizes = [1, 384], strides = [1, 1]} : vector<1x512xf32> to vector<1x384xf32>
    %454 = arith.negf %453 : vector<1x384xf32>
    %455 = math.exp %454 : vector<1x384xf32>
    %cst_108 = arith.constant 1.000000e+00 : f32
    %456 = vector.broadcast %cst_108 : f32 to vector<1x384xf32>
    %457 = arith.addf %456, %455 : vector<1x384xf32>
    %458 = arith.divf %456, %457 : vector<1x384xf32>
    %459 = vector.extract_strided_slice %452 {offsets = [0, 384], sizes = [1, 128], strides = [1, 1]} : vector<1x512xf32> to vector<1x128xf32>
    %460 = math.tanh %459 : vector<1x128xf32>
    %461 = vector.extract_strided_slice %458 {offsets = [0, 128], sizes = [1, 128], strides = [1, 1]} : vector<1x384xf32> to vector<1x128xf32>
    %462 = arith.mulf %461, %425 : vector<1x128xf32>
    %463 = vector.extract_strided_slice %458 {offsets = [0, 0], sizes = [1, 128], strides = [1, 1]} : vector<1x384xf32> to vector<1x128xf32>
    %464 = arith.mulf %463, %460 : vector<1x128xf32>
    %465 = arith.addf %462, %464 : vector<1x128xf32>
    %466 = vector.extract_strided_slice %458 {offsets = [0, 256], sizes = [1, 128], strides = [1, 1]} : vector<1x384xf32> to vector<1x128xf32>
    %467 = math.tanh %465 : vector<1x128xf32>
    %468 = arith.mulf %466, %467 : vector<1x128xf32>
    %469 = vector.extract_strided_slice %344 {offsets = [3, 0], sizes = [1, 512], strides = [1, 1]} : vector<8x1024xf32> to vector<1x512xf32>
    %c0_109 = arith.constant 0 : index
    %c0_110 = arith.constant 0 : index
    %470 = vector.load %arg8[%c0_109, %c0_110] : memref<128x512xf32, #tpu.memory_space<vmem>>, vector<128x512xf32>
    %cst_111 = arith.constant dense<0.000000e+00> : vector<1x512xf32>
    %471 = tpu.matmul %448, %470, %cst_111 {dimension_numbers = #tpu.dot_dimension_numbers<[1], [0], [0], [1], [0, 0, 1, 1], [], []>} : vector<1x128xf32>, vector<128x512xf32>, vector<1x512xf32> -> vector<1x512xf32>
    %472 = arith.addf %469, %471 : vector<1x512xf32>
    %473 = vector.extract_strided_slice %472 {offsets = [0, 0], sizes = [1, 384], strides = [1, 1]} : vector<1x512xf32> to vector<1x384xf32>
    %474 = arith.negf %473 : vector<1x384xf32>
    %475 = math.exp %474 : vector<1x384xf32>
    %cst_112 = arith.constant 1.000000e+00 : f32
    %476 = vector.broadcast %cst_112 : f32 to vector<1x384xf32>
    %477 = arith.addf %476, %475 : vector<1x384xf32>
    %478 = arith.divf %476, %477 : vector<1x384xf32>
    %479 = vector.extract_strided_slice %472 {offsets = [0, 384], sizes = [1, 128], strides = [1, 1]} : vector<1x512xf32> to vector<1x128xf32>
    %480 = math.tanh %479 : vector<1x128xf32>
    %481 = vector.extract_strided_slice %478 {offsets = [0, 128], sizes = [1, 128], strides = [1, 1]} : vector<1x384xf32> to vector<1x128xf32>
    %482 = arith.mulf %481, %445 : vector<1x128xf32>
    %483 = vector.extract_strided_slice %478 {offsets = [0, 0], sizes = [1, 128], strides = [1, 1]} : vector<1x384xf32> to vector<1x128xf32>
    %484 = arith.mulf %483, %480 : vector<1x128xf32>
    %485 = arith.addf %482, %484 : vector<1x128xf32>
    %486 = vector.extract_strided_slice %478 {offsets = [0, 256], sizes = [1, 128], strides = [1, 1]} : vector<1x384xf32> to vector<1x128xf32>
    %487 = math.tanh %485 : vector<1x128xf32>
    %488 = arith.mulf %486, %487 : vector<1x128xf32>
    %489 = vector.extract_strided_slice %344 {offsets = [4, 512], sizes = [1, 512], strides = [1, 1]} : vector<8x1024xf32> to vector<1x512xf32>
    %c0_113 = arith.constant 0 : index
    %c0_114 = arith.constant 0 : index
    %490 = vector.load %arg9[%c0_113, %c0_114] : memref<128x512xf32, #tpu.memory_space<vmem>>, vector<128x512xf32>
    %cst_115 = arith.constant dense<0.000000e+00> : vector<1x512xf32>
    %491 = tpu.matmul %468, %490, %cst_115 {dimension_numbers = #tpu.dot_dimension_numbers<[1], [0], [0], [1], [0, 0, 1, 1], [], []>} : vector<1x128xf32>, vector<128x512xf32>, vector<1x512xf32> -> vector<1x512xf32>
    %492 = arith.addf %489, %491 : vector<1x512xf32>
    %493 = vector.extract_strided_slice %492 {offsets = [0, 0], sizes = [1, 384], strides = [1, 1]} : vector<1x512xf32> to vector<1x384xf32>
    %494 = arith.negf %493 : vector<1x384xf32>
    %495 = math.exp %494 : vector<1x384xf32>
    %cst_116 = arith.constant 1.000000e+00 : f32
    %496 = vector.broadcast %cst_116 : f32 to vector<1x384xf32>
    %497 = arith.addf %496, %495 : vector<1x384xf32>
    %498 = arith.divf %496, %497 : vector<1x384xf32>
    %499 = vector.extract_strided_slice %492 {offsets = [0, 384], sizes = [1, 128], strides = [1, 1]} : vector<1x512xf32> to vector<1x128xf32>
    %500 = math.tanh %499 : vector<1x128xf32>
    %501 = vector.extract_strided_slice %498 {offsets = [0, 128], sizes = [1, 128], strides = [1, 1]} : vector<1x384xf32> to vector<1x128xf32>
    %502 = arith.mulf %501, %465 : vector<1x128xf32>
    %503 = vector.extract_strided_slice %498 {offsets = [0, 0], sizes = [1, 128], strides = [1, 1]} : vector<1x384xf32> to vector<1x128xf32>
    %504 = arith.mulf %503, %500 : vector<1x128xf32>
    %505 = arith.addf %502, %504 : vector<1x128xf32>
    %506 = vector.extract_strided_slice %498 {offsets = [0, 256], sizes = [1, 128], strides = [1, 1]} : vector<1x384xf32> to vector<1x128xf32>
    %507 = math.tanh %505 : vector<1x128xf32>
    %508 = arith.mulf %506, %507 : vector<1x128xf32>
    %509 = vector.extract_strided_slice %344 {offsets = [4, 0], sizes = [1, 512], strides = [1, 1]} : vector<8x1024xf32> to vector<1x512xf32>
    %c0_117 = arith.constant 0 : index
    %c0_118 = arith.constant 0 : index
    %510 = vector.load %arg8[%c0_117, %c0_118] : memref<128x512xf32, #tpu.memory_space<vmem>>, vector<128x512xf32>
    %cst_119 = arith.constant dense<0.000000e+00> : vector<1x512xf32>
    %511 = tpu.matmul %488, %510, %cst_119 {dimension_numbers = #tpu.dot_dimension_numbers<[1], [0], [0], [1], [0, 0, 1, 1], [], []>} : vector<1x128xf32>, vector<128x512xf32>, vector<1x512xf32> -> vector<1x512xf32>
    %512 = arith.addf %509, %511 : vector<1x512xf32>
    %513 = vector.extract_strided_slice %512 {offsets = [0, 0], sizes = [1, 384], strides = [1, 1]} : vector<1x512xf32> to vector<1x384xf32>
    %514 = arith.negf %513 : vector<1x384xf32>
    %515 = math.exp %514 : vector<1x384xf32>
    %cst_120 = arith.constant 1.000000e+00 : f32
    %516 = vector.broadcast %cst_120 : f32 to vector<1x384xf32>
    %517 = arith.addf %516, %515 : vector<1x384xf32>
    %518 = arith.divf %516, %517 : vector<1x384xf32>
    %519 = vector.extract_strided_slice %512 {offsets = [0, 384], sizes = [1, 128], strides = [1, 1]} : vector<1x512xf32> to vector<1x128xf32>
    %520 = math.tanh %519 : vector<1x128xf32>
    %521 = vector.extract_strided_slice %518 {offsets = [0, 128], sizes = [1, 128], strides = [1, 1]} : vector<1x384xf32> to vector<1x128xf32>
    %522 = arith.mulf %521, %485 : vector<1x128xf32>
    %523 = vector.extract_strided_slice %518 {offsets = [0, 0], sizes = [1, 128], strides = [1, 1]} : vector<1x384xf32> to vector<1x128xf32>
    %524 = arith.mulf %523, %520 : vector<1x128xf32>
    %525 = arith.addf %522, %524 : vector<1x128xf32>
    %526 = vector.extract_strided_slice %518 {offsets = [0, 256], sizes = [1, 128], strides = [1, 1]} : vector<1x384xf32> to vector<1x128xf32>
    %527 = math.tanh %525 : vector<1x128xf32>
    %528 = arith.mulf %526, %527 : vector<1x128xf32>
    %529 = vector.extract_strided_slice %344 {offsets = [3, 512], sizes = [1, 512], strides = [1, 1]} : vector<8x1024xf32> to vector<1x512xf32>
    %c0_121 = arith.constant 0 : index
    %c0_122 = arith.constant 0 : index
    %530 = vector.load %arg9[%c0_121, %c0_122] : memref<128x512xf32, #tpu.memory_space<vmem>>, vector<128x512xf32>
    %cst_123 = arith.constant dense<0.000000e+00> : vector<1x512xf32>
    %531 = tpu.matmul %508, %530, %cst_123 {dimension_numbers = #tpu.dot_dimension_numbers<[1], [0], [0], [1], [0, 0, 1, 1], [], []>} : vector<1x128xf32>, vector<128x512xf32>, vector<1x512xf32> -> vector<1x512xf32>
    %532 = arith.addf %529, %531 : vector<1x512xf32>
    %533 = vector.extract_strided_slice %532 {offsets = [0, 0], sizes = [1, 384], strides = [1, 1]} : vector<1x512xf32> to vector<1x384xf32>
    %534 = arith.negf %533 : vector<1x384xf32>
    %535 = math.exp %534 : vector<1x384xf32>
    %cst_124 = arith.constant 1.000000e+00 : f32
    %536 = vector.broadcast %cst_124 : f32 to vector<1x384xf32>
    %537 = arith.addf %536, %535 : vector<1x384xf32>
    %538 = arith.divf %536, %537 : vector<1x384xf32>
    %539 = vector.extract_strided_slice %532 {offsets = [0, 384], sizes = [1, 128], strides = [1, 1]} : vector<1x512xf32> to vector<1x128xf32>
    %540 = math.tanh %539 : vector<1x128xf32>
    %541 = vector.extract_strided_slice %538 {offsets = [0, 128], sizes = [1, 128], strides = [1, 1]} : vector<1x384xf32> to vector<1x128xf32>
    %542 = arith.mulf %541, %505 : vector<1x128xf32>
    %543 = vector.extract_strided_slice %538 {offsets = [0, 0], sizes = [1, 128], strides = [1, 1]} : vector<1x384xf32> to vector<1x128xf32>
    %544 = arith.mulf %543, %540 : vector<1x128xf32>
    %545 = arith.addf %542, %544 : vector<1x128xf32>
    %546 = vector.extract_strided_slice %538 {offsets = [0, 256], sizes = [1, 128], strides = [1, 1]} : vector<1x384xf32> to vector<1x128xf32>
    %547 = math.tanh %545 : vector<1x128xf32>
    %548 = arith.mulf %546, %547 : vector<1x128xf32>
    %549 = vector.extract_strided_slice %344 {offsets = [5, 0], sizes = [1, 512], strides = [1, 1]} : vector<8x1024xf32> to vector<1x512xf32>
    %c0_125 = arith.constant 0 : index
    %c0_126 = arith.constant 0 : index
    %550 = vector.load %arg8[%c0_125, %c0_126] : memref<128x512xf32, #tpu.memory_space<vmem>>, vector<128x512xf32>
    %cst_127 = arith.constant dense<0.000000e+00> : vector<1x512xf32>
    %551 = tpu.matmul %528, %550, %cst_127 {dimension_numbers = #tpu.dot_dimension_numbers<[1], [0], [0], [1], [0, 0, 1, 1], [], []>} : vector<1x128xf32>, vector<128x512xf32>, vector<1x512xf32> -> vector<1x512xf32>
    %552 = arith.addf %549, %551 : vector<1x512xf32>
    %553 = vector.extract_strided_slice %552 {offsets = [0, 0], sizes = [1, 384], strides = [1, 1]} : vector<1x512xf32> to vector<1x384xf32>
    %554 = arith.negf %553 : vector<1x384xf32>
    %555 = math.exp %554 : vector<1x384xf32>
    %cst_128 = arith.constant 1.000000e+00 : f32
    %556 = vector.broadcast %cst_128 : f32 to vector<1x384xf32>
    %557 = arith.addf %556, %555 : vector<1x384xf32>
    %558 = arith.divf %556, %557 : vector<1x384xf32>
    %559 = vector.extract_strided_slice %552 {offsets = [0, 384], sizes = [1, 128], strides = [1, 1]} : vector<1x512xf32> to vector<1x128xf32>
    %560 = math.tanh %559 : vector<1x128xf32>
    %561 = vector.extract_strided_slice %558 {offsets = [0, 128], sizes = [1, 128], strides = [1, 1]} : vector<1x384xf32> to vector<1x128xf32>
    %562 = arith.mulf %561, %525 : vector<1x128xf32>
    %563 = vector.extract_strided_slice %558 {offsets = [0, 0], sizes = [1, 128], strides = [1, 1]} : vector<1x384xf32> to vector<1x128xf32>
    %564 = arith.mulf %563, %560 : vector<1x128xf32>
    %565 = arith.addf %562, %564 : vector<1x128xf32>
    %566 = vector.extract_strided_slice %558 {offsets = [0, 256], sizes = [1, 128], strides = [1, 1]} : vector<1x384xf32> to vector<1x128xf32>
    %567 = math.tanh %565 : vector<1x128xf32>
    %568 = arith.mulf %566, %567 : vector<1x128xf32>
    %569 = vector.extract_strided_slice %344 {offsets = [2, 512], sizes = [1, 512], strides = [1, 1]} : vector<8x1024xf32> to vector<1x512xf32>
    %c0_129 = arith.constant 0 : index
    %c0_130 = arith.constant 0 : index
    %570 = vector.load %arg9[%c0_129, %c0_130] : memref<128x512xf32, #tpu.memory_space<vmem>>, vector<128x512xf32>
    %cst_131 = arith.constant dense<0.000000e+00> : vector<1x512xf32>
    %571 = tpu.matmul %548, %570, %cst_131 {dimension_numbers = #tpu.dot_dimension_numbers<[1], [0], [0], [1], [0, 0, 1, 1], [], []>} : vector<1x128xf32>, vector<128x512xf32>, vector<1x512xf32> -> vector<1x512xf32>
    %572 = arith.addf %569, %571 : vector<1x512xf32>
    %573 = vector.extract_strided_slice %572 {offsets = [0, 0], sizes = [1, 384], strides = [1, 1]} : vector<1x512xf32> to vector<1x384xf32>
    %574 = arith.negf %573 : vector<1x384xf32>
    %575 = math.exp %574 : vector<1x384xf32>
    %cst_132 = arith.constant 1.000000e+00 : f32
    %576 = vector.broadcast %cst_132 : f32 to vector<1x384xf32>
    %577 = arith.addf %576, %575 : vector<1x384xf32>
    %578 = arith.divf %576, %577 : vector<1x384xf32>
    %579 = vector.extract_strided_slice %572 {offsets = [0, 384], sizes = [1, 128], strides = [1, 1]} : vector<1x512xf32> to vector<1x128xf32>
    %580 = math.tanh %579 : vector<1x128xf32>
    %581 = vector.extract_strided_slice %578 {offsets = [0, 128], sizes = [1, 128], strides = [1, 1]} : vector<1x384xf32> to vector<1x128xf32>
    %582 = arith.mulf %581, %545 : vector<1x128xf32>
    %583 = vector.extract_strided_slice %578 {offsets = [0, 0], sizes = [1, 128], strides = [1, 1]} : vector<1x384xf32> to vector<1x128xf32>
    %584 = arith.mulf %583, %580 : vector<1x128xf32>
    %585 = arith.addf %582, %584 : vector<1x128xf32>
    %586 = vector.extract_strided_slice %578 {offsets = [0, 256], sizes = [1, 128], strides = [1, 1]} : vector<1x384xf32> to vector<1x128xf32>
    %587 = math.tanh %585 : vector<1x128xf32>
    %588 = arith.mulf %586, %587 : vector<1x128xf32>
    %589 = vector.extract_strided_slice %344 {offsets = [6, 0], sizes = [1, 512], strides = [1, 1]} : vector<8x1024xf32> to vector<1x512xf32>
    %c0_133 = arith.constant 0 : index
    %c0_134 = arith.constant 0 : index
    %590 = vector.load %arg8[%c0_133, %c0_134] : memref<128x512xf32, #tpu.memory_space<vmem>>, vector<128x512xf32>
    %cst_135 = arith.constant dense<0.000000e+00> : vector<1x512xf32>
    %591 = tpu.matmul %568, %590, %cst_135 {dimension_numbers = #tpu.dot_dimension_numbers<[1], [0], [0], [1], [0, 0, 1, 1], [], []>} : vector<1x128xf32>, vector<128x512xf32>, vector<1x512xf32> -> vector<1x512xf32>
    %592 = arith.addf %589, %591 : vector<1x512xf32>
    %593 = vector.extract_strided_slice %592 {offsets = [0, 0], sizes = [1, 384], strides = [1, 1]} : vector<1x512xf32> to vector<1x384xf32>
    %594 = arith.negf %593 : vector<1x384xf32>
    %595 = math.exp %594 : vector<1x384xf32>
    %cst_136 = arith.constant 1.000000e+00 : f32
    %596 = vector.broadcast %cst_136 : f32 to vector<1x384xf32>
    %597 = arith.addf %596, %595 : vector<1x384xf32>
    %598 = arith.divf %596, %597 : vector<1x384xf32>
    %599 = vector.extract_strided_slice %592 {offsets = [0, 384], sizes = [1, 128], strides = [1, 1]} : vector<1x512xf32> to vector<1x128xf32>
    %600 = math.tanh %599 : vector<1x128xf32>
    %601 = vector.extract_strided_slice %598 {offsets = [0, 128], sizes = [1, 128], strides = [1, 1]} : vector<1x384xf32> to vector<1x128xf32>
    %602 = arith.mulf %601, %565 : vector<1x128xf32>
    %603 = vector.extract_strided_slice %598 {offsets = [0, 0], sizes = [1, 128], strides = [1, 1]} : vector<1x384xf32> to vector<1x128xf32>
    %604 = arith.mulf %603, %600 : vector<1x128xf32>
    %605 = arith.addf %602, %604 : vector<1x128xf32>
    %606 = vector.extract_strided_slice %598 {offsets = [0, 256], sizes = [1, 128], strides = [1, 1]} : vector<1x384xf32> to vector<1x128xf32>
    %607 = math.tanh %605 : vector<1x128xf32>
    %608 = arith.mulf %606, %607 : vector<1x128xf32>
    %609 = vector.extract_strided_slice %344 {offsets = [1, 512], sizes = [1, 512], strides = [1, 1]} : vector<8x1024xf32> to vector<1x512xf32>
    %c0_137 = arith.constant 0 : index
    %c0_138 = arith.constant 0 : index
    %610 = vector.load %arg9[%c0_137, %c0_138] : memref<128x512xf32, #tpu.memory_space<vmem>>, vector<128x512xf32>
    %cst_139 = arith.constant dense<0.000000e+00> : vector<1x512xf32>
    %611 = tpu.matmul %588, %610, %cst_139 {dimension_numbers = #tpu.dot_dimension_numbers<[1], [0], [0], [1], [0, 0, 1, 1], [], []>} : vector<1x128xf32>, vector<128x512xf32>, vector<1x512xf32> -> vector<1x512xf32>
    %612 = arith.addf %609, %611 : vector<1x512xf32>
    %613 = vector.extract_strided_slice %612 {offsets = [0, 0], sizes = [1, 384], strides = [1, 1]} : vector<1x512xf32> to vector<1x384xf32>
    %614 = arith.negf %613 : vector<1x384xf32>
    %615 = math.exp %614 : vector<1x384xf32>
    %cst_140 = arith.constant 1.000000e+00 : f32
    %616 = vector.broadcast %cst_140 : f32 to vector<1x384xf32>
    %617 = arith.addf %616, %615 : vector<1x384xf32>
    %618 = arith.divf %616, %617 : vector<1x384xf32>
    %619 = vector.extract_strided_slice %612 {offsets = [0, 384], sizes = [1, 128], strides = [1, 1]} : vector<1x512xf32> to vector<1x128xf32>
    %620 = math.tanh %619 : vector<1x128xf32>
    %621 = vector.extract_strided_slice %618 {offsets = [0, 128], sizes = [1, 128], strides = [1, 1]} : vector<1x384xf32> to vector<1x128xf32>
    %622 = arith.mulf %621, %585 : vector<1x128xf32>
    %623 = vector.extract_strided_slice %618 {offsets = [0, 0], sizes = [1, 128], strides = [1, 1]} : vector<1x384xf32> to vector<1x128xf32>
    %624 = arith.mulf %623, %620 : vector<1x128xf32>
    %625 = arith.addf %622, %624 : vector<1x128xf32>
    %626 = vector.extract_strided_slice %618 {offsets = [0, 256], sizes = [1, 128], strides = [1, 1]} : vector<1x384xf32> to vector<1x128xf32>
    %627 = math.tanh %625 : vector<1x128xf32>
    %628 = arith.mulf %626, %627 : vector<1x128xf32>
    %629 = vector.extract_strided_slice %344 {offsets = [7, 0], sizes = [1, 512], strides = [1, 1]} : vector<8x1024xf32> to vector<1x512xf32>
    %c0_141 = arith.constant 0 : index
    %c0_142 = arith.constant 0 : index
    %630 = vector.load %arg8[%c0_141, %c0_142] : memref<128x512xf32, #tpu.memory_space<vmem>>, vector<128x512xf32>
    %cst_143 = arith.constant dense<0.000000e+00> : vector<1x512xf32>
    %631 = tpu.matmul %608, %630, %cst_143 {dimension_numbers = #tpu.dot_dimension_numbers<[1], [0], [0], [1], [0, 0, 1, 1], [], []>} : vector<1x128xf32>, vector<128x512xf32>, vector<1x512xf32> -> vector<1x512xf32>
    %632 = arith.addf %629, %631 : vector<1x512xf32>
    %633 = vector.extract_strided_slice %632 {offsets = [0, 0], sizes = [1, 384], strides = [1, 1]} : vector<1x512xf32> to vector<1x384xf32>
    %634 = arith.negf %633 : vector<1x384xf32>
    %635 = math.exp %634 : vector<1x384xf32>
    %cst_144 = arith.constant 1.000000e+00 : f32
    %636 = vector.broadcast %cst_144 : f32 to vector<1x384xf32>
    %637 = arith.addf %636, %635 : vector<1x384xf32>
    %638 = arith.divf %636, %637 : vector<1x384xf32>
    %639 = vector.extract_strided_slice %632 {offsets = [0, 384], sizes = [1, 128], strides = [1, 1]} : vector<1x512xf32> to vector<1x128xf32>
    %640 = math.tanh %639 : vector<1x128xf32>
    %641 = vector.extract_strided_slice %638 {offsets = [0, 128], sizes = [1, 128], strides = [1, 1]} : vector<1x384xf32> to vector<1x128xf32>
    %642 = arith.mulf %641, %605 : vector<1x128xf32>
    %643 = vector.extract_strided_slice %638 {offsets = [0, 0], sizes = [1, 128], strides = [1, 1]} : vector<1x384xf32> to vector<1x128xf32>
    %644 = arith.mulf %643, %640 : vector<1x128xf32>
    %645 = arith.addf %642, %644 : vector<1x128xf32>
    %646 = vector.extract_strided_slice %638 {offsets = [0, 256], sizes = [1, 128], strides = [1, 1]} : vector<1x384xf32> to vector<1x128xf32>
    %647 = math.tanh %645 : vector<1x128xf32>
    %648 = arith.mulf %646, %647 : vector<1x128xf32>
    %649 = vector.extract_strided_slice %344 {offsets = [0, 512], sizes = [1, 512], strides = [1, 1]} : vector<8x1024xf32> to vector<1x512xf32>
    %c0_145 = arith.constant 0 : index
    %c0_146 = arith.constant 0 : index
    %650 = vector.load %arg9[%c0_145, %c0_146] : memref<128x512xf32, #tpu.memory_space<vmem>>, vector<128x512xf32>
    %cst_147 = arith.constant dense<0.000000e+00> : vector<1x512xf32>
    %651 = tpu.matmul %628, %650, %cst_147 {dimension_numbers = #tpu.dot_dimension_numbers<[1], [0], [0], [1], [0, 0, 1, 1], [], []>} : vector<1x128xf32>, vector<128x512xf32>, vector<1x512xf32> -> vector<1x512xf32>
    %652 = arith.addf %649, %651 : vector<1x512xf32>
    %653 = vector.extract_strided_slice %652 {offsets = [0, 0], sizes = [1, 384], strides = [1, 1]} : vector<1x512xf32> to vector<1x384xf32>
    %654 = arith.negf %653 : vector<1x384xf32>
    %655 = math.exp %654 : vector<1x384xf32>
    %cst_148 = arith.constant 1.000000e+00 : f32
    %656 = vector.broadcast %cst_148 : f32 to vector<1x384xf32>
    %657 = arith.addf %656, %655 : vector<1x384xf32>
    %658 = arith.divf %656, %657 : vector<1x384xf32>
    %659 = vector.extract_strided_slice %652 {offsets = [0, 384], sizes = [1, 128], strides = [1, 1]} : vector<1x512xf32> to vector<1x128xf32>
    %660 = math.tanh %659 : vector<1x128xf32>
    %661 = vector.extract_strided_slice %658 {offsets = [0, 128], sizes = [1, 128], strides = [1, 1]} : vector<1x384xf32> to vector<1x128xf32>
    %662 = arith.mulf %661, %625 : vector<1x128xf32>
    %663 = vector.extract_strided_slice %658 {offsets = [0, 0], sizes = [1, 128], strides = [1, 1]} : vector<1x384xf32> to vector<1x128xf32>
    %664 = arith.mulf %663, %660 : vector<1x128xf32>
    %665 = arith.addf %662, %664 : vector<1x128xf32>
    %666 = vector.extract_strided_slice %658 {offsets = [0, 256], sizes = [1, 128], strides = [1, 1]} : vector<1x384xf32> to vector<1x128xf32>
    %667 = math.tanh %665 : vector<1x128xf32>
    %668 = arith.mulf %666, %667 : vector<1x128xf32>
    %669 = tpu.concatenate %368, %408, %448, %488, %528, %568, %608, %648 in 0 : vector<1x128xf32>, vector<1x128xf32>, vector<1x128xf32>, vector<1x128xf32>, vector<1x128xf32>, vector<1x128xf32>, vector<1x128xf32>, vector<1x128xf32> -> vector<8x128xf32>
    %670 = tpu.concatenate %668, %628, %588, %548, %508, %468, %428, %388 in 0 : vector<1x128xf32>, vector<1x128xf32>, vector<1x128xf32>, vector<1x128xf32>, vector<1x128xf32>, vector<1x128xf32>, vector<1x128xf32>, vector<1x128xf32> -> vector<8x128xf32>
    %671 = tpu.concatenate %669, %670 in 1 : vector<8x128xf32>, vector<8x128xf32> -> vector<8x256xf32>
    %c0_149 = arith.constant 0 : index
    %c0_150 = arith.constant 0 : index
    %672 = vector.load %arg11[%c0_149, %c0_150] : memref<256x128xf32, #tpu.memory_space<vmem>>, vector<256x128xf32>
    %cst_151 = arith.constant dense<0.000000e+00> : vector<8x128xf32>
    %673 = tpu.matmul %671, %672, %cst_151 {dimension_numbers = #tpu.dot_dimension_numbers<[1], [0], [0], [1], [0, 0, 1, 1], [], []>} : vector<8x256xf32>, vector<256x128xf32>, vector<8x128xf32> -> vector<8x128xf32>
    %c0_152 = arith.constant 0 : index
    %c0_153 = arith.constant 0 : index
    %674 = vector.load %arg12[%c0_152, %c0_153] : memref<1x128xf32, #tpu.memory_space<vmem>>, vector<1x128xf32>
    %675 = vector.broadcast %674 : vector<1x128xf32> to vector<8x128xf32>
    %676 = arith.addf %673, %675 : vector<8x128xf32>
    %cst_154 = arith.constant dense<0xFF800000> : vector<8xf32>
    %677 = vector.multi_reduction <maximumf>, %676, %cst_154 [1] : vector<8x128xf32> to vector<8xf32>
    %678 = vector.shape_cast %677 : vector<8xf32> to vector<8x1xf32>
    %679 = vector.broadcast %678 : vector<8x1xf32> to vector<8x128xf32>
    %680 = arith.subf %676, %679 : vector<8x128xf32>
    %681 = math.exp %680 : vector<8x128xf32>
    %cst_155 = arith.constant dense<0.000000e+00> : vector<8xf32>
    %682 = vector.multi_reduction <add>, %681, %cst_155 [1] : vector<8x128xf32> to vector<8xf32>
    %683 = vector.shape_cast %682 : vector<8xf32> to vector<8x1xf32>
    %684 = math.log %683 : vector<8x1xf32>
    %685 = vector.broadcast %684 : vector<8x1xf32> to vector<8x128xf32>
    %686 = arith.subf %680, %685 : vector<8x128xf32>
    %c0_156 = arith.constant 0 : index
    %c0_157 = arith.constant 0 : index
    %687 = vector.load %arg13[%c0_156, %c0_157] : memref<8x128xf32, #tpu.memory_space<vmem>>, vector<8x128xf32>
    tpu.vector_store %arg13[%c0_156, %c0_157], %686 {strides = array<i32>} : memref<8x128xf32, #tpu.memory_space<vmem>>, vector<8x128xf32>,
    return
  }
  func.func @transform_0(%arg0: i32) -> (i32, i32) {
    %c0_i32 = arith.constant 0 : i32
    %c0_i32_0 = arith.constant 0 : i32
    %c0_i32_1 = arith.constant 0 : i32
    return %c0_i32, %c0_i32_0 : i32, i32
  }
  func.func @transform_1(%arg0: i32) -> (i32, i32) {
    %c0_i32 = arith.constant 0 : i32
    %c0_i32_0 = arith.constant 0 : i32
    %c0_i32_1 = arith.constant 0 : i32
    return %c0_i32, %c0_i32_0 : i32, i32
  }
  func.func @transform_2(%arg0: i32) -> (i32, i32) {
    %c0_i32 = arith.constant 0 : i32
    %c0_i32_0 = arith.constant 0 : i32
    %c0_i32_1 = arith.constant 0 : i32
    return %c0_i32, %c0_i32_0 : i32, i32
  }
  func.func @transform_3(%arg0: i32) -> (i32, i32) {
    %c0_i32 = arith.constant 0 : i32
    %c0_i32_0 = arith.constant 0 : i32
    %c0_i32_1 = arith.constant 0 : i32
    return %c0_i32, %c0_i32_0 : i32, i32
  }
  func.func @transform_4(%arg0: i32) -> (i32, i32) {
    %c0_i32 = arith.constant 0 : i32
    %c0_i32_0 = arith.constant 0 : i32
    %c0_i32_1 = arith.constant 0 : i32
    return %c0_i32, %c0_i32_0 : i32, i32
  }
  func.func @transform_5(%arg0: i32) -> (i32, i32) {
    %c0_i32 = arith.constant 0 : i32
    %c0_i32_0 = arith.constant 0 : i32
    %c0_i32_1 = arith.constant 0 : i32
    return %c0_i32, %c0_i32_0 : i32, i32
  }
  func.func @transform_6(%arg0: i32) -> (i32, i32) {
    %c0_i32 = arith.constant 0 : i32
    %c0_i32_0 = arith.constant 0 : i32
    %c0_i32_1 = arith.constant 0 : i32
    return %c0_i32, %c0_i32_0 : i32, i32
  }
  func.func @transform_7(%arg0: i32) -> (i32, i32) {
    %c0_i32 = arith.constant 0 : i32
    %c0_i32_0 = arith.constant 0 : i32
    %c0_i32_1 = arith.constant 0 : i32
    return %c0_i32, %c0_i32_0 : i32, i32
  }
  func.func @transform_8(%arg0: i32) -> (i32, i32) {
    %c0_i32 = arith.constant 0 : i32
    %c0_i32_0 = arith.constant 0 : i32
    %c0_i32_1 = arith.constant 0 : i32
    return %c0_i32, %c0_i32_0 : i32, i32
  }
  func.func @transform_9(%arg0: i32) -> (i32, i32) {
    %c0_i32 = arith.constant 0 : i32
    %c0_i32_0 = arith.constant 0 : i32
    %c0_i32_1 = arith.constant 0 : i32
    return %c0_i32, %c0_i32_0 : i32, i32
  }
  func.func @transform_10(%arg0: i32) -> (i32, i32) {
    %c0_i32 = arith.constant 0 : i32
    %c0_i32_0 = arith.constant 0 : i32
    %c0_i32_1 = arith.constant 0 : i32
    return %c0_i32, %c0_i32_0 : i32, i32
  }
  func.func @transform_11(%arg0: i32) -> (i32, i32) {
    %c0_i32 = arith.constant 0 : i32
    %c0_i32_0 = arith.constant 0 : i32
    %c0_i32_1 = arith.constant 0 : i32
    return %c0_i32, %c0_i32_0 : i32, i32
  }
  func.func @transform_12(%arg0: i32) -> (i32, i32) {
    %c0_i32 = arith.constant 0 : i32
    %c0_i32_0 = arith.constant 0 : i32
    %c0_i32_1 = arith.constant 0 : i32
    return %c0_i32, %c0_i32_0 : i32, i32
  }
}

</mosaic_0001>

<bundles_post_ra>
// kernel: sequence_tagging_forward.1
= control target key start
LH: loop header
LB: loop body
LE: loop exit
PB: predicated region body
PF: predicated region fallthrough
CT: control target
= control target key end

     0   :  { %17 = vsyncpa [#allocation3], 0  ;;  %s13158_s0 = inlined_call_operand.vmem [shape: s32[8,1], index: 0, kind: input, shape index: {}]   ;;  %s13159_s1 = inlined_call_operand.hbm [shape: f32[128,128], index: 1, kind: input, shape index: {}]   ;;  %s13160_s2 = inlined_call_operand.hbm [shape: f32[128,1024], index: 2, kind: input, shape index: {}]   ;;  %s13161_s3 = inlined_call_operand.hbm [shape: f32[128,512], index: 3, kind: input, shape index: {}]   ;;  %s13162_s4 = inlined_call_operand.hbm [shape: f32[128,512], index: 4, kind: input, shape index: {}]   ;;  %s13163_s5 = inlined_call_operand.vmem [shape: f32[1,1024], index: 5, kind: input, shape index: {}]   ;;  %s13164_s6 = inlined_call_operand.hbm [shape: f32[256,1024], index: 6, kind: input, shape index: {}]   ;;  %s13165_s7 = inlined_call_operand.hbm [shape: f32[128,512], index: 7, kind: input, shape index: {}]   ;;  %s13166_s8 = inlined_call_operand.hbm [shape: f32[128,512], index: 8, kind: input, shape index: {}]   ;;  %s13167_s9 = inlined_call_operand.vmem [shape: f32[1,1024], index: 9, kind: input, shape index: {}]   ;;  %s13168_s10 = inlined_call_operand.hbm [shape: f32[256,128], index: 10, kind: input, shape index: {}]   ;;  %s13169_s11 = inlined_call_operand.vmem [shape: f32[1,128], index: 11, kind: input, shape index: {}]   ;;  %s13170_s12 = inlined_call_operand.hbm [shape: f32[8,128], index: 12, kind: output, shape index: {}]  }
   0x1   :  { %18 = vsyncpa [#allocation6], 0 }
   0x2   :  { %19 = vsyncpa [#allocation9], 0 }
   0x3   :  { %20 = vsyncpa [#allocation12], 0 }
   0x4   :  { %21 = vsyncpa [#allocation15], 0 }
   0x5   :  { %22 = vsyncpa [#allocation4], 0  ;;  %s11071_s21 = smov [#allocation5]   ;;  %s10861_s25 = scalar_lea.hbm %s13160_s2, 16384 }
   0x6   :  { %s42_s22 = sshll.u32 %s11071_s21, 4  ;;  %p10862_p0 = scmp.ne.s32.totalorder %s13160_s2, %s10861_s25  ;;  %s43_s22 = int_to_ptr.vmem [resolvable:$true] %s42_s22 }
   0x7   :  { %p10865_p1 = scmp.lt.u32.totalorder %s10861_s25, %s13160_s2 }
   0x9   :  { %p10867_p2 = pnand %p10865_p1, %p10862_p0 }
   0xb   :  { %10870 = shalt.err (!%p10867_p2)
}
   0xc   :  { %s10871_s30 = scalar_lea.vmem %s43_s22, 16384  ;;  %p10876_p4 = scmp.lt.s32.totalorder %s43_s22, %s43_s22 }
   0xd   :  { %p10872_p3 = scmp.ne.s32.totalorder %s43_s22, %s10871_s30  ;;  %p10877_p5 = scmp.lt.s32.totalorder %s10871_s30, %s10871_s30 }
   0xf   :  { %p10878_p6 = por %p10877_p5, %p10876_p4 }
  0x11   :  { %p10879_p7 = pnand %p10878_p6, %p10872_p3 }
  0x13   :  { %10882 = shalt.err (!%p10879_p7)
}
  0x14   :  { %s11072_s13 = smov 1024   ;;  %s11073_s14 = smov 64  }
  0x15   :  { %48 = dma.hbm_to_vmem [thread:$0]  %s13160_s2, 16384, %s43_s22, [#allocation6], %s11072_s13, %s11072_s13, %s11073_s14  }
  0x16   :  { %s11074_s17 = smov [#allocation8]   ;;  %s11075_s19 = smov [#allocation11]  }
  0x17   :  { %s66_s18 = sshll.u32 %s11074_s17, 4  ;;  %s92_s20 = sshll.u32 %s11075_s19, 4  ;;  %s67_s18 = int_to_ptr.vmem [resolvable:$true] %s66_s18  ;;  %s93_s20 = int_to_ptr.vmem [resolvable:$true] %s92_s20 }
  0x18   :  { %s10883_s24 = scalar_lea.hbm %s13162_s4, 8192 }
  0x19   :  { %p10884_p8 = scmp.ne.s32.totalorder %s13162_s4, %s10883_s24  ;;  %p10887_p9 = scmp.lt.u32.totalorder %s10883_s24, %s13162_s4 }
  0x1b   :  { %p10889_p10 = pnand %p10887_p9, %p10884_p8 }
  0x1d   :  { %10892 = shalt.err (!%p10889_p10)
}
  0x1e   :  { %s10893_s2 = scalar_lea.vmem %s67_s18, 8192  ;;  %p10898_p12 = scmp.lt.s32.totalorder %s67_s18, %s67_s18 }
  0x1f   :  { %p10894_p11 = scmp.ne.s32.totalorder %s67_s18, %s10893_s2  ;;  %p10899_p13 = scmp.lt.s32.totalorder %s10893_s2, %s10893_s2 }
  0x21   :  { %p10900_p0 = por %p10899_p13, %p10898_p12 }
  0x23   :  { %p10901_p1 = pnand %p10900_p0, %p10894_p11 }
  0x25   :  { %10904 = shalt.err (!%p10901_p1)
}
  0x26   :  { %s11076_s22 = smov 512   ;;  %s11077_s29 = smov 32  }
  0x27   :  { %72 = dma.hbm_to_vmem [thread:$0]  %s13162_s4, 8192, %s67_s18, [#allocation9], %s11076_s22, %s11076_s22, %s11077_s29  }
  0x28   :  { %s10905_s19 = scalar_lea.hbm %s13165_s7, 8192 }
  0x29   :  { %p10906_p2 = scmp.ne.s32.totalorder %s13165_s7, %s10905_s19  ;;  %p10909_p3 = scmp.lt.u32.totalorder %s10905_s19, %s13165_s7 }
  0x2b   :  { %p10911_p4 = pnand %p10909_p3, %p10906_p2 }
  0x2d   :  { %10914 = shalt.err (!%p10911_p4)
}
  0x2e   :  { %s10915_s26 = scalar_lea.vmem %s93_s20, 8192  ;;  %p10920_p6 = scmp.lt.s32.totalorder %s93_s20, %s93_s20 }
  0x2f   :  { %p10916_p5 = scmp.ne.s32.totalorder %s93_s20, %s10915_s26  ;;  %p10921_p7 = scmp.lt.s32.totalorder %s10915_s26, %s10915_s26 }
  0x31   :  { %p10922_p8 = por %p10921_p7, %p10920_p6 }
  0x33   :  { %p10923_p9 = pnand %p10922_p8, %p10916_p5 }
  0x35   :  { %10926 = shalt.err (!%p10923_p9)
}
  0x36   :  { %98 = dma.hbm_to_vmem [thread:$0]  %s13165_s7, 8192, %s93_s20, [#allocation12], %s11076_s22, %s11076_s22, %s11077_s29  }
  0x37   :  { %s11078_s27 = smov [#allocation2]   ;;  %s10927_s15 = scalar_lea.hbm %s13159_s1, 2048 }
  0x38   :  { %s30_s28 = sshll.u32 %s11078_s27, 4  ;;  %p10928_p10 = scmp.ne.s32.totalorder %s13159_s1, %s10927_s15  ;;  %s31_s28 = int_to_ptr.vmem [resolvable:$true] %s30_s28 }
  0x39   :  { %p10931_p11 = scmp.lt.u32.totalorder %s10927_s15, %s13159_s1 }
  0x3b   :  { %p10933_p12 = pnand %p10931_p11, %p10928_p10 }
  0x3d   :  { %10936 = shalt.err (!%p10933_p12)
}
  0x3e   :  { %s10937_s23 = scalar_lea.vmem %s31_s28, 2048  ;;  %p10942_p0 = scmp.lt.s32.totalorder %s31_s28, %s31_s28 }
  0x3f   :  { %p10938_p13 = scmp.ne.s32.totalorder %s31_s28, %s10937_s23  ;;  %p10943_p1 = scmp.lt.s32.totalorder %s10937_s23, %s10937_s23 }
  0x41   :  { %p10944_p2 = por %p10943_p1, %p10942_p0 }
  0x43   :  { %p10945_p3 = pnand %p10944_p2, %p10938_p13 }
  0x45   :  { %10948 = shalt.err (!%p10945_p3)
}
  0x46   :  { %s11079_s7 = smov 128   ;;  %s11080_s20 = smov 8  }
  0x47   :  { %36 = dma.hbm_to_vmem [thread:$0]  %s13159_s1, 2048, %s31_s28, [#allocation3], %s11079_s7, %s11079_s7, %s11080_s20  }
  0x48   :  { %s11081_s26 = smov [#allocation7]   ;;  %s11082_s18 = smov [#allocation10]  }
  0x49   :  { %s54_s4 = sshll.u32 %s11081_s26, 4  ;;  %s80_s27 = sshll.u32 %s11082_s18, 4  ;;  %s55_s4 = int_to_ptr.vmem [resolvable:$true] %s54_s4  ;;  %s11216_s27 = int_to_ptr.vmem [resolvable:$true] %s80_s27 }
  0x4a   :  { %s10949_s15 = scalar_lea.hbm %s13161_s3, 8192 }
  0x4b   :  { %p10950_p4 = scmp.ne.s32.totalorder %s13161_s3, %s10949_s15  ;;  %p10953_p5 = scmp.lt.u32.totalorder %s10949_s15, %s13161_s3 }
  0x4d   :  { %p10955_p6 = pnand %p10953_p5, %p10950_p4 }
  0x4f   :  { %10958 = shalt.err (!%p10955_p6)
}
  0x50   :  { %s10959_s1 = scalar_lea.vmem %s55_s4, 8192  ;;  %p10964_p8 = scmp.lt.s32.totalorder %s55_s4, %s55_s4 }
  0x51   :  { %p10960_p7 = scmp.ne.s32.totalorder %s55_s4, %s10959_s1  ;;  %p10965_p9 = scmp.lt.s32.totalorder %s10959_s1, %s10959_s1 }
  0x53   :  { %p10966_p10 = por %p10965_p9, %p10964_p8 }
  0x55   :  { %p10967_p11 = pnand %p10966_p10, %p10960_p7 }
  0x57   :  { %10970 = shalt.err (!%p10967_p11)
}
  0x58   :  { %60 = dma.hbm_to_vmem [thread:$0]  %s13161_s3, 8192, %s55_s4, [#allocation6], %s11076_s22, %s11076_s22, %s11077_s29  }
  0x59   :  { %s10971_s26 = scalar_lea.hbm %s13164_s6, 32768 }
  0x5a   :  { %p10972_p12 = scmp.ne.s32.totalorder %s13164_s6, %s10971_s26  ;;  %p10975_p13 = scmp.lt.u32.totalorder %s10971_s26, %s13164_s6 }
  0x5c   :  { %p10977_p0 = pnand %p10975_p13, %p10972_p12 }
  0x5e   :  { %10980 = shalt.err (!%p10977_p0)
}
  0x5f   :  { %s10981_s16 = scalar_lea.vmem %s11216_s27, 32768  ;;  %p10986_p2 = scmp.lt.s32.totalorder %s11216_s27, %s11216_s27 }
  0x60   :  { %p10982_p1 = scmp.ne.s32.totalorder %s11216_s27, %s10981_s16  ;;  %p10987_p3 = scmp.lt.s32.totalorder %s10981_s16, %s10981_s16 }
  0x62   :  { %p10988_p4 = por %p10987_p3, %p10986_p2 }
  0x64   :  { %p10989_p5 = pnand %p10988_p4, %p10982_p1 }
  0x66   :  { %10992 = shalt.err (!%p10989_p5)
}
  0x67   :  { %86 = dma.hbm_to_vmem [thread:$0]  %s13164_s6, 32768, %s11216_s27, [#allocation9], %s11072_s13, %s11072_s13, %s11073_s14  }
  0x68   :  { %s11083_s17 = smov [#allocation13]   ;;  %s11084_s21 = smov [#allocation14]  }
  0x69   :  { %s104_s19 = sshll.u32 %s11083_s17, 4  ;;  %s118_s1 = sshll.u32 %s11084_s21, 4  ;;  %s105_s19 = int_to_ptr.vmem [resolvable:$true] %s104_s19  ;;  %s11253_s1 = int_to_ptr.vmem [resolvable:$true] %s118_s1 }
  0x6a   :  { %s10993_s24 = scalar_lea.hbm %s13166_s8, 8192 }
  0x6b   :  { %p10994_p6 = scmp.ne.s32.totalorder %s13166_s8, %s10993_s24  ;;  %p10997_p7 = scmp.lt.u32.totalorder %s10993_s24, %s13166_s8 }
  0x6d   :  { %p10999_p8 = pnand %p10997_p7, %p10994_p6 }
  0x6f   :  { %11002 = shalt.err (!%p10999_p8)
}
  0x70   :  { %s11003_s6 = scalar_lea.vmem %s105_s19, 8192  ;;  %p11008_p10 = scmp.lt.s32.totalorder %s105_s19, %s105_s19 }
  0x71   :  { %p11004_p9 = scmp.ne.s32.totalorder %s105_s19, %s11003_s6  ;;  %p11009_p11 = scmp.lt.s32.totalorder %s11003_s6, %s11003_s6 }
  0x73   :  { %p11010_p12 = por %p11009_p11, %p11008_p10 }
  0x75   :  { %p11011_p13 = pnand %p11010_p12, %p11004_p9 }
  0x77   :  { %11014 = shalt.err (!%p11011_p13)
}
  0x78   :  { %110 = dma.hbm_to_vmem [thread:$0]  %s13166_s8, 8192, %s105_s19, [#allocation12], %s11076_s22, %s11076_s22, %s11077_s29  }
  0x79   :  { %s11015_s15 = scalar_lea.hbm %s13168_s10, 4096 }
  0x7a   :  { %p11016_p0 = scmp.ne.s32.totalorder %s13168_s10, %s11015_s15  ;;  %p11019_p1 = scmp.lt.u32.totalorder %s11015_s15, %s13168_s10 }
  0x7c   :  { %p11021_p2 = pnand %p11019_p1, %p11016_p0 }
  0x7e   :  { %11024 = shalt.err (!%p11021_p2)
}
  0x7f   :  { %s11025_s21 = scalar_lea.vmem %s11253_s1, 4096  ;;  %p11030_p4 = scmp.lt.s32.totalorder %s11253_s1, %s11253_s1 }
  0x80   :  { %p11026_p3 = scmp.ne.s32.totalorder %s11253_s1, %s11025_s21  ;;  %p11031_p5 = scmp.lt.s32.totalorder %s11025_s21, %s11025_s21 }
  0x82   :  { %p11032_p6 = por %p11031_p5, %p11030_p4 }
  0x84   :  { %p11033_p7 = pnand %p11032_p6, %p11026_p3 }
  0x86   :  { %11036 = shalt.err (!%p11033_p7)
}
  0x87   :  { %124 = dma.hbm_to_vmem [thread:$0]  %s13168_s10, 4096, %s11253_s1, [#allocation15], %s11079_s7, %s11079_s7, %s11080_s20  }
  0x88   :  { %11059 = dma.done.wait [#allocation3], 2048  }
  0x89   :  { %11060 = vsyncadd [#allocation3], 4294965248 }
  0x8a   :  { %11061 = dma.done.wait [#allocation6], 24576  }
  0x8b   :  { %11062 = vsyncadd [#allocation6], 4294942720 }
  0x8c   :  { %11063 = dma.done.wait [#allocation9], 40960  }
  0x8d   :  { %11064 = vsyncadd [#allocation9], 4294926336 }
  0x8e   :  { %11065 = dma.done.wait [#allocation12], 16384  }
  0x8f   :  { %11066 = vsyncadd [#allocation12], 4294950912 }
  0x90   :  { %11067 = dma.done.wait [#allocation15], 4096  }
  0x91   :  { %11068 = vsyncadd [#allocation15], 4294963200  ;;  %v11085_v0 = vmov 0   ;;  %v11086_v1 = vmov 0.0|0.0   ;;  %v151_v2 = vld [vmem:[%s13158_s0] sm:$0xff]  ;;  %v161_v4 = vld [vmem:[#allocation2 + $0x8] sm:$0xff] }
  0x92   :  { %10344 = vset.pattern.permute.xlu0 %v11085_v0  ;;  %7836 = vmatprep.subr.bf16.mxu0 %v11086_v1  ;;  %v160_v3 = vld [vmem:[#allocation2] sm:$0xff]  ;;  %v162_v6 = vld [vmem:[#allocation2 + $0x10] sm:$0xff]  ;;  %v163_v7 = vld [vmem:[#allocation2 + $0x18] sm:$0xff]  ;;  %vm11087_vm0 = vmmov 0   ;;  %v13172_v8 = vmov 0.0   ;;  %vm3797_vm2 = vcmask 1040384  }
  0x93   :  { %155 = vperm.xlu0 %10344, %v151_v2   ;;  %v7837_v5 = vpack.c.bf16 %v161_v4, %v160_v3  ;;  %7833 = vmatprep.mubr.msk.f32.mxu0 %vm11087_vm0, %v13172_v8  ;;  %v7840_v9 = vpack.c.bf16 %v163_v7, %v162_v6  ;;  %v164_v10 = vld [vmem:[#allocation2 + $0x20] sm:$0xff]  ;;  %v165_v11 = vld [vmem:[#allocation2 + $0x28] sm:$0xff]  ;;  %v166_v15 = vld [vmem:[#allocation2 + $0x30] sm:$0xff]  ;;  %vm3799_vm3 = vcmask 1041408   ;;  %vm3801_vm4 = vcmask 1042432   ;;  %s11090_s1 = smov [#allocation16]  }
  0x94   :  { %480 = vmatprep.mubr.f32.mxu1 %v13172_v8  ;;  %v247_v12 = vld [vmem:[#allocation5 + $0x8] sm:$0xff]  ;;  %v7843_v14 = vpack.c.bf16 %v165_v11, %v164_v10  ;;  %v246_v17 = vld [vmem:[#allocation5] sm:$0xff]  ;;  %v167_v19 = vld [vmem:[#allocation2 + $0x38] sm:$0xff]  ;;  %vm3803_vm5 = vcmask 1043456   ;;  %vm3805_vm6 = vcmask 1044480   ;;  %vm3807_vm7 = vcmask 1045504  }
  0x95   :  { %7838 = vmatpush3.bf16.msra.mxu0 %v7837_v5  ;;  %v255_v13 = vld [vmem:[#allocation5 + $0x48] sm:$0xff]  ;;  %v254_v18 = vld [vmem:[#allocation5 + $0x40] sm:$0xff]  ;;  %v7846_v26 = vpack.c.bf16 %v167_v19, %v166_v15  ;;  %v170_v39 = vld [vmem:[#allocation2 + $0x50] sm:$0xff]  ;;  %vm3809_vm8 = vcmask 1046528   ;;  %s7637_s28 = sshll.u32 %s11090_s1, 4  ;;  %s7638_s28 = int_to_ptr.vmem [resolvable:$true] %s7637_s28 }
  0x96   :  { %7839 = vmatprep.subr.bf16.mxu0 %v11086_v1  ;;  %v7860_v16 = vpack.c.bf16 %v255_v13, %v247_v12  ;;  %v7862_v20 = vpack.c.bf16 %v254_v18, %v246_v17  ;;  %v263_v21 = vld [vmem:[#allocation5 + $0x88] sm:$0xff]  ;;  %v262_v24 = vld [vmem:[#allocation5 + $0x80] sm:$0xff]  ;;  %v171_v43 = vld [vmem:[#allocation2 + $0x58] sm:$0xff]  ;;  %v13171_v17 = vlaneseq  ;;  %s11037_s23 = scalar_lea.vmem %s7638_s28, 128  ;;  %p11042_p9 = scmp.lt.s32.totalorder %s7638_s28, %s7638_s28 }
  0x97   :  { %v271_v22 = vld [vmem:[#allocation5 + $0xc8] sm:$0xff]  ;;  %v270_v25 = vld [vmem:[#allocation5 + $0xc0] sm:$0xff]  ;;  %v7852_v47 = vpack.c.bf16 %v171_v43, %v170_v39  ;;  %v174_v57 = vld [vmem:[#allocation2 + $0x70] sm:$0xff]  ;;  %p11038_p8 = scmp.ne.s32.totalorder %s7638_s28, %s11037_s23  ;;  %p11043_p10 = scmp.lt.s32.totalorder %s11037_s23, %s11037_s23 }
  0x98   :  { %7861 = vmatprep.subr.bf16.mxu1 %v7860_v16  ;;  %v7864_v23 = vpack.c.bf16 %v271_v22, %v263_v21  ;;  %v168_v27 = vld [vmem:[#allocation2 + $0x40] sm:$0xff]  ;;  %v7866_v28 = vpack.c.bf16 %v270_v25, %v262_v24  ;;  %v279_v29 = vld [vmem:[#allocation5 + $0x108] sm:$0xff]  ;;  %v175_v61 = vld [vmem:[#allocation2 + $0x78] sm:$0xff] }
  0x99   :  { %7841 = vmatpush3.bf16.msra.mxu0 %v7840_v9  ;;  %7863 = vmatpush1.bf16.msra.mxu1 %v7862_v20  ;;  %v287_v30 = vld [vmem:[#allocation5 + $0x148] sm:$0xff]  ;;  %v278_v33 = vld [vmem:[#allocation5 + $0x100] sm:$0xff]  ;;  %v249_v0 = vld [vmem:[#allocation5 + $0x18] sm:$0xff]  ;;  %v7858_v4 = vpack.c.bf16 %v175_v61, %v174_v57  ;;  %p11044_p11 = por %p11043_p10, %p11042_p9 }
  0x9a   :  { %7842 = vmatprep.subr.bf16.mxu0 %v11086_v1  ;;  %7865 = vmatprep.subr.bf16.mxu1 %v7864_v23  ;;  %v169_v31 = vld [vmem:[#allocation2 + $0x48] sm:$0xff]  ;;  %v7868_v32 = vpack.c.bf16 %v287_v30, %v279_v29  ;;  %v286_v34 = vld [vmem:[#allocation5 + $0x140] sm:$0xff]  ;;  %v257_v2 = vld [vmem:[#allocation5 + $0x58] sm:$0xff]  ;;  %v11089_v29 = vmov 1.0  }
  0x9b   :  { %v295_v35 = vld [vmem:[#allocation5 + $0x188] sm:$0xff]  ;;  %v7870_v36 = vpack.c.bf16 %v286_v34, %v278_v33  ;;  %v7849_v38 = vpack.c.bf16 %v169_v31, %v168_v27  ;;  %v294_v41 = vld [vmem:[#allocation5 + $0x180] sm:$0xff]  ;;  %v7892_v9 = vpack.c.bf16 %v257_v2, %v249_v0  ;;  %v248_v18 = vld [vmem:[#allocation5 + $0x10] sm:$0xff]  ;;  %p11045_p12 = pnand %p11044_p11, %p11038_p8 }
  0x9c   :  { %v303_v37 = vld [vmem:[#allocation5 + $0x1c8] sm:$0xff]  ;;  %v302_v42 = vld [vmem:[#allocation5 + $0x1c0] sm:$0xff]  ;;  %v256_v19 = vld [vmem:[#allocation5 + $0x50] sm:$0xff] }
  0x9d   :  { %7844 = vmatpush3.bf16.msra.mxu0 %v7843_v14  ;;  %7867 = vmatpush1.bf16.msra.mxu1 %v7866_v28  ;;  %v7872_v40 = vpack.c.bf16 %v303_v37, %v295_v35  ;;  %v311_v44 = vld [vmem:[#allocation5 + $0x208] sm:$0xff]  ;;  %v7874_v46 = vpack.c.bf16 %v302_v42, %v294_v41  ;;  %v172_v48 = vld [vmem:[#allocation2 + $0x60] sm:$0xff]  ;;  %v265_v20 = vld [vmem:[#allocation5 + $0x98] sm:$0xff]  ;;  %v7894_v22 = vpack.c.bf16 %v256_v19, %v248_v18 }
  0x9e   :  { %7845 = vmatprep.subr.bf16.mxu0 %v11086_v1  ;;  %7869 = vmatprep.subr.bf16.mxu1 %v7868_v32  ;;  %v319_v45 = vld [vmem:[#allocation5 + $0x248] sm:$0xff]  ;;  %v310_v50 = vld [vmem:[#allocation5 + $0x200] sm:$0xff]  ;;  %v273_v21 = vld [vmem:[#allocation5 + $0xd8] sm:$0xff] }
  0x9f   :  { %v7876_v49 = vpack.c.bf16 %v319_v45, %v311_v44  ;;  %v318_v51 = vld [vmem:[#allocation5 + $0x240] sm:$0xff]  ;;  %v173_v52 = vld [vmem:[#allocation2 + $0x68] sm:$0xff]  ;;  %v7896_v24 = vpack.c.bf16 %v273_v21, %v265_v20  ;;  %v264_v25 = vld [vmem:[#allocation5 + $0x90] sm:$0xff] }
  0xa0   :  { %v327_v53 = vld [vmem:[#allocation5 + $0x288] sm:$0xff]  ;;  %v7878_v55 = vpack.c.bf16 %v318_v51, %v310_v50  ;;  %v7855_v56 = vpack.c.bf16 %v173_v52, %v172_v48  ;;  %v326_v59 = vld [vmem:[#allocation5 + $0x280] sm:$0xff]  ;;  %v281_v27 = vld [vmem:[#allocation5 + $0x118] sm:$0xff] }
  0xa1   :  { %7847 = vmatpush3.bf16.msra.mxu0 %v7846_v26  ;;  %7871 = vmatpush1.bf16.msra.mxu1 %v7870_v36  ;;  %v335_v54 = vld [vmem:[#allocation5 + $0x2c8] sm:$0xff]  ;;  %v334_v60 = vld [vmem:[#allocation5 + $0x2c0] sm:$0xff]  ;;  %v272_v26 = vld [vmem:[#allocation5 + $0xd0] sm:$0xff] }
  0xa2   :  { %7848 = vmatprep.subr.bf16.mxu0 %v11086_v1  ;;  %7873 = vmatprep.subr.bf16.mxu1 %v7872_v40  ;;  %v7880_v58 = vpack.c.bf16 %v335_v54, %v327_v53  ;;  %v343_v62 = vld [vmem:[#allocation5 + $0x308] sm:$0xff]  ;;  %v7882_v3 = vpack.c.bf16 %v334_v60, %v326_v59  ;;  %v342_v6 = vld [vmem:[#allocation5 + $0x300] sm:$0xff]  ;;  %v289_v28 = vld [vmem:[#allocation5 + $0x158] sm:$0xff]  ;;  %v7898_v30 = vpack.c.bf16 %v272_v26, %v264_v25 }
  0xa3   :  { %v351_v63 = vld [vmem:[#allocation5 + $0x348] sm:$0xff]  ;;  %v350_v7 = vld [vmem:[#allocation5 + $0x340] sm:$0xff]  ;;  %v7900_v31 = vpack.c.bf16 %v289_v28, %v281_v27  ;;  %v280_v32 = vld [vmem:[#allocation5 + $0x110] sm:$0xff] }
  0xa4   :  { %v7884_v5 = vpack.c.bf16 %v351_v63, %v343_v62  ;;  %v359_v10 = vld [vmem:[#allocation5 + $0x388] sm:$0xff]  ;;  %v7886_v12 = vpack.c.bf16 %v350_v7, %v342_v6  ;;  %v358_v14 = vld [vmem:[#allocation5 + $0x380] sm:$0xff]  ;;  %v288_v33 = vld [vmem:[#allocation5 + $0x150] sm:$0xff] }
  0xa5   :  { %7850 = vmatpush3.bf16.msra.mxu0 %v7849_v38  ;;  %7875 = vmatpush1.bf16.msra.mxu1 %v7874_v46  ;;  %v367_v11 = vld [vmem:[#allocation5 + $0x3c8] sm:$0xff]  ;;  %v366_v15 = vld [vmem:[#allocation5 + $0x3c0] sm:$0xff]  ;;  %v297_v34 = vld [vmem:[#allocation5 + $0x198] sm:$0xff]  ;;  %v7902_v36 = vpack.c.bf16 %v288_v33, %v280_v32 }
  0xa6   :  { %7851 = vmatprep.subr.bf16.mxu0 %v11086_v1  ;;  %7877 = vmatprep.subr.bf16.mxu1 %v7876_v49  ;;  %v7888_v13 = vpack.c.bf16 %v367_v11, %v359_v10  ;;  %v7890_v16 = vpack.c.bf16 %v366_v15, %v358_v14  ;;  %v305_v35 = vld [vmem:[#allocation5 + $0x1d8] sm:$0xff]  ;;  %v296_v38 = vld [vmem:[#allocation5 + $0x190] sm:$0xff]  ;;  %v251_v2 = vld [vmem:[#allocation5 + $0x28] sm:$0xff] }
  0xa7   :  { %v7904_v37 = vpack.c.bf16 %v305_v35, %v297_v34  ;;  %v304_v39 = vld [vmem:[#allocation5 + $0x1d0] sm:$0xff]  ;;  %v313_v40 = vld [vmem:[#allocation5 + $0x218] sm:$0xff]  ;;  %v258_v10 = vld [vmem:[#allocation5 + $0x60] sm:$0xff] }
  0xa8   :  { %v321_v41 = vld [vmem:[#allocation5 + $0x258] sm:$0xff]  ;;  %v7906_v42 = vpack.c.bf16 %v304_v39, %v296_v38  ;;  %v312_v44 = vld [vmem:[#allocation5 + $0x210] sm:$0xff]  ;;  %v275_v14 = vld [vmem:[#allocation5 + $0xe8] sm:$0xff] }
  0xa9   :  { %7853 = vmatpush3.bf16.msra.mxu0 %v7852_v47  ;;  %7879 = vmatpush1.bf16.msra.mxu1 %v7878_v55  ;;  %v7908_v43 = vpack.c.bf16 %v321_v41, %v313_v40  ;;  %v320_v45 = vld [vmem:[#allocation5 + $0x250] sm:$0xff]  ;;  %v329_v46 = vld [vmem:[#allocation5 + $0x298] sm:$0xff]  ;;  %v274_v20 = vld [vmem:[#allocation5 + $0xe0] sm:$0xff] }
  0xaa   :  { %7854 = vmatprep.subr.bf16.mxu0 %v11086_v1  ;;  %7881 = vmatprep.subr.bf16.mxu1 %v7880_v58  ;;  %v337_v47 = vld [vmem:[#allocation5 + $0x2d8] sm:$0xff]  ;;  %v7910_v48 = vpack.c.bf16 %v320_v45, %v312_v44  ;;  %v328_v50 = vld [vmem:[#allocation5 + $0x290] sm:$0xff]  ;;  %v283_v25 = vld [vmem:[#allocation5 + $0x128] sm:$0xff] }
  0xab   :  { %v7912_v49 = vpack.c.bf16 %v337_v47, %v329_v46  ;;  %v336_v51 = vld [vmem:[#allocation5 + $0x2d0] sm:$0xff]  ;;  %v345_v52 = vld [vmem:[#allocation5 + $0x318] sm:$0xff]  ;;  %v291_v27 = vld [vmem:[#allocation5 + $0x168] sm:$0xff] }
  0xac   :  { %v353_v53 = vld [vmem:[#allocation5 + $0x358] sm:$0xff]  ;;  %v7914_v54 = vpack.c.bf16 %v336_v51, %v328_v50  ;;  %v352_v57 = vld [vmem:[#allocation5 + $0x350] sm:$0xff]  ;;  %v282_v33 = vld [vmem:[#allocation5 + $0x120] sm:$0xff]  ;;  %v7932_v35 = vpack.c.bf16 %v291_v27, %v283_v25 }
  0xad   :  { %7856 = vmatpush3.bf16.msra.mxu0 %v7855_v56  ;;  %7883 = vmatpush1.bf16.msra.mxu1 %v7882_v3  ;;  %v7916_v55 = vpack.c.bf16 %v353_v53, %v345_v52  ;;  %v344_v56 = vld [vmem:[#allocation5 + $0x310] sm:$0xff]  ;;  %v361_v58 = vld [vmem:[#allocation5 + $0x398] sm:$0xff]  ;;  %v259_v3 = vld [vmem:[#allocation5 + $0x68] sm:$0xff] }
  0xae   :  { %7857 = vmatprep.subr.bf16.mxu0 %v11086_v1  ;;  %7885 = vmatprep.subr.bf16.mxu1 %v7884_v5  ;;  %v153_v1 = vand.u32 127, %v13171_v17  ;;  %v369_v59 = vld [vmem:[#allocation5 + $0x3d8] sm:$0xff]  ;;  %v7918_v60 = vpack.c.bf16 %v352_v57, %v344_v56  ;;  %v360_v62 = vld [vmem:[#allocation5 + $0x390] sm:$0xff]  ;;  %v7924_v5 = vpack.c.bf16 %v259_v3, %v251_v2  ;;  %v290_v34 = vld [vmem:[#allocation5 + $0x160] sm:$0xff] }
  0xaf   :  { %v7920_v61 = vpack.c.bf16 %v369_v59, %v361_v58  ;;  %v368_v63 = vld [vmem:[#allocation5 + $0x3d0] sm:$0xff]  ;;  %v261_v6 = vld [vmem:[#allocation5 + $0x78] sm:$0xff]  ;;  %v299_v39 = vld [vmem:[#allocation5 + $0x1a8] sm:$0xff] }
  0xb0   :  { %v7922_v0 = vpack.c.bf16 %v368_v63, %v360_v62  ;;  %v252_v11 = vld [vmem:[#allocation5 + $0x30] sm:$0xff]  ;;  %v269_v15 = vld [vmem:[#allocation5 + $0xb8] sm:$0xff]  ;;  %v307_v40 = vld [vmem:[#allocation5 + $0x1e8] sm:$0xff] }
  0xb1   :  { %7859 = vmatpush3.bf16.msra.mxu0 %v7858_v4  ;;  %7887 = vmatpush1.bf16.msra.mxu1 %v7886_v12  ;;  %v253_v4 = vld [vmem:[#allocation5 + $0x38] sm:$0xff]  ;;  %v260_v12 = vld [vmem:[#allocation5 + $0x70] sm:$0xff]  ;;  %v298_v45 = vld [vmem:[#allocation5 + $0x1a0] sm:$0xff]  ;;  %v7936_v47 = vpack.c.bf16 %v307_v40, %v299_v39 }
  0xb2   :  { %7893 = vmatprep.subr.bf16.mxu0 %v7892_v9  ;;  %7889 = vmatprep.subr.bf16.mxu1 %v7888_v13  ;;  %v7956_v7 = vpack.c.bf16 %v261_v6, %v253_v4  ;;  %v250_v9 = vld [vmem:[#allocation5 + $0x20] sm:$0xff]  ;;  %v267_v13 = vld [vmem:[#allocation5 + $0xa8] sm:$0xff]  ;;  %v7958_v19 = vpack.c.bf16 %v260_v12, %v252_v11  ;;  %v285_v28 = vld [vmem:[#allocation5 + $0x138] sm:$0xff] }
  0xb3   :  { %v7926_v18 = vpack.c.bf16 %v258_v10, %v250_v9  ;;  %v7928_v21 = vpack.c.bf16 %v275_v14, %v267_v13  ;;  %v292_v38 = vld [vmem:[#allocation5 + $0x170] sm:$0xff]  ;;  %v301_v41 = vld [vmem:[#allocation5 + $0x1b8] sm:$0xff]  ;;  %v306_v46 = vld [vmem:[#allocation5 + $0x1e0] sm:$0xff] }
  0xb4   :  { %v308_v50 = vld [vmem:[#allocation5 + $0x1f0] sm:$0xff]  ;;  %v315_v51 = vld [vmem:[#allocation5 + $0x228] sm:$0xff]  ;;  %v317_v53 = vld [vmem:[#allocation5 + $0x238] sm:$0xff] }
  0xb5   :  { %7891 = vmatpush1.bf16.msra.mxu1 %v7890_v16  ;;  %v277_v16 = vld [vmem:[#allocation5 + $0xf8] sm:$0xff]  ;;  %v323_v52 = vld [vmem:[#allocation5 + $0x268] sm:$0xff]  ;;  %v314_v57 = vld [vmem:[#allocation5 + $0x220] sm:$0xff] }
  0xb6   :  { %7925 = vmatprep.subr.bf16.mxu1 %v7924_v5  ;;  %v322_v58 = vld [vmem:[#allocation5 + $0x260] sm:$0xff]  ;;  %v7940_v59 = vpack.c.bf16 %v323_v52, %v315_v51  ;;  %v324_v62 = vld [vmem:[#allocation5 + $0x270] sm:$0xff]  ;;  %v331_v63 = vld [vmem:[#allocation5 + $0x2a8] sm:$0xff] }
  0xb7   :  { %v333_v2 = vld [vmem:[#allocation5 + $0x2b8] sm:$0xff]  ;;  %v7942_v4 = vpack.c.bf16 %v322_v58, %v314_v57  ;;  %v330_v6 = vld [vmem:[#allocation5 + $0x2a0] sm:$0xff]  ;;  %v332_v11 = vld [vmem:[#allocation5 + $0x2b0] sm:$0xff] }
  0xb8   :  { %v341_v3 = vld [vmem:[#allocation5 + $0x2f8] sm:$0xff]  ;;  %v340_v12 = vld [vmem:[#allocation5 + $0x2f0] sm:$0xff]  ;;  %v347_v13 = vld [vmem:[#allocation5 + $0x328] sm:$0xff] }
  0xb9   :  { %v7976_v10 = vpack.c.bf16 %v341_v3, %v333_v2  ;;  %v355_v14 = vld [vmem:[#allocation5 + $0x368] sm:$0xff]  ;;  %v703_v40 = vld [vmem:[#allocation7 + $0x18] sm:$0xff]  ;;  %v712_v57 = vld [vmem:[#allocation7 + $0x60] sm:$0xff] }
  0xba   :  { %v363_v25 = vld [vmem:[#allocation5 + $0x3a8] sm:$0xff]  ;;  %v711_v52 = vld [vmem:[#allocation7 + $0x58] sm:$0xff] }
  0xbb   :  { %v371_v27 = vld [vmem:[#allocation5 + $0x3e8] sm:$0xff]  ;;  %v723_v2 = vld [vmem:[#allocation7 + $0xb8] sm:$0xff] }
  0xbc   :  { %v705_v39 = vld [vmem:[#allocation7 + $0x28] sm:$0xff] }
  0xbd   :  { %v713_v51 = vld [vmem:[#allocation7 + $0x68] sm:$0xff] }
  0xbe   :  { %v975_v17 = vld [vmem:[#allocation8 + $0x148] sm:$0xff] }
 0x112   :  { %v156_v23 = vpop.permute.xlu0 %155 }
 0x113   :  { %vm157_vm1 = vcmp.eq.s32.totalorder %v156_v23, %v153_v1  ;;  %v266_v1 = vld [vmem:[#allocation5 + $0xa0] sm:$0xff]  ;;  %v268_v23 = vld [vmem:[#allocation5 + $0xb0] sm:$0xff] }
 0x114   :  { %7834 = vmatmul.mubr.msk.f32.vlgmr.msra.gmra.mrb[0].mxu0 %vm157_vm1, %v11089_v29  ;;  %v293_v29 = vld [vmem:[#allocation5 + $0x178] sm:$0xff] }
 0x115   :  { %7895 = vmatpush1.bf16.msra.mxu0 %v7894_v22  ;;  %551 = vmatprep.mubr.f32.mxu0 %v13172_v8  ;;  %v7960_v22 = vpack.c.bf16 %v277_v16, %v269_v15  ;;  %v349_v15 = vld [vmem:[#allocation5 + $0x338] sm:$0xff] }
 0x116   :  { %7897 = vmatprep.subr.bf16.mxu0 %v7896_v24  ;;  %v276_v24 = vld [vmem:[#allocation5 + $0xf0] sm:$0xff]  ;;  %v357_v16 = vld [vmem:[#allocation5 + $0x378] sm:$0xff] }
 0x117   :  { %v7962_v32 = vpack.c.bf16 %v276_v24, %v268_v23  ;;  %v348_v23 = vld [vmem:[#allocation5 + $0x330] sm:$0xff] }
 0x118   :  { %v356_v24 = vld [vmem:[#allocation5 + $0x370] sm:$0xff] }
 0x119   :  { %7899 = vmatpush1.bf16.msra.mxu0 %v7898_v30 }
 0x11a   :  { %7901 = vmatprep.subr.bf16.mxu0 %v7900_v31  ;;  %v7930_v31 = vpack.c.bf16 %v274_v20, %v266_v1  ;;  %v346_v1 = vld [vmem:[#allocation5 + $0x320] sm:$0xff] }
 0x11b   :  { %v354_v20 = vld [vmem:[#allocation5 + $0x360] sm:$0xff] }
 0x11d   :  { %7903 = vmatpush1.bf16.msra.mxu0 %v7902_v36  ;;  %v7964_v36 = vpack.c.bf16 %v293_v29, %v285_v28  ;;  %v365_v28 = vld [vmem:[#allocation5 + $0x3b8] sm:$0xff] }
 0x11e   :  { %7905 = vmatprep.subr.bf16.mxu0 %v7904_v37  ;;  %v284_v37 = vld [vmem:[#allocation5 + $0x130] sm:$0xff]  ;;  %v373_v29 = vld [vmem:[#allocation5 + $0x3f8] sm:$0xff] }
 0x11f   :  { %v7966_v44 = vpack.c.bf16 %v292_v38, %v284_v37  ;;  %v372_v37 = vld [vmem:[#allocation5 + $0x3f0] sm:$0xff]  ;;  %v701_v38 = vld [vmem:[#allocation7 + $0x8] sm:$0xff] }
 0x121   :  { %7907 = vmatpush1.bf16.msra.mxu0 %v7906_v42  ;;  %v309_v42 = vld [vmem:[#allocation5 + $0x1f8] sm:$0xff] }
 0x122   :  { %7909 = vmatprep.subr.bf16.mxu0 %v7908_v43  ;;  %v7934_v43 = vpack.c.bf16 %v290_v34, %v282_v33  ;;  %v370_v33 = vld [vmem:[#allocation5 + $0x3e0] sm:$0xff]  ;;  %v7952_v34 = vpack.c.bf16 %v371_v27, %v363_v25  ;;  %v735_v25 = vld [vmem:[#allocation7 + $0x118] sm:$0xff] }
 0x123   :  { %v739_v27 = vld [vmem:[#allocation7 + $0x138] sm:$0xff] }
 0x125   :  { %7911 = vmatpush1.bf16.msra.mxu0 %v7910_v48  ;;  %v7968_v48 = vpack.c.bf16 %v309_v42, %v301_v41  ;;  %v707_v41 = vld [vmem:[#allocation7 + $0x38] sm:$0xff] }
 0x126   :  { %7913 = vmatprep.subr.bf16.mxu0 %v7912_v49  ;;  %v300_v49 = vld [vmem:[#allocation5 + $0x1b0] sm:$0xff] }
 0x127   :  { %v7970_v56 = vpack.c.bf16 %v308_v50, %v300_v49  ;;  %v706_v49 = vld [vmem:[#allocation7 + $0x30] sm:$0xff]  ;;  %v709_v50 = vld [vmem:[#allocation7 + $0x48] sm:$0xff] }
 0x128   :  { %v11321_v58 = vpack.c.bf16 %v713_v51, %v709_v50  ;;  %v749_v50 = vld [vmem:[#allocation7 + $0x188] sm:$0xff] }
 0x129   :  { %7915 = vmatpush1.bf16.msra.mxu0 %v7914_v54  ;;  %v325_v54 = vld [vmem:[#allocation5 + $0x278] sm:$0xff]  ;;  %v753_v51 = vld [vmem:[#allocation7 + $0x1a8] sm:$0xff] }
 0x12a   :  { %7917 = vmatprep.subr.bf16.mxu0 %v7916_v55  ;;  %v7938_v55 = vpack.c.bf16 %v306_v46, %v298_v45  ;;  %v704_v45 = vld [vmem:[#allocation7 + $0x20] sm:$0xff]  ;;  %v11311_v46 = vpack.c.bf16 %v705_v39, %v701_v38  ;;  %v743_v38 = vld [vmem:[#allocation7 + $0x158] sm:$0xff] }
 0x12b   :  { %v747_v39 = vld [vmem:[#allocation7 + $0x178] sm:$0xff] }
 0x12d   :  { %7919 = vmatpush1.bf16.msra.mxu0 %v7918_v60  ;;  %v7972_v60 = vpack.c.bf16 %v325_v54, %v317_v53  ;;  %v715_v53 = vld [vmem:[#allocation7 + $0x78] sm:$0xff] }
 0x12e   :  { %7921 = vmatprep.subr.bf16.mxu0 %v7920_v61  ;;  %v316_v61 = vld [vmem:[#allocation5 + $0x230] sm:$0xff] }
 0x12f   :  { %v7974_v5 = vpack.c.bf16 %v324_v62, %v316_v61  ;;  %v714_v61 = vld [vmem:[#allocation7 + $0x70] sm:$0xff]  ;;  %v717_v62 = vld [vmem:[#allocation7 + $0x88] sm:$0xff] }
 0x131   :  { %7923 = vmatpush1.bf16.msra.mxu0 %v7922_v0  ;;  %v339_v0 = vld [vmem:[#allocation5 + $0x2e8] sm:$0xff] }
 0x132   :  { %7957 = vmatprep.subr.bf16.mxu0 %v7956_v7  ;;  %v338_v7 = vld [vmem:[#allocation5 + $0x2e0] sm:$0xff]  ;;  %v7944_v9 = vpack.c.bf16 %v339_v0, %v331_v63  ;;  %v721_v63 = vld [vmem:[#allocation7 + $0xa8] sm:$0xff]  ;;  %v719_v0 = vld [vmem:[#allocation7 + $0x98] sm:$0xff] }
 0x1e7   :  { %v11305_v26 = vpop.f32.mrb[0].mxu0 }
 0x1e8   :  { %v7835_v30 = vpop.f32.mrb[1].mxu0  ;;  %481 = vmatmul.mubr.f32.vlgmr.msra.gmra.mrb[0].mxu1 %v11305_v26  ;;  %552 = vmatmul.mubr.f32.vlgmr.msra.gmra.mrb[2].mxu0 %v11305_v26 }
 0x1e9   :  { %7927 = vmatpush1.bf16.msra.mxu1 %v7926_v18  ;;  %7959 = vmatpush1.bf16.msra.mxu0 %v7958_v19  ;;  %v7946_v18 = vpack.c.bf16 %v338_v7, %v330_v6  ;;  %v7978_v19 = vpack.c.bf16 %v340_v12, %v332_v11  ;;  %v7950_v30 = vpack.c.bf16 %v354_v20, %v346_v1  ;;  %v720_v6 = vld [vmem:[#allocation7 + $0xa0] sm:$0xff]  ;;  %v725_v11 = vld [vmem:[#allocation7 + $0xc8] sm:$0xff] }
 0x1ea   :  { %7929 = vmatprep.subr.bf16.mxu1 %v7928_v21  ;;  %7961 = vmatprep.subr.bf16.mxu0 %v7960_v22  ;;  %v7948_v21 = vpack.c.bf16 %v355_v14, %v347_v13  ;;  %v7980_v22 = vpack.c.bf16 %v357_v16, %v349_v15  ;;  %v11335_v7 = vpack.c.bf16 %v721_v63, %v717_v62  ;;  %v729_v12 = vld [vmem:[#allocation7 + $0xe8] sm:$0xff]  ;;  %v727_v13 = vld [vmem:[#allocation7 + $0xd8] sm:$0xff] }
 0x1eb   :  { %622 = vmatprep.mubr.f32.mxu1 %v13172_v8  ;;  %693 = vmatprep.mubr.f32.mxu0 %v13172_v8  ;;  %v731_v14 = vld [vmem:[#allocation7 + $0xf8] sm:$0xff]  ;;  %v11349_v1 = vpack.c.bf16 %v729_v12, %v725_v11  ;;  %v11385_v62 = vpack.c.bf16 %v753_v51, %v749_v50 }
 0x1ec   :  { %13373 = vst [vmem:[#allocation26_spill] sm:$0xff] %v11335_v7  ;;  %v11351_v20 = vpack.c.bf16 %v731_v14, %v727_v13  ;;  %v756_v13 = vld [vmem:[#allocation7 + $0x1c0] sm:$0xff] }
 0x1ed   :  { %7931 = vmatpush1.bf16.msra.mxu1 %v7930_v31  ;;  %7963 = vmatpush1.bf16.msra.mxu0 %v7962_v32  ;;  %v7982_v31 = vpack.c.bf16 %v356_v24, %v348_v23  ;;  %v362_v32 = vld [vmem:[#allocation5 + $0x3a0] sm:$0xff]  ;;  %13377 = vst [vmem:[#allocation30_spill] sm:$0xff] %v11349_v1  ;;  %v733_v23 = vld [vmem:[#allocation7 + $0x108] sm:$0xff]  ;;  %13389 = vst [vmem:[#allocation42_spill] sm:$0xff] %v11385_v62 }
 0x1ee   :  { %7933 = vmatprep.subr.bf16.mxu1 %v7932_v35  ;;  %7965 = vmatprep.subr.bf16.mxu0 %v7964_v36  ;;  %v7984_v35 = vpack.c.bf16 %v373_v29, %v365_v28  ;;  %v364_v36 = vld [vmem:[#allocation5 + $0x3b0] sm:$0xff]  ;;  %v7954_v42 = vpack.c.bf16 %v370_v33, %v362_v32  ;;  %13378 = vst [vmem:[#allocation31_spill] sm:$0xff] %v11351_v20  ;;  %v737_v24 = vld [vmem:[#allocation7 + $0x128] sm:$0xff]  ;;  %v760_v14 = vld [vmem:[#allocation7 + $0x1e0] sm:$0xff] }
 0x1ef   :  { %v11361_v32 = vpack.c.bf16 %v737_v24, %v733_v23  ;;  %v11363_v33 = vpack.c.bf16 %v739_v27, %v735_v25  ;;  %v935_v23 = vld [vmem:[#allocation8 + $0x8] sm:$0xff]  ;;  %v937_v25 = vld [vmem:[#allocation8 + $0x18] sm:$0xff] }
 0x1f0   :  { %v939_v24 = vld [vmem:[#allocation8 + $0x28] sm:$0xff]  ;;  %v941_v27 = vld [vmem:[#allocation8 + $0x38] sm:$0xff] }
 0x1f1   :  { %7935 = vmatpush1.bf16.msra.mxu1 %v7934_v43  ;;  %7967 = vmatpush1.bf16.msra.mxu0 %v7966_v44  ;;  %v7986_v43 = vpack.c.bf16 %v372_v37, %v364_v36  ;;  %v700_v44 = vld [vmem:[#allocation7] sm:$0xff]  ;;  %13381 = vst [vmem:[#allocation34_spill] sm:$0xff] %v11361_v32  ;;  %13382 = vst [vmem:[#allocation35_spill] sm:$0xff] %v11363_v33  ;;  %v741_v36 = vld [vmem:[#allocation7 + $0x148] sm:$0xff] }
 0x1f2   :  { %7937 = vmatprep.subr.bf16.mxu1 %v7936_v47  ;;  %7969 = vmatprep.subr.bf16.mxu0 %v7968_v48  ;;  %v11313_v47 = vpack.c.bf16 %v707_v41, %v703_v40  ;;  %v702_v48 = vld [vmem:[#allocation7 + $0x10] sm:$0xff]  ;;  %v11315_v54 = vpack.c.bf16 %v704_v45, %v700_v44  ;;  %v745_v37 = vld [vmem:[#allocation7 + $0x168] sm:$0xff]  ;;  %v11375_v45 = vpack.c.bf16 %v747_v39, %v743_v38 }
 0x1f3   :  { %v11373_v44 = vpack.c.bf16 %v745_v37, %v741_v36  ;;  %v11409_v36 = vpack.c.bf16 %v939_v24, %v935_v23  ;;  %v11411_v37 = vpack.c.bf16 %v941_v27, %v937_v25  ;;  %v936_v38 = vld [vmem:[#allocation8 + $0x10] sm:$0xff] }
 0x1f4   :  { %13386 = vst [vmem:[#allocation39_spill] sm:$0xff] %v11375_v45  ;;  %v940_v39 = vld [vmem:[#allocation8 + $0x30] sm:$0xff] }
 0x1f5   :  { %7939 = vmatpush1.bf16.msra.mxu1 %v7938_v55  ;;  %7971 = vmatpush1.bf16.msra.mxu0 %v7970_v56  ;;  %v11317_v55 = vpack.c.bf16 %v706_v49, %v702_v48  ;;  %v708_v56 = vld [vmem:[#allocation7 + $0x40] sm:$0xff]  ;;  %13385 = vst [vmem:[#allocation38_spill] sm:$0xff] %v11373_v44  ;;  %v742_v48 = vld [vmem:[#allocation7 + $0x150] sm:$0xff]  ;;  %13397 = vst [vmem:[#allocation50_spill] sm:$0xff] %v11409_v36  ;;  %v11417_v51 = vpack.c.bf16 %v940_v39, %v936_v38 }
 0x1f6   :  { %7941 = vmatprep.subr.bf16.mxu1 %v7940_v59  ;;  %7973 = vmatprep.subr.bf16.mxu0 %v7972_v60  ;;  %v11323_v59 = vpack.c.bf16 %v715_v53, %v711_v52  ;;  %v710_v60 = vld [vmem:[#allocation7 + $0x50] sm:$0xff]  ;;  %v11329_v3 = vpack.c.bf16 %v712_v57, %v708_v56  ;;  %v751_v52 = vld [vmem:[#allocation7 + $0x198] sm:$0xff]  ;;  %13398 = vst [vmem:[#allocation51_spill] sm:$0xff] %v11411_v37 }
 0x1f7   :  { %v746_v49 = vld [vmem:[#allocation7 + $0x170] sm:$0xff]  ;;  %v755_v53 = vld [vmem:[#allocation7 + $0x1b8] sm:$0xff] }
 0x1f8   :  { %13370 = vst [vmem:[#allocation23_spill] sm:$0xff] %v11323_v59  ;;  %13371 = vst [vmem:[#allocation24_spill] sm:$0xff] %v11329_v3  ;;  %v11381_v57 = vpack.c.bf16 %v746_v49, %v742_v48  ;;  %v11387_v63 = vpack.c.bf16 %v755_v53, %v751_v52  ;;  %v945_v48 = vld [vmem:[#allocation8 + $0x58] sm:$0xff]  ;;  %v942_v52 = vld [vmem:[#allocation8 + $0x40] sm:$0xff] }
 0x1f9   :  { %7943 = vmatpush1.bf16.msra.mxu1 %v7942_v4  ;;  %7975 = vmatpush1.bf16.msra.mxu0 %v7974_v5  ;;  %v11331_v4 = vpack.c.bf16 %v714_v61, %v710_v60  ;;  %v716_v5 = vld [vmem:[#allocation7 + $0x80] sm:$0xff]  ;;  %v949_v49 = vld [vmem:[#allocation8 + $0x78] sm:$0xff]  ;;  %v952_v25 = vld [vmem:[#allocation8 + $0x90] sm:$0xff] }
 0x1fa   :  { %7945 = vmatprep.subr.bf16.mxu1 %v7944_v9  ;;  %7977 = vmatprep.subr.bf16.mxu0 %v7976_v10  ;;  %v11337_v9 = vpack.c.bf16 %v723_v2, %v719_v0  ;;  %v718_v10 = vld [vmem:[#allocation7 + $0x90] sm:$0xff]  ;;  %v11343_v15 = vpack.c.bf16 %v720_v6, %v716_v5  ;;  %13388 = vst [vmem:[#allocation41_spill] sm:$0xff] %v11381_v57  ;;  %v748_v60 = vld [vmem:[#allocation7 + $0x180] sm:$0xff]  ;;  %13390 = vst [vmem:[#allocation43_spill] sm:$0xff] %v11387_v63 }
 0x1fb   :  { %13372 = vst [vmem:[#allocation25_spill] sm:$0xff] %v11331_v4  ;;  %v752_v61 = vld [vmem:[#allocation7 + $0x1a0] sm:$0xff]  ;;  %v750_v0 = vld [vmem:[#allocation7 + $0x190] sm:$0xff]  ;;  %v757_v5 = vld [vmem:[#allocation7 + $0x1c8] sm:$0xff] }
 0x1fc   :  { %13374 = vst [vmem:[#allocation27_spill] sm:$0xff] %v11337_v9  ;;  %13375 = vst [vmem:[#allocation28_spill] sm:$0xff] %v11343_v15  ;;  %v754_v2 = vld [vmem:[#allocation7 + $0x1b0] sm:$0xff]  ;;  %v761_v6 = vld [vmem:[#allocation7 + $0x1e8] sm:$0xff]  ;;  %v11391_v11 = vpack.c.bf16 %v752_v61, %v748_v60  ;;  %v11423_v61 = vpack.c.bf16 %v949_v49, %v945_v48 }
 0x1fd   :  { %7947 = vmatpush1.bf16.msra.mxu1 %v7946_v18  ;;  %7979 = vmatpush1.bf16.msra.mxu0 %v7978_v19  ;;  %v724_v18 = vld [vmem:[#allocation7 + $0xc0] sm:$0xff]  ;;  %v11393_v12 = vpack.c.bf16 %v754_v2, %v750_v0  ;;  %v944_v0 = vld [vmem:[#allocation8 + $0x50] sm:$0xff]  ;;  %v961_v38 = vld [vmem:[#allocation8 + $0xd8] sm:$0xff] }
 0x1fe   :  { %7949 = vmatprep.subr.bf16.mxu1 %v7948_v21  ;;  %7981 = vmatprep.subr.bf16.mxu0 %v7980_v22  ;;  %v728_v19 = vld [vmem:[#allocation7 + $0xe0] sm:$0xff]  ;;  %v726_v21 = vld [vmem:[#allocation7 + $0xd0] sm:$0xff]  ;;  %13391 = vst [vmem:[#allocation44_spill] sm:$0xff] %v11391_v11  ;;  %v965_v39 = vld [vmem:[#allocation8 + $0xf8] sm:$0xff] }
 0x1ff   :  { %v730_v22 = vld [vmem:[#allocation7 + $0xf0] sm:$0xff]  ;;  %v11355_v28 = vpack.c.bf16 %v728_v19, %v724_v18  ;;  %13392 = vst [vmem:[#allocation45_spill] sm:$0xff] %v11393_v12  ;;  %v11397_v18 = vpack.c.bf16 %v761_v6, %v757_v5  ;;  %v946_v53 = vld [vmem:[#allocation8 + $0x60] sm:$0xff]  ;;  %v951_v5 = vld [vmem:[#allocation8 + $0x88] sm:$0xff] }
 0x200   :  { %v11357_v29 = vpack.c.bf16 %v730_v22, %v726_v21  ;;  %v758_v21 = vld [vmem:[#allocation7 + $0x1d0] sm:$0xff]  ;;  %v955_v6 = vld [vmem:[#allocation8 + $0xa8] sm:$0xff]  ;;  %v958_v48 = vld [vmem:[#allocation8 + $0xc0] sm:$0xff] }
 0x201   :  { %7951 = vmatpush1.bf16.msra.mxu1 %v7950_v30  ;;  %7983 = vmatpush1.bf16.msra.mxu0 %v7982_v31  ;;  %13379 = vst [vmem:[#allocation32_spill] sm:$0xff] %v11355_v28  ;;  %v732_v30 = vld [vmem:[#allocation7 + $0x100] sm:$0xff]  ;;  %13393 = vst [vmem:[#allocation46_spill] sm:$0xff] %v11397_v18  ;;  %v762_v22 = vld [vmem:[#allocation7 + $0x1f0] sm:$0xff]  ;;  %v11435_v23 = vpack.c.bf16 %v955_v6, %v951_v5 }
 0x202   :  { %7953 = vmatprep.subr.bf16.mxu1 %v7952_v34  ;;  %7985 = vmatprep.subr.bf16.mxu0 %v7984_v35  ;;  %13380 = vst [vmem:[#allocation33_spill] sm:$0xff] %v11357_v29  ;;  %v736_v31 = vld [vmem:[#allocation7 + $0x120] sm:$0xff]  ;;  %v734_v34 = vld [vmem:[#allocation7 + $0x110] sm:$0xff]  ;;  %v967_v5 = vld [vmem:[#allocation8 + $0x108] sm:$0xff] }
 0x203   :  { %v738_v35 = vld [vmem:[#allocation7 + $0x130] sm:$0xff]  ;;  %v11367_v40 = vpack.c.bf16 %v736_v31, %v732_v30  ;;  %v11403_v30 = vpack.c.bf16 %v760_v14, %v756_v13  ;;  %v11405_v31 = vpack.c.bf16 %v762_v22, %v758_v21  ;;  %v11429_v13 = vpack.c.bf16 %v946_v53, %v942_v52  ;;  %v950_v21 = vld [vmem:[#allocation8 + $0x80] sm:$0xff]  ;;  %v971_v6 = vld [vmem:[#allocation8 + $0x128] sm:$0xff] }
 0x204   :  { %v11369_v41 = vpack.c.bf16 %v738_v35, %v734_v34  ;;  %v934_v34 = vld [vmem:[#allocation8] sm:$0xff]  ;;  %v948_v2 = vld [vmem:[#allocation8 + $0x70] sm:$0xff]  ;;  %v11451_v53 = vpack.c.bf16 %v965_v39, %v961_v38 }
 0x205   :  { %7955 = vmatpush1.bf16.msra.mxu1 %v7954_v42  ;;  %7987 = vmatpush1.bf16.msra.mxu0 %v7986_v43  ;;  %13383 = vst [vmem:[#allocation36_spill] sm:$0xff] %v11367_v40  ;;  %v740_v42 = vld [vmem:[#allocation7 + $0x140] sm:$0xff]  ;;  %13395 = vst [vmem:[#allocation48_spill] sm:$0xff] %v11403_v30  ;;  %v11431_v14 = vpack.c.bf16 %v948_v2, %v944_v0  ;;  %v956_v27 = vld [vmem:[#allocation8 + $0xb0] sm:$0xff] }
 0x206   :  { %7989 = vmatprep.subr.bf16.mxu1 %v11311_v46  ;;  %8021 = vmatprep.subr.bf16.mxu0 %v11313_v47  ;;  %13384 = vst [vmem:[#allocation37_spill] sm:$0xff] %v11369_v41  ;;  %v744_v43 = vld [vmem:[#allocation7 + $0x160] sm:$0xff]  ;;  %13396 = vst [vmem:[#allocation49_spill] sm:$0xff] %v11405_v31  ;;  %v960_v0 = vld [vmem:[#allocation8 + $0xd0] sm:$0xff] }
 0x207   :  { %v11379_v56 = vpack.c.bf16 %v744_v43, %v740_v42  ;;  %v938_v35 = vld [vmem:[#allocation8 + $0x20] sm:$0xff]  ;;  %v943_v42 = vld [vmem:[#allocation8 + $0x48] sm:$0xff]  ;;  %13402 = vst [vmem:[#allocation55_spill] sm:$0xff] %v11451_v53  ;;  %v964_v2 = vld [vmem:[#allocation8 + $0xf0] sm:$0xff] }
 0x208   :  { %623 = vmatmul.mubr.f32.vlgmr.msra.gmra.mrb[2].mxu1 %v11305_v26  ;;  %694 = vmatmul.mubr.f32.vlgmr.msra.gmra.mrb[4].mxu0 %v11305_v26  ;;  %v722_v26 = vld [vmem:[#allocation7 + $0xb0] sm:$0xff]  ;;  %v947_v43 = vld [vmem:[#allocation8 + $0x68] sm:$0xff]  ;;  %v11415_v50 = vpack.c.bf16 %v938_v35, %v934_v34  ;;  %v954_v22 = vld [vmem:[#allocation8 + $0xa0] sm:$0xff] }
 0x209   :  { %7991 = vmatpush1.bf16.msra.mxu1 %v11315_v54  ;;  %8023 = vmatpush1.bf16.msra.mxu0 %v11317_v55  ;;  %v11345_v16 = vpack.c.bf16 %v722_v26, %v718_v10  ;;  %13387 = vst [vmem:[#allocation40_spill] sm:$0xff] %v11379_v56  ;;  %v759_v10 = vld [vmem:[#allocation7 + $0x1d8] sm:$0xff]  ;;  %v11421_v60 = vpack.c.bf16 %v947_v43, %v943_v42  ;;  %v959_v34 = vld [vmem:[#allocation8 + $0xc8] sm:$0xff]  ;;  %v962_v49 = vld [vmem:[#allocation8 + $0xe0] sm:$0xff] }
 0x20a   :  { %7993 = vmatprep.subr.bf16.mxu1 %v11321_v58  ;;  %8025 = vmatprep.subr.bf16.mxu0 %v11323_v59  ;;  %v763_v26 = vld [vmem:[#allocation7 + $0x1f8] sm:$0xff]  ;;  %v963_v35 = vld [vmem:[#allocation8 + $0xe8] sm:$0xff]  ;;  %v11443_v42 = vpack.c.bf16 %v954_v22, %v950_v21  ;;  %v11445_v43 = vpack.c.bf16 %v956_v27, %v952_v25  ;;  %v11455_v21 = vpack.c.bf16 %v962_v49, %v958_v48  ;;  %v966_v25 = vld [vmem:[#allocation8 + $0x100] sm:$0xff] }
 0x20b   :  { %828 = vmatprep.mubr.f32.mxu1 %v13172_v8  ;;  %899 = vmatprep.mubr.f32.mxu0 %v13172_v8  ;;  %13376 = vst [vmem:[#allocation29_spill] sm:$0xff] %v11345_v16  ;;  %v11399_v19 = vpack.c.bf16 %v763_v26, %v759_v10  ;;  %v953_v10 = vld [vmem:[#allocation8 + $0x98] sm:$0xff]  ;;  %v11449_v52 = vpack.c.bf16 %v963_v35, %v959_v34  ;;  %v970_v27 = vld [vmem:[#allocation8 + $0x120] sm:$0xff]  ;;  %v968_v38 = vld [vmem:[#allocation8 + $0x110] sm:$0xff] }
 0x20c   :  { %v957_v26 = vld [vmem:[#allocation8 + $0xb8] sm:$0xff]  ;;  %13399 = vst [vmem:[#allocation52_spill] sm:$0xff] %v11443_v42  ;;  %13400 = vst [vmem:[#allocation53_spill] sm:$0xff] %v11445_v43  ;;  %v11457_v22 = vpack.c.bf16 %v964_v2, %v960_v0  ;;  %v11461_v34 = vpack.c.bf16 %v971_v6, %v967_v5  ;;  %v972_v39 = vld [vmem:[#allocation8 + $0x130] sm:$0xff]  ;;  %v11467_v48 = vpack.c.bf16 %v970_v27, %v966_v25 }
 0x20d   :  { %7995 = vmatpush1.bf16.msra.mxu1 %v11329_v3  ;;  %8027 = vmatpush1.bf16.msra.mxu0 %v11331_v4  ;;  %13394 = vst [vmem:[#allocation47_spill] sm:$0xff] %v11399_v19  ;;  %v11437_v24 = vpack.c.bf16 %v957_v26, %v953_v10  ;;  %13401 = vst [vmem:[#allocation54_spill] sm:$0xff] %v11449_v52  ;;  %v969_v10 = vld [vmem:[#allocation8 + $0x118] sm:$0xff]  ;;  %v11469_v49 = vpack.c.bf16 %v972_v39, %v968_v38  ;;  %v974_v0 = vld [vmem:[#allocation8 + $0x140] sm:$0xff] }
 0x20e   :  { %7997 = vmatprep.subr.bf16.mxu1 %v11335_v7  ;;  %8029 = vmatprep.subr.bf16.mxu0 %v11337_v9  ;;  %v973_v26 = vld [vmem:[#allocation8 + $0x138] sm:$0xff]  ;;  %13403 = vst [vmem:[#allocation56_spill] sm:$0xff] %v11455_v21  ;;  %13404 = vst [vmem:[#allocation57_spill] sm:$0xff] %v11457_v22  ;;  %v978_v2 = vld [vmem:[#allocation8 + $0x160] sm:$0xff] }
 0x20f   :  { %13405 = vst [vmem:[#allocation58_spill] sm:$0xff] %v11461_v34  ;;  %v11463_v35 = vpack.c.bf16 %v973_v26, %v969_v10  ;;  %13407 = vst [vmem:[#allocation60_spill] sm:$0xff] %v11467_v48  ;;  %v976_v10 = vld [vmem:[#allocation8 + $0x150] sm:$0xff]  ;;  %v11479_v25 = vpack.c.bf16 %v978_v2, %v974_v0  ;;  %v982_v38 = vld [vmem:[#allocation8 + $0x180] sm:$0xff] }
 0x210   :  { %13408 = vst [vmem:[#allocation61_spill] sm:$0xff] %v11469_v49  ;;  %v980_v26 = vld [vmem:[#allocation8 + $0x170] sm:$0xff]  ;;  %v986_v39 = vld [vmem:[#allocation8 + $0x1a0] sm:$0xff] }
 0x211   :  { %7999 = vmatpush1.bf16.msra.mxu1 %v11343_v15  ;;  %8031 = vmatpush1.bf16.msra.mxu0 %v11345_v16  ;;  %13406 = vst [vmem:[#allocation59_spill] sm:$0xff] %v11463_v35  ;;  %v11481_v27 = vpack.c.bf16 %v980_v26, %v976_v10  ;;  %v11491_v0 = vpack.c.bf16 %v986_v39, %v982_v38  ;;  %v990_v10 = vld [vmem:[#allocation8 + $0x1c0] sm:$0xff]  ;;  %v996_v26 = vld [vmem:[#allocation8 + $0x1f0] sm:$0xff] }
 0x212   :  { %8001 = vmatprep.subr.bf16.mxu1 %v11349_v1  ;;  %8033 = vmatprep.subr.bf16.mxu0 %v11351_v20 }
 0x215   :  { %8003 = vmatpush1.bf16.msra.mxu1 %v11355_v28  ;;  %8035 = vmatpush1.bf16.msra.mxu0 %v11357_v29 }
 0x216   :  { %8005 = vmatprep.subr.bf16.mxu1 %v11361_v32  ;;  %8037 = vmatprep.subr.bf16.mxu0 %v11363_v33 }
 0x219   :  { %8007 = vmatpush1.bf16.msra.mxu1 %v11367_v40  ;;  %8039 = vmatpush1.bf16.msra.mxu0 %v11369_v41 }
 0x21a   :  { %8009 = vmatprep.subr.bf16.mxu1 %v11373_v44  ;;  %8041 = vmatprep.subr.bf16.mxu0 %v11375_v45 }
 0x21d   :  { %8011 = vmatpush1.bf16.msra.mxu1 %v11379_v56  ;;  %8043 = vmatpush1.bf16.msra.mxu0 %v11381_v57 }
 0x21e   :  { %8013 = vmatprep.subr.bf16.mxu1 %v11385_v62  ;;  %8045 = vmatprep.subr.bf16.mxu0 %v11387_v63 }
 0x221   :  { %8015 = vmatpush1.bf16.msra.mxu1 %v11391_v11  ;;  %8047 = vmatpush1.bf16.msra.mxu0 %v11393_v12 }
 0x222   :  { %8017 = vmatprep.subr.bf16.mxu1 %v11397_v18  ;;  %8049 = vmatprep.subr.bf16.mxu0 %v11399_v19 }
 0x225   :  { %8019 = vmatpush1.bf16.msra.mxu1 %v11403_v30  ;;  %8051 = vmatpush1.bf16.msra.mxu0 %v11405_v31 }
 0x226   :  { %8053 = vmatprep.subr.bf16.mxu1 %v11409_v36  ;;  %8085 = vmatprep.subr.bf16.mxu0 %v11411_v37 }
 0x228   :  { %829 = vmatmul.mubr.f32.vlgmr.msra.gmra.mrb[4].mxu1 %v13172_v8  ;;  %900 = vmatmul.mubr.f32.vlgmr.msra.gmra.mrb[6].mxu0 %v13172_v8 }
 0x229   :  { %8055 = vmatpush1.bf16.msra.mxu1 %v11415_v50  ;;  %8087 = vmatpush1.bf16.msra.mxu0 %v11417_v51 }
 0x22a   :  { %8057 = vmatprep.subr.bf16.mxu1 %v11421_v60  ;;  %8089 = vmatprep.subr.bf16.mxu0 %v11423_v61 }
 0x22b   :  { %1062 = vmatprep.mubr.f32.mxu1 %v13172_v8  ;;  %1133 = vmatprep.mubr.f32.mxu0 %v13172_v8  ;;  %v979_v8 = vld [vmem:[#allocation8 + $0x168] sm:$0xff] }
 0x22c   :  { %v11473_v5 = vpack.c.bf16 %v979_v8, %v975_v17 }
 0x22d   :  { %8059 = vmatpush1.bf16.msra.mxu1 %v11429_v13  ;;  %8091 = vmatpush1.bf16.msra.mxu0 %v11431_v14 }
 0x22e   :  { %8061 = vmatprep.subr.bf16.mxu1 %v11435_v23  ;;  %8093 = vmatprep.subr.bf16.mxu0 %v11437_v24 }
 0x231   :  { %8063 = vmatpush1.bf16.msra.mxu1 %v11443_v42  ;;  %8095 = vmatpush1.bf16.msra.mxu0 %v11445_v43  ;;  %v977_v42 = vld [vmem:[#allocation8 + $0x158] sm:$0xff] }
 0x232   :  { %8065 = vmatprep.subr.bf16.mxu1 %v11449_v52  ;;  %8097 = vmatprep.subr.bf16.mxu0 %v11451_v53  ;;  %v981_v43 = vld [vmem:[#allocation8 + $0x178] sm:$0xff]  ;;  %v983_v53 = vld [vmem:[#allocation8 + $0x188] sm:$0xff] }
 0x233   :  { %v11475_v6 = vpack.c.bf16 %v981_v43, %v977_v42  ;;  %v985_v52 = vld [vmem:[#allocation8 + $0x198] sm:$0xff]  ;;  %v984_v42 = vld [vmem:[#allocation8 + $0x190] sm:$0xff] }
 0x234   :  { %v988_v43 = vld [vmem:[#allocation8 + $0x1b0] sm:$0xff] }
 0x235   :  { %8067 = vmatpush1.bf16.msra.mxu1 %v11455_v21  ;;  %8099 = vmatpush1.bf16.msra.mxu0 %v11457_v22  ;;  %v987_v21 = vld [vmem:[#allocation8 + $0x1a8] sm:$0xff]  ;;  %v989_v22 = vld [vmem:[#allocation8 + $0x1b8] sm:$0xff]  ;;  %v11493_v2 = vpack.c.bf16 %v988_v43, %v984_v42 }
 0x236   :  { %8069 = vmatprep.subr.bf16.mxu1 %v11461_v34  ;;  %8101 = vmatprep.subr.bf16.mxu0 %v11463_v35  ;;  %v11485_v8 = vpack.c.bf16 %v987_v21, %v983_v53  ;;  %v11487_v17 = vpack.c.bf16 %v989_v22, %v985_v52  ;;  %v991_v35 = vld [vmem:[#allocation8 + $0x1c8] sm:$0xff]  ;;  %v993_v34 = vld [vmem:[#allocation8 + $0x1d8] sm:$0xff]  ;;  %v994_v21 = vld [vmem:[#allocation8 + $0x1e0] sm:$0xff] }
 0x237   :  { %v992_v22 = vld [vmem:[#allocation8 + $0x1d0] sm:$0xff]  ;;  %v11503_v38 = vpack.c.bf16 %v994_v21, %v990_v10 }
 0x238   :  { %v11505_v39 = vpack.c.bf16 %v996_v26, %v992_v22  ;;  %v13410_v26 = vlaneseq }
 0x239   :  { %8071 = vmatpush1.bf16.msra.mxu1 %v11467_v48  ;;  %8103 = vmatpush1.bf16.msra.mxu0 %v11469_v49  ;;  %v995_v48 = vld [vmem:[#allocation8 + $0x1e8] sm:$0xff]  ;;  %v997_v49 = vld [vmem:[#allocation8 + $0x1f8] sm:$0xff] }
 0x23a   :  { %8073 = vmatprep.subr.bf16.mxu1 %v11473_v5  ;;  %8105 = vmatprep.subr.bf16.mxu0 %v11475_v6  ;;  %v11497_v52 = vpack.c.bf16 %v995_v48, %v991_v35  ;;  %v11499_v53 = vpack.c.bf16 %v997_v49, %v993_v34  ;;  %v13409_v34 = vmov 0.0  }
 0x23d   :  { %8075 = vmatpush1.bf16.msra.mxu1 %v11479_v25  ;;  %8107 = vmatpush1.bf16.msra.mxu0 %v11481_v27 }
 0x23e   :  { %8077 = vmatprep.subr.bf16.mxu1 %v11485_v8  ;;  %8109 = vmatprep.subr.bf16.mxu0 %v11487_v17 }
 0x241   :  { %8079 = vmatpush1.bf16.msra.mxu1 %v11491_v0  ;;  %8111 = vmatpush1.bf16.msra.mxu0 %v11493_v2 }
 0x242   :  { %8081 = vmatprep.subr.bf16.mxu1 %v11497_v52  ;;  %8113 = vmatprep.subr.bf16.mxu0 %v11499_v53 }
 0x245   :  { %8083 = vmatpush1.bf16.msra.mxu1 %v11503_v38  ;;  %8115 = vmatpush1.bf16.msra.mxu0 %v11505_v39 }
 0x246   :  { %8117 = vmatprep.subr.bf16.mxu1 %v11311_v46  ;;  %8149 = vmatprep.subr.bf16.mxu0 %v11313_v47 }
 0x248   :  { %1063 = vmatmul.mubr.f32.vlgmr.msra.gmra.mrb[6].mxu1 %v13409_v34  ;;  %1134 = vmatmul.mubr.f32.vlgmr.msra.gmra.mrb[8].mxu0 %v13409_v34 }
 0x249   :  { %8119 = vmatpush1.bf16.msra.mxu1 %v11315_v54  ;;  %8151 = vmatpush1.bf16.msra.mxu0 %v11317_v55 }
 0x24a   :  { %8121 = vmatprep.subr.bf16.mxu1 %v11321_v58  ;;  %8153 = vmatprep.subr.bf16.mxu0 %v11323_v59 }
 0x24b   :  { %1244 = vmatprep.mubr.f32.mxu1 %v13409_v34  ;;  %1315 = vmatprep.mubr.f32.mxu0 %v13409_v34 }
 0x24d   :  { %8123 = vmatpush1.bf16.msra.mxu1 %v11329_v3  ;;  %8155 = vmatpush1.bf16.msra.mxu0 %v11331_v4 }
 0x24e   :  { %8125 = vmatprep.subr.bf16.mxu1 %v11335_v7  ;;  %8157 = vmatprep.subr.bf16.mxu0 %v11337_v9 }
 0x251   :  { %8127 = vmatpush1.bf16.msra.mxu1 %v11343_v15  ;;  %8159 = vmatpush1.bf16.msra.mxu0 %v11345_v16 }
 0x252   :  { %8129 = vmatprep.subr.bf16.mxu1 %v11349_v1  ;;  %8161 = vmatprep.subr.bf16.mxu0 %v11351_v20 }
 0x255   :  { %8131 = vmatpush1.bf16.msra.mxu1 %v11355_v28  ;;  %8163 = vmatpush1.bf16.msra.mxu0 %v11357_v29 }
 0x256   :  { %8133 = vmatprep.subr.bf16.mxu1 %v11361_v32  ;;  %8165 = vmatprep.subr.bf16.mxu0 %v11363_v33 }
 0x259   :  { %8135 = vmatpush1.bf16.msra.mxu1 %v11367_v40  ;;  %8167 = vmatpush1.bf16.msra.mxu0 %v11369_v41 }
 0x25a   :  { %8137 = vmatprep.subr.bf16.mxu1 %v11373_v44  ;;  %8169 = vmatprep.subr.bf16.mxu0 %v11375_v45 }
 0x25d   :  { %8139 = vmatpush1.bf16.msra.mxu1 %v11379_v56  ;;  %8171 = vmatpush1.bf16.msra.mxu0 %v11381_v57 }
 0x25e   :  { %8141 = vmatprep.subr.bf16.mxu1 %v11385_v62  ;;  %8173 = vmatprep.subr.bf16.mxu0 %v11387_v63 }
 0x261   :  { %8143 = vmatpush1.bf16.msra.mxu1 %v11391_v11  ;;  %8175 = vmatpush1.bf16.msra.mxu0 %v11393_v12 }
 0x262   :  { %8145 = vmatprep.subr.bf16.mxu1 %v11397_v18  ;;  %8177 = vmatprep.subr.bf16.mxu0 %v11399_v19  ;;  %v11554_v19 = vshrl.u32 %v13410_v26, 7 }
 0x264   :  { %13411 = vst [vmem:[#allocation62_spill] sm:$0xff] %v11554_v19  ;;  %v13233_v26 = vsub.s32 2, %v11554_v19  ;;  %v13232_v44 = vsub.s32 3, %v11554_v19 }
 0x265   :  { %8147 = vmatpush1.bf16.msra.mxu1 %v11403_v30  ;;  %8179 = vmatpush1.bf16.msra.mxu0 %v11405_v31  ;;  %v13222_v30 = vsub.s32 0, %v11554_v19 }
 0x266   :  { %8181 = vmatprep.subr.bf16.mxu1 %v11409_v36  ;;  %8213 = vmatprep.subr.bf16.mxu0 %v11411_v37  ;;  %v11560_v36 = vld [vmem:[%s13163_s5] sm:$0xff]  ;;  %v13223_v37 = vsub.s32 1, %v11554_v19 }
 0x267   :  { %v379_v31 = vrot.slane %v11560_v36, %v13222_v30 }
 0x268   :  { %v383_v18 = vrot.slane %v11560_v36, %v13223_v37  ;;  %v387_v37 = vrot.slane %v11560_v36, %v13233_v26 }
 0x2bb   :  { %v482_v35 = vpop.f32.mrb[0].mxu1  ;;  %v553_v48 = vpop.f32.mrb[2].mxu0 }
 0x2bc   :  { %v484_v49 = vpop.f32.mrb[1].mxu1  ;;  %v555_v42 = vpop.f32.mrb[3].mxu0  ;;  %v11569_v12 = vadd.f32 %v482_v35, %v379_v31 }
 0x2bd   :  { %v11572_v11 = vadd.f32 %v484_v49, %v383_v18  ;;  %v391_v18 = vrot.slane %v11560_v36, %v13232_v44  ;;  %v11583_v49 = vadd.f32 %v553_v48, %v387_v37  ;;  %v13241_v48 = vsub.s32 5, %v11554_v19 }
 0x2be   :  { %13412 = vst [vmem:[#allocation63_spill] sm:$0xff] %v11569_v12 }
 0x2bf   :  { %13413 = vst [vmem:[#allocation64_spill] sm:$0xff] %v11572_v11  ;;  %13414 = vst [vmem:[#allocation65_spill] sm:$0xff] %v11583_v49 }
 0x2db   :  { %v624_v43 = vpop.f32.mrb[2].mxu1  ;;  %v11549_v10 = vpop.f32.mrb[4].mxu0 }
 0x2dc   :  { %v626_v21 = vpop.f32.mrb[3].mxu1  ;;  %v11551_v22 = vpop.f32.mrb[5].mxu0 }
 0x2fb   :  { %v830_v63 = vpop.f32.mrb[4].mxu1  ;;  %v901_v62 = vpop.f32.mrb[6].mxu0 }
 0x2fc   :  { %v906_v57 = vadd.f32 %v830_v63, %v11569_v12  ;;  %v832_v56 = vpop.f32.mrb[5].mxu1  ;;  %v903_v45 = vpop.f32.mrb[7].mxu0  ;;  %v908_v63 = vadd.f32 %v901_v62, %v11583_v49  ;;  %v11586_v12 = vadd.f32 %v555_v42, %v391_v18 }
 0x2fd   :  { %v907_v30 = vadd.f32 %v832_v56, %v11572_v11 }
 0x2fe   :  { %v7652_v31 = vmul.f32 -1.442695, %v906_v57  ;;  %13415 = vst [vmem:[#allocation66_spill] sm:$0xff] %v11586_v12  ;;  %v909_v56 = vadd.f32 %v903_v45, %v11586_v12  ;;  %v7654_v11 = vmul.f32 -1.442695, %v908_v63 }
 0x2ff   :  { %v7653_v35 = vmul.f32 -1.442695, %v907_v30 }
 0x300   :  { %10345 = vpow2.f32 %v7652_v31  ;;  %v13238_v31 = vsub.s32 4, %v11554_v19 }
 0x301   :  { %10347 = vpow2.f32 %v7653_v35 }
 0x302   :  { %10349 = vtanh.f32 %v909_v56  ;;  %v395_v45 = vrot.slane %v11560_v36, %v13238_v31 }
 0x303   :  { %10351 = vpow2.f32 %v7654_v11 }
 0x30a   :  { %v10346_v41 = vpop.eup %10345 }
 0x30b   :  { %v919_v40 = vadd.f32 1.0, %v10346_v41  ;;  %v10348_v57 = vpop.eup %10347  ;;  %v399_v41 = vrot.slane %v11560_v36, %v13241_v48 }
 0x30c   :  { %v920_v30 = vadd.f32 1.0, %v10348_v57  ;;  %v10350_v37 = vpop.eup %10349  ;;  %v11597_v57 = vadd.f32 %v624_v43, %v395_v45 }
 0x30d   :  { %10353 = vrcp.f32 %v919_v40  ;;  %v10352_v35 = vpop.eup %10351  ;;  %v11602_v31 = vadd.f32 %v626_v21, %v399_v41 }
 0x30e   :  { %10355 = vrcp.f32 %v920_v30  ;;  %v921_v40 = vadd.f32 1.0, %v10352_v35  ;;  %v13240_v30 = vsub.s32 6, %v11554_v19 }
 0x310   :  { %10357 = vrcp.f32 %v921_v40  ;;  %v403_v45 = vrot.slane %v11560_v36, %v13240_v30  ;;  %v13426_v30 = vld [vmem:[#allocation61_spill] sm:$0xff] }
 0x312   :  { %v11615_v21 = vadd.f32 %v11549_v10, %v403_v45  ;;  %v13417_v45 = vld [vmem:[#allocation52_spill] sm:$0xff] }
 0x317   :  { %v10354_v62 = vpop.eup %10353 }
 0x318   :  { %v930_v42 = vmul.f32 %v10354_v62, %v10350_v37  ;;  %v10356_v18 = vpop.eup %10355  ;;  %v13239_v62 = vsub.s32 7, %v11554_v19  ;;  %v13434_v19 = vld [vmem:[#allocation42_spill] sm:$0xff] }
 0x319   :  { %v929_v11 = vmul.f32 0.0, %v10356_v18 }
 0x31a   :  { %v10358_v40 = vpop.eup %10357 }
 0x31b   :  { %v1064_v63 = vpop.f32.mrb[6].mxu1  ;;  %v1135_v56 = vpop.f32.mrb[8].mxu0  ;;  %v11600_v44 = vadd.f32 %v930_v42, %v929_v11 }
 0x31c   :  { %v1144_v26 = vrot.slane %v1064_v63, 1  ;;  %v1066_v12 = vpop.f32.mrb[7].mxu1  ;;  %v1137_v49 = vpop.f32.mrb[9].mxu0  ;;  %v1146_v11 = vrot.slane %v1135_v56, 1 }
 0x31d   :  { %v1145_v37 = vrot.slane %v1066_v12, 1  ;;  %10359 = vtanh.f32 %v11600_v44  ;;  %v407_v12 = vrot.slane %v11560_v36, %v13239_v62  ;;  %v13425_v62 = vld [vmem:[#allocation60_spill] sm:$0xff] }
 0x31e   :  { %v1152_v35 = vadd.f32 %v1144_v26, %v11597_v57  ;;  %v1147_v26 = vrot.slane %v1137_v49, 1  ;;  %v1154_v41 = vadd.f32 %v1146_v11, %v11615_v21  ;;  %v13420_v11 = vld [vmem:[#allocation55_spill] sm:$0xff] }
 0x31f   :  { %v1153_v43 = vadd.f32 %v1145_v37, %v11602_v31  ;;  %v11619_v63 = vadd.f32 %v11551_v22, %v407_v12 }
 0x320   :  { %v7655_v42 = vmul.f32 -1.442695, %v1152_v35  ;;  %v7657_v56 = vmul.f32 -1.442695, %v1154_v41  ;;  %v13421_v41 = vld [vmem:[#allocation56_spill] sm:$0xff] }
 0x321   :  { %v7656_v18 = vmul.f32 -1.442695, %v1153_v43  ;;  %v1155_v35 = vadd.f32 %v1147_v26, %v11619_v63 }
 0x322   :  { %10361 = vpow2.f32 %v7655_v42  ;;  %v13418_v42 = vld [vmem:[#allocation53_spill] sm:$0xff] }
 0x323   :  { %10363 = vpow2.f32 %v7656_v18  ;;  %v13419_v18 = vld [vmem:[#allocation54_spill] sm:$0xff] }
 0x324   :  { %10365 = vtanh.f32 %v1155_v35  ;;  %v13423_v35 = vld [vmem:[#allocation58_spill] sm:$0xff] }
 0x325   :  { %10367 = vpow2.f32 %v7657_v56  ;;  %v13424_v56 = vld [vmem:[#allocation59_spill] sm:$0xff] }
 0x327   :  { %v10360_v37 = vpop.eup %10359 }
 0x328   :  { %v11622_v43 = vmul.f32 %v10360_v37, %v10358_v40  ;;  %v13422_v40 = vld [vmem:[#allocation57_spill] sm:$0xff] }
 0x32a   :  { %13416 = vst [vmem:[#allocation67_spill] sm:$0xff] %v11622_v43  ;;  %1245 = vmatmul.mubr.f32.vlgmr.msra.gmra.mrb[8].mxu1 %v11622_v43  ;;  %1316 = vmatmul.mubr.f32.vlgmr.msra.gmra.mrb[10].mxu0 %v11622_v43  ;;  %v13436_v43 = vld [vmem:[#allocation44_spill] sm:$0xff] }
 0x32b   :  { %8183 = vmatpush1.bf16.msra.mxu1 %v11415_v50  ;;  %8215 = vmatpush1.bf16.msra.mxu0 %v11417_v51 }
 0x32c   :  { %v10362_v36 = vpop.eup %10361  ;;  %8185 = vmatprep.subr.bf16.mxu1 %v11421_v60  ;;  %8217 = vmatprep.subr.bf16.mxu0 %v11423_v61 }
 0x32d   :  { %v1165_v10 = vadd.f32 1.0, %v10362_v36  ;;  %v10364_v22 = vpop.eup %10363  ;;  %1432 = vmatprep.mubr.f32.mxu1 %v13409_v34  ;;  %1503 = vmatprep.mubr.f32.mxu0 %v13409_v34 }
 0x32e   :  { %v1166_v49 = vadd.f32 1.0, %v10364_v22  ;;  %v10366_v12 = vpop.eup %10365 }
 0x32f   :  { %10369 = vrcp.f32 %v1165_v10  ;;  %8187 = vmatpush1.bf16.msra.mxu1 %v11429_v13  ;;  %8219 = vmatpush1.bf16.msra.mxu0 %v11431_v14  ;;  %v10368_v26 = vpop.eup %10367 }
 0x330   :  { %10371 = vrcp.f32 %v1166_v49  ;;  %8189 = vmatprep.subr.bf16.mxu1 %v11435_v23  ;;  %8221 = vmatprep.subr.bf16.mxu0 %v11437_v24  ;;  %v1167_v22 = vadd.f32 1.0, %v10368_v26 }
 0x332   :  { %10373 = vrcp.f32 %v1167_v22  ;;  %v13429_v22 = vld [vmem:[#allocation37_spill] sm:$0xff] }
 0x333   :  { %8191 = vmatpush1.bf16.msra.mxu1 %v13417_v45  ;;  %8223 = vmatpush1.bf16.msra.mxu0 %v13418_v42 }
 0x334   :  { %8193 = vmatprep.subr.bf16.mxu1 %v13419_v18  ;;  %8225 = vmatprep.subr.bf16.mxu0 %v13420_v11 }
 0x337   :  { %8195 = vmatpush1.bf16.msra.mxu1 %v13421_v41  ;;  %8227 = vmatpush1.bf16.msra.mxu0 %v13422_v40 }
 0x338   :  { %8197 = vmatprep.subr.bf16.mxu1 %v13423_v35  ;;  %8229 = vmatprep.subr.bf16.mxu0 %v13424_v56 }
 0x339   :  { %v10370_v37 = vpop.eup %10369 }
 0x33a   :  { %v1176_v36 = vmul.f32 %v10370_v37, %v10366_v12  ;;  %v10372_v10 = vpop.eup %10371 }
 0x33b   :  { %v1175_v49 = vmul.f32 0.0, %v10372_v10  ;;  %8199 = vmatpush1.bf16.msra.mxu1 %v13425_v62  ;;  %8231 = vmatpush1.bf16.msra.mxu0 %v13426_v30  ;;  %v13428_v10 = vld [vmem:[#allocation36_spill] sm:$0xff] }
 0x33c   :  { %8201 = vmatprep.subr.bf16.mxu1 %v11473_v5  ;;  %8233 = vmatprep.subr.bf16.mxu0 %v11475_v6  ;;  %v10374_v12 = vpop.eup %10373 }
 0x33d   :  { %v11648_v48 = vadd.f32 %v1176_v36, %v1175_v49  ;;  %v13430_v49 = vld [vmem:[#allocation38_spill] sm:$0xff] }
 0x33f   :  { %10375 = vtanh.f32 %v11648_v48  ;;  %8203 = vmatpush1.bf16.msra.mxu1 %v11479_v25  ;;  %8235 = vmatpush1.bf16.msra.mxu0 %v11481_v27 }
 0x340   :  { %8205 = vmatprep.subr.bf16.mxu1 %v11485_v8  ;;  %8237 = vmatprep.subr.bf16.mxu0 %v11487_v17 }
 0x343   :  { %8207 = vmatpush1.bf16.msra.mxu1 %v11491_v0  ;;  %8239 = vmatpush1.bf16.msra.mxu0 %v11493_v2 }
 0x344   :  { %8209 = vmatprep.subr.bf16.mxu1 %v11497_v52  ;;  %8241 = vmatprep.subr.bf16.mxu0 %v11499_v53 }
 0x347   :  { %8211 = vmatpush1.bf16.msra.mxu1 %v11503_v38  ;;  %8243 = vmatpush1.bf16.msra.mxu0 %v11505_v39 }
 0x348   :  { %8245 = vmatprep.subr.bf16.mxu1 %v11311_v46  ;;  %8277 = vmatprep.subr.bf16.mxu0 %v11313_v47 }
 0x349   :  { %v10376_v26 = vpop.eup %10375 }
 0x34a   :  { %v11663_v37 = vmul.f32 %v10376_v26, %v10374_v12  ;;  %v13431_v12 = vld [vmem:[#allocation39_spill] sm:$0xff]  ;;  %v13432_v26 = vld [vmem:[#allocation40_spill] sm:$0xff] }
 0x34c   :  { %13427 = vst [vmem:[#allocation52_spill] sm:$0xff] %v11663_v37  ;;  %v1366_v36 = vrot.slane %v11663_v37, 7  ;;  %v13435_v37 = vld [vmem:[#allocation43_spill] sm:$0xff] }
 0x34e   :  { %1433 = vmatmul.mubr.f32.vlgmr.msra.gmra.mrb[10].mxu1 %v1366_v36  ;;  %1504 = vmatmul.mubr.f32.vlgmr.msra.gmra.mrb[12].mxu0 %v1366_v36  ;;  %v13433_v36 = vld [vmem:[#allocation41_spill] sm:$0xff] }
 0x34f   :  { %8247 = vmatpush1.bf16.msra.mxu1 %v11315_v54  ;;  %8279 = vmatpush1.bf16.msra.mxu0 %v11317_v55 }
 0x350   :  { %8249 = vmatprep.subr.bf16.mxu1 %v11321_v58  ;;  %8281 = vmatprep.subr.bf16.mxu0 %v11323_v59 }
 0x351   :  { %1620 = vmatprep.mubr.f32.mxu1 %v13409_v34  ;;  %1691 = vmatprep.mubr.f32.mxu0 %v13409_v34 }
 0x353   :  { %8251 = vmatpush1.bf16.msra.mxu1 %v11329_v3  ;;  %8283 = vmatpush1.bf16.msra.mxu0 %v11331_v4 }
 0x354   :  { %8253 = vmatprep.subr.bf16.mxu1 %v11335_v7  ;;  %8285 = vmatprep.subr.bf16.mxu0 %v11337_v9  ;;  %v13447_v9 = vld [vmem:[#allocation66_spill] sm:$0xff] }
 0x357   :  { %8255 = vmatpush1.bf16.msra.mxu1 %v11343_v15  ;;  %8287 = vmatpush1.bf16.msra.mxu0 %v11345_v16  ;;  %v13446_v15 = vld [vmem:[#allocation65_spill] sm:$0xff] }
 0x358   :  { %8257 = vmatprep.subr.bf16.mxu1 %v11349_v1  ;;  %8289 = vmatprep.subr.bf16.mxu0 %v11351_v20  ;;  %v13444_v20 = vld [vmem:[#allocation63_spill] sm:$0xff]  ;;  %v13445_v1 = vld [vmem:[#allocation64_spill] sm:$0xff] }
 0x35b   :  { %8259 = vmatpush1.bf16.msra.mxu1 %v11355_v28  ;;  %8291 = vmatpush1.bf16.msra.mxu0 %v11357_v29 }
 0x35c   :  { %8261 = vmatprep.subr.bf16.mxu1 %v11361_v32  ;;  %8293 = vmatprep.subr.bf16.mxu0 %v11363_v33  ;;  %v13437_v32 = vld [vmem:[#allocation45_spill] sm:$0xff]  ;;  %v13438_v33 = vld [vmem:[#allocation46_spill] sm:$0xff] }
 0x35f   :  { %8263 = vmatpush1.bf16.msra.mxu1 %v13428_v10  ;;  %8295 = vmatpush1.bf16.msra.mxu0 %v13429_v22  ;;  %v13439_v10 = vld [vmem:[#allocation47_spill] sm:$0xff]  ;;  %v13440_v22 = vld [vmem:[#allocation48_spill] sm:$0xff] }
 0x360   :  { %8265 = vmatprep.subr.bf16.mxu1 %v13430_v49  ;;  %8297 = vmatprep.subr.bf16.mxu0 %v13431_v12  ;;  %v13441_v49 = vld [vmem:[#allocation49_spill] sm:$0xff]  ;;  %v13442_v12 = vld [vmem:[#allocation50_spill] sm:$0xff] }
 0x363   :  { %8267 = vmatpush1.bf16.msra.mxu1 %v13432_v26  ;;  %8299 = vmatpush1.bf16.msra.mxu0 %v13433_v36  ;;  %v13443_v26 = vld [vmem:[#allocation51_spill] sm:$0xff] }
 0x364   :  { %8269 = vmatprep.subr.bf16.mxu1 %v13434_v19  ;;  %8301 = vmatprep.subr.bf16.mxu0 %v13435_v37 }
 0x367   :  { %8271 = vmatpush1.bf16.msra.mxu1 %v13436_v43  ;;  %8303 = vmatpush1.bf16.msra.mxu0 %v13437_v32 }
 0x368   :  { %8273 = vmatprep.subr.bf16.mxu1 %v13438_v33  ;;  %8305 = vmatprep.subr.bf16.mxu0 %v13439_v10 }
 0x36b   :  { %8275 = vmatpush1.bf16.msra.mxu1 %v13440_v22  ;;  %8307 = vmatpush1.bf16.msra.mxu0 %v13441_v49 }
 0x36c   :  { %8309 = vmatprep.subr.bf16.mxu1 %v13442_v12  ;;  %8341 = vmatprep.subr.bf16.mxu0 %v13443_v26 }
 0x3fd   :  { %v1246_v36 = vpop.f32.mrb[8].mxu1  ;;  %v1317_v19 = vpop.f32.mrb[10].mxu0 }
 0x3fe   :  { %v1326_v29 = vrot.slane %v1246_v36, 7  ;;  %v1248_v37 = vpop.f32.mrb[9].mxu1  ;;  %v1319_v28 = vpop.f32.mrb[11].mxu0  ;;  %v1328_v22 = vrot.slane %v1317_v19, 7 }
 0x3ff   :  { %v1327_v43 = vrot.slane %v1248_v37, 7  ;;  %v1329_v49 = vrot.slane %v1319_v28, 7 }
 0x400   :  { %v1334_v32 = vadd.f32 %v1326_v29, %v13444_v20  ;;  %v1336_v12 = vadd.f32 %v1328_v22, %v13446_v15 }
 0x401   :  { %v1335_v33 = vadd.f32 %v1327_v43, %v13445_v1  ;;  %v1337_v26 = vadd.f32 %v1329_v49, %v13447_v9 }
 0x402   :  { %v7658_v16 = vmul.f32 -1.442695, %v1334_v32  ;;  %v7660_v7 = vmul.f32 -1.442695, %v1336_v12 }
 0x403   :  { %v7659_v10 = vmul.f32 -1.442695, %v1335_v33 }
 0x404   :  { %10377 = vpow2.f32 %v7658_v16  ;;  %v1358_v16 = vrot.slane %v11600_v44, 7 }
 0x405   :  { %10379 = vpow2.f32 %v7659_v10 }
 0x406   :  { %10381 = vtanh.f32 %v1337_v26 }
 0x407   :  { %10383 = vpow2.f32 %v7660_v7 }
 0x40e   :  { %v10378_v4 = vpop.eup %10377 }
 0x40f   :  { %v1347_v36 = vadd.f32 1.0, %v10378_v4  ;;  %v10380_v3 = vpop.eup %10379 }
 0x410   :  { %v1348_v29 = vadd.f32 1.0, %v10380_v3  ;;  %v10382_v43 = vpop.eup %10381 }
 0x411   :  { %10385 = vrcp.f32 %v1347_v36  ;;  %v10384_v32 = vpop.eup %10383 }
 0x412   :  { %10387 = vrcp.f32 %v1348_v29  ;;  %v1349_v37 = vadd.f32 1.0, %v10384_v32 }
 0x414   :  { %10389 = vrcp.f32 %v1349_v37 }
 0x41b   :  { %v10386_v33 = vpop.eup %10385 }
 0x41c   :  { %v1361_v19 = vmul.f32 %v10386_v33, %v10382_v43  ;;  %v10388_v28 = vpop.eup %10387 }
 0x41d   :  { %v1360_v10 = vmul.f32 %v10388_v28, %v1358_v16 }
 0x41e   :  { %v10390_v33 = vpop.eup %10389 }
 0x41f   :  { %v11705_v22 = vadd.f32 %v1361_v19, %v1360_v10 }
 0x421   :  { %v1434_v49 = vpop.f32.mrb[10].mxu1  ;;  %v1505_v4 = vpop.f32.mrb[12].mxu0  ;;  %10391 = vtanh.f32 %v11705_v22 }
 0x422   :  { %v1514_v7 = vrot.slane %v1434_v49, 2  ;;  %v1436_v12 = vpop.f32.mrb[11].mxu1  ;;  %v1507_v3 = vpop.f32.mrb[13].mxu0  ;;  %v1516_v32 = vrot.slane %v1505_v4, 2 }
 0x423   :  { %v1515_v26 = vrot.slane %v1436_v12, 2  ;;  %v1517_v16 = vrot.slane %v1507_v3, 2 }
 0x424   :  { %v1522_v36 = vadd.f32 %v1514_v7, %v11597_v57  ;;  %v1524_v28 = vadd.f32 %v1516_v32, %v11615_v21 }
 0x425   :  { %v1523_v29 = vadd.f32 %v1515_v26, %v11602_v31  ;;  %v1525_v10 = vadd.f32 %v1517_v16, %v11619_v63 }
 0x426   :  { %v7661_v44 = vmul.f32 -1.442695, %v1522_v36  ;;  %v7663_v12 = vmul.f32 -1.442695, %v1524_v28 }
 0x427   :  { %v7662_v43 = vmul.f32 -1.442695, %v1523_v29 }
 0x428   :  { %10393 = vpow2.f32 %v7661_v44 }
 0x429   :  { %10395 = vpow2.f32 %v7662_v43  ;;  %v1546_v43 = vrot.slane %v11648_v48, 1 }
 0x42a   :  { %10397 = vtanh.f32 %v1525_v10 }
 0x42b   :  { %v10392_v19 = vpop.eup %10391  ;;  %10399 = vpow2.f32 %v7663_v12 }
 0x42c   :  { %v11711_v37 = vmul.f32 %v10392_v19, %v10390_v33 }
 0x42e   :  { %v1554_v49 = vrot.slane %v11711_v37, 1 }
 0x430   :  { %1621 = vmatmul.mubr.f32.vlgmr.msra.gmra.mrb[12].mxu1 %v1554_v49  ;;  %1692 = vmatmul.mubr.f32.vlgmr.msra.gmra.mrb[14].mxu0 %v1554_v49 }
 0x431   :  { %8311 = vmatpush1.bf16.msra.mxu1 %v11415_v50  ;;  %8343 = vmatpush1.bf16.msra.mxu0 %v11417_v51 }
 0x432   :  { %v10394_v7 = vpop.eup %10393  ;;  %8313 = vmatprep.subr.bf16.mxu1 %v11421_v60  ;;  %8345 = vmatprep.subr.bf16.mxu0 %v11423_v61 }
 0x433   :  { %v1535_v4 = vadd.f32 1.0, %v10394_v7  ;;  %v10396_v3 = vpop.eup %10395  ;;  %1808 = vmatprep.mubr.f32.mxu1 %v13409_v34  ;;  %1879 = vmatprep.mubr.f32.mxu0 %v13409_v34  ;;  %v13449_v7 = vld [vmem:[#allocation24_spill] sm:$0xff] }
 0x434   :  { %v1536_v26 = vadd.f32 1.0, %v10396_v3  ;;  %v10398_v36 = vpop.eup %10397  ;;  %v13451_v3 = vld [vmem:[#allocation26_spill] sm:$0xff] }
 0x435   :  { %10401 = vrcp.f32 %v1535_v4  ;;  %8315 = vmatpush1.bf16.msra.mxu1 %v11429_v13  ;;  %8347 = vmatpush1.bf16.msra.mxu0 %v11431_v14  ;;  %v10400_v29 = vpop.eup %10399  ;;  %v13450_v4 = vld [vmem:[#allocation25_spill] sm:$0xff] }
 0x436   :  { %10403 = vrcp.f32 %v1536_v26  ;;  %8317 = vmatprep.subr.bf16.mxu1 %v11435_v23  ;;  %8349 = vmatprep.subr.bf16.mxu0 %v11437_v24  ;;  %v1537_v16 = vadd.f32 1.0, %v10400_v29  ;;  %v13452_v26 = vld [vmem:[#allocation27_spill] sm:$0xff]  ;;  %v13454_v29 = vld [vmem:[#allocation29_spill] sm:$0xff] }
 0x438   :  { %10405 = vrcp.f32 %v1537_v16  ;;  %v13459_v16 = vld [vmem:[#allocation34_spill] sm:$0xff] }
 0x439   :  { %8319 = vmatpush1.bf16.msra.mxu1 %v13417_v45  ;;  %8351 = vmatpush1.bf16.msra.mxu0 %v13418_v42 }
 0x43a   :  { %8321 = vmatprep.subr.bf16.mxu1 %v13419_v18  ;;  %8353 = vmatprep.subr.bf16.mxu0 %v13420_v11 }
 0x43d   :  { %8323 = vmatpush1.bf16.msra.mxu1 %v13421_v41  ;;  %8355 = vmatpush1.bf16.msra.mxu0 %v13422_v40 }
 0x43e   :  { %8325 = vmatprep.subr.bf16.mxu1 %v13423_v35  ;;  %8357 = vmatprep.subr.bf16.mxu0 %v13424_v56 }
 0x43f   :  { %v10402_v44 = vpop.eup %10401 }
 0x440   :  { %v1549_v32 = vmul.f32 %v10402_v44, %v10398_v36  ;;  %v10404_v33 = vpop.eup %10403  ;;  %v13453_v36 = vld [vmem:[#allocation28_spill] sm:$0xff]  ;;  %v13455_v44 = vld [vmem:[#allocation30_spill] sm:$0xff] }
 0x441   :  { %v1548_v19 = vmul.f32 %v10404_v33, %v1546_v43  ;;  %8327 = vmatpush1.bf16.msra.mxu1 %v13425_v62  ;;  %8359 = vmatpush1.bf16.msra.mxu0 %v13426_v30  ;;  %v13456_v43 = vld [vmem:[#allocation31_spill] sm:$0xff]  ;;  %v13458_v33 = vld [vmem:[#allocation33_spill] sm:$0xff] }
 0x442   :  { %8329 = vmatprep.subr.bf16.mxu1 %v11473_v5  ;;  %8361 = vmatprep.subr.bf16.mxu0 %v11475_v6  ;;  %v10406_v48 = vpop.eup %10405 }
 0x443   :  { %v11738_v28 = vadd.f32 %v1549_v32, %v1548_v19  ;;  %v13457_v32 = vld [vmem:[#allocation32_spill] sm:$0xff]  ;;  %v13460_v19 = vld [vmem:[#allocation35_spill] sm:$0xff] }
 0x445   :  { %10407 = vtanh.f32 %v11738_v28  ;;  %8331 = vmatpush1.bf16.msra.mxu1 %v11479_v25  ;;  %8363 = vmatpush1.bf16.msra.mxu0 %v11481_v27 }
 0x446   :  { %8333 = vmatprep.subr.bf16.mxu1 %v11485_v8  ;;  %8365 = vmatprep.subr.bf16.mxu0 %v11487_v17 }
 0x449   :  { %8335 = vmatpush1.bf16.msra.mxu1 %v11491_v0  ;;  %8367 = vmatpush1.bf16.msra.mxu0 %v11493_v2 }
 0x44a   :  { %8337 = vmatprep.subr.bf16.mxu1 %v11497_v52  ;;  %8369 = vmatprep.subr.bf16.mxu0 %v11499_v53 }
 0x44d   :  { %8339 = vmatpush1.bf16.msra.mxu1 %v11503_v38  ;;  %8371 = vmatpush1.bf16.msra.mxu0 %v11505_v39 }
 0x44e   :  { %8373 = vmatprep.subr.bf16.mxu1 %v11311_v46  ;;  %8405 = vmatprep.subr.bf16.mxu0 %v11313_v47 }
 0x44f   :  { %v10408_v10 = vpop.eup %10407 }
 0x450   :  { %v11753_v49 = vmul.f32 %v10408_v10, %v10406_v48  ;;  %v13461_v48 = vld [vmem:[#allocation36_spill] sm:$0xff]  ;;  %v13462_v10 = vld [vmem:[#allocation37_spill] sm:$0xff] }
 0x452   :  { %13448 = vst [vmem:[#allocation53_spill] sm:$0xff] %v11753_v49  ;;  %v1742_v12 = vrot.slane %v11753_v49, 6  ;;  %v13464_v49 = vld [vmem:[#allocation39_spill] sm:$0xff] }
 0x454   :  { %1809 = vmatmul.mubr.f32.vlgmr.msra.gmra.mrb[14].mxu1 %v1742_v12  ;;  %1880 = vmatmul.mubr.f32.vlgmr.msra.gmra.mrb[16].mxu0 %v1742_v12  ;;  %v13463_v12 = vld [vmem:[#allocation38_spill] sm:$0xff] }
 0x455   :  { %8375 = vmatpush1.bf16.msra.mxu1 %v11315_v54  ;;  %8407 = vmatpush1.bf16.msra.mxu0 %v11317_v55 }
 0x456   :  { %8377 = vmatprep.subr.bf16.mxu1 %v11321_v58  ;;  %8409 = vmatprep.subr.bf16.mxu0 %v11323_v59 }
 0x457   :  { %1996 = vmatprep.mubr.f32.mxu1 %v13409_v34  ;;  %2067 = vmatprep.mubr.f32.mxu0 %v13409_v34 }
 0x459   :  { %8379 = vmatpush1.bf16.msra.mxu1 %v13449_v7  ;;  %8411 = vmatpush1.bf16.msra.mxu0 %v13450_v4 }
 0x45a   :  { %8381 = vmatprep.subr.bf16.mxu1 %v13451_v3  ;;  %8413 = vmatprep.subr.bf16.mxu0 %v13452_v26 }
 0x45d   :  { %8383 = vmatpush1.bf16.msra.mxu1 %v13453_v36  ;;  %8415 = vmatpush1.bf16.msra.mxu0 %v13454_v29  ;;  %v13465_v29 = vld [vmem:[#allocation40_spill] sm:$0xff] }
 0x45e   :  { %8385 = vmatprep.subr.bf16.mxu1 %v13455_v44  ;;  %8417 = vmatprep.subr.bf16.mxu0 %v13456_v43  ;;  %v13466_v44 = vld [vmem:[#allocation41_spill] sm:$0xff]  ;;  %v13467_v43 = vld [vmem:[#allocation42_spill] sm:$0xff] }
 0x461   :  { %8387 = vmatpush1.bf16.msra.mxu1 %v13457_v32  ;;  %8419 = vmatpush1.bf16.msra.mxu0 %v13458_v33  ;;  %v13468_v32 = vld [vmem:[#allocation43_spill] sm:$0xff]  ;;  %v13469_v33 = vld [vmem:[#allocation44_spill] sm:$0xff] }
 0x462   :  { %8389 = vmatprep.subr.bf16.mxu1 %v13459_v16  ;;  %8421 = vmatprep.subr.bf16.mxu0 %v13460_v19  ;;  %v13470_v16 = vld [vmem:[#allocation45_spill] sm:$0xff]  ;;  %v13471_v19 = vld [vmem:[#allocation46_spill] sm:$0xff] }
 0x465   :  { %8391 = vmatpush1.bf16.msra.mxu1 %v13461_v48  ;;  %8423 = vmatpush1.bf16.msra.mxu0 %v13462_v10  ;;  %v13472_v48 = vld [vmem:[#allocation47_spill] sm:$0xff]  ;;  %v13473_v10 = vld [vmem:[#allocation48_spill] sm:$0xff] }
 0x466   :  { %8393 = vmatprep.subr.bf16.mxu1 %v13463_v12  ;;  %8425 = vmatprep.subr.bf16.mxu0 %v13464_v49  ;;  %v13474_v12 = vld [vmem:[#allocation49_spill] sm:$0xff]  ;;  %v13475_v49 = vld [vmem:[#allocation50_spill] sm:$0xff] }
 0x469   :  { %8395 = vmatpush1.bf16.msra.mxu1 %v13465_v29  ;;  %8427 = vmatpush1.bf16.msra.mxu0 %v13466_v44  ;;  %v13476_v29 = vld [vmem:[#allocation51_spill] sm:$0xff] }
 0x46a   :  { %8397 = vmatprep.subr.bf16.mxu1 %v13467_v43  ;;  %8429 = vmatprep.subr.bf16.mxu0 %v13468_v32 }
 0x46d   :  { %8399 = vmatpush1.bf16.msra.mxu1 %v13469_v33  ;;  %8431 = vmatpush1.bf16.msra.mxu0 %v13470_v16 }
 0x46e   :  { %8401 = vmatprep.subr.bf16.mxu1 %v13471_v19  ;;  %8433 = vmatprep.subr.bf16.mxu0 %v13472_v48 }
 0x471   :  { %8403 = vmatpush1.bf16.msra.mxu1 %v13473_v10  ;;  %8435 = vmatpush1.bf16.msra.mxu0 %v13474_v12 }
 0x472   :  { %8437 = vmatprep.subr.bf16.mxu1 %v13475_v49  ;;  %8469 = vmatprep.subr.bf16.mxu0 %v13476_v29 }
 0x503   :  { %v1622_v44 = vpop.f32.mrb[12].mxu1  ;;  %v1693_v43 = vpop.f32.mrb[14].mxu0 }
 0x504   :  { %v1702_v36 = vrot.slane %v1622_v44, 6  ;;  %v1624_v32 = vpop.f32.mrb[13].mxu1  ;;  %v1695_v26 = vpop.f32.mrb[15].mxu0  ;;  %v1704_v10 = vrot.slane %v1693_v43, 6 }
 0x505   :  { %v1703_v33 = vrot.slane %v1624_v32, 6  ;;  %v1705_v12 = vrot.slane %v1695_v26, 6 }
 0x506   :  { %v1710_v16 = vadd.f32 %v1702_v36, %v13444_v20  ;;  %v1712_v49 = vadd.f32 %v1704_v10, %v13446_v15 }
 0x507   :  { %v1711_v19 = vadd.f32 %v1703_v33, %v13445_v1  ;;  %v1713_v29 = vadd.f32 %v1705_v12, %v13447_v9 }
 0x508   :  { %v7664_v3 = vmul.f32 -1.442695, %v1710_v16  ;;  %v7666_v4 = vmul.f32 -1.442695, %v1712_v49 }
 0x509   :  { %v7665_v48 = vmul.f32 -1.442695, %v1711_v19 }
 0x50a   :  { %10409 = vpow2.f32 %v7664_v3  ;;  %v1734_v3 = vrot.slane %v11705_v22, 7 }
 0x50b   :  { %10411 = vpow2.f32 %v7665_v48 }
 0x50c   :  { %10413 = vtanh.f32 %v1713_v29 }
 0x50d   :  { %10415 = vpow2.f32 %v7666_v4 }
 0x514   :  { %v10410_v7 = vpop.eup %10409 }
 0x515   :  { %v1723_v44 = vadd.f32 1.0, %v10410_v7  ;;  %v10412_v59 = vpop.eup %10411 }
 0x516   :  { %v1724_v36 = vadd.f32 1.0, %v10412_v59  ;;  %v10414_v32 = vpop.eup %10413 }
 0x517   :  { %10417 = vrcp.f32 %v1723_v44  ;;  %v10416_v33 = vpop.eup %10415 }
 0x518   :  { %10419 = vrcp.f32 %v1724_v36  ;;  %v1725_v19 = vadd.f32 1.0, %v10416_v33 }
 0x51a   :  { %10421 = vrcp.f32 %v1725_v19 }
 0x521   :  { %v10418_v16 = vpop.eup %10417 }
 0x522   :  { %v1737_v43 = vmul.f32 %v10418_v16, %v10414_v32  ;;  %v10420_v26 = vpop.eup %10419 }
 0x523   :  { %v1736_v48 = vmul.f32 %v10420_v26, %v1734_v3 }
 0x524   :  { %v10422_v16 = vpop.eup %10421 }
 0x525   :  { %v11795_v10 = vadd.f32 %v1737_v43, %v1736_v48  ;;  %v13477_v48 = vld [vmem:[#allocation67_spill] sm:$0xff] }
 0x527   :  { %v1810_v49 = vpop.f32.mrb[14].mxu1  ;;  %v1881_v7 = vpop.f32.mrb[16].mxu0  ;;  %10423 = vtanh.f32 %v11795_v10 }
 0x528   :  { %v1890_v4 = vrot.slane %v1810_v49, 3  ;;  %v1812_v29 = vpop.f32.mrb[15].mxu1  ;;  %v1883_v59 = vpop.f32.mrb[17].mxu0  ;;  %v1892_v33 = vrot.slane %v1881_v7, 3  ;;  %v3798_v49 = vsel %vm3797_vm2, %v13477_v48, %v11711_v37 }
 0x529   :  { %v1891_v12 = vrot.slane %v1812_v29, 3  ;;  %v1893_v3 = vrot.slane %v1883_v59, 3 }
 0x52a   :  { %v1898_v44 = vadd.f32 %v1890_v4, %v11597_v57  ;;  %v1900_v26 = vadd.f32 %v1892_v33, %v11615_v21 }
 0x52b   :  { %v1899_v36 = vadd.f32 %v1891_v12, %v11602_v31  ;;  %v1901_v4 = vadd.f32 %v1893_v3, %v11619_v63 }
 0x52c   :  { %v7667_v22 = vmul.f32 -1.442695, %v1898_v44  ;;  %v7669_v7 = vmul.f32 -1.442695, %v1900_v26 }
 0x52d   :  { %v7668_v32 = vmul.f32 -1.442695, %v1899_v36 }
 0x52e   :  { %10425 = vpow2.f32 %v7667_v22 }
 0x52f   :  { %10427 = vpow2.f32 %v7668_v32 }
 0x530   :  { %10429 = vtanh.f32 %v1901_v4 }
 0x531   :  { %v10424_v43 = vpop.eup %10423  ;;  %10431 = vpow2.f32 %v7669_v7  ;;  %v13479_v7 = vld [vmem:[#allocation23_spill] sm:$0xff] }
 0x532   :  { %v1740_v19 = vmul.f32 %v10424_v43, %v10422_v16  ;;  %v1922_v16 = vrot.slane %v11738_v28, 1 }
 0x534   :  { %v1930_v29 = vrot.slane %v1740_v19, 2  ;;  %v11806_v12 = vsel %vm3799_vm3, %v3798_v49, %v1740_v19 }
 0x536   :  { %1997 = vmatmul.mubr.f32.vlgmr.msra.gmra.mrb[16].mxu1 %v1930_v29  ;;  %2068 = vmatmul.mubr.f32.vlgmr.msra.gmra.mrb[18].mxu0 %v1930_v29 }
 0x537   :  { %8439 = vmatpush1.bf16.msra.mxu1 %v11415_v50  ;;  %8471 = vmatpush1.bf16.msra.mxu0 %v11417_v51 }
 0x538   :  { %v10426_v44 = vpop.eup %10425  ;;  %8441 = vmatprep.subr.bf16.mxu1 %v11421_v60  ;;  %8473 = vmatprep.subr.bf16.mxu0 %v11423_v61 }
 0x539   :  { %v1911_v59 = vadd.f32 1.0, %v10426_v44  ;;  %v10428_v37 = vpop.eup %10427  ;;  %2184 = vmatprep.mubr.f32.mxu1 %v13409_v34  ;;  %2255 = vmatprep.mubr.f32.mxu0 %v13409_v34  ;;  %v13480_v44 = vld [vmem:[#allocation24_spill] sm:$0xff] }
 0x53a   :  { %v1912_v36 = vadd.f32 1.0, %v10428_v37  ;;  %v10430_v22 = vpop.eup %10429  ;;  %v13482_v37 = vld [vmem:[#allocation26_spill] sm:$0xff] }
 0x53b   :  { %10433 = vrcp.f32 %v1911_v59  ;;  %8443 = vmatpush1.bf16.msra.mxu1 %v11429_v13  ;;  %8475 = vmatpush1.bf16.msra.mxu0 %v11431_v14  ;;  %v10432_v32 = vpop.eup %10431  ;;  %v13481_v59 = vld [vmem:[#allocation25_spill] sm:$0xff] }
 0x53c   :  { %10435 = vrcp.f32 %v1912_v36  ;;  %8445 = vmatprep.subr.bf16.mxu1 %v11435_v23  ;;  %8477 = vmatprep.subr.bf16.mxu0 %v11437_v24  ;;  %v1913_v26 = vadd.f32 1.0, %v10432_v32  ;;  %v13483_v36 = vld [vmem:[#allocation27_spill] sm:$0xff]  ;;  %v13485_v32 = vld [vmem:[#allocation29_spill] sm:$0xff] }
 0x53e   :  { %10437 = vrcp.f32 %v1913_v26  ;;  %v13490_v26 = vld [vmem:[#allocation34_spill] sm:$0xff] }
 0x53f   :  { %8447 = vmatpush1.bf16.msra.mxu1 %v13417_v45  ;;  %8479 = vmatpush1.bf16.msra.mxu0 %v13418_v42 }
 0x540   :  { %8449 = vmatprep.subr.bf16.mxu1 %v13419_v18  ;;  %8481 = vmatprep.subr.bf16.mxu0 %v13420_v11 }
 0x543   :  { %8451 = vmatpush1.bf16.msra.mxu1 %v13421_v41  ;;  %8483 = vmatpush1.bf16.msra.mxu0 %v13422_v40 }
 0x544   :  { %8453 = vmatprep.subr.bf16.mxu1 %v13423_v35  ;;  %8485 = vmatprep.subr.bf16.mxu0 %v13424_v56 }
 0x545   :  { %v10434_v33 = vpop.eup %10433 }
 0x546   :  { %v1925_v3 = vmul.f32 %v10434_v33, %v10430_v22  ;;  %v10436_v43 = vpop.eup %10435  ;;  %v13484_v22 = vld [vmem:[#allocation28_spill] sm:$0xff]  ;;  %v13486_v33 = vld [vmem:[#allocation30_spill] sm:$0xff] }
 0x547   :  { %v1924_v19 = vmul.f32 %v10436_v43, %v1922_v16  ;;  %8455 = vmatpush1.bf16.msra.mxu1 %v13425_v62  ;;  %8487 = vmatpush1.bf16.msra.mxu0 %v13426_v30  ;;  %v13487_v16 = vld [vmem:[#allocation31_spill] sm:$0xff]  ;;  %v13489_v43 = vld [vmem:[#allocation33_spill] sm:$0xff] }
 0x548   :  { %8457 = vmatprep.subr.bf16.mxu1 %v11473_v5  ;;  %8489 = vmatprep.subr.bf16.mxu0 %v11475_v6  ;;  %v10438_v28 = vpop.eup %10437 }
 0x549   :  { %v11831_v48 = vadd.f32 %v1925_v3, %v1924_v19  ;;  %v13488_v3 = vld [vmem:[#allocation32_spill] sm:$0xff]  ;;  %v13491_v19 = vld [vmem:[#allocation35_spill] sm:$0xff] }
 0x54b   :  { %10439 = vtanh.f32 %v11831_v48  ;;  %8459 = vmatpush1.bf16.msra.mxu1 %v11479_v25  ;;  %8491 = vmatpush1.bf16.msra.mxu0 %v11481_v27 }
 0x54c   :  { %8461 = vmatprep.subr.bf16.mxu1 %v11485_v8  ;;  %8493 = vmatprep.subr.bf16.mxu0 %v11487_v17 }
 0x54f   :  { %8463 = vmatpush1.bf16.msra.mxu1 %v11491_v0  ;;  %8495 = vmatpush1.bf16.msra.mxu0 %v11493_v2 }
 0x550   :  { %8465 = vmatprep.subr.bf16.mxu1 %v11497_v52  ;;  %8497 = vmatprep.subr.bf16.mxu0 %v11499_v53 }
 0x553   :  { %8467 = vmatpush1.bf16.msra.mxu1 %v11503_v38  ;;  %8499 = vmatpush1.bf16.msra.mxu0 %v11505_v39 }
 0x554   :  { %8501 = vmatprep.subr.bf16.mxu1 %v11311_v46  ;;  %8533 = vmatprep.subr.bf16.mxu0 %v11313_v47 }
 0x555   :  { %v10440_v49 = vpop.eup %10439 }
 0x556   :  { %v11846_v4 = vmul.f32 %v10440_v49, %v10438_v28  ;;  %v13492_v28 = vld [vmem:[#allocation36_spill] sm:$0xff]  ;;  %v13493_v49 = vld [vmem:[#allocation37_spill] sm:$0xff] }
 0x558   :  { %13478 = vst [vmem:[#allocation54_spill] sm:$0xff] %v11846_v4  ;;  %v2118_v29 = vrot.slane %v11846_v4, 5  ;;  %v13495_v4 = vld [vmem:[#allocation39_spill] sm:$0xff] }
 0x55a   :  { %2185 = vmatmul.mubr.f32.vlgmr.msra.gmra.mrb[18].mxu1 %v2118_v29  ;;  %2256 = vmatmul.mubr.f32.vlgmr.msra.gmra.mrb[20].mxu0 %v2118_v29  ;;  %v13494_v29 = vld [vmem:[#allocation38_spill] sm:$0xff] }
 0x55b   :  { %8503 = vmatpush1.bf16.msra.mxu1 %v11315_v54  ;;  %8535 = vmatpush1.bf16.msra.mxu0 %v11317_v55 }
 0x55c   :  { %8505 = vmatprep.subr.bf16.mxu1 %v11321_v58  ;;  %8537 = vmatprep.subr.bf16.mxu0 %v13479_v7 }
 0x55d   :  { %2372 = vmatprep.mubr.f32.mxu1 %v13409_v34  ;;  %2443 = vmatprep.mubr.f32.mxu0 %v13409_v34 }
 0x55f   :  { %8507 = vmatpush1.bf16.msra.mxu1 %v13480_v44  ;;  %8539 = vmatpush1.bf16.msra.mxu0 %v13481_v59 }
 0x560   :  { %8509 = vmatprep.subr.bf16.mxu1 %v13482_v37  ;;  %8541 = vmatprep.subr.bf16.mxu0 %v13483_v36 }
 0x563   :  { %8511 = vmatpush1.bf16.msra.mxu1 %v13484_v22  ;;  %8543 = vmatpush1.bf16.msra.mxu0 %v13485_v32  ;;  %v13496_v32 = vld [vmem:[#allocation40_spill] sm:$0xff] }
 0x564   :  { %8513 = vmatprep.subr.bf16.mxu1 %v13486_v33  ;;  %8545 = vmatprep.subr.bf16.mxu0 %v13487_v16  ;;  %v13497_v33 = vld [vmem:[#allocation41_spill] sm:$0xff]  ;;  %v13498_v16 = vld [vmem:[#allocation42_spill] sm:$0xff] }
 0x567   :  { %8515 = vmatpush1.bf16.msra.mxu1 %v13488_v3  ;;  %8547 = vmatpush1.bf16.msra.mxu0 %v13489_v43  ;;  %v13499_v3 = vld [vmem:[#allocation43_spill] sm:$0xff]  ;;  %v13500_v43 = vld [vmem:[#allocation44_spill] sm:$0xff] }
 0x568   :  { %8517 = vmatprep.subr.bf16.mxu1 %v13490_v26  ;;  %8549 = vmatprep.subr.bf16.mxu0 %v13491_v19  ;;  %v13501_v26 = vld [vmem:[#allocation45_spill] sm:$0xff]  ;;  %v13502_v19 = vld [vmem:[#allocation46_spill] sm:$0xff] }
 0x56b   :  { %8519 = vmatpush1.bf16.msra.mxu1 %v13492_v28  ;;  %8551 = vmatpush1.bf16.msra.mxu0 %v13493_v49  ;;  %v13503_v28 = vld [vmem:[#allocation47_spill] sm:$0xff]  ;;  %v13504_v49 = vld [vmem:[#allocation48_spill] sm:$0xff] }
 0x56c   :  { %8521 = vmatprep.subr.bf16.mxu1 %v13494_v29  ;;  %8553 = vmatprep.subr.bf16.mxu0 %v13495_v4  ;;  %v13505_v29 = vld [vmem:[#allocation49_spill] sm:$0xff]  ;;  %v13506_v4 = vld [vmem:[#allocation50_spill] sm:$0xff] }
 0x56f   :  { %8523 = vmatpush1.bf16.msra.mxu1 %v13496_v32  ;;  %8555 = vmatpush1.bf16.msra.mxu0 %v13497_v33  ;;  %v13507_v32 = vld [vmem:[#allocation51_spill] sm:$0xff] }
 0x570   :  { %8525 = vmatprep.subr.bf16.mxu1 %v13498_v16  ;;  %8557 = vmatprep.subr.bf16.mxu0 %v13499_v3 }
 0x573   :  { %8527 = vmatpush1.bf16.msra.mxu1 %v13500_v43  ;;  %8559 = vmatpush1.bf16.msra.mxu0 %v13501_v26 }
 0x574   :  { %8529 = vmatprep.subr.bf16.mxu1 %v13502_v19  ;;  %8561 = vmatprep.subr.bf16.mxu0 %v13503_v28 }
 0x577   :  { %8531 = vmatpush1.bf16.msra.mxu1 %v13504_v49  ;;  %8563 = vmatpush1.bf16.msra.mxu0 %v13505_v29 }
 0x578   :  { %8565 = vmatprep.subr.bf16.mxu1 %v13506_v4  ;;  %8597 = vmatprep.subr.bf16.mxu0 %v13507_v32 }
 0x609   :  { %v1998_v33 = vpop.f32.mrb[16].mxu1  ;;  %v2069_v16 = vpop.f32.mrb[18].mxu0 }
 0x60a   :  { %v2078_v22 = vrot.slane %v1998_v33, 5  ;;  %v2000_v3 = vpop.f32.mrb[17].mxu1  ;;  %v2071_v36 = vpop.f32.mrb[19].mxu0  ;;  %v2080_v49 = vrot.slane %v2069_v16, 5 }
 0x60b   :  { %v2079_v43 = vrot.slane %v2000_v3, 5  ;;  %v2081_v29 = vrot.slane %v2071_v36, 5 }
 0x60c   :  { %v2086_v26 = vadd.f32 %v2078_v22, %v13444_v20  ;;  %v2088_v4 = vadd.f32 %v2080_v49, %v13446_v15 }
 0x60d   :  { %v2087_v19 = vadd.f32 %v2079_v43, %v13445_v1  ;;  %v2089_v32 = vadd.f32 %v2081_v29, %v13447_v9 }
 0x60e   :  { %v7670_v37 = vmul.f32 -1.442695, %v2086_v26  ;;  %v7672_v59 = vmul.f32 -1.442695, %v2088_v4 }
 0x60f   :  { %v7671_v28 = vmul.f32 -1.442695, %v2087_v19 }
 0x610   :  { %10441 = vpow2.f32 %v7670_v37  ;;  %v2110_v37 = vrot.slane %v11795_v10, 7 }
 0x611   :  { %10443 = vpow2.f32 %v7671_v28 }
 0x612   :  { %10445 = vtanh.f32 %v2089_v32 }
 0x613   :  { %10447 = vpow2.f32 %v7672_v59 }
 0x61a   :  { %v10442_v44 = vpop.eup %10441 }
 0x61b   :  { %v2099_v33 = vadd.f32 1.0, %v10442_v44  ;;  %v10444_v7 = vpop.eup %10443 }
 0x61c   :  { %v2100_v22 = vadd.f32 1.0, %v10444_v7  ;;  %v10446_v3 = vpop.eup %10445 }
 0x61d   :  { %10449 = vrcp.f32 %v2099_v33  ;;  %v10448_v43 = vpop.eup %10447 }
 0x61e   :  { %10451 = vrcp.f32 %v2100_v22  ;;  %v2101_v19 = vadd.f32 1.0, %v10448_v43 }
 0x620   :  { %10453 = vrcp.f32 %v2101_v19 }
 0x627   :  { %v10450_v26 = vpop.eup %10449 }
 0x628   :  { %v2113_v16 = vmul.f32 %v10450_v26, %v10446_v3  ;;  %v10452_v36 = vpop.eup %10451 }
 0x629   :  { %v2112_v28 = vmul.f32 %v10452_v36, %v2110_v37 }
 0x62a   :  { %v10454_v26 = vpop.eup %10453 }
 0x62b   :  { %v11888_v49 = vadd.f32 %v2113_v16, %v2112_v28 }
 0x62d   :  { %v2186_v4 = vpop.f32.mrb[18].mxu1  ;;  %v2257_v44 = vpop.f32.mrb[20].mxu0  ;;  %10455 = vtanh.f32 %v11888_v49 }
 0x62e   :  { %v2266_v59 = vrot.slane %v2186_v4, 4  ;;  %v2188_v32 = vpop.f32.mrb[19].mxu1  ;;  %v2259_v7 = vpop.f32.mrb[21].mxu0  ;;  %v2268_v43 = vrot.slane %v2257_v44, 4 }
 0x62f   :  { %v2267_v29 = vrot.slane %v2188_v32, 4  ;;  %v2269_v37 = vrot.slane %v2259_v7, 4 }
 0x630   :  { %v2274_v33 = vadd.f32 %v2266_v59, %v11597_v57  ;;  %v2276_v36 = vadd.f32 %v2268_v43, %v11615_v21 }
 0x631   :  { %v2275_v22 = vadd.f32 %v2267_v29, %v11602_v31  ;;  %v2277_v28 = vadd.f32 %v2269_v37, %v11619_v63 }
 0x632   :  { %v7673_v10 = vmul.f32 -1.442695, %v2274_v33  ;;  %v7675_v32 = vmul.f32 -1.442695, %v2276_v36 }
 0x633   :  { %v7674_v3 = vmul.f32 -1.442695, %v2275_v22 }
 0x634   :  { %10457 = vpow2.f32 %v7673_v10 }
 0x635   :  { %10459 = vpow2.f32 %v7674_v3  ;;  %v2298_v3 = vrot.slane %v11831_v48, 1 }
 0x636   :  { %10461 = vtanh.f32 %v2277_v28 }
 0x637   :  { %v10456_v16 = vpop.eup %10455  ;;  %10463 = vpow2.f32 %v7675_v32  ;;  %v13509_v32 = vld [vmem:[#allocation23_spill] sm:$0xff] }
 0x638   :  { %v2116_v19 = vmul.f32 %v10456_v16, %v10454_v26 }
 0x63a   :  { %v2306_v4 = vrot.slane %v2116_v19, 3  ;;  %v11897_v59 = vsel %vm3801_vm4, %v11806_v12, %v2116_v19 }
 0x63c   :  { %2373 = vmatmul.mubr.f32.vlgmr.msra.gmra.mrb[20].mxu1 %v2306_v4  ;;  %2444 = vmatmul.mubr.f32.vlgmr.msra.gmra.mrb[22].mxu0 %v2306_v4 }
 0x63d   :  { %8567 = vmatpush1.bf16.msra.mxu1 %v11415_v50  ;;  %8599 = vmatpush1.bf16.msra.mxu0 %v11417_v51 }
 0x63e   :  { %v10458_v29 = vpop.eup %10457  ;;  %8569 = vmatprep.subr.bf16.mxu1 %v11421_v60  ;;  %8601 = vmatprep.subr.bf16.mxu0 %v11423_v61 }
 0x63f   :  { %v2287_v44 = vadd.f32 1.0, %v10458_v29  ;;  %v10460_v7 = vpop.eup %10459  ;;  %2560 = vmatprep.mubr.f32.mxu1 %v13409_v34  ;;  %2631 = vmatprep.mubr.f32.mxu0 %v13409_v34  ;;  %v13510_v29 = vld [vmem:[#allocation24_spill] sm:$0xff] }
 0x640   :  { %v2288_v12 = vadd.f32 1.0, %v10460_v7  ;;  %v10462_v33 = vpop.eup %10461  ;;  %v13512_v7 = vld [vmem:[#allocation26_spill] sm:$0xff] }
 0x641   :  { %10465 = vrcp.f32 %v2287_v44  ;;  %8571 = vmatpush1.bf16.msra.mxu1 %v11429_v13  ;;  %8603 = vmatpush1.bf16.msra.mxu0 %v11431_v14  ;;  %v10464_v22 = vpop.eup %10463  ;;  %v13511_v44 = vld [vmem:[#allocation25_spill] sm:$0xff] }
 0x642   :  { %10467 = vrcp.f32 %v2288_v12  ;;  %8573 = vmatprep.subr.bf16.mxu1 %v11435_v23  ;;  %8605 = vmatprep.subr.bf16.mxu0 %v11437_v24  ;;  %v2289_v37 = vadd.f32 1.0, %v10464_v22  ;;  %v13513_v12 = vld [vmem:[#allocation27_spill] sm:$0xff]  ;;  %v13515_v22 = vld [vmem:[#allocation29_spill] sm:$0xff] }
 0x644   :  { %10469 = vrcp.f32 %v2289_v37  ;;  %v13520_v37 = vld [vmem:[#allocation34_spill] sm:$0xff] }
 0x645   :  { %8575 = vmatpush1.bf16.msra.mxu1 %v13417_v45  ;;  %8607 = vmatpush1.bf16.msra.mxu0 %v13418_v42 }
 0x646   :  { %8577 = vmatprep.subr.bf16.mxu1 %v13419_v18  ;;  %8609 = vmatprep.subr.bf16.mxu0 %v13420_v11 }
 0x649   :  { %8579 = vmatpush1.bf16.msra.mxu1 %v13421_v41  ;;  %8611 = vmatpush1.bf16.msra.mxu0 %v13422_v40 }
 0x64a   :  { %8581 = vmatprep.subr.bf16.mxu1 %v13423_v35  ;;  %8613 = vmatprep.subr.bf16.mxu0 %v13424_v56 }
 0x64b   :  { %v10466_v10 = vpop.eup %10465 }
 0x64c   :  { %v2301_v43 = vmul.f32 %v10466_v10, %v10462_v33  ;;  %v10468_v26 = vpop.eup %10467  ;;  %v13514_v33 = vld [vmem:[#allocation28_spill] sm:$0xff]  ;;  %v13516_v10 = vld [vmem:[#allocation30_spill] sm:$0xff] }
 0x64d   :  { %v2300_v16 = vmul.f32 %v10468_v26, %v2298_v3  ;;  %8583 = vmatpush1.bf16.msra.mxu1 %v13425_v62  ;;  %8615 = vmatpush1.bf16.msra.mxu0 %v13426_v30  ;;  %v13517_v3 = vld [vmem:[#allocation31_spill] sm:$0xff]  ;;  %v13519_v26 = vld [vmem:[#allocation33_spill] sm:$0xff] }
 0x64e   :  { %8585 = vmatprep.subr.bf16.mxu1 %v11473_v5  ;;  %8617 = vmatprep.subr.bf16.mxu0 %v11475_v6  ;;  %v10470_v48 = vpop.eup %10469 }
 0x64f   :  { %v11922_v36 = vadd.f32 %v2301_v43, %v2300_v16  ;;  %v13518_v43 = vld [vmem:[#allocation32_spill] sm:$0xff]  ;;  %v13521_v16 = vld [vmem:[#allocation35_spill] sm:$0xff] }
 0x651   :  { %10471 = vtanh.f32 %v11922_v36  ;;  %8587 = vmatpush1.bf16.msra.mxu1 %v11479_v25  ;;  %8619 = vmatpush1.bf16.msra.mxu0 %v11481_v27 }
 0x652   :  { %8589 = vmatprep.subr.bf16.mxu1 %v11485_v8  ;;  %8621 = vmatprep.subr.bf16.mxu0 %v11487_v17 }
 0x655   :  { %8591 = vmatpush1.bf16.msra.mxu1 %v11491_v0  ;;  %8623 = vmatpush1.bf16.msra.mxu0 %v11493_v2 }
 0x656   :  { %8593 = vmatprep.subr.bf16.mxu1 %v11497_v52  ;;  %8625 = vmatprep.subr.bf16.mxu0 %v11499_v53 }
 0x659   :  { %8595 = vmatpush1.bf16.msra.mxu1 %v11503_v38  ;;  %8627 = vmatpush1.bf16.msra.mxu0 %v11505_v39 }
 0x65a   :  { %8629 = vmatprep.subr.bf16.mxu1 %v11311_v46  ;;  %8661 = vmatprep.subr.bf16.mxu0 %v11313_v47 }
 0x65b   :  { %v10472_v19 = vpop.eup %10471 }
 0x65c   :  { %v11937_v28 = vmul.f32 %v10472_v19, %v10470_v48  ;;  %v13522_v48 = vld [vmem:[#allocation36_spill] sm:$0xff]  ;;  %v13523_v19 = vld [vmem:[#allocation37_spill] sm:$0xff] }
 0x65e   :  { %13508 = vst [vmem:[#allocation55_spill] sm:$0xff] %v11937_v28  ;;  %v2494_v4 = vrot.slane %v11937_v28, 4  ;;  %v13525_v28 = vld [vmem:[#allocation39_spill] sm:$0xff] }
 0x660   :  { %2561 = vmatmul.mubr.f32.vlgmr.msra.gmra.mrb[22].mxu1 %v2494_v4  ;;  %2632 = vmatmul.mubr.f32.vlgmr.msra.gmra.mrb[24].mxu0 %v2494_v4  ;;  %v13524_v4 = vld [vmem:[#allocation38_spill] sm:$0xff] }
 0x661   :  { %8631 = vmatpush1.bf16.msra.mxu1 %v11315_v54  ;;  %8663 = vmatpush1.bf16.msra.mxu0 %v11317_v55 }
 0x662   :  { %8633 = vmatprep.subr.bf16.mxu1 %v11321_v58  ;;  %8665 = vmatprep.subr.bf16.mxu0 %v13509_v32 }
 0x663   :  { %2748 = vmatprep.mubr.f32.mxu1 %v13409_v34  ;;  %2819 = vmatprep.mubr.f32.mxu0 %v13409_v34 }
 0x665   :  { %8635 = vmatpush1.bf16.msra.mxu1 %v13510_v29  ;;  %8667 = vmatpush1.bf16.msra.mxu0 %v13511_v44 }
 0x666   :  { %8637 = vmatprep.subr.bf16.mxu1 %v13512_v7  ;;  %8669 = vmatprep.subr.bf16.mxu0 %v13513_v12 }
 0x669   :  { %8639 = vmatpush1.bf16.msra.mxu1 %v13514_v33  ;;  %8671 = vmatpush1.bf16.msra.mxu0 %v13515_v22  ;;  %v13526_v22 = vld [vmem:[#allocation40_spill] sm:$0xff] }
 0x66a   :  { %8641 = vmatprep.subr.bf16.mxu1 %v13516_v10  ;;  %8673 = vmatprep.subr.bf16.mxu0 %v13517_v3  ;;  %v13527_v10 = vld [vmem:[#allocation41_spill] sm:$0xff]  ;;  %v13528_v3 = vld [vmem:[#allocation42_spill] sm:$0xff] }
 0x66d   :  { %8643 = vmatpush1.bf16.msra.mxu1 %v13518_v43  ;;  %8675 = vmatpush1.bf16.msra.mxu0 %v13519_v26  ;;  %v13529_v43 = vld [vmem:[#allocation43_spill] sm:$0xff]  ;;  %v13530_v26 = vld [vmem:[#allocation44_spill] sm:$0xff] }
 0x66e   :  { %8645 = vmatprep.subr.bf16.mxu1 %v13520_v37  ;;  %8677 = vmatprep.subr.bf16.mxu0 %v13521_v16  ;;  %v13531_v37 = vld [vmem:[#allocation45_spill] sm:$0xff]  ;;  %v13532_v16 = vld [vmem:[#allocation46_spill] sm:$0xff] }
 0x671   :  { %8647 = vmatpush1.bf16.msra.mxu1 %v13522_v48  ;;  %8679 = vmatpush1.bf16.msra.mxu0 %v13523_v19  ;;  %v13533_v48 = vld [vmem:[#allocation47_spill] sm:$0xff]  ;;  %v13534_v19 = vld [vmem:[#allocation48_spill] sm:$0xff] }
 0x672   :  { %8649 = vmatprep.subr.bf16.mxu1 %v13524_v4  ;;  %8681 = vmatprep.subr.bf16.mxu0 %v13525_v28  ;;  %v13535_v4 = vld [vmem:[#allocation49_spill] sm:$0xff]  ;;  %v13536_v28 = vld [vmem:[#allocation50_spill] sm:$0xff] }
 0x675   :  { %8651 = vmatpush1.bf16.msra.mxu1 %v13526_v22  ;;  %8683 = vmatpush1.bf16.msra.mxu0 %v13527_v10  ;;  %v13537_v22 = vld [vmem:[#allocation51_spill] sm:$0xff] }
 0x676   :  { %8653 = vmatprep.subr.bf16.mxu1 %v13528_v3  ;;  %8685 = vmatprep.subr.bf16.mxu0 %v13529_v43 }
 0x679   :  { %8655 = vmatpush1.bf16.msra.mxu1 %v13530_v26  ;;  %8687 = vmatpush1.bf16.msra.mxu0 %v13531_v37 }
 0x67a   :  { %8657 = vmatprep.subr.bf16.mxu1 %v13532_v16  ;;  %8689 = vmatprep.subr.bf16.mxu0 %v13533_v48 }
 0x67d   :  { %8659 = vmatpush1.bf16.msra.mxu1 %v13534_v19  ;;  %8691 = vmatpush1.bf16.msra.mxu0 %v13535_v4 }
 0x67e   :  { %8693 = vmatprep.subr.bf16.mxu1 %v13536_v28  ;;  %8725 = vmatprep.subr.bf16.mxu0 %v13537_v22 }
 0x70f   :  { %v2374_v10 = vpop.f32.mrb[20].mxu1  ;;  %v2445_v3 = vpop.f32.mrb[22].mxu0 }
 0x710   :  { %v2454_v33 = vrot.slane %v2374_v10, 4  ;;  %v2376_v43 = vpop.f32.mrb[21].mxu1  ;;  %v2447_v12 = vpop.f32.mrb[23].mxu0  ;;  %v2456_v19 = vrot.slane %v2445_v3, 4 }
 0x711   :  { %v2455_v26 = vrot.slane %v2376_v43, 4  ;;  %v2457_v4 = vrot.slane %v2447_v12, 4 }
 0x712   :  { %v2462_v37 = vadd.f32 %v2454_v33, %v13444_v20  ;;  %v2464_v28 = vadd.f32 %v2456_v19, %v13446_v15 }
 0x713   :  { %v2463_v16 = vadd.f32 %v2455_v26, %v13445_v1  ;;  %v2465_v22 = vadd.f32 %v2457_v4, %v13447_v9 }
 0x714   :  { %v7676_v7 = vmul.f32 -1.442695, %v2462_v37  ;;  %v7678_v44 = vmul.f32 -1.442695, %v2464_v28 }
 0x715   :  { %v7677_v48 = vmul.f32 -1.442695, %v2463_v16 }
 0x716   :  { %10473 = vpow2.f32 %v7676_v7  ;;  %v2486_v7 = vrot.slane %v11888_v49, 7 }
 0x717   :  { %10475 = vpow2.f32 %v7677_v48 }
 0x718   :  { %10477 = vtanh.f32 %v2465_v22 }
 0x719   :  { %10479 = vpow2.f32 %v7678_v44 }
 0x720   :  { %v10474_v29 = vpop.eup %10473 }
 0x721   :  { %v2475_v10 = vadd.f32 1.0, %v10474_v29  ;;  %v10476_v32 = vpop.eup %10475 }
 0x722   :  { %v2476_v33 = vadd.f32 1.0, %v10476_v32  ;;  %v10478_v43 = vpop.eup %10477 }
 0x723   :  { %10481 = vrcp.f32 %v2475_v10  ;;  %v10480_v26 = vpop.eup %10479 }
 0x724   :  { %10483 = vrcp.f32 %v2476_v33  ;;  %v2477_v16 = vadd.f32 1.0, %v10480_v26 }
 0x726   :  { %10485 = vrcp.f32 %v2477_v16 }
 0x72d   :  { %v10482_v37 = vpop.eup %10481 }
 0x72e   :  { %v2489_v3 = vmul.f32 %v10482_v37, %v10478_v43  ;;  %v10484_v12 = vpop.eup %10483 }
 0x72f   :  { %v2488_v48 = vmul.f32 %v10484_v12, %v2486_v7 }
 0x730   :  { %v10486_v37 = vpop.eup %10485 }
 0x731   :  { %v11979_v19 = vadd.f32 %v2489_v3, %v2488_v48 }
 0x733   :  { %v2562_v28 = vpop.f32.mrb[22].mxu1  ;;  %v2633_v29 = vpop.f32.mrb[24].mxu0  ;;  %10487 = vtanh.f32 %v11979_v19 }
 0x734   :  { %v2642_v44 = vrot.slane %v2562_v28, 5  ;;  %v2564_v22 = vpop.f32.mrb[23].mxu1  ;;  %v2635_v32 = vpop.f32.mrb[25].mxu0  ;;  %v2644_v26 = vrot.slane %v2633_v29, 5 }
 0x735   :  { %v2643_v4 = vrot.slane %v2564_v22, 5  ;;  %v2645_v7 = vrot.slane %v2635_v32, 5 }
 0x736   :  { %v2650_v10 = vadd.f32 %v2642_v44, %v11597_v57  ;;  %v2652_v12 = vadd.f32 %v2644_v26, %v11615_v21 }
 0x737   :  { %v2651_v33 = vadd.f32 %v2643_v4, %v11602_v31  ;;  %v2653_v48 = vadd.f32 %v2645_v7, %v11619_v63 }
 0x738   :  { %v7679_v49 = vmul.f32 -1.442695, %v2650_v10  ;;  %v7681_v22 = vmul.f32 -1.442695, %v2652_v12 }
 0x739   :  { %v7680_v43 = vmul.f32 -1.442695, %v2651_v33 }
 0x73a   :  { %10489 = vpow2.f32 %v7679_v49 }
 0x73b   :  { %10491 = vpow2.f32 %v7680_v43  ;;  %v2674_v43 = vrot.slane %v11922_v36, 1 }
 0x73c   :  { %10493 = vtanh.f32 %v2653_v48 }
 0x73d   :  { %v10488_v3 = vpop.eup %10487  ;;  %10495 = vpow2.f32 %v7681_v22  ;;  %v13539_v22 = vld [vmem:[#allocation23_spill] sm:$0xff] }
 0x73e   :  { %v2492_v16 = vmul.f32 %v10488_v3, %v10486_v37 }
 0x740   :  { %v2682_v28 = vrot.slane %v2492_v16, 4  ;;  %v11988_v44 = vsel %vm3803_vm5, %v11897_v59, %v2492_v16 }
 0x742   :  { %2749 = vmatmul.mubr.f32.vlgmr.msra.gmra.mrb[24].mxu1 %v2682_v28  ;;  %2820 = vmatmul.mubr.f32.vlgmr.msra.gmra.mrb[26].mxu0 %v2682_v28 }
 0x743   :  { %8695 = vmatpush1.bf16.msra.mxu1 %v11415_v50  ;;  %8727 = vmatpush1.bf16.msra.mxu0 %v11417_v51 }
 0x744   :  { %v10490_v4 = vpop.eup %10489  ;;  %8697 = vmatprep.subr.bf16.mxu1 %v11421_v60  ;;  %8729 = vmatprep.subr.bf16.mxu0 %v11423_v61 }
 0x745   :  { %v2663_v29 = vadd.f32 1.0, %v10490_v4  ;;  %v10492_v32 = vpop.eup %10491  ;;  %2936 = vmatprep.mubr.f32.mxu1 %v13409_v34  ;;  %3007 = vmatprep.mubr.f32.mxu0 %v13409_v34  ;;  %v13540_v4 = vld [vmem:[#allocation24_spill] sm:$0xff] }
 0x746   :  { %v2664_v59 = vadd.f32 1.0, %v10492_v32  ;;  %v10494_v10 = vpop.eup %10493  ;;  %v13542_v32 = vld [vmem:[#allocation26_spill] sm:$0xff] }
 0x747   :  { %10497 = vrcp.f32 %v2663_v29  ;;  %8699 = vmatpush1.bf16.msra.mxu1 %v11429_v13  ;;  %8731 = vmatpush1.bf16.msra.mxu0 %v11431_v14  ;;  %v10496_v33 = vpop.eup %10495  ;;  %v13541_v29 = vld [vmem:[#allocation25_spill] sm:$0xff] }
 0x748   :  { %10499 = vrcp.f32 %v2664_v59  ;;  %8701 = vmatprep.subr.bf16.mxu1 %v11435_v23  ;;  %8733 = vmatprep.subr.bf16.mxu0 %v11437_v24  ;;  %v2665_v7 = vadd.f32 1.0, %v10496_v33  ;;  %v13543_v59 = vld [vmem:[#allocation27_spill] sm:$0xff]  ;;  %v13545_v33 = vld [vmem:[#allocation29_spill] sm:$0xff] }
 0x74a   :  { %10501 = vrcp.f32 %v2665_v7  ;;  %v13550_v7 = vld [vmem:[#allocation34_spill] sm:$0xff] }
 0x74b   :  { %8703 = vmatpush1.bf16.msra.mxu1 %v13417_v45  ;;  %8735 = vmatpush1.bf16.msra.mxu0 %v13418_v42 }
 0x74c   :  { %8705 = vmatprep.subr.bf16.mxu1 %v13419_v18  ;;  %8737 = vmatprep.subr.bf16.mxu0 %v13420_v11 }
 0x74f   :  { %8707 = vmatpush1.bf16.msra.mxu1 %v13421_v41  ;;  %8739 = vmatpush1.bf16.msra.mxu0 %v13422_v40 }
 0x750   :  { %8709 = vmatprep.subr.bf16.mxu1 %v13423_v35  ;;  %8741 = vmatprep.subr.bf16.mxu0 %v13424_v56 }
 0x751   :  { %v10498_v49 = vpop.eup %10497 }
 0x752   :  { %v2677_v26 = vmul.f32 %v10498_v49, %v10494_v10  ;;  %v10500_v37 = vpop.eup %10499  ;;  %v13544_v10 = vld [vmem:[#allocation28_spill] sm:$0xff]  ;;  %v13546_v49 = vld [vmem:[#allocation30_spill] sm:$0xff] }
 0x753   :  { %v2676_v3 = vmul.f32 %v10500_v37, %v2674_v43  ;;  %8711 = vmatpush1.bf16.msra.mxu1 %v13425_v62  ;;  %8743 = vmatpush1.bf16.msra.mxu0 %v13426_v30  ;;  %v13547_v43 = vld [vmem:[#allocation31_spill] sm:$0xff]  ;;  %v13549_v37 = vld [vmem:[#allocation33_spill] sm:$0xff] }
 0x754   :  { %8713 = vmatprep.subr.bf16.mxu1 %v11473_v5  ;;  %8745 = vmatprep.subr.bf16.mxu0 %v11475_v6  ;;  %v10502_v36 = vpop.eup %10501 }
 0x755   :  { %v12013_v12 = vadd.f32 %v2677_v26, %v2676_v3  ;;  %v13548_v26 = vld [vmem:[#allocation32_spill] sm:$0xff]  ;;  %v13551_v3 = vld [vmem:[#allocation35_spill] sm:$0xff] }
 0x757   :  { %10503 = vtanh.f32 %v12013_v12  ;;  %8715 = vmatpush1.bf16.msra.mxu1 %v11479_v25  ;;  %8747 = vmatpush1.bf16.msra.mxu0 %v11481_v27 }
 0x758   :  { %8717 = vmatprep.subr.bf16.mxu1 %v11485_v8  ;;  %8749 = vmatprep.subr.bf16.mxu0 %v11487_v17 }
 0x75b   :  { %8719 = vmatpush1.bf16.msra.mxu1 %v11491_v0  ;;  %8751 = vmatpush1.bf16.msra.mxu0 %v11493_v2 }
 0x75c   :  { %8721 = vmatprep.subr.bf16.mxu1 %v11497_v52  ;;  %8753 = vmatprep.subr.bf16.mxu0 %v11499_v53 }
 0x75f   :  { %8723 = vmatpush1.bf16.msra.mxu1 %v11503_v38  ;;  %8755 = vmatpush1.bf16.msra.mxu0 %v11505_v39 }
 0x760   :  { %8757 = vmatprep.subr.bf16.mxu1 %v11311_v46  ;;  %8789 = vmatprep.subr.bf16.mxu0 %v11313_v47 }
 0x761   :  { %v10504_v16 = vpop.eup %10503 }
 0x762   :  { %v12028_v48 = vmul.f32 %v10504_v16, %v10502_v36  ;;  %v13552_v36 = vld [vmem:[#allocation36_spill] sm:$0xff]  ;;  %v13553_v16 = vld [vmem:[#allocation37_spill] sm:$0xff] }
 0x764   :  { %13538 = vst [vmem:[#allocation56_spill] sm:$0xff] %v12028_v48  ;;  %v2870_v28 = vrot.slane %v12028_v48, 3  ;;  %v13555_v48 = vld [vmem:[#allocation39_spill] sm:$0xff] }
 0x766   :  { %2937 = vmatmul.mubr.f32.vlgmr.msra.gmra.mrb[26].mxu1 %v2870_v28  ;;  %3008 = vmatmul.mubr.f32.vlgmr.msra.gmra.mrb[28].mxu0 %v2870_v28  ;;  %v13554_v28 = vld [vmem:[#allocation38_spill] sm:$0xff] }
 0x767   :  { %8759 = vmatpush1.bf16.msra.mxu1 %v11315_v54  ;;  %8791 = vmatpush1.bf16.msra.mxu0 %v11317_v55 }
 0x768   :  { %8761 = vmatprep.subr.bf16.mxu1 %v11321_v58  ;;  %8793 = vmatprep.subr.bf16.mxu0 %v13539_v22 }
 0x769   :  { %3124 = vmatprep.mubr.f32.mxu1 %v13409_v34  ;;  %3195 = vmatprep.mubr.f32.mxu0 %v13409_v34 }
 0x76b   :  { %8763 = vmatpush1.bf16.msra.mxu1 %v13540_v4  ;;  %8795 = vmatpush1.bf16.msra.mxu0 %v13541_v29 }
 0x76c   :  { %8765 = vmatprep.subr.bf16.mxu1 %v13542_v32  ;;  %8797 = vmatprep.subr.bf16.mxu0 %v13543_v59 }
 0x76f   :  { %8767 = vmatpush1.bf16.msra.mxu1 %v13544_v10  ;;  %8799 = vmatpush1.bf16.msra.mxu0 %v13545_v33  ;;  %v13556_v33 = vld [vmem:[#allocation40_spill] sm:$0xff] }
 0x770   :  { %8769 = vmatprep.subr.bf16.mxu1 %v13546_v49  ;;  %8801 = vmatprep.subr.bf16.mxu0 %v13547_v43  ;;  %v13557_v49 = vld [vmem:[#allocation41_spill] sm:$0xff]  ;;  %v13558_v43 = vld [vmem:[#allocation42_spill] sm:$0xff] }
 0x773   :  { %8771 = vmatpush1.bf16.msra.mxu1 %v13548_v26  ;;  %8803 = vmatpush1.bf16.msra.mxu0 %v13549_v37  ;;  %v13559_v26 = vld [vmem:[#allocation43_spill] sm:$0xff]  ;;  %v13560_v37 = vld [vmem:[#allocation44_spill] sm:$0xff] }
 0x774   :  { %8773 = vmatprep.subr.bf16.mxu1 %v13550_v7  ;;  %8805 = vmatprep.subr.bf16.mxu0 %v13551_v3  ;;  %v13561_v7 = vld [vmem:[#allocation45_spill] sm:$0xff]  ;;  %v13562_v3 = vld [vmem:[#allocation46_spill] sm:$0xff] }
 0x777   :  { %8775 = vmatpush1.bf16.msra.mxu1 %v13552_v36  ;;  %8807 = vmatpush1.bf16.msra.mxu0 %v13553_v16  ;;  %v13563_v36 = vld [vmem:[#allocation47_spill] sm:$0xff]  ;;  %v13564_v16 = vld [vmem:[#allocation48_spill] sm:$0xff] }
 0x778   :  { %8777 = vmatprep.subr.bf16.mxu1 %v13554_v28  ;;  %8809 = vmatprep.subr.bf16.mxu0 %v13555_v48  ;;  %v13565_v28 = vld [vmem:[#allocation49_spill] sm:$0xff]  ;;  %v13566_v48 = vld [vmem:[#allocation50_spill] sm:$0xff] }
 0x77b   :  { %8779 = vmatpush1.bf16.msra.mxu1 %v13556_v33  ;;  %8811 = vmatpush1.bf16.msra.mxu0 %v13557_v49  ;;  %v13567_v33 = vld [vmem:[#allocation51_spill] sm:$0xff] }
 0x77c   :  { %8781 = vmatprep.subr.bf16.mxu1 %v13558_v43  ;;  %8813 = vmatprep.subr.bf16.mxu0 %v13559_v26 }
 0x77f   :  { %8783 = vmatpush1.bf16.msra.mxu1 %v13560_v37  ;;  %8815 = vmatpush1.bf16.msra.mxu0 %v13561_v7 }
 0x780   :  { %8785 = vmatprep.subr.bf16.mxu1 %v13562_v3  ;;  %8817 = vmatprep.subr.bf16.mxu0 %v13563_v36 }
 0x783   :  { %8787 = vmatpush1.bf16.msra.mxu1 %v13564_v16  ;;  %8819 = vmatpush1.bf16.msra.mxu0 %v13565_v28 }
 0x784   :  { %8821 = vmatprep.subr.bf16.mxu1 %v13566_v48  ;;  %8853 = vmatprep.subr.bf16.mxu0 %v13567_v33 }
 0x815   :  { %v2750_v49 = vpop.f32.mrb[24].mxu1  ;;  %v2821_v43 = vpop.f32.mrb[26].mxu0 }
 0x816   :  { %v2830_v10 = vrot.slane %v2750_v49, 3  ;;  %v2752_v26 = vpop.f32.mrb[25].mxu1  ;;  %v2823_v59 = vpop.f32.mrb[27].mxu0  ;;  %v2832_v16 = vrot.slane %v2821_v43, 3 }
 0x817   :  { %v2831_v37 = vrot.slane %v2752_v26, 3  ;;  %v2833_v28 = vrot.slane %v2823_v59, 3 }
 0x818   :  { %v2838_v7 = vadd.f32 %v2830_v10, %v13444_v20  ;;  %v2840_v48 = vadd.f32 %v2832_v16, %v13446_v15 }
 0x819   :  { %v2839_v3 = vadd.f32 %v2831_v37, %v13445_v1  ;;  %v2841_v33 = vadd.f32 %v2833_v28, %v13447_v9 }
 0x81a   :  { %v7682_v32 = vmul.f32 -1.442695, %v2838_v7  ;;  %v7684_v29 = vmul.f32 -1.442695, %v2840_v48 }
 0x81b   :  { %v7683_v36 = vmul.f32 -1.442695, %v2839_v3 }
 0x81c   :  { %10505 = vpow2.f32 %v7682_v32  ;;  %v2862_v32 = vrot.slane %v11979_v19, 7 }
 0x81d   :  { %10507 = vpow2.f32 %v7683_v36 }
 0x81e   :  { %10509 = vtanh.f32 %v2841_v33 }
 0x81f   :  { %10511 = vpow2.f32 %v7684_v29 }
 0x826   :  { %v10506_v4 = vpop.eup %10505 }
 0x827   :  { %v2851_v49 = vadd.f32 1.0, %v10506_v4  ;;  %v10508_v22 = vpop.eup %10507 }
 0x828   :  { %v2852_v10 = vadd.f32 1.0, %v10508_v22  ;;  %v10510_v26 = vpop.eup %10509 }
 0x829   :  { %10513 = vrcp.f32 %v2851_v49  ;;  %v10512_v37 = vpop.eup %10511 }
 0x82a   :  { %10515 = vrcp.f32 %v2852_v10  ;;  %v2853_v3 = vadd.f32 1.0, %v10512_v37 }
 0x82c   :  { %10517 = vrcp.f32 %v2853_v3 }
 0x833   :  { %v10514_v7 = vpop.eup %10513 }
 0x834   :  { %v2865_v43 = vmul.f32 %v10514_v7, %v10510_v26  ;;  %v10516_v59 = vpop.eup %10515 }
 0x835   :  { %v2864_v36 = vmul.f32 %v10516_v59, %v2862_v32 }
 0x836   :  { %v10518_v7 = vpop.eup %10517 }
 0x837   :  { %v12070_v16 = vadd.f32 %v2865_v43, %v2864_v36 }
 0x839   :  { %v2938_v48 = vpop.f32.mrb[26].mxu1  ;;  %v3009_v4 = vpop.f32.mrb[28].mxu0  ;;  %10519 = vtanh.f32 %v12070_v16 }
 0x83a   :  { %v3018_v29 = vrot.slane %v2938_v48, 6  ;;  %v2940_v33 = vpop.f32.mrb[27].mxu1  ;;  %v3011_v22 = vpop.f32.mrb[29].mxu0  ;;  %v3020_v37 = vrot.slane %v3009_v4, 6 }
 0x83b   :  { %v3019_v28 = vrot.slane %v2940_v33, 6  ;;  %v3021_v32 = vrot.slane %v3011_v22, 6 }
 0x83c   :  { %v3026_v49 = vadd.f32 %v3018_v29, %v11597_v57  ;;  %v3028_v59 = vadd.f32 %v3020_v37, %v11615_v21 }
 0x83d   :  { %v3027_v10 = vadd.f32 %v3019_v28, %v11602_v31  ;;  %v3029_v36 = vadd.f32 %v3021_v32, %v11619_v63 }
 0x83e   :  { %v7685_v19 = vmul.f32 -1.442695, %v3026_v49  ;;  %v7687_v33 = vmul.f32 -1.442695, %v3028_v59 }
 0x83f   :  { %v7686_v26 = vmul.f32 -1.442695, %v3027_v10 }
 0x840   :  { %10521 = vpow2.f32 %v7685_v19 }
 0x841   :  { %10523 = vpow2.f32 %v7686_v26  ;;  %v3050_v26 = vrot.slane %v12013_v12, 1 }
 0x842   :  { %10525 = vtanh.f32 %v3029_v36 }
 0x843   :  { %v10520_v43 = vpop.eup %10519  ;;  %10527 = vpow2.f32 %v7687_v33  ;;  %v13568_v33 = vld [vmem:[#allocation23_spill] sm:$0xff] }
 0x844   :  { %v2868_v3 = vmul.f32 %v10520_v43, %v10518_v7 }
 0x846   :  { %v3058_v48 = vrot.slane %v2868_v3, 5  ;;  %v12079_v29 = vsel %vm3805_vm6, %v11988_v44, %v2868_v3 }
 0x848   :  { %3125 = vmatmul.mubr.f32.vlgmr.msra.gmra.mrb[28].mxu1 %v3058_v48  ;;  %3196 = vmatmul.mubr.f32.vlgmr.msra.gmra.mrb[30].mxu0 %v3058_v48 }
 0x849   :  { %8823 = vmatpush1.bf16.msra.mxu1 %v11415_v50  ;;  %8855 = vmatpush1.bf16.msra.mxu0 %v11417_v51 }
 0x84a   :  { %v10522_v28 = vpop.eup %10521  ;;  %8825 = vmatprep.subr.bf16.mxu1 %v11421_v60  ;;  %8857 = vmatprep.subr.bf16.mxu0 %v11423_v61 }
 0x84b   :  { %v3039_v4 = vadd.f32 1.0, %v10522_v28  ;;  %v10524_v22 = vpop.eup %10523  ;;  %3312 = vmatprep.mubr.f32.mxu1 %v13409_v34  ;;  %3383 = vmatprep.mubr.f32.mxu0 %v13409_v34  ;;  %v13571_v28 = vld [vmem:[#allocation26_spill] sm:$0xff] }
 0x84c   :  { %v3040_v44 = vadd.f32 1.0, %v10524_v22  ;;  %v10526_v49 = vpop.eup %10525  ;;  %v13573_v22 = vld [vmem:[#allocation28_spill] sm:$0xff] }
 0x84d   :  { %10529 = vrcp.f32 %v3039_v4  ;;  %8827 = vmatpush1.bf16.msra.mxu1 %v11429_v13  ;;  %8859 = vmatpush1.bf16.msra.mxu0 %v11431_v14  ;;  %v10528_v10 = vpop.eup %10527  ;;  %v13572_v4 = vld [vmem:[#allocation27_spill] sm:$0xff] }
 0x84e   :  { %10531 = vrcp.f32 %v3040_v44  ;;  %8829 = vmatprep.subr.bf16.mxu1 %v11435_v23  ;;  %8861 = vmatprep.subr.bf16.mxu0 %v11437_v24  ;;  %v3041_v32 = vadd.f32 1.0, %v10528_v10  ;;  %v13577_v44 = vld [vmem:[#allocation32_spill] sm:$0xff]  ;;  %v13579_v10 = vld [vmem:[#allocation34_spill] sm:$0xff] }
 0x850   :  { %10533 = vrcp.f32 %v3041_v32  ;;  %v13584_v32 = vld [vmem:[#allocation39_spill] sm:$0xff] }
 0x851   :  { %8831 = vmatpush1.bf16.msra.mxu1 %v13417_v45  ;;  %8863 = vmatpush1.bf16.msra.mxu0 %v13418_v42 }
 0x852   :  { %8833 = vmatprep.subr.bf16.mxu1 %v13419_v18  ;;  %8865 = vmatprep.subr.bf16.mxu0 %v13420_v11 }
 0x855   :  { %8835 = vmatpush1.bf16.msra.mxu1 %v13421_v41  ;;  %8867 = vmatpush1.bf16.msra.mxu0 %v13422_v40 }
 0x856   :  { %8837 = vmatprep.subr.bf16.mxu1 %v13423_v35  ;;  %8869 = vmatprep.subr.bf16.mxu0 %v13424_v56 }
 0x857   :  { %v10530_v19 = vpop.eup %10529 }
 0x858   :  { %v3053_v37 = vmul.f32 %v10530_v19, %v10526_v49  ;;  %v10532_v7 = vpop.eup %10531  ;;  %v13578_v49 = vld [vmem:[#allocation33_spill] sm:$0xff]  ;;  %v13580_v19 = vld [vmem:[#allocation35_spill] sm:$0xff] }
 0x859   :  { %v3052_v43 = vmul.f32 %v10532_v7, %v3050_v26  ;;  %8839 = vmatpush1.bf16.msra.mxu1 %v13425_v62  ;;  %8871 = vmatpush1.bf16.msra.mxu0 %v13426_v30  ;;  %v13581_v26 = vld [vmem:[#allocation36_spill] sm:$0xff]  ;;  %v13583_v7 = vld [vmem:[#allocation38_spill] sm:$0xff] }
 0x85a   :  { %8841 = vmatprep.subr.bf16.mxu1 %v11473_v5  ;;  %8873 = vmatprep.subr.bf16.mxu0 %v11475_v6  ;;  %v10534_v12 = vpop.eup %10533 }
 0x85b   :  { %v12104_v59 = vadd.f32 %v3053_v37, %v3052_v43  ;;  %v13582_v37 = vld [vmem:[#allocation37_spill] sm:$0xff]  ;;  %v13585_v43 = vld [vmem:[#allocation40_spill] sm:$0xff] }
 0x85d   :  { %10535 = vtanh.f32 %v12104_v59  ;;  %8843 = vmatpush1.bf16.msra.mxu1 %v11479_v25  ;;  %8875 = vmatpush1.bf16.msra.mxu0 %v11481_v27 }
 0x85e   :  { %8845 = vmatprep.subr.bf16.mxu1 %v11485_v8  ;;  %8877 = vmatprep.subr.bf16.mxu0 %v11487_v17 }
 0x861   :  { %8847 = vmatpush1.bf16.msra.mxu1 %v11491_v0  ;;  %8879 = vmatpush1.bf16.msra.mxu0 %v11493_v2 }
 0x862   :  { %8849 = vmatprep.subr.bf16.mxu1 %v11497_v52  ;;  %8881 = vmatprep.subr.bf16.mxu0 %v11499_v53 }
 0x865   :  { %8851 = vmatpush1.bf16.msra.mxu1 %v11503_v38  ;;  %8883 = vmatpush1.bf16.msra.mxu0 %v11505_v39 }
 0x866   :  { %8885 = vmatprep.subr.bf16.mxu1 %v11311_v46  ;;  %8917 = vmatprep.subr.bf16.mxu0 %v11313_v47  ;;  %v13569_v46 = vld [vmem:[#allocation24_spill] sm:$0xff]  ;;  %v13570_v47 = vld [vmem:[#allocation25_spill] sm:$0xff] }
 0x867   :  { %v10536_v3 = vpop.eup %10535 }
 0x868   :  { %v12119_v36 = vmul.f32 %v10536_v3, %v10534_v12  ;;  %v13586_v12 = vld [vmem:[#allocation41_spill] sm:$0xff]  ;;  %v13587_v3 = vld [vmem:[#allocation42_spill] sm:$0xff] }
 0x86a   :  { %v3246_v48 = vrot.slane %v12119_v36, 2 }
 0x86c   :  { %3313 = vmatmul.mubr.f32.vlgmr.msra.gmra.mrb[30].mxu1 %v3246_v48  ;;  %3384 = vmatmul.mubr.f32.vlgmr.msra.gmra.mrb[32].mxu0 %v3246_v48  ;;  %v13588_v48 = vld [vmem:[#allocation43_spill] sm:$0xff] }
 0x86d   :  { %8887 = vmatpush1.bf16.msra.mxu1 %v11315_v54  ;;  %8919 = vmatpush1.bf16.msra.mxu0 %v11317_v55  ;;  %v13574_v54 = vld [vmem:[#allocation29_spill] sm:$0xff]  ;;  %v13575_v55 = vld [vmem:[#allocation30_spill] sm:$0xff] }
 0x86e   :  { %8889 = vmatprep.subr.bf16.mxu1 %v11321_v58  ;;  %8921 = vmatprep.subr.bf16.mxu0 %v13568_v33  ;;  %v13576_v58 = vld [vmem:[#allocation31_spill] sm:$0xff]  ;;  %v13589_v33 = vld [vmem:[#allocation44_spill] sm:$0xff] }
 0x86f   :  { %3500 = vmatprep.mubr.f32.mxu1 %v13409_v34  ;;  %3571 = vmatprep.mubr.f32.mxu0 %v13409_v34 }
 0x871   :  { %8891 = vmatpush1.bf16.msra.mxu1 %v13569_v46  ;;  %8923 = vmatpush1.bf16.msra.mxu0 %v13570_v47  ;;  %v13590_v46 = vld [vmem:[#allocation45_spill] sm:$0xff]  ;;  %v13591_v47 = vld [vmem:[#allocation46_spill] sm:$0xff] }
 0x872   :  { %8893 = vmatprep.subr.bf16.mxu1 %v13571_v28  ;;  %8925 = vmatprep.subr.bf16.mxu0 %v13572_v4  ;;  %v13592_v28 = vld [vmem:[#allocation47_spill] sm:$0xff]  ;;  %v13593_v4 = vld [vmem:[#allocation48_spill] sm:$0xff] }
 0x875   :  { %8895 = vmatpush1.bf16.msra.mxu1 %v13573_v22  ;;  %8927 = vmatpush1.bf16.msra.mxu0 %v13574_v54  ;;  %v13594_v22 = vld [vmem:[#allocation49_spill] sm:$0xff]  ;;  %v13595_v54 = vld [vmem:[#allocation50_spill] sm:$0xff] }
 0x876   :  { %8897 = vmatprep.subr.bf16.mxu1 %v13575_v55  ;;  %8929 = vmatprep.subr.bf16.mxu0 %v13576_v58  ;;  %v13596_v55 = vld [vmem:[#allocation51_spill] sm:$0xff] }
 0x879   :  { %8899 = vmatpush1.bf16.msra.mxu1 %v13577_v44  ;;  %8931 = vmatpush1.bf16.msra.mxu0 %v13578_v49 }
 0x87a   :  { %8901 = vmatprep.subr.bf16.mxu1 %v13579_v10  ;;  %8933 = vmatprep.subr.bf16.mxu0 %v13580_v19 }
 0x87d   :  { %8903 = vmatpush1.bf16.msra.mxu1 %v13581_v26  ;;  %8935 = vmatpush1.bf16.msra.mxu0 %v13582_v37 }
 0x87e   :  { %8905 = vmatprep.subr.bf16.mxu1 %v13583_v7  ;;  %8937 = vmatprep.subr.bf16.mxu0 %v13584_v32 }
 0x881   :  { %8907 = vmatpush1.bf16.msra.mxu1 %v13585_v43  ;;  %8939 = vmatpush1.bf16.msra.mxu0 %v13586_v12 }
 0x882   :  { %8909 = vmatprep.subr.bf16.mxu1 %v13587_v3  ;;  %8941 = vmatprep.subr.bf16.mxu0 %v13588_v48 }
 0x885   :  { %8911 = vmatpush1.bf16.msra.mxu1 %v13589_v33  ;;  %8943 = vmatpush1.bf16.msra.mxu0 %v13590_v46 }
 0x886   :  { %8913 = vmatprep.subr.bf16.mxu1 %v13591_v47  ;;  %8945 = vmatprep.subr.bf16.mxu0 %v13592_v28 }
 0x889   :  { %8915 = vmatpush1.bf16.msra.mxu1 %v13593_v4  ;;  %8947 = vmatpush1.bf16.msra.mxu0 %v13594_v22 }
 0x88a   :  { %8949 = vmatprep.subr.bf16.mxu1 %v13595_v54  ;;  %8981 = vmatprep.subr.bf16.mxu0 %v13596_v55 }
 0x91b   :  { %v3126_v58 = vpop.f32.mrb[28].mxu1  ;;  %v3197_v44 = vpop.f32.mrb[30].mxu0 }
 0x91c   :  { %v3206_v49 = vrot.slane %v3126_v58, 2  ;;  %v3128_v10 = vpop.f32.mrb[29].mxu1  ;;  %v3199_v19 = vpop.f32.mrb[31].mxu0  ;;  %v3208_v12 = vrot.slane %v3197_v44, 2  ;;  %v3238_v44 = vrot.slane %v12070_v16, 7 }
 0x91d   :  { %v3207_v26 = vrot.slane %v3128_v10, 2  ;;  %v3209_v3 = vrot.slane %v3199_v19, 2 }
 0x91e   :  { %v3214_v37 = vadd.f32 %v3206_v49, %v13444_v20  ;;  %v3216_v48 = vadd.f32 %v3208_v12, %v13446_v15 }
 0x91f   :  { %v3215_v7 = vadd.f32 %v3207_v26, %v13445_v1  ;;  %v3217_v33 = vadd.f32 %v3209_v3, %v13447_v9 }
 0x920   :  { %v7688_v32 = vmul.f32 -1.442695, %v3214_v37  ;;  %v7690_v46 = vmul.f32 -1.442695, %v3216_v48 }
 0x921   :  { %v7689_v43 = vmul.f32 -1.442695, %v3215_v7 }
 0x922   :  { %10537 = vpow2.f32 %v7688_v32 }
 0x923   :  { %10539 = vpow2.f32 %v7689_v43 }
 0x924   :  { %10541 = vtanh.f32 %v3217_v33 }
 0x925   :  { %10543 = vpow2.f32 %v7690_v46 }
 0x92c   :  { %v10538_v47 = vpop.eup %10537 }
 0x92d   :  { %v3227_v28 = vadd.f32 1.0, %v10538_v47  ;;  %v10540_v4 = vpop.eup %10539 }
 0x92e   :  { %v3228_v22 = vadd.f32 1.0, %v10540_v4  ;;  %v10542_v54 = vpop.eup %10541 }
 0x92f   :  { %10545 = vrcp.f32 %v3227_v28  ;;  %v10544_v55 = vpop.eup %10543 }
 0x930   :  { %10547 = vrcp.f32 %v3228_v22  ;;  %v3229_v19 = vadd.f32 1.0, %v10544_v55 }
 0x932   :  { %10549 = vrcp.f32 %v3229_v19 }
 0x939   :  { %v10546_v58 = vpop.eup %10545 }
 0x93a   :  { %v3241_v49 = vmul.f32 %v10546_v58, %v10542_v54  ;;  %v10548_v10 = vpop.eup %10547 }
 0x93b   :  { %v3240_v26 = vmul.f32 %v10548_v10, %v3238_v44 }
 0x93c   :  { %v10550_v4 = vpop.eup %10549 }
 0x93d   :  { %v12161_v37 = vadd.f32 %v3241_v49, %v3240_v26 }
 0x93f   :  { %v3314_v7 = vpop.f32.mrb[30].mxu1  ;;  %v3385_v32 = vpop.f32.mrb[32].mxu0  ;;  %10551 = vtanh.f32 %v12161_v37 }
 0x940   :  { %v3394_v43 = vrot.slane %v3314_v7, 7  ;;  %v3316_v12 = vpop.f32.mrb[31].mxu1  ;;  %v3387_v3 = vpop.f32.mrb[33].mxu0  ;;  %v3396_v28 = vrot.slane %v3385_v32, 7 }
 0x941   :  { %v3395_v48 = vrot.slane %v3316_v12, 7  ;;  %v3397_v22 = vrot.slane %v3387_v3, 7 }
 0x942   :  { %v3402_v33 = vadd.f32 %v3394_v43, %v11597_v57  ;;  %v3404_v55 = vadd.f32 %v3396_v28, %v11615_v21  ;;  %v3842_v43 = vld [vmem:[#allocation10 + $0xc0] sm:$0xff]  ;;  %v3853_v28 = vld [vmem:[#allocation10 + $0x118] sm:$0xff] }
 0x943   :  { %v3403_v46 = vadd.f32 %v3395_v48, %v11602_v31  ;;  %v3405_v44 = vadd.f32 %v3397_v22, %v11619_v63  ;;  %v3836_v48 = vld [vmem:[#allocation10 + $0x90] sm:$0xff]  ;;  %v3861_v22 = vld [vmem:[#allocation10 + $0x158] sm:$0xff] }
 0x944   :  { %v7691_v16 = vmul.f32 -1.442695, %v3402_v33  ;;  %v7693_v19 = vmul.f32 -1.442695, %v3404_v55  ;;  %v3844_v33 = vld [vmem:[#allocation10 + $0xd0] sm:$0xff]  ;;  %v3858_v55 = vld [vmem:[#allocation10 + $0x140] sm:$0xff] }
 0x945   :  { %v7692_v47 = vmul.f32 -1.442695, %v3403_v46  ;;  %v9082_v46 = vpack.c.bf16 %v3844_v33, %v3836_v48  ;;  %v3915_v33 = vld [vmem:[#allocation10 + $0x308] sm:$0xff] }
 0x946   :  { %10553 = vpow2.f32 %v7691_v16  ;;  %v3851_v16 = vld [vmem:[#allocation10 + $0x108] sm:$0xff] }
 0x947   :  { %10555 = vpow2.f32 %v7692_v47  ;;  %v3859_v47 = vld [vmem:[#allocation10 + $0x148] sm:$0xff] }
 0x948   :  { %10557 = vtanh.f32 %v3405_v44 }
 0x949   :  { %v10552_v54 = vpop.eup %10551  ;;  %10559 = vpow2.f32 %v7693_v19  ;;  %v3860_v19 = vld [vmem:[#allocation10 + $0x150] sm:$0xff] }
 0x94a   :  { %v3244_v58 = vmul.f32 %v10552_v54, %v10550_v4  ;;  %v9020_v4 = vpack.c.bf16 %v3859_v47, %v3851_v16  ;;  %v3850_v54 = vld [vmem:[#allocation10 + $0x100] sm:$0xff]  ;;  %v3917_v16 = vld [vmem:[#allocation10 + $0x318] sm:$0xff] }
 0x94b   :  { %v9022_v44 = vpack.c.bf16 %v3858_v55, %v3850_v54 }
 0x94c   :  { %v3434_v49 = vrot.slane %v3244_v58, 6  ;;  %v12170_v10 = vsel %vm3807_vm7, %v12079_v29, %v3244_v58  ;;  %v9084_v58 = vpack.c.bf16 %v3861_v22, %v3853_v28  ;;  %v3925_v28 = vld [vmem:[#allocation10 + $0x358] sm:$0xff]  ;;  %v3922_v22 = vld [vmem:[#allocation10 + $0x340] sm:$0xff] }
 0x94d   :  { %v9100_v54 = vpack.c.bf16 %v3925_v28, %v3917_v16  ;;  %v3989_v16 = vld [vmem:[#allocation10 + $0x558] sm:$0xff]  ;;  %v3986_v28 = vld [vmem:[#allocation10 + $0x540] sm:$0xff] }
 0x94e   :  { %3501 = vmatmul.mubr.f32.vlgmr.msra.gmra.mrb[32].mxu1 %v3434_v49  ;;  %3572 = vmatmul.mubr.f32.vlgmr.msra.gmra.mrb[34].mxu0 %v3434_v49  ;;  %v3852_v49 = vld [vmem:[#allocation10 + $0x110] sm:$0xff] }
 0x94f   :  { %8951 = vmatpush1.bf16.msra.mxu1 %v11415_v50  ;;  %8983 = vmatpush1.bf16.msra.mxu0 %v11417_v51 }
 0x950   :  { %v10554_v26 = vpop.eup %10553  ;;  %8953 = vmatprep.subr.bf16.mxu1 %v11421_v60  ;;  %8985 = vmatprep.subr.bf16.mxu0 %v11423_v61  ;;  %v3426_v61 = vrot.slane %v12104_v59, 1  ;;  %v3834_v59 = vld [vmem:[#allocation10 + $0x80] sm:$0xff] }
 0x951   :  { %v3415_v7 = vadd.f32 1.0, %v10554_v26  ;;  %v10556_v32 = vpop.eup %10555  ;;  %3688 = vmatprep.mubr.f32.mxu1 %v13409_v34  ;;  %3759 = vmatprep.mubr.f32.mxu0 %v13409_v34  ;;  %v9018_v3 = vpack.c.bf16 %v3842_v43, %v3834_v59  ;;  %v9086_v26 = vpack.c.bf16 %v3860_v19, %v3852_v49  ;;  %v3931_v19 = vld [vmem:[#allocation10 + $0x388] sm:$0xff] }
 0x952   :  { %v3416_v29 = vadd.f32 1.0, %v10556_v32  ;;  %v10558_v50 = vpop.eup %10557  ;;  %v3875_v32 = vld [vmem:[#allocation10 + $0x1c8] sm:$0xff] }
 0x953   :  { %10561 = vrcp.f32 %v3415_v7  ;;  %8955 = vmatpush1.bf16.msra.mxu1 %v11429_v13  ;;  %8987 = vmatpush1.bf16.msra.mxu0 %v11431_v14  ;;  %v10560_v51 = vpop.eup %10559  ;;  %v3867_v7 = vld [vmem:[#allocation10 + $0x188] sm:$0xff] }
 0x954   :  { %10563 = vrcp.f32 %v3416_v29  ;;  %8957 = vmatprep.subr.bf16.mxu1 %v11435_v23  ;;  %8989 = vmatprep.subr.bf16.mxu0 %v11437_v24  ;;  %v3417_v23 = vadd.f32 1.0, %v10560_v51  ;;  %v3869_v29 = vld [vmem:[#allocation10 + $0x198] sm:$0xff] }
 0x955   :  { %v3877_v51 = vld [vmem:[#allocation10 + $0x1d8] sm:$0xff] }
 0x956   :  { %10565 = vrcp.f32 %v3417_v23  ;;  %v3868_v23 = vld [vmem:[#allocation10 + $0x190] sm:$0xff] }
 0x957   :  { %8959 = vmatpush1.bf16.msra.mxu1 %v13417_v45  ;;  %8991 = vmatpush1.bf16.msra.mxu0 %v13418_v42 }
 0x958   :  { %8961 = vmatprep.subr.bf16.mxu1 %v13419_v18  ;;  %8993 = vmatprep.subr.bf16.mxu0 %v13420_v11  ;;  %v3828_v18 = vld [vmem:[#allocation10 + $0x50] sm:$0xff]  ;;  %v3835_v11 = vld [vmem:[#allocation10 + $0x88] sm:$0xff] }
 0x95b   :  { %8963 = vmatpush1.bf16.msra.mxu1 %v13421_v41  ;;  %8995 = vmatpush1.bf16.msra.mxu0 %v13422_v40  ;;  %v3843_v41 = vld [vmem:[#allocation10 + $0xc8] sm:$0xff]  ;;  %v3837_v40 = vld [vmem:[#allocation10 + $0x98] sm:$0xff] }
 0x95c   :  { %8965 = vmatprep.subr.bf16.mxu1 %v13423_v35  ;;  %8997 = vmatprep.subr.bf16.mxu0 %v13424_v56  ;;  %v9016_v35 = vpack.c.bf16 %v3843_v41, %v3835_v11  ;;  %v3845_v56 = vld [vmem:[#allocation10 + $0xd8] sm:$0xff] }
 0x95d   :  { %v10562_v60 = vpop.eup %10561  ;;  %v9080_v12 = vpack.c.bf16 %v3845_v56, %v3837_v40  ;;  %v3901_v11 = vld [vmem:[#allocation10 + $0x298] sm:$0xff]  ;;  %v3906_v56 = vld [vmem:[#allocation10 + $0x2c0] sm:$0xff] }
 0x95e   :  { %v3429_v13 = vmul.f32 %v10562_v60, %v10558_v50  ;;  %v10564_v14 = vpop.eup %10563  ;;  %v9024_v50 = vpack.c.bf16 %v3875_v32, %v3867_v7  ;;  %v3866_v60 = vld [vmem:[#allocation10 + $0x180] sm:$0xff]  ;;  %v3909_v40 = vld [vmem:[#allocation10 + $0x2d8] sm:$0xff] }
 0x95f   :  { %v3428_v24 = vmul.f32 %v10564_v14, %v3426_v61  ;;  %8967 = vmatpush1.bf16.msra.mxu1 %v13425_v62  ;;  %8999 = vmatpush1.bf16.msra.mxu0 %v13426_v30  ;;  %v3829_v30 = vld [vmem:[#allocation10 + $0x58] sm:$0xff]  ;;  %v3826_v62 = vld [vmem:[#allocation10 + $0x40] sm:$0xff]  ;;  %v9096_v59 = vpack.c.bf16 %v3909_v40, %v3901_v11 }
 0x960   :  { %8969 = vmatprep.subr.bf16.mxu1 %v11473_v5  ;;  %9001 = vmatprep.subr.bf16.mxu0 %v11475_v6  ;;  %v10566_v5 = vpop.eup %10565  ;;  %v3874_v61 = vld [vmem:[#allocation10 + $0x1c0] sm:$0xff]  ;;  %v3933_v7 = vld [vmem:[#allocation10 + $0x398] sm:$0xff] }
 0x961   :  { %v12195_v45 = vadd.f32 %v3429_v13, %v3428_v24  ;;  %v9088_v13 = vpack.c.bf16 %v3877_v51, %v3869_v29  ;;  %v9026_v14 = vpack.c.bf16 %v3874_v61, %v3866_v60  ;;  %v3876_v24 = vld [vmem:[#allocation10 + $0x1d0] sm:$0xff]  ;;  %v3941_v29 = vld [vmem:[#allocation10 + $0x3d8] sm:$0xff]  ;;  %v3938_v51 = vld [vmem:[#allocation10 + $0x3c0] sm:$0xff] }
 0x962   :  { %v9104_v60 = vpack.c.bf16 %v3941_v29, %v3933_v7  ;;  %v3973_v11 = vld [vmem:[#allocation10 + $0x4d8] sm:$0xff]  ;;  %v3970_v40 = vld [vmem:[#allocation10 + $0x4c0] sm:$0xff] }
 0x963   :  { %10567 = vtanh.f32 %v12195_v45  ;;  %8971 = vmatpush1.bf16.msra.mxu1 %v11479_v25  ;;  %9003 = vmatpush1.bf16.msra.mxu0 %v11481_v27  ;;  %v4005_v7 = vld [vmem:[#allocation10 + $0x5d8] sm:$0xff]  ;;  %v4002_v29 = vld [vmem:[#allocation10 + $0x5c0] sm:$0xff] }
 0x964   :  { %8973 = vmatprep.subr.bf16.mxu1 %v11485_v8  ;;  %9005 = vmatprep.subr.bf16.mxu0 %v11487_v17  ;;  %v3819_v8 = vld [vmem:[#allocation10 + $0x8] sm:$0xff] }
 0x965   :  { %v3827_v17 = vld [vmem:[#allocation10 + $0x48] sm:$0xff] }
 0x967   :  { %8975 = vmatpush1.bf16.msra.mxu1 %v11491_v0  ;;  %9007 = vmatpush1.bf16.msra.mxu0 %v11493_v2  ;;  %v3821_v0 = vld [vmem:[#allocation10 + $0x18] sm:$0xff]  ;;  %v9012_v2 = vpack.c.bf16 %v3827_v17, %v3819_v8 }
 0x968   :  { %8977 = vmatprep.subr.bf16.mxu1 %v11497_v52  ;;  %9009 = vmatprep.subr.bf16.mxu0 %v11499_v53  ;;  %v3818_v52 = vld [vmem:[#allocation10] sm:$0xff]  ;;  %v9076_v53 = vpack.c.bf16 %v3829_v30, %v3821_v0  ;;  %v3885_v8 = vld [vmem:[#allocation10 + $0x218] sm:$0xff] }
 0x969   :  { %v9014_v42 = vpack.c.bf16 %v3826_v62, %v3818_v52  ;;  %v3893_v0 = vld [vmem:[#allocation10 + $0x258] sm:$0xff]  ;;  %v3890_v30 = vld [vmem:[#allocation10 + $0x240] sm:$0xff] }
 0x96a   :  { %v9092_v52 = vpack.c.bf16 %v3893_v0, %v3885_v8  ;;  %v3957_v8 = vld [vmem:[#allocation10 + $0x458] sm:$0xff]  ;;  %v3954_v0 = vld [vmem:[#allocation10 + $0x440] sm:$0xff] }
 0x96b   :  { %8979 = vmatpush1.bf16.msra.mxu1 %v11503_v38  ;;  %9011 = vmatpush1.bf16.msra.mxu0 %v11505_v39  ;;  %v3820_v38 = vld [vmem:[#allocation10 + $0x10] sm:$0xff] }
 0x96c   :  { %9013 = vmatprep.subr.bf16.mxu1 %v9012_v2  ;;  %v9078_v39 = vpack.c.bf16 %v3828_v18, %v3820_v38  ;;  %9077 = vmatprep.subr.bf16.mxu0 %v9076_v53  ;;  %v3882_v2 = vld [vmem:[#allocation10 + $0x200] sm:$0xff]  ;;  %v3884_v53 = vld [vmem:[#allocation10 + $0x210] sm:$0xff]  ;;  %v3899_v18 = vld [vmem:[#allocation10 + $0x288] sm:$0xff] }
 0x96d   :  { %v10568_v6 = vpop.eup %10567  ;;  %v9030_v62 = vpack.c.bf16 %v3890_v30, %v3882_v2 }
 0x96e   :  { %v12208_v25 = vmul.f32 %v10568_v6, %v10566_v5  ;;  %v9090_v5 = vpack.c.bf16 %v3876_v24, %v3868_v23  ;;  %v3883_v6 = vld [vmem:[#allocation10 + $0x208] sm:$0xff] }
 0x96f   :  { %v3947_v24 = vld [vmem:[#allocation10 + $0x408] sm:$0xff] }
 0x970   :  { %v3622_v27 = vrot.slane %v12208_v25, 1 }
 0x972   :  { %3689 = vmatmul.mubr.f32.vlgmr.msra.gmra.mrb[34].mxu1 %v3622_v27  ;;  %3760 = vmatmul.mubr.f32.vlgmr.msra.gmra.mrb[36].mxu0 %v3622_v27  ;;  %v3891_v27 = vld [vmem:[#allocation10 + $0x248] sm:$0xff] }
 0x973   :  { %9015 = vmatpush1.bf16.msra.mxu1 %v9014_v42  ;;  %9079 = vmatpush1.bf16.msra.mxu0 %v9078_v39  ;;  %v9028_v17 = vpack.c.bf16 %v3891_v27, %v3883_v6  ;;  %v3892_v42 = vld [vmem:[#allocation10 + $0x250] sm:$0xff]  ;;  %v3907_v39 = vld [vmem:[#allocation10 + $0x2c8] sm:$0xff]  ;;  %v3949_v6 = vld [vmem:[#allocation10 + $0x418] sm:$0xff] }
 0x974   :  { %9017 = vmatprep.subr.bf16.mxu1 %v9016_v35  ;;  %9081 = vmatprep.subr.bf16.mxu0 %v9080_v12  ;;  %v9094_v38 = vpack.c.bf16 %v3892_v42, %v3884_v53  ;;  %v9032_v41 = vpack.c.bf16 %v3907_v39, %v3899_v18  ;;  %v3898_v35 = vld [vmem:[#allocation10 + $0x280] sm:$0xff]  ;;  %v3900_v12 = vld [vmem:[#allocation10 + $0x290] sm:$0xff]  ;;  %v9108_v2 = vpack.c.bf16 %v3957_v8, %v3949_v6  ;;  %v3963_v42 = vld [vmem:[#allocation10 + $0x488] sm:$0xff] }
 0x975   :  { %v9034_v43 = vpack.c.bf16 %v3906_v56, %v3898_v35  ;;  %v3965_v18 = vld [vmem:[#allocation10 + $0x498] sm:$0xff]  ;;  %v4018_v8 = vld [vmem:[#allocation10 + $0x640] sm:$0xff] }
 0x976   :  { %v9112_v35 = vpack.c.bf16 %v3973_v11, %v3965_v18  ;;  %v4021_v6 = vld [vmem:[#allocation10 + $0x658] sm:$0xff]  ;;  %v4026_v11 = vld [vmem:[#allocation10 + $0x680] sm:$0xff] }
 0x977   :  { %9019 = vmatpush1.bf16.msra.mxu1 %v9018_v3  ;;  %9083 = vmatpush1.bf16.msra.mxu0 %v9082_v46  ;;  %v3908_v3 = vld [vmem:[#allocation10 + $0x2d0] sm:$0xff]  ;;  %v3923_v46 = vld [vmem:[#allocation10 + $0x348] sm:$0xff] }
 0x978   :  { %9021 = vmatprep.subr.bf16.mxu1 %v9020_v4  ;;  %9085 = vmatprep.subr.bf16.mxu0 %v9084_v58  ;;  %v9098_v48 = vpack.c.bf16 %v3908_v3, %v3900_v12  ;;  %v9036_v47 = vpack.c.bf16 %v3923_v46, %v3915_v33  ;;  %v3914_v4 = vld [vmem:[#allocation10 + $0x300] sm:$0xff]  ;;  %v3916_v58 = vld [vmem:[#allocation10 + $0x310] sm:$0xff]  ;;  %v3979_v3 = vld [vmem:[#allocation10 + $0x508] sm:$0xff] }
 0x979   :  { %v9038_v55 = vpack.c.bf16 %v3922_v22, %v3914_v4  ;;  %v3981_v33 = vld [vmem:[#allocation10 + $0x518] sm:$0xff] }
 0x97a   :  { %v9116_v4 = vpack.c.bf16 %v3989_v16, %v3981_v33  ;;  %v4053_v33 = vld [vmem:[#allocation10 + $0x758] sm:$0xff] }
 0x97b   :  { %9023 = vmatpush1.bf16.msra.mxu1 %v9022_v44  ;;  %9087 = vmatpush1.bf16.msra.mxu0 %v9086_v26  ;;  %v3924_v44 = vld [vmem:[#allocation10 + $0x350] sm:$0xff]  ;;  %v3939_v26 = vld [vmem:[#allocation10 + $0x3c8] sm:$0xff] }
 0x97c   :  { %9025 = vmatprep.subr.bf16.mxu1 %v9024_v50  ;;  %9089 = vmatprep.subr.bf16.mxu0 %v9088_v13  ;;  %v9102_v49 = vpack.c.bf16 %v3924_v44, %v3916_v58  ;;  %v9040_v32 = vpack.c.bf16 %v3939_v26, %v3931_v19  ;;  %v3930_v50 = vld [vmem:[#allocation10 + $0x380] sm:$0xff]  ;;  %v3932_v13 = vld [vmem:[#allocation10 + $0x390] sm:$0xff]  ;;  %v3995_v44 = vld [vmem:[#allocation10 + $0x588] sm:$0xff] }
 0x97d   :  { %v9042_v61 = vpack.c.bf16 %v3938_v51, %v3930_v50  ;;  %v3997_v19 = vld [vmem:[#allocation10 + $0x598] sm:$0xff] }
 0x97e   :  { %v9120_v50 = vpack.c.bf16 %v4005_v7, %v3997_v19  ;;  %v4066_v7 = vld [vmem:[#allocation10 + $0x7c0] sm:$0xff] }
 0x97f   :  { %9027 = vmatpush1.bf16.msra.mxu1 %v9026_v14  ;;  %9091 = vmatpush1.bf16.msra.mxu0 %v9090_v5  ;;  %v3940_v14 = vld [vmem:[#allocation10 + $0x3d0] sm:$0xff]  ;;  %v3955_v5 = vld [vmem:[#allocation10 + $0x448] sm:$0xff] }
 0x980   :  { %9029 = vmatprep.subr.bf16.mxu1 %v9028_v17  ;;  %9093 = vmatprep.subr.bf16.mxu0 %v9092_v52  ;;  %v9106_v23 = vpack.c.bf16 %v3940_v14, %v3932_v13  ;;  %v9044_v27 = vpack.c.bf16 %v3955_v5, %v3947_v24  ;;  %v3946_v17 = vld [vmem:[#allocation10 + $0x400] sm:$0xff]  ;;  %v3948_v52 = vld [vmem:[#allocation10 + $0x410] sm:$0xff]  ;;  %v4011_v14 = vld [vmem:[#allocation10 + $0x608] sm:$0xff] }
 0x981   :  { %v9046_v30 = vpack.c.bf16 %v3954_v0, %v3946_v17  ;;  %v4013_v24 = vld [vmem:[#allocation10 + $0x618] sm:$0xff] }
 0x982   :  { %v9124_v17 = vpack.c.bf16 %v4021_v6, %v4013_v24  ;;  %v3833_v24 = vld [vmem:[#allocation10 + $0x78] sm:$0xff] }
 0x983   :  { %9031 = vmatpush1.bf16.msra.mxu1 %v9030_v62  ;;  %9095 = vmatpush1.bf16.msra.mxu0 %v9094_v38  ;;  %v3956_v62 = vld [vmem:[#allocation10 + $0x450] sm:$0xff]  ;;  %v3971_v38 = vld [vmem:[#allocation10 + $0x4c8] sm:$0xff] }
 0x984   :  { %9033 = vmatprep.subr.bf16.mxu1 %v9032_v41  ;;  %9097 = vmatprep.subr.bf16.mxu0 %v9096_v59  ;;  %v9110_v53 = vpack.c.bf16 %v3956_v62, %v3948_v52  ;;  %v9048_v39 = vpack.c.bf16 %v3971_v38, %v3963_v42  ;;  %v3962_v41 = vld [vmem:[#allocation10 + $0x480] sm:$0xff]  ;;  %v3964_v59 = vld [vmem:[#allocation10 + $0x490] sm:$0xff]  ;;  %v4027_v52 = vld [vmem:[#allocation10 + $0x688] sm:$0xff] }
 0x985   :  { %v9050_v56 = vpack.c.bf16 %v3970_v40, %v3962_v41  ;;  %v4029_v42 = vld [vmem:[#allocation10 + $0x698] sm:$0xff]  ;;  %v4034_v41 = vld [vmem:[#allocation10 + $0x6c0] sm:$0xff]  ;;  %v4028_v40 = vld [vmem:[#allocation10 + $0x690] sm:$0xff] }
 0x986   :  { %v4037_v38 = vld [vmem:[#allocation10 + $0x6d8] sm:$0xff] }
 0x987   :  { %9035 = vmatpush1.bf16.msra.mxu1 %v9034_v43  ;;  %9099 = vmatpush1.bf16.msra.mxu0 %v9098_v48  ;;  %v3972_v43 = vld [vmem:[#allocation10 + $0x4d0] sm:$0xff]  ;;  %v3987_v48 = vld [vmem:[#allocation10 + $0x548] sm:$0xff] }
 0x988   :  { %9037 = vmatprep.subr.bf16.mxu1 %v9036_v47  ;;  %9101 = vmatprep.subr.bf16.mxu0 %v9100_v54  ;;  %v9114_v12 = vpack.c.bf16 %v3972_v43, %v3964_v59  ;;  %v9052_v46 = vpack.c.bf16 %v3987_v48, %v3979_v3  ;;  %v3978_v47 = vld [vmem:[#allocation10 + $0x500] sm:$0xff]  ;;  %v3980_v54 = vld [vmem:[#allocation10 + $0x510] sm:$0xff]  ;;  %v4043_v59 = vld [vmem:[#allocation10 + $0x708] sm:$0xff] }
 0x989   :  { %v9054_v22 = vpack.c.bf16 %v3986_v28, %v3978_v47  ;;  %v4051_v43 = vld [vmem:[#allocation10 + $0x748] sm:$0xff]  ;;  %v4045_v48 = vld [vmem:[#allocation10 + $0x718] sm:$0xff]  ;;  %v4050_v47 = vld [vmem:[#allocation10 + $0x740] sm:$0xff] }
 0x98a   :  { %v9068_v3 = vpack.c.bf16 %v4051_v43, %v4043_v59  ;;  %v9132_v16 = vpack.c.bf16 %v4053_v33, %v4045_v48  ;;  %v4044_v28 = vld [vmem:[#allocation10 + $0x710] sm:$0xff]  ;;  %v3614_v43 = vrot.slane %v12161_v37, 7 }
 0x98b   :  { %9039 = vmatpush1.bf16.msra.mxu1 %v9038_v55  ;;  %9103 = vmatpush1.bf16.msra.mxu0 %v9102_v49  ;;  %v3988_v55 = vld [vmem:[#allocation10 + $0x550] sm:$0xff]  ;;  %v4003_v49 = vld [vmem:[#allocation10 + $0x5c8] sm:$0xff] }
 0x98c   :  { %9041 = vmatprep.subr.bf16.mxu1 %v9040_v32  ;;  %9105 = vmatprep.subr.bf16.mxu0 %v9104_v60  ;;  %v9118_v58 = vpack.c.bf16 %v3988_v55, %v3980_v54  ;;  %v9056_v26 = vpack.c.bf16 %v4003_v49, %v3995_v44  ;;  %v3994_v32 = vld [vmem:[#allocation10 + $0x580] sm:$0xff]  ;;  %v3996_v60 = vld [vmem:[#allocation10 + $0x590] sm:$0xff]  ;;  %v4067_v54 = vld [vmem:[#allocation10 + $0x7c8] sm:$0xff] }
 0x98d   :  { %v9058_v51 = vpack.c.bf16 %v4002_v29, %v3994_v32  ;;  %v4061_v55 = vld [vmem:[#allocation10 + $0x798] sm:$0xff]  ;;  %v4060_v29 = vld [vmem:[#allocation10 + $0x790] sm:$0xff] }
 0x98e   :  { %v4069_v44 = vld [vmem:[#allocation10 + $0x7d8] sm:$0xff] }
 0x98f   :  { %9043 = vmatpush1.bf16.msra.mxu1 %v9042_v61  ;;  %9107 = vmatpush1.bf16.msra.mxu0 %v9106_v23  ;;  %v4004_v61 = vld [vmem:[#allocation10 + $0x5d0] sm:$0xff]  ;;  %v4019_v23 = vld [vmem:[#allocation10 + $0x648] sm:$0xff]  ;;  %v9136_v32 = vpack.c.bf16 %v4069_v44, %v4061_v55 }
 0x990   :  { %9045 = vmatprep.subr.bf16.mxu1 %v9044_v27  ;;  %9109 = vmatprep.subr.bf16.mxu0 %v9108_v2  ;;  %v9122_v13 = vpack.c.bf16 %v4004_v61, %v3996_v60  ;;  %v9060_v5 = vpack.c.bf16 %v4019_v23, %v4011_v14  ;;  %v4010_v27 = vld [vmem:[#allocation10 + $0x600] sm:$0xff]  ;;  %v4012_v2 = vld [vmem:[#allocation10 + $0x610] sm:$0xff]  ;;  %v3823_v61 = vld [vmem:[#allocation10 + $0x28] sm:$0xff] }
 0x991   :  { %v9062_v0 = vpack.c.bf16 %v4018_v8, %v4010_v27  ;;  %v3825_v14 = vld [vmem:[#allocation10 + $0x38] sm:$0xff] }
 0x993   :  { %9047 = vmatpush1.bf16.msra.mxu1 %v9046_v30  ;;  %9111 = vmatpush1.bf16.msra.mxu0 %v9110_v53  ;;  %v4020_v30 = vld [vmem:[#allocation10 + $0x650] sm:$0xff]  ;;  %v4035_v53 = vld [vmem:[#allocation10 + $0x6c8] sm:$0xff] }
 0x994   :  { %9049 = vmatprep.subr.bf16.mxu1 %v9048_v39  ;;  %9113 = vmatprep.subr.bf16.mxu0 %v9112_v35  ;;  %v9126_v62 = vpack.c.bf16 %v4020_v30, %v4012_v2  ;;  %v9064_v18 = vpack.c.bf16 %v4035_v53, %v4027_v52  ;;  %v9128_v39 = vpack.c.bf16 %v4037_v38, %v4029_v42 }
 0x995   :  { %v9066_v35 = vpack.c.bf16 %v4034_v41, %v4026_v11 }
 0x997   :  { %9051 = vmatpush1.bf16.msra.mxu1 %v9050_v56  ;;  %9115 = vmatpush1.bf16.msra.mxu0 %v9114_v12  ;;  %v4036_v56 = vld [vmem:[#allocation10 + $0x6d0] sm:$0xff] }
 0x998   :  { %9053 = vmatprep.subr.bf16.mxu1 %v9052_v46  ;;  %9117 = vmatprep.subr.bf16.mxu0 %v9116_v4  ;;  %v9130_v12 = vpack.c.bf16 %v4036_v56, %v4028_v40  ;;  %v4042_v46 = vld [vmem:[#allocation10 + $0x700] sm:$0xff]  ;;  %v4052_v4 = vld [vmem:[#allocation10 + $0x750] sm:$0xff] }
 0x999   :  { %v9134_v49 = vpack.c.bf16 %v4052_v4, %v4044_v28 }
 0x99b   :  { %9055 = vmatpush1.bf16.msra.mxu1 %v9054_v22  ;;  %9119 = vmatpush1.bf16.msra.mxu0 %v9118_v58  ;;  %v4059_v22 = vld [vmem:[#allocation10 + $0x788] sm:$0xff]  ;;  %v9070_v58 = vpack.c.bf16 %v4050_v47, %v4042_v46 }
 0x99c   :  { %9057 = vmatprep.subr.bf16.mxu1 %v9056_v26  ;;  %9121 = vmatprep.subr.bf16.mxu0 %v9120_v50  ;;  %v9072_v19 = vpack.c.bf16 %v4067_v54, %v4059_v22  ;;  %v4058_v26 = vld [vmem:[#allocation10 + $0x780] sm:$0xff]  ;;  %v4068_v50 = vld [vmem:[#allocation10 + $0x7d0] sm:$0xff] }
 0x99d   :  { %v9138_v60 = vpack.c.bf16 %v4068_v50, %v4060_v29 }
 0x99f   :  { %9059 = vmatpush1.bf16.msra.mxu1 %v9058_v51  ;;  %9123 = vmatpush1.bf16.msra.mxu0 %v9122_v13  ;;  %v9074_v51 = vpack.c.bf16 %v4066_v7, %v4058_v26  ;;  %v3831_v13 = vld [vmem:[#allocation10 + $0x68] sm:$0xff] }
 0x9a0   :  { %9061 = vmatprep.subr.bf16.mxu1 %v9060_v5  ;;  %9125 = vmatprep.subr.bf16.mxu0 %v9124_v17  ;;  %v9140_v23 = vpack.c.bf16 %v3831_v13, %v3823_v61  ;;  %v9204_v5 = vpack.c.bf16 %v3833_v24, %v3825_v14 }
 0x9a3   :  { %9063 = vmatpush1.bf16.msra.mxu1 %v9062_v0  ;;  %9127 = vmatpush1.bf16.msra.mxu0 %v9126_v62 }
 0x9a4   :  { %9065 = vmatprep.subr.bf16.mxu1 %v9064_v18  ;;  %9129 = vmatprep.subr.bf16.mxu0 %v9128_v39 }
 0x9a7   :  { %9067 = vmatpush1.bf16.msra.mxu1 %v9066_v35  ;;  %9131 = vmatpush1.bf16.msra.mxu0 %v9130_v12 }
 0x9a8   :  { %9069 = vmatprep.subr.bf16.mxu1 %v9068_v3  ;;  %9133 = vmatprep.subr.bf16.mxu0 %v9132_v16 }
 0x9ab   :  { %9071 = vmatpush1.bf16.msra.mxu1 %v9070_v58  ;;  %9135 = vmatpush1.bf16.msra.mxu0 %v9134_v49 }
 0x9ac   :  { %9073 = vmatprep.subr.bf16.mxu1 %v9072_v19  ;;  %9137 = vmatprep.subr.bf16.mxu0 %v9136_v32 }
 0x9af   :  { %9075 = vmatpush1.bf16.msra.mxu1 %v9074_v51  ;;  %9139 = vmatpush1.bf16.msra.mxu0 %v9138_v60  ;;  %v3790_v51 = vrot.slane %v12195_v45, 1 }
 0x9b0   :  { %9141 = vmatprep.subr.bf16.mxu1 %v9140_v23  ;;  %9205 = vmatprep.subr.bf16.mxu0 %v9204_v5 }
 0xa21   :  { %v3502_v6 = vpop.f32.mrb[32].mxu1  ;;  %v3573_v27 = vpop.f32.mrb[34].mxu0 }
 0xa22   :  { %v3582_v8 = vrot.slane %v3502_v6, 1  ;;  %v3504_v17 = vpop.f32.mrb[33].mxu1  ;;  %v3575_v0 = vpop.f32.mrb[35].mxu0  ;;  %v3584_v42 = vrot.slane %v3573_v27, 1  ;;  %v3822_v27 = vld [vmem:[#allocation10 + $0x20] sm:$0xff] }
 0xa23   :  { %v3583_v2 = vrot.slane %v3504_v17, 1  ;;  %v3585_v38 = vrot.slane %v3575_v0, 1  ;;  %v3830_v17 = vld [vmem:[#allocation10 + $0x60] sm:$0xff]  ;;  %v3824_v0 = vld [vmem:[#allocation10 + $0x30] sm:$0xff] }
 0xa24   :  { %v3590_v30 = vadd.f32 %v3582_v8, %v13444_v20  ;;  %v3592_v18 = vadd.f32 %v3584_v42, %v13446_v15  ;;  %v13597_v8 = vld [vmem:[#allocation56_spill] sm:$0xff] }
 0xa25   :  { %v3591_v52 = vadd.f32 %v3583_v2, %v13445_v1  ;;  %v3593_v39 = vadd.f32 %v3585_v38, %v13447_v9  ;;  %v3832_v2 = vld [vmem:[#allocation10 + $0x70] sm:$0xff]  ;;  %v3847_v38 = vld [vmem:[#allocation10 + $0xe8] sm:$0xff] }
 0xa26   :  { %v7694_v62 = vmul.f32 -1.442695, %v3590_v30  ;;  %v7696_v11 = vmul.f32 -1.442695, %v3592_v18  ;;  %v13598_v30 = vld [vmem:[#allocation55_spill] sm:$0xff]  ;;  %v3841_v18 = vld [vmem:[#allocation10 + $0xb8] sm:$0xff] }
 0xa27   :  { %v7695_v53 = vmul.f32 -1.442695, %v3591_v52 }
 0xa28   :  { %10569 = vpow2.f32 %v7694_v62  ;;  %v3839_v62 = vld [vmem:[#allocation10 + $0xa8] sm:$0xff] }
 0xa29   :  { %10571 = vpow2.f32 %v7695_v53  ;;  %v13599_v53 = vld [vmem:[#allocation54_spill] sm:$0xff] }
 0xa2a   :  { %10573 = vtanh.f32 %v3593_v39  ;;  %v13600_v39 = vld [vmem:[#allocation53_spill] sm:$0xff] }
 0xa2b   :  { %10575 = vpow2.f32 %v7696_v11  ;;  %v9142_v11 = vpack.c.bf16 %v3830_v17, %v3822_v27  ;;  %v3903_v27 = vld [vmem:[#allocation10 + $0x2a8] sm:$0xff]  ;;  %v3913_v17 = vld [vmem:[#allocation10 + $0x2f8] sm:$0xff] }
 0xa32   :  { %v10570_v41 = vpop.eup %10569 }
 0xa33   :  { %v3603_v40 = vadd.f32 1.0, %v10570_v41  ;;  %v10572_v35 = vpop.eup %10571  ;;  %v9206_v41 = vpack.c.bf16 %v3832_v2, %v3824_v0 }
 0xa34   :  { %v3604_v20 = vadd.f32 1.0, %v10572_v35  ;;  %v10574_v1 = vpop.eup %10573  ;;  %v3846_v35 = vld [vmem:[#allocation10 + $0xe0] sm:$0xff] }
 0xa35   :  { %10577 = vrcp.f32 %v3603_v40  ;;  %v10576_v56 = vpop.eup %10575  ;;  %v3838_v40 = vld [vmem:[#allocation10 + $0xa0] sm:$0xff] }
 0xa36   :  { %10579 = vrcp.f32 %v3604_v20  ;;  %v3605_v48 = vadd.f32 1.0, %v10576_v56  ;;  %v13601_v20 = vld [vmem:[#allocation52_spill] sm:$0xff] }
 0xa37   :  { %v3840_v56 = vld [vmem:[#allocation10 + $0xb0] sm:$0xff] }
 0xa38   :  { %10581 = vrcp.f32 %v3605_v48  ;;  %v3863_v48 = vld [vmem:[#allocation10 + $0x168] sm:$0xff] }
 0xa3f   :  { %v10578_v59 = vpop.eup %10577 }
 0xa40   :  { %v3617_v12 = vmul.f32 %v10578_v59, %v10574_v1  ;;  %v10580_v3 = vpop.eup %10579  ;;  %v3848_v59 = vld [vmem:[#allocation10 + $0xf0] sm:$0xff] }
 0xa41   :  { %v3616_v15 = vmul.f32 %v10580_v3, %v3614_v43  ;;  %v3855_v43 = vld [vmem:[#allocation10 + $0x128] sm:$0xff] }
 0xa42   :  { %v10582_v55 = vpop.eup %10581 }
 0xa43   :  { %v3618_v33 = vadd.f32 %v3617_v12, %v3616_v15  ;;  %v9144_v12 = vpack.c.bf16 %v3847_v38, %v3839_v62  ;;  %v3857_v15 = vld [vmem:[#allocation10 + $0x138] sm:$0xff]  ;;  %v3912_v38 = vld [vmem:[#allocation10 + $0x2f0] sm:$0xff] }
 0xa45   :  { %v3690_v9 = vpop.f32.mrb[34].mxu1  ;;  %v3761_v46 = vpop.f32.mrb[36].mxu0  ;;  %10583 = vtanh.f32 %v3618_v33  ;;  %v3865_v33 = vld [vmem:[#allocation10 + $0x178] sm:$0xff] }
 0xa46   :  { %v3766_v16 = vadd.f32 %v3690_v9, %v11597_v57  ;;  %v3692_v47 = vpop.f32.mrb[35].mxu1  ;;  %v3763_v28 = vpop.f32.mrb[37].mxu0  ;;  %v3768_v37 = vadd.f32 %v3761_v46, %v11615_v21  ;;  %v9146_v9 = vpack.c.bf16 %v3846_v35, %v3838_v40  ;;  %v9210_v46 = vpack.c.bf16 %v3848_v59, %v3840_v56  ;;  %v3918_v40 = vld [vmem:[#allocation10 + $0x320] sm:$0xff]  ;;  %v3920_v56 = vld [vmem:[#allocation10 + $0x330] sm:$0xff] }
 0xa47   :  { %v3767_v4 = vadd.f32 %v3692_v47, %v11602_v31  ;;  %v3769_v44 = vadd.f32 %v3763_v28, %v11619_v63  ;;  %v3862_v47 = vld [vmem:[#allocation10 + $0x160] sm:$0xff]  ;;  %v9148_v28 = vpack.c.bf16 %v3863_v48, %v3855_v43  ;;  %v3928_v59 = vld [vmem:[#allocation10 + $0x370] sm:$0xff]  ;;  %v3935_v43 = vld [vmem:[#allocation10 + $0x3a8] sm:$0xff] }
 0xa48   :  { %v7697_v22 = vmul.f32 -1.442695, %v3766_v16  ;;  %v7699_v19 = vmul.f32 -1.442695, %v3768_v37  ;;  %v3854_v16 = vld [vmem:[#allocation10 + $0x120] sm:$0xff]  ;;  %v3871_v37 = vld [vmem:[#allocation10 + $0x1a8] sm:$0xff] }
 0xa49   :  { %v7698_v54 = vmul.f32 -1.442695, %v3767_v4  ;;  %v9212_v4 = vpack.c.bf16 %v3865_v33, %v3857_v15  ;;  %v3926_v35 = vld [vmem:[#allocation10 + $0x360] sm:$0xff]  ;;  %v3945_v48 = vld [vmem:[#allocation10 + $0x3f8] sm:$0xff]  ;;  %v9230_v33 = vpack.c.bf16 %v3928_v59, %v3920_v56  ;;  %v4015_v56 = vld [vmem:[#allocation10 + $0x628] sm:$0xff] }
 0xa4a   :  { %10585 = vpow2.f32 %v7697_v22  ;;  %v3856_v22 = vld [vmem:[#allocation10 + $0x130] sm:$0xff]  ;;  %v9166_v15 = vpack.c.bf16 %v3926_v35, %v3918_v40  ;;  %v4023_v59 = vld [vmem:[#allocation10 + $0x668] sm:$0xff] }
 0xa4b   :  { %10587 = vpow2.f32 %v7698_v54  ;;  %v3864_v54 = vld [vmem:[#allocation10 + $0x170] sm:$0xff] }
 0xa4c   :  { %10589 = vtanh.f32 %v3769_v44  ;;  %v3881_v44 = vld [vmem:[#allocation10 + $0x1f8] sm:$0xff] }
 0xa4d   :  { %10591 = vpow2.f32 %v7699_v19  ;;  %v9214_v19 = vpack.c.bf16 %v3864_v54, %v3856_v22  ;;  %v3951_v22 = vld [vmem:[#allocation10 + $0x428] sm:$0xff] }
 0xa4e   :  { %v3959_v54 = vld [vmem:[#allocation10 + $0x468] sm:$0xff] }
 0xa4f   :  { %v10584_v58 = vpop.eup %10583 }
 0xa50   :  { %v3620_v49 = vmul.f32 %v10584_v58, %v10582_v55  ;;  %v3879_v55 = vld [vmem:[#allocation10 + $0x1e8] sm:$0xff]  ;;  %v3873_v58 = vld [vmem:[#allocation10 + $0x1b8] sm:$0xff] }
 0xa52   :  { %v12222_v57 = vsel %vm3809_vm8, %v12170_v10, %v3620_v49  ;;  %v9150_v49 = vpack.c.bf16 %v3862_v47, %v3854_v16 }
 0xa54   :  { %v10586_v26 = vpop.eup %10585 }
 0xa55   :  { %v3779_v7 = vadd.f32 1.0, %v10586_v26  ;;  %v10588_v31 = vpop.eup %10587  ;;  %v3870_v26 = vld [vmem:[#allocation10 + $0x1a0] sm:$0xff] }
 0xa56   :  { %v3780_v32 = vadd.f32 1.0, %v10588_v31  ;;  %v10590_v21 = vpop.eup %10589  ;;  %v9152_v31 = vpack.c.bf16 %v3879_v55, %v3871_v37  ;;  %v3953_v37 = vld [vmem:[#allocation10 + $0x438] sm:$0xff] }
 0xa57   :  { %10593 = vrcp.f32 %v3779_v7  ;;  %v10592_v29 = vpop.eup %10591  ;;  %v3878_v7 = vld [vmem:[#allocation10 + $0x1e0] sm:$0xff]  ;;  %v3961_v55 = vld [vmem:[#allocation10 + $0x478] sm:$0xff] }
 0xa58   :  { %10595 = vrcp.f32 %v3780_v32  ;;  %v3781_v61 = vadd.f32 1.0, %v10592_v29  ;;  %v9216_v32 = vpack.c.bf16 %v3881_v44, %v3873_v58  ;;  %v3880_v29 = vld [vmem:[#allocation10 + $0x1f0] sm:$0xff] }
 0xa5a   :  { %10597 = vrcp.f32 %v3781_v61  ;;  %v9154_v61 = vpack.c.bf16 %v3878_v7, %v3870_v26  ;;  %v9172_v26 = vpack.c.bf16 %v3959_v54, %v3951_v22  ;;  %v9236_v7 = vpack.c.bf16 %v3961_v55, %v3953_v37  ;;  %v4033_v22 = vld [vmem:[#allocation10 + $0x6b8] sm:$0xff] }
 0xa5b   :  { %v4041_v54 = vld [vmem:[#allocation10 + $0x6f8] sm:$0xff] }
 0xa61   :  { %v10594_v50 = vpop.eup %10593 }
 0xa62   :  { %v3793_v63 = vmul.f32 %v10594_v50, %v10590_v21  ;;  %v10596_v60 = vpop.eup %10595  ;;  %v3872_v21 = vld [vmem:[#allocation10 + $0x1b0] sm:$0xff]  ;;  %v3887_v50 = vld [vmem:[#allocation10 + $0x228] sm:$0xff] }
 0xa63   :  { %v3792_v13 = vmul.f32 %v10596_v60, %v3790_v51  ;;  %v3895_v51 = vld [vmem:[#allocation10 + $0x268] sm:$0xff]  ;;  %v3897_v60 = vld [vmem:[#allocation10 + $0x278] sm:$0xff] }
 0xa64   :  { %v10598_v10 = vpop.eup %10597 }
 0xa65   :  { %v3794_v14 = vadd.f32 %v3793_v63, %v3792_v13  ;;  %v3889_v63 = vld [vmem:[#allocation10 + $0x238] sm:$0xff]  ;;  %v9218_v13 = vpack.c.bf16 %v3880_v29, %v3872_v21  ;;  %v3967_v21 = vld [vmem:[#allocation10 + $0x4a8] sm:$0xff] }
 0xa66   :  { %v3975_v29 = vld [vmem:[#allocation10 + $0x4e8] sm:$0xff] }
 0xa67   :  { %10599 = vtanh.f32 %v3794_v14  ;;  %v3886_v14 = vld [vmem:[#allocation10 + $0x220] sm:$0xff] }
 0xa71   :  { %v10600_v23 = vpop.eup %10599 }
 0xa72   :  { %v3796_v24 = vmul.f32 %v10600_v23, %v10598_v10  ;;  %v3894_v10 = vld [vmem:[#allocation10 + $0x260] sm:$0xff]  ;;  %v9156_v23 = vpack.c.bf16 %v3895_v51, %v3887_v50  ;;  %v3969_v50 = vld [vmem:[#allocation10 + $0x4b8] sm:$0xff] }
 0xa73   :  { %v9158_v0 = vpack.c.bf16 %v3894_v10, %v3886_v14  ;;  %v3977_v51 = vld [vmem:[#allocation10 + $0x4f8] sm:$0xff]  ;;  %v9176_v14 = vpack.c.bf16 %v3975_v29, %v3967_v21 }
 0xa74   :  { %v3811_v5 = vsel %vm3797_vm2, %v3796_v24, %v12208_v25  ;;  %v3849_v25 = vld [vmem:[#allocation10 + $0xf8] sm:$0xff]  ;;  %v9220_v24 = vpack.c.bf16 %v3897_v60, %v3889_v63  ;;  %v9240_v10 = vpack.c.bf16 %v3977_v51, %v3969_v50 }
 0xa75   :  { %v3812_v6 = vsel %vm3799_vm3, %v3811_v5, %v12119_v36  ;;  %v9208_v3 = vpack.c.bf16 %v3849_v25, %v3841_v18  ;;  %v3888_v5 = vld [vmem:[#allocation10 + $0x230] sm:$0xff]  ;;  %v3919_v18 = vld [vmem:[#allocation10 + $0x328] sm:$0xff]  ;;  %v4049_v21 = vld [vmem:[#allocation10 + $0x738] sm:$0xff] }
 0xa76   :  { %v3813_v45 = vsel %vm3801_vm4, %v3812_v6, %v13597_v8  ;;  %v3896_v6 = vld [vmem:[#allocation10 + $0x270] sm:$0xff]  ;;  %v3911_v8 = vld [vmem:[#allocation10 + $0x2e8] sm:$0xff]  ;;  %v4057_v29 = vld [vmem:[#allocation10 + $0x778] sm:$0xff] }
 0xa77   :  { %v3814_v52 = vsel %vm3803_vm5, %v3813_v45, %v13598_v30  ;;  %v3905_v45 = vld [vmem:[#allocation10 + $0x2b8] sm:$0xff]  ;;  %v9222_v2 = vpack.c.bf16 %v3896_v6, %v3888_v5  ;;  %v3902_v30 = vld [vmem:[#allocation10 + $0x2a0] sm:$0xff]  ;;  %v9160_v62 = vpack.c.bf16 %v3911_v8, %v3903_v27  ;;  %v3927_v25 = vld [vmem:[#allocation10 + $0x368] sm:$0xff] }
 0xa78   :  { %v3815_v42 = vsel %vm3805_vm6, %v3814_v52, %v13599_v53  ;;  %v3910_v52 = vld [vmem:[#allocation10 + $0x2e0] sm:$0xff]  ;;  %v9224_v53 = vpack.c.bf16 %v3913_v17, %v3905_v45  ;;  %v3983_v5 = vld [vmem:[#allocation10 + $0x528] sm:$0xff]  ;;  %v3985_v27 = vld [vmem:[#allocation10 + $0x538] sm:$0xff] }
 0xa79   :  { %v3816_v36 = vsel %vm3807_vm7, %v3815_v42, %v13600_v39  ;;  %v3904_v42 = vld [vmem:[#allocation10 + $0x2b0] sm:$0xff]  ;;  %v3921_v39 = vld [vmem:[#allocation10 + $0x338] sm:$0xff]  ;;  %v3991_v6 = vld [vmem:[#allocation10 + $0x568] sm:$0xff] }
 0xa7a   :  { %v3817_v1 = vsel %vm3809_vm8, %v3816_v36, %v13601_v20  ;;  %v3929_v36 = vld [vmem:[#allocation10 + $0x378] sm:$0xff]  ;;  %v9164_v20 = vpack.c.bf16 %v3927_v25, %v3919_v18 }
 0xa7b   :  { %4180 = vmatprep.mubr.f32.mxu1 %v3817_v1  ;;  %4251 = vmatprep.mubr.f32.mxu0 %v3817_v1  ;;  %v3993_v8 = vld [vmem:[#allocation10 + $0x578] sm:$0xff] }
 0xa7c   :  { %4181 = vmatmul.mubr.f32.vlgmr.msra.gmra.mrb[36].mxu1 %v12222_v57  ;;  %4252 = vmatmul.mubr.f32.vlgmr.msra.gmra.mrb[38].mxu0 %v12222_v57  ;;  %v4001_v18 = vld [vmem:[#allocation10 + $0x5b8] sm:$0xff] }
 0xa7d   :  { %9143 = vmatpush1.bf16.msra.mxu1 %v9142_v11  ;;  %9207 = vmatpush1.bf16.msra.mxu0 %v9206_v41  ;;  %v9162_v11 = vpack.c.bf16 %v3910_v52, %v3902_v30  ;;  %v9226_v41 = vpack.c.bf16 %v3912_v38, %v3904_v42  ;;  %v9180_v30 = vpack.c.bf16 %v3991_v6, %v3983_v5  ;;  %v3999_v42 = vld [vmem:[#allocation10 + $0x5a8] sm:$0xff]  ;;  %v4009_v25 = vld [vmem:[#allocation10 + $0x5f8] sm:$0xff] }
 0xa7e   :  { %4322 = vmatprep.mubr.f32.mxu1 %v3817_v1  ;;  %4393 = vmatprep.mubr.f32.mxu0 %v3817_v1  ;;  %v9228_v1 = vpack.c.bf16 %v3929_v36, %v3921_v39  ;;  %v9244_v52 = vpack.c.bf16 %v3993_v8, %v3985_v27  ;;  %v4007_v38 = vld [vmem:[#allocation10 + $0x5e8] sm:$0xff]  ;;  %v9248_v35 = vpack.c.bf16 %v4009_v25, %v4001_v18  ;;  %v4065_v5 = vld [vmem:[#allocation10 + $0x7b8] sm:$0xff] }
 0xa7f   :  { %9145 = vmatprep.subr.bf16.mxu1 %v9144_v12  ;;  %9209 = vmatprep.subr.bf16.mxu0 %v9208_v3  ;;  %v3943_v12 = vld [vmem:[#allocation10 + $0x3e8] sm:$0xff]  ;;  %v3937_v3 = vld [vmem:[#allocation10 + $0x3b8] sm:$0xff]  ;;  %v9184_v40 = vpack.c.bf16 %v4007_v38, %v3999_v42 }
 0xa80   :  { %v9168_v16 = vpack.c.bf16 %v3943_v12, %v3935_v43  ;;  %v9232_v47 = vpack.c.bf16 %v3945_v48, %v3937_v3  ;;  %v4017_v43 = vld [vmem:[#allocation10 + $0x638] sm:$0xff] }
 0xa81   :  { %9147 = vmatpush1.bf16.msra.mxu1 %v9146_v9  ;;  %9211 = vmatpush1.bf16.msra.mxu0 %v9210_v46  ;;  %v3934_v9 = vld [vmem:[#allocation10 + $0x3a0] sm:$0xff]  ;;  %v4025_v12 = vld [vmem:[#allocation10 + $0x678] sm:$0xff] }
 0xa82   :  { %9149 = vmatprep.subr.bf16.mxu1 %v9148_v28  ;;  %9213 = vmatprep.subr.bf16.mxu0 %v9212_v4  ;;  %v3942_v46 = vld [vmem:[#allocation10 + $0x3e0] sm:$0xff]  ;;  %v3936_v28 = vld [vmem:[#allocation10 + $0x3b0] sm:$0xff]  ;;  %v4073_v6 = vld [vmem:[#allocation10 + $0x7f8] sm:$0xff] }
 0xa83   :  { %v3944_v4 = vld [vmem:[#allocation10 + $0x3f0] sm:$0xff]  ;;  %v9170_v58 = vpack.c.bf16 %v3942_v46, %v3934_v9  ;;  %v9188_v9 = vpack.c.bf16 %v4023_v59, %v4015_v56  ;;  %v9252_v46 = vpack.c.bf16 %v4025_v12, %v4017_v43  ;;  %v4403_v42 = vld [vmem:[#allocation11 + $0x18] sm:$0xff] }
 0xa84   :  { %v9234_v44 = vpack.c.bf16 %v3944_v4, %v3936_v28  ;;  %v4031_v28 = vld [vmem:[#allocation10 + $0x6a8] sm:$0xff]  ;;  %v4407_v38 = vld [vmem:[#allocation11 + $0x38] sm:$0xff] }
 0xa85   :  { %9151 = vmatpush1.bf16.msra.mxu1 %v9150_v49  ;;  %9215 = vmatpush1.bf16.msra.mxu0 %v9214_v19  ;;  %v3950_v49 = vld [vmem:[#allocation10 + $0x420] sm:$0xff]  ;;  %v4039_v4 = vld [vmem:[#allocation10 + $0x6e8] sm:$0xff]  ;;  %v4411_v56 = vld [vmem:[#allocation11 + $0x58] sm:$0xff] }
 0xa86   :  { %9153 = vmatprep.subr.bf16.mxu1 %v9152_v31  ;;  %9217 = vmatprep.subr.bf16.mxu0 %v9216_v32  ;;  %v3958_v19 = vld [vmem:[#allocation10 + $0x460] sm:$0xff]  ;;  %v3952_v31 = vld [vmem:[#allocation10 + $0x430] sm:$0xff]  ;;  %v4415_v59 = vld [vmem:[#allocation11 + $0x78] sm:$0xff] }
 0xa87   :  { %v3960_v32 = vld [vmem:[#allocation10 + $0x470] sm:$0xff]  ;;  %v9174_v63 = vpack.c.bf16 %v3958_v19, %v3950_v49  ;;  %v9192_v49 = vpack.c.bf16 %v4039_v4, %v4031_v28  ;;  %v9256_v19 = vpack.c.bf16 %v4041_v54, %v4033_v22  ;;  %v4419_v28 = vld [vmem:[#allocation11 + $0x98] sm:$0xff] }
 0xa88   :  { %v9238_v60 = vpack.c.bf16 %v3960_v32, %v3952_v31  ;;  %v4047_v31 = vld [vmem:[#allocation10 + $0x728] sm:$0xff]  ;;  %v4423_v4 = vld [vmem:[#allocation11 + $0xb8] sm:$0xff] }
 0xa89   :  { %9155 = vmatpush1.bf16.msra.mxu1 %v9154_v61  ;;  %9219 = vmatpush1.bf16.msra.mxu0 %v9218_v13  ;;  %v3966_v61 = vld [vmem:[#allocation10 + $0x4a0] sm:$0xff]  ;;  %v4055_v32 = vld [vmem:[#allocation10 + $0x768] sm:$0xff] }
 0xa8a   :  { %9157 = vmatprep.subr.bf16.mxu1 %v9156_v23  ;;  %9221 = vmatprep.subr.bf16.mxu0 %v9220_v24  ;;  %v3974_v13 = vld [vmem:[#allocation10 + $0x4e0] sm:$0xff]  ;;  %v3968_v23 = vld [vmem:[#allocation10 + $0x4b0] sm:$0xff] }
 0xa8b   :  { %v3976_v24 = vld [vmem:[#allocation10 + $0x4f0] sm:$0xff]  ;;  %v9178_v45 = vpack.c.bf16 %v3974_v13, %v3966_v61  ;;  %v9196_v61 = vpack.c.bf16 %v4055_v32, %v4047_v31  ;;  %v9260_v13 = vpack.c.bf16 %v4057_v29, %v4049_v21  ;;  %v4431_v31 = vld [vmem:[#allocation11 + $0xf8] sm:$0xff]  ;;  %v4424_v29 = vld [vmem:[#allocation11 + $0xc0] sm:$0xff] }
 0xa8c   :  { %v9242_v17 = vpack.c.bf16 %v3976_v24, %v3968_v23  ;;  %v4063_v23 = vld [vmem:[#allocation10 + $0x7a8] sm:$0xff] }
 0xa8d   :  { %9159 = vmatpush1.bf16.msra.mxu1 %v9158_v0  ;;  %9223 = vmatpush1.bf16.msra.mxu0 %v9222_v2  ;;  %v3982_v0 = vld [vmem:[#allocation10 + $0x520] sm:$0xff]  ;;  %v4071_v24 = vld [vmem:[#allocation10 + $0x7e8] sm:$0xff] }
 0xa8e   :  { %9161 = vmatprep.subr.bf16.mxu1 %v9160_v62  ;;  %9225 = vmatprep.subr.bf16.mxu0 %v9224_v53  ;;  %v3990_v2 = vld [vmem:[#allocation10 + $0x560] sm:$0xff]  ;;  %v3984_v62 = vld [vmem:[#allocation10 + $0x530] sm:$0xff] }
 0xa8f   :  { %v3992_v53 = vld [vmem:[#allocation10 + $0x570] sm:$0xff]  ;;  %v9182_v39 = vpack.c.bf16 %v3990_v2, %v3982_v0  ;;  %v9200_v0 = vpack.c.bf16 %v4071_v24, %v4063_v23  ;;  %v9264_v2 = vpack.c.bf16 %v4073_v6, %v4065_v5  ;;  %v4439_v23 = vld [vmem:[#allocation11 + $0x138] sm:$0xff]  ;;  %v4432_v6 = vld [vmem:[#allocation11 + $0x100] sm:$0xff] }
 0xa90   :  { %v9246_v36 = vpack.c.bf16 %v3992_v53, %v3984_v62  ;;  %v4401_v62 = vld [vmem:[#allocation11 + $0x8] sm:$0xff] }
 0xa91   :  { %9163 = vmatpush1.bf16.msra.mxu1 %v9162_v11  ;;  %9227 = vmatpush1.bf16.msra.mxu0 %v9226_v41  ;;  %v3998_v11 = vld [vmem:[#allocation10 + $0x5a0] sm:$0xff]  ;;  %v4405_v53 = vld [vmem:[#allocation11 + $0x28] sm:$0xff] }
 0xa92   :  { %9165 = vmatprep.subr.bf16.mxu1 %v9164_v20  ;;  %9229 = vmatprep.subr.bf16.mxu0 %v9228_v1  ;;  %v4006_v41 = vld [vmem:[#allocation10 + $0x5e0] sm:$0xff]  ;;  %v4000_v20 = vld [vmem:[#allocation10 + $0x5b0] sm:$0xff] }
 0xa93   :  { %v4008_v1 = vld [vmem:[#allocation10 + $0x5f0] sm:$0xff]  ;;  %v9186_v3 = vpack.c.bf16 %v4006_v41, %v3998_v11  ;;  %v12241_v11 = vpack.c.bf16 %v4405_v53, %v4401_v62  ;;  %v12243_v41 = vpack.c.bf16 %v4407_v38, %v4403_v42  ;;  %v4447_v62 = vld [vmem:[#allocation11 + $0x178] sm:$0xff]  ;;  %v4440_v38 = vld [vmem:[#allocation11 + $0x140] sm:$0xff] }
 0xa94   :  { %v9250_v48 = vpack.c.bf16 %v4008_v1, %v4000_v20  ;;  %v4409_v20 = vld [vmem:[#allocation11 + $0x48] sm:$0xff] }
 0xa95   :  { %9167 = vmatpush1.bf16.msra.mxu1 %v9166_v15  ;;  %9231 = vmatpush1.bf16.msra.mxu0 %v9230_v33  ;;  %v4014_v15 = vld [vmem:[#allocation10 + $0x620] sm:$0xff]  ;;  %v4413_v1 = vld [vmem:[#allocation11 + $0x68] sm:$0xff] }
 0xa96   :  { %9169 = vmatprep.subr.bf16.mxu1 %v9168_v16  ;;  %9233 = vmatprep.subr.bf16.mxu0 %v9232_v47  ;;  %v4022_v33 = vld [vmem:[#allocation10 + $0x660] sm:$0xff]  ;;  %v4016_v16 = vld [vmem:[#allocation10 + $0x630] sm:$0xff] }
 0xa97   :  { %v4024_v47 = vld [vmem:[#allocation10 + $0x670] sm:$0xff]  ;;  %v9190_v37 = vpack.c.bf16 %v4022_v33, %v4014_v15  ;;  %v12251_v15 = vpack.c.bf16 %v4413_v1, %v4409_v20  ;;  %v12253_v33 = vpack.c.bf16 %v4415_v59, %v4411_v56  ;;  %v4453_v20 = vld [vmem:[#allocation11 + $0x1a8] sm:$0xff]  ;;  %v4451_v1 = vld [vmem:[#allocation11 + $0x198] sm:$0xff] }
 0xa98   :  { %v9254_v55 = vpack.c.bf16 %v4024_v47, %v4016_v16  ;;  %v4417_v16 = vld [vmem:[#allocation11 + $0x88] sm:$0xff]  ;;  %v4455_v56 = vld [vmem:[#allocation11 + $0x1b8] sm:$0xff] }
 0xa99   :  { %9171 = vmatpush1.bf16.msra.mxu1 %v9170_v58  ;;  %9235 = vmatpush1.bf16.msra.mxu0 %v9234_v44  ;;  %v4030_v58 = vld [vmem:[#allocation10 + $0x6a0] sm:$0xff]  ;;  %13602 = vst [vmem:[#allocation57_spill] sm:$0xff] %v12253_v33  ;;  %v4421_v47 = vld [vmem:[#allocation11 + $0xa8] sm:$0xff] }
 0xa9a   :  { %9173 = vmatprep.subr.bf16.mxu1 %v9172_v26  ;;  %9237 = vmatprep.subr.bf16.mxu0 %v9236_v7  ;;  %v4038_v44 = vld [vmem:[#allocation10 + $0x6e0] sm:$0xff]  ;;  %v4032_v26 = vld [vmem:[#allocation10 + $0x6b0] sm:$0xff] }
 0xa9b   :  { %v4040_v7 = vld [vmem:[#allocation10 + $0x6f0] sm:$0xff]  ;;  %v9194_v50 = vpack.c.bf16 %v4038_v44, %v4030_v58  ;;  %v12265_v58 = vpack.c.bf16 %v4421_v47, %v4417_v16  ;;  %v12267_v44 = vpack.c.bf16 %v4423_v4, %v4419_v28  ;;  %v12317_v16 = vpack.c.bf16 %v4455_v56, %v4451_v1  ;;  %v4457_v4 = vld [vmem:[#allocation11 + $0x1c8] sm:$0xff]  ;;  %v4646_v1 = vld [vmem:[#allocation13 + $0x60] sm:$0xff] }
 0xa9c   :  { %v9258_v51 = vpack.c.bf16 %v4040_v7, %v4032_v26  ;;  %v4429_v26 = vld [vmem:[#allocation11 + $0xe8] sm:$0xff]  ;;  %v4427_v7 = vld [vmem:[#allocation11 + $0xd8] sm:$0xff]  ;;  %v4450_v47 = vld [vmem:[#allocation11 + $0x190] sm:$0xff] }
 0xa9d   :  { %9175 = vmatpush1.bf16.msra.mxu1 %v9174_v63  ;;  %9239 = vmatpush1.bf16.msra.mxu0 %v9238_v60  ;;  %v4046_v63 = vld [vmem:[#allocation10 + $0x720] sm:$0xff]  ;;  %13605 = vst [vmem:[#allocation60_spill] sm:$0xff] %v12265_v58  ;;  %13606 = vst [vmem:[#allocation61_spill] sm:$0xff] %v12267_v44  ;;  %v4454_v28 = vld [vmem:[#allocation11 + $0x1b0] sm:$0xff] }
 0xa9e   :  { %9177 = vmatprep.subr.bf16.mxu1 %v9176_v14  ;;  %9241 = vmatprep.subr.bf16.mxu0 %v9240_v10  ;;  %v4054_v60 = vld [vmem:[#allocation10 + $0x760] sm:$0xff]  ;;  %v4048_v14 = vld [vmem:[#allocation10 + $0x730] sm:$0xff]  ;;  %13622 = vst [vmem:[#allocation33_spill] sm:$0xff] %v12317_v16 }
 0xa9f   :  { %v4056_v10 = vld [vmem:[#allocation10 + $0x770] sm:$0xff]  ;;  %v9198_v27 = vpack.c.bf16 %v4054_v60, %v4046_v63  ;;  %v12281_v63 = vpack.c.bf16 %v4431_v31, %v4427_v7  ;;  %v4460_v7 = vld [vmem:[#allocation11 + $0x1e0] sm:$0xff] }
 0xaa0   :  { %v9262_v8 = vpack.c.bf16 %v4056_v10, %v4048_v14  ;;  %v4426_v60 = vld [vmem:[#allocation11 + $0xd0] sm:$0xff]  ;;  %v4437_v14 = vld [vmem:[#allocation11 + $0x128] sm:$0xff]  ;;  %v4435_v10 = vld [vmem:[#allocation11 + $0x118] sm:$0xff] }
 0xaa1   :  { %9179 = vmatpush1.bf16.msra.mxu1 %v9178_v45  ;;  %9243 = vmatpush1.bf16.msra.mxu0 %v9242_v17  ;;  %v4062_v45 = vld [vmem:[#allocation10 + $0x7a0] sm:$0xff]  ;;  %13610 = vst [vmem:[#allocation66_spill] sm:$0xff] %v12281_v63 }
 0xaa2   :  { %9181 = vmatprep.subr.bf16.mxu1 %v9180_v30  ;;  %9245 = vmatprep.subr.bf16.mxu0 %v9244_v52  ;;  %v4070_v17 = vld [vmem:[#allocation10 + $0x7e0] sm:$0xff]  ;;  %v4064_v30 = vld [vmem:[#allocation10 + $0x7b0] sm:$0xff] }
 0xaa3   :  { %v4072_v52 = vld [vmem:[#allocation10 + $0x7f0] sm:$0xff]  ;;  %v9202_v18 = vpack.c.bf16 %v4070_v17, %v4062_v45  ;;  %v12293_v45 = vpack.c.bf16 %v4439_v23, %v4435_v10  ;;  %v4641_v10 = vld [vmem:[#allocation13 + $0x38] sm:$0xff] }
 0xaa4   :  { %v9266_v25 = vpack.c.bf16 %v4072_v52, %v4064_v30  ;;  %v4434_v17 = vld [vmem:[#allocation11 + $0x110] sm:$0xff]  ;;  %v4445_v30 = vld [vmem:[#allocation11 + $0x168] sm:$0xff]  ;;  %v4443_v52 = vld [vmem:[#allocation11 + $0x158] sm:$0xff] }
 0xaa5   :  { %9183 = vmatpush1.bf16.msra.mxu1 %v9182_v39  ;;  %9247 = vmatpush1.bf16.msra.mxu0 %v9246_v36  ;;  %v4400_v39 = vld [vmem:[#allocation11] sm:$0xff]  ;;  %13614 = vst [vmem:[#allocation25_spill] sm:$0xff] %v12293_v45 }
 0xaa6   :  { %9185 = vmatprep.subr.bf16.mxu1 %v9184_v40  ;;  %9249 = vmatprep.subr.bf16.mxu0 %v9248_v35  ;;  %v4404_v36 = vld [vmem:[#allocation11 + $0x20] sm:$0xff]  ;;  %v4402_v40 = vld [vmem:[#allocation11 + $0x10] sm:$0xff] }
 0xaa7   :  { %v4406_v35 = vld [vmem:[#allocation11 + $0x30] sm:$0xff]  ;;  %v12245_v43 = vpack.c.bf16 %v4404_v36, %v4400_v39  ;;  %v12305_v39 = vpack.c.bf16 %v4447_v62, %v4443_v52  ;;  %v4643_v62 = vld [vmem:[#allocation13 + $0x48] sm:$0xff] }
 0xaa8   :  { %v12247_v12 = vpack.c.bf16 %v4406_v35, %v4402_v40  ;;  %v4442_v36 = vld [vmem:[#allocation11 + $0x150] sm:$0xff]  ;;  %v4449_v35 = vld [vmem:[#allocation11 + $0x188] sm:$0xff] }
 0xaa9   :  { %9187 = vmatpush1.bf16.msra.mxu1 %v9186_v3  ;;  %9251 = vmatpush1.bf16.msra.mxu0 %v9250_v48  ;;  %v4408_v3 = vld [vmem:[#allocation11 + $0x40] sm:$0xff]  ;;  %13618 = vst [vmem:[#allocation29_spill] sm:$0xff] %v12305_v39  ;;  %v4446_v40 = vld [vmem:[#allocation11 + $0x170] sm:$0xff] }
 0xaaa   :  { %9189 = vmatprep.subr.bf16.mxu1 %v9188_v9  ;;  %9253 = vmatprep.subr.bf16.mxu0 %v9252_v46  ;;  %v4412_v48 = vld [vmem:[#allocation11 + $0x60] sm:$0xff]  ;;  %v4410_v9 = vld [vmem:[#allocation11 + $0x50] sm:$0xff] }
 0xaab   :  { %v4414_v46 = vld [vmem:[#allocation11 + $0x70] sm:$0xff]  ;;  %v12259_v22 = vpack.c.bf16 %v4412_v48, %v4408_v3  ;;  %v12311_v3 = vpack.c.bf16 %v4446_v40, %v4442_v36  ;;  %v4448_v48 = vld [vmem:[#allocation11 + $0x180] sm:$0xff]  ;;  %v4649_v36 = vld [vmem:[#allocation13 + $0x78] sm:$0xff] }
 0xaac   :  { %v12261_v54 = vpack.c.bf16 %v4414_v46, %v4410_v9  ;;  %v4452_v9 = vld [vmem:[#allocation11 + $0x1a0] sm:$0xff]  ;;  %v12315_v46 = vpack.c.bf16 %v4453_v20, %v4449_v35  ;;  %v4640_v52 = vld [vmem:[#allocation13 + $0x30] sm:$0xff] }
 0xaad   :  { %9191 = vmatpush1.bf16.msra.mxu1 %v9190_v37  ;;  %9255 = vmatpush1.bf16.msra.mxu0 %v9254_v55  ;;  %13603 = vst [vmem:[#allocation58_spill] sm:$0xff] %v12259_v22  ;;  %v4416_v37 = vld [vmem:[#allocation11 + $0x80] sm:$0xff]  ;;  %13620 = vst [vmem:[#allocation31_spill] sm:$0xff] %v12311_v3 }
 0xaae   :  { %9193 = vmatprep.subr.bf16.mxu1 %v9192_v49  ;;  %9257 = vmatprep.subr.bf16.mxu0 %v9256_v19  ;;  %13604 = vst [vmem:[#allocation59_spill] sm:$0xff] %v12261_v54  ;;  %v4420_v55 = vld [vmem:[#allocation11 + $0xa0] sm:$0xff]  ;;  %v4418_v49 = vld [vmem:[#allocation11 + $0x90] sm:$0xff]  ;;  %v4425_v19 = vld [vmem:[#allocation11 + $0xc8] sm:$0xff] }
 0xaaf   :  { %v12273_v32 = vpack.c.bf16 %v4420_v55, %v4416_v37  ;;  %13621 = vst [vmem:[#allocation32_spill] sm:$0xff] %v12315_v46  ;;  %v4461_v37 = vld [vmem:[#allocation11 + $0x1e8] sm:$0xff]  ;;  %v4459_v55 = vld [vmem:[#allocation11 + $0x1d8] sm:$0xff]  ;;  %v4642_v20 = vld [vmem:[#allocation13 + $0x40] sm:$0xff] }
 0xab0   :  { %v12327_v31 = vpack.c.bf16 %v4461_v37, %v4457_v4  ;;  %v4655_v4 = vld [vmem:[#allocation13 + $0xa8] sm:$0xff]  ;;  %v4653_v37 = vld [vmem:[#allocation13 + $0x98] sm:$0xff] }
 0xab1   :  { %9195 = vmatpush1.bf16.msra.mxu1 %v9194_v50  ;;  %9259 = vmatpush1.bf16.msra.mxu0 %v9258_v51  ;;  %13607 = vst [vmem:[#allocation63_spill] sm:$0xff] %v12273_v32  ;;  %v4428_v50 = vld [vmem:[#allocation11 + $0xe0] sm:$0xff]  ;;  %v12279_v51 = vpack.c.bf16 %v4429_v26, %v4425_v19  ;;  %v12323_v19 = vpack.c.bf16 %v4454_v28, %v4450_v47  ;;  %v4648_v47 = vld [vmem:[#allocation13 + $0x70] sm:$0xff]  ;;  %v4651_v28 = vld [vmem:[#allocation13 + $0x88] sm:$0xff] }
 0xab2   :  { %9197 = vmatprep.subr.bf16.mxu1 %v9196_v61  ;;  %9261 = vmatprep.subr.bf16.mxu0 %v9260_v13  ;;  %v4430_v61 = vld [vmem:[#allocation11 + $0xf0] sm:$0xff]  ;;  %v4433_v13 = vld [vmem:[#allocation11 + $0x108] sm:$0xff]  ;;  %v12285_v24 = vpack.c.bf16 %v4428_v50, %v4424_v29  ;;  %v4456_v26 = vld [vmem:[#allocation11 + $0x1c0] sm:$0xff]  ;;  %13625 = vst [vmem:[#allocation36_spill] sm:$0xff] %v12327_v31 }
 0xab3   :  { %13609 = vst [vmem:[#allocation65_spill] sm:$0xff] %v12279_v51  ;;  %v12287_v5 = vpack.c.bf16 %v4430_v61, %v4426_v60  ;;  %13624 = vst [vmem:[#allocation35_spill] sm:$0xff] %v12323_v19  ;;  %v4458_v50 = vld [vmem:[#allocation11 + $0x1d0] sm:$0xff]  ;;  %v4635_v61 = vld [vmem:[#allocation13 + $0x8] sm:$0xff]  ;;  %v12333_v23 = vpack.c.bf16 %v4460_v7, %v4456_v26 }
 0xab4   :  { %13611 = vst [vmem:[#allocation67_spill] sm:$0xff] %v12285_v24  ;;  %v4462_v60 = vld [vmem:[#allocation11 + $0x1f0] sm:$0xff]  ;;  %v4650_v7 = vld [vmem:[#allocation13 + $0x80] sm:$0xff] }
 0xab5   :  { %9199 = vmatpush1.bf16.msra.mxu1 %v9198_v27  ;;  %9263 = vmatpush1.bf16.msra.mxu0 %v9262_v8  ;;  %13612 = vst [vmem:[#allocation23_spill] sm:$0xff] %v12287_v5  ;;  %v4436_v27 = vld [vmem:[#allocation11 + $0x120] sm:$0xff]  ;;  %v12291_v8 = vpack.c.bf16 %v4437_v14, %v4433_v13  ;;  %v4639_v13 = vld [vmem:[#allocation13 + $0x28] sm:$0xff]  ;;  %v4637_v14 = vld [vmem:[#allocation13 + $0x18] sm:$0xff] }
 0xab6   :  { %9201 = vmatprep.subr.bf16.mxu1 %v9200_v0  ;;  %9265 = vmatprep.subr.bf16.mxu0 %v9264_v2  ;;  %v4438_v0 = vld [vmem:[#allocation11 + $0x130] sm:$0xff]  ;;  %v4441_v2 = vld [vmem:[#allocation11 + $0x148] sm:$0xff]  ;;  %v12297_v53 = vpack.c.bf16 %v4436_v27, %v4432_v6  ;;  %13627 = vst [vmem:[#allocation38_spill] sm:$0xff] %v12333_v23  ;;  %v12335_v6 = vpack.c.bf16 %v4462_v60, %v4458_v50  ;;  %v4634_v27 = vld [vmem:[#allocation13] sm:$0xff] }
 0xab7   :  { %13613 = vst [vmem:[#allocation24_spill] sm:$0xff] %v12291_v8  ;;  %v12299_v42 = vpack.c.bf16 %v4438_v0, %v4434_v17  ;;  %v4638_v17 = vld [vmem:[#allocation13 + $0x20] sm:$0xff]  ;;  %v12339_v0 = vpack.c.bf16 %v4639_v13, %v4635_v61  ;;  %v12365_v60 = vpack.c.bf16 %v4655_v4, %v4651_v28  ;;  %v4652_v13 = vld [vmem:[#allocation13 + $0x90] sm:$0xff]  ;;  %v4671_v28 = vld [vmem:[#allocation13 + $0x128] sm:$0xff] }
 0xab8   :  { %13615 = vst [vmem:[#allocation26_spill] sm:$0xff] %v12297_v53  ;;  %13628 = vst [vmem:[#allocation39_spill] sm:$0xff] %v12335_v6  ;;  %v12345_v40 = vpack.c.bf16 %v4638_v17, %v4634_v27  ;;  %v4654_v50 = vld [vmem:[#allocation13 + $0xa0] sm:$0xff]  ;;  %v4663_v27 = vld [vmem:[#allocation13 + $0xe8] sm:$0xff] }
 0xab9   :  { %9203 = vmatpush1.bf16.msra.mxu1 %v9202_v18  ;;  %9267 = vmatpush1.bf16.msra.mxu0 %v9266_v25  ;;  %13616 = vst [vmem:[#allocation27_spill] sm:$0xff] %v12299_v42  ;;  %v4444_v18 = vld [vmem:[#allocation11 + $0x160] sm:$0xff]  ;;  %v12303_v25 = vpack.c.bf16 %v4445_v30, %v4441_v2  ;;  %13629 = vst [vmem:[#allocation40_spill] sm:$0xff] %v12339_v0  ;;  %v12341_v2 = vpack.c.bf16 %v4641_v10, %v4637_v14  ;;  %v4636_v30 = vld [vmem:[#allocation13 + $0x10] sm:$0xff] }
 0xaba   :  { %9269 = vmatprep.subr.bf16.mxu1 %v12241_v11  ;;  %9301 = vmatprep.subr.bf16.mxu0 %v12243_v41  ;;  %v12309_v59 = vpack.c.bf16 %v4444_v18, %v4440_v38  ;;  %v4647_v38 = vld [vmem:[#allocation13 + $0x68] sm:$0xff]  ;;  %v4645_v18 = vld [vmem:[#allocation13 + $0x58] sm:$0xff]  ;;  %v12347_v35 = vpack.c.bf16 %v4640_v52, %v4636_v30  ;;  %v4656_v14 = vld [vmem:[#allocation13 + $0xb0] sm:$0xff]  ;;  %v12373_v52 = vpack.c.bf16 %v4654_v50, %v4650_v7 }
 0xabb   :  { %13617 = vst [vmem:[#allocation28_spill] sm:$0xff] %v12303_v25  ;;  %13630 = vst [vmem:[#allocation41_spill] sm:$0xff] %v12341_v2  ;;  %v12351_v56 = vpack.c.bf16 %v4647_v38, %v4643_v62  ;;  %v4659_v10 = vld [vmem:[#allocation13 + $0xc8] sm:$0xff]  ;;  %v4661_v17 = vld [vmem:[#allocation13 + $0xd8] sm:$0xff]  ;;  %v12375_v62 = vpack.c.bf16 %v4656_v14, %v4652_v13 }
 0xabc   :  { %4323 = vmatmul.mubr.f32.vlgmr.msra.gmra.mrb[38].mxu1 %v12222_v57  ;;  %4394 = vmatmul.mubr.f32.vlgmr.msra.gmra.mrb[40].mxu0 %v12222_v57  ;;  %v4422_v57 = vld [vmem:[#allocation11 + $0xb0] sm:$0xff]  ;;  %13619 = vst [vmem:[#allocation30_spill] sm:$0xff] %v12309_v59  ;;  %v4665_v30 = vld [vmem:[#allocation13 + $0xf8] sm:$0xff]  ;;  %13632 = vst [vmem:[#allocation43_spill] sm:$0xff] %v12373_v52 }
 0xabd   :  { %9271 = vmatpush1.bf16.msra.mxu1 %v12245_v43  ;;  %9303 = vmatpush1.bf16.msra.mxu0 %v12247_v12  ;;  %v12275_v21 = vpack.c.bf16 %v4422_v57, %v4418_v49  ;;  %v4463_v49 = vld [vmem:[#allocation11 + $0x1f8] sm:$0xff]  ;;  %v12321_v57 = vpack.c.bf16 %v4452_v9, %v4448_v48  ;;  %v12353_v48 = vpack.c.bf16 %v4649_v36, %v4645_v18  ;;  %v4644_v9 = vld [vmem:[#allocation13 + $0x50] sm:$0xff]  ;;  %v4658_v38 = vld [vmem:[#allocation13 + $0xc0] sm:$0xff] }
 0xabe   :  { %9273 = vmatprep.subr.bf16.mxu1 %v12251_v15  ;;  %9305 = vmatprep.subr.bf16.mxu0 %v12253_v33  ;;  %v12329_v29 = vpack.c.bf16 %v4463_v49, %v4459_v55  ;;  %v4657_v55 = vld [vmem:[#allocation13 + $0xb8] sm:$0xff]  ;;  %v12359_v49 = vpack.c.bf16 %v4646_v1, %v4642_v20  ;;  %v12361_v26 = vpack.c.bf16 %v4648_v47, %v4644_v9  ;;  %v4662_v18 = vld [vmem:[#allocation13 + $0xe0] sm:$0xff]  ;;  %v4660_v1 = vld [vmem:[#allocation13 + $0xd0] sm:$0xff] }
 0xabf   :  { %4528 = vmatprep.mubr.f32.mxu1 %v13409_v34  ;;  %4599 = vmatprep.mubr.f32.mxu0 %v13409_v34  ;;  %13608 = vst [vmem:[#allocation64_spill] sm:$0xff] %v12275_v21  ;;  %13623 = vst [vmem:[#allocation34_spill] sm:$0xff] %v12321_v57  ;;  %v12367_v61 = vpack.c.bf16 %v4657_v55, %v4653_v37  ;;  %v12379_v36 = vpack.c.bf16 %v4663_v27, %v4659_v10  ;;  %v4664_v9 = vld [vmem:[#allocation13 + $0xf0] sm:$0xff]  ;;  %v4667_v47 = vld [vmem:[#allocation13 + $0x108] sm:$0xff] }
 0xac0   :  { %13626 = vst [vmem:[#allocation37_spill] sm:$0xff] %v12329_v29  ;;  %13633 = vst [vmem:[#allocation44_spill] sm:$0xff] %v12375_v62  ;;  %v12381_v20 = vpack.c.bf16 %v4665_v30, %v4661_v17  ;;  %v4669_v4 = vld [vmem:[#allocation13 + $0x118] sm:$0xff]  ;;  %v12385_v55 = vpack.c.bf16 %v4662_v18, %v4658_v38  ;;  %v12387_v7 = vpack.c.bf16 %v4664_v9, %v4660_v1  ;;  %v4666_v50 = vld [vmem:[#allocation13 + $0x100] sm:$0xff] }
 0xac1   :  { %9275 = vmatpush1.bf16.msra.mxu1 %v12259_v22  ;;  %9307 = vmatpush1.bf16.msra.mxu0 %v12261_v54  ;;  %13631 = vst [vmem:[#allocation42_spill] sm:$0xff] %v12367_v61  ;;  %13634 = vst [vmem:[#allocation45_spill] sm:$0xff] %v12379_v36  ;;  %v4673_v37 = vld [vmem:[#allocation13 + $0x138] sm:$0xff]  ;;  %v4670_v13 = vld [vmem:[#allocation13 + $0x120] sm:$0xff]  ;;  %v12391_v14 = vpack.c.bf16 %v4671_v28, %v4667_v47 }
 0xac2   :  { %9277 = vmatprep.subr.bf16.mxu1 %v12265_v58  ;;  %9309 = vmatprep.subr.bf16.mxu0 %v12267_v44  ;;  %13635 = vst [vmem:[#allocation46_spill] sm:$0xff] %v12381_v20  ;;  %13636 = vst [vmem:[#allocation47_spill] sm:$0xff] %v12385_v55  ;;  %v12393_v10 = vpack.c.bf16 %v4673_v37, %v4669_v4  ;;  %v4668_v27 = vld [vmem:[#allocation13 + $0x110] sm:$0xff]  ;;  %v4675_v30 = vld [vmem:[#allocation13 + $0x148] sm:$0xff]  ;;  %v12397_v38 = vpack.c.bf16 %v4670_v13, %v4666_v50 }
 0xac3   :  { %13637 = vst [vmem:[#allocation48_spill] sm:$0xff] %v12387_v7  ;;  %13638 = vst [vmem:[#allocation49_spill] sm:$0xff] %v12391_v14  ;;  %v4672_v17 = vld [vmem:[#allocation13 + $0x130] sm:$0xff]  ;;  %v4674_v1 = vld [vmem:[#allocation13 + $0x140] sm:$0xff] }
 0xac4   :  { %13639 = vst [vmem:[#allocation50_spill] sm:$0xff] %v12393_v10  ;;  %13640 = vst [vmem:[#allocation51_spill] sm:$0xff] %v12397_v38  ;;  %v12399_v18 = vpack.c.bf16 %v4672_v17, %v4668_v27  ;;  %v4678_v9 = vld [vmem:[#allocation13 + $0x160] sm:$0xff]  ;;  %v4676_v4 = vld [vmem:[#allocation13 + $0x150] sm:$0xff] }
 0xac5   :  { %9279 = vmatpush1.bf16.msra.mxu1 %v12273_v32  ;;  %9311 = vmatpush1.bf16.msra.mxu0 %v12275_v21  ;;  %v4680_v37 = vld [vmem:[#allocation13 + $0x170] sm:$0xff]  ;;  %v12409_v50 = vpack.c.bf16 %v4678_v9, %v4674_v1  ;;  %v4682_v27 = vld [vmem:[#allocation13 + $0x180] sm:$0xff] }
 0xac6   :  { %9281 = vmatprep.subr.bf16.mxu1 %v12279_v51  ;;  %9313 = vmatprep.subr.bf16.mxu0 %v12281_v63  ;;  %13641 = vst [vmem:[#allocation56_spill] sm:$0xff] %v12399_v18  ;;  %v12411_v13 = vpack.c.bf16 %v4680_v37, %v4676_v4  ;;  %v4686_v17 = vld [vmem:[#allocation13 + $0x1a0] sm:$0xff]  ;;  %v4696_v37 = vld [vmem:[#allocation13 + $0x1f0] sm:$0xff] }
 0xac7   :  { %v12421_v1 = vpack.c.bf16 %v4686_v17, %v4682_v27  ;;  %v4690_v4 = vld [vmem:[#allocation13 + $0x1c0] sm:$0xff] }
 0xac9   :  { %9283 = vmatpush1.bf16.msra.mxu1 %v12285_v24  ;;  %9315 = vmatpush1.bf16.msra.mxu0 %v12287_v5 }
 0xaca   :  { %9285 = vmatprep.subr.bf16.mxu1 %v12291_v8  ;;  %9317 = vmatprep.subr.bf16.mxu0 %v12293_v45 }
 0xacd   :  { %9287 = vmatpush1.bf16.msra.mxu1 %v12297_v53  ;;  %9319 = vmatpush1.bf16.msra.mxu0 %v12299_v42 }
 0xace   :  { %9289 = vmatprep.subr.bf16.mxu1 %v12303_v25  ;;  %9321 = vmatprep.subr.bf16.mxu0 %v12305_v39 }
 0xad1   :  { %9291 = vmatpush1.bf16.msra.mxu1 %v12309_v59  ;;  %9323 = vmatpush1.bf16.msra.mxu0 %v12311_v3 }
 0xad2   :  { %9293 = vmatprep.subr.bf16.mxu1 %v12315_v46  ;;  %9325 = vmatprep.subr.bf16.mxu0 %v12317_v16 }
 0xad5   :  { %9295 = vmatpush1.bf16.msra.mxu1 %v12321_v57  ;;  %9327 = vmatpush1.bf16.msra.mxu0 %v12323_v19 }
 0xad6   :  { %9297 = vmatprep.subr.bf16.mxu1 %v12327_v31  ;;  %9329 = vmatprep.subr.bf16.mxu0 %v12329_v29 }
 0xad9   :  { %9299 = vmatpush1.bf16.msra.mxu1 %v12333_v23  ;;  %9331 = vmatpush1.bf16.msra.mxu0 %v12335_v6 }
 0xada   :  { %9333 = vmatprep.subr.bf16.mxu1 %v12339_v0  ;;  %9365 = vmatprep.subr.bf16.mxu0 %v12341_v2 }
 0xadc   :  { %4529 = vmatmul.mubr.f32.vlgmr.msra.gmra.mrb[40].mxu1 %v13409_v34  ;;  %4600 = vmatmul.mubr.f32.vlgmr.msra.gmra.mrb[42].mxu0 %v13409_v34 }
 0xadd   :  { %9335 = vmatpush1.bf16.msra.mxu1 %v12345_v40  ;;  %9367 = vmatpush1.bf16.msra.mxu0 %v12347_v35 }
 0xade   :  { %9337 = vmatprep.subr.bf16.mxu1 %v12351_v56  ;;  %9369 = vmatprep.subr.bf16.mxu0 %v12353_v48 }
 0xadf   :  { %4762 = vmatprep.mubr.f32.mxu1 %v13409_v34  ;;  %4833 = vmatprep.mubr.f32.mxu0 %v13409_v34 }
 0xae1   :  { %9339 = vmatpush1.bf16.msra.mxu1 %v12359_v49  ;;  %9371 = vmatpush1.bf16.msra.mxu0 %v12361_v26 }
 0xae2   :  { %9341 = vmatprep.subr.bf16.mxu1 %v12365_v60  ;;  %9373 = vmatprep.subr.bf16.mxu0 %v12367_v61  ;;  %v4677_v61 = vld [vmem:[#allocation13 + $0x158] sm:$0xff] }
 0xae5   :  { %9343 = vmatpush1.bf16.msra.mxu1 %v12373_v52  ;;  %9375 = vmatpush1.bf16.msra.mxu0 %v12375_v62  ;;  %v4679_v52 = vld [vmem:[#allocation13 + $0x168] sm:$0xff]  ;;  %v4681_v62 = vld [vmem:[#allocation13 + $0x178] sm:$0xff] }
 0xae6   :  { %9345 = vmatprep.subr.bf16.mxu1 %v12379_v36  ;;  %9377 = vmatprep.subr.bf16.mxu0 %v12381_v20  ;;  %v12403_v47 = vpack.c.bf16 %v4679_v52, %v4675_v30  ;;  %v12405_v28 = vpack.c.bf16 %v4681_v62, %v4677_v61  ;;  %v4683_v20 = vld [vmem:[#allocation13 + $0x188] sm:$0xff]  ;;  %v4685_v36 = vld [vmem:[#allocation13 + $0x198] sm:$0xff]  ;;  %v4684_v62 = vld [vmem:[#allocation13 + $0x190] sm:$0xff] }
 0xae7   :  { %v4688_v30 = vld [vmem:[#allocation13 + $0x1b0] sm:$0xff] }
 0xae8   :  { %v12423_v9 = vpack.c.bf16 %v4688_v30, %v4684_v62 }
 0xae9   :  { %9347 = vmatpush1.bf16.msra.mxu1 %v12385_v55  ;;  %9379 = vmatpush1.bf16.msra.mxu0 %v12387_v7  ;;  %v4687_v55 = vld [vmem:[#allocation13 + $0x1a8] sm:$0xff]  ;;  %v4689_v7 = vld [vmem:[#allocation13 + $0x1b8] sm:$0xff] }
 0xaea   :  { %9349 = vmatprep.subr.bf16.mxu1 %v12391_v14  ;;  %9381 = vmatprep.subr.bf16.mxu0 %v12393_v10  ;;  %v12415_v61 = vpack.c.bf16 %v4687_v55, %v4683_v20  ;;  %v12417_v52 = vpack.c.bf16 %v4689_v7, %v4685_v36  ;;  %v4691_v10 = vld [vmem:[#allocation13 + $0x1c8] sm:$0xff]  ;;  %v4693_v14 = vld [vmem:[#allocation13 + $0x1d8] sm:$0xff]  ;;  %v4694_v55 = vld [vmem:[#allocation13 + $0x1e0] sm:$0xff] }
 0xaeb   :  { %v4692_v7 = vld [vmem:[#allocation13 + $0x1d0] sm:$0xff]  ;;  %v12433_v27 = vpack.c.bf16 %v4694_v55, %v4690_v4 }
 0xaec   :  { %v12435_v17 = vpack.c.bf16 %v4696_v37, %v4692_v7  ;;  %v4074_v7 = vld [vmem:[%s13167_s9] sm:$0xff] }
 0xaed   :  { %9351 = vmatpush1.bf16.msra.mxu1 %v12397_v38  ;;  %9383 = vmatpush1.bf16.msra.mxu0 %v12399_v18  ;;  %v4695_v38 = vld [vmem:[#allocation13 + $0x1e8] sm:$0xff]  ;;  %v4697_v18 = vld [vmem:[#allocation13 + $0x1f8] sm:$0xff]  ;;  %v13642_v37 = vld [vmem:[#allocation62_spill] sm:$0xff] }
 0xaee   :  { %9353 = vmatprep.subr.bf16.mxu1 %v12403_v47  ;;  %9385 = vmatprep.subr.bf16.mxu0 %v12405_v28  ;;  %v12427_v36 = vpack.c.bf16 %v4695_v38, %v4691_v10  ;;  %v12429_v20 = vpack.c.bf16 %v4697_v18, %v4693_v14 }
 0xaf1   :  { %9355 = vmatpush1.bf16.msra.mxu1 %v12409_v50  ;;  %9387 = vmatpush1.bf16.msra.mxu0 %v12411_v13 }
 0xaf2   :  { %9357 = vmatprep.subr.bf16.mxu1 %v12415_v61  ;;  %9389 = vmatprep.subr.bf16.mxu0 %v12417_v52 }
 0xaf5   :  { %9359 = vmatpush1.bf16.msra.mxu1 %v12421_v1  ;;  %9391 = vmatpush1.bf16.msra.mxu0 %v12423_v9 }
 0xaf6   :  { %9361 = vmatprep.subr.bf16.mxu1 %v12427_v36  ;;  %9393 = vmatprep.subr.bf16.mxu0 %v12429_v20 }
 0xaf9   :  { %9363 = vmatpush1.bf16.msra.mxu1 %v12433_v27  ;;  %9395 = vmatpush1.bf16.msra.mxu0 %v12435_v17 }
 0xafa   :  { %9397 = vmatprep.subr.bf16.mxu1 %v12241_v11  ;;  %9429 = vmatprep.subr.bf16.mxu0 %v12243_v41 }
 0xafc   :  { %4763 = vmatmul.mubr.f32.vlgmr.msra.gmra.mrb[42].mxu1 %v13409_v34  ;;  %4834 = vmatmul.mubr.f32.vlgmr.msra.gmra.mrb[44].mxu0 %v13409_v34 }
 0xafd   :  { %9399 = vmatpush1.bf16.msra.mxu1 %v12245_v43  ;;  %9431 = vmatpush1.bf16.msra.mxu0 %v12247_v12 }
 0xafe   :  { %9401 = vmatprep.subr.bf16.mxu1 %v12251_v15  ;;  %9433 = vmatprep.subr.bf16.mxu0 %v12253_v33 }
 0xaff   :  { %4944 = vmatprep.mubr.f32.mxu1 %v13409_v34  ;;  %5015 = vmatprep.mubr.f32.mxu0 %v13409_v34 }
 0xb01   :  { %9403 = vmatpush1.bf16.msra.mxu1 %v12259_v22  ;;  %9435 = vmatpush1.bf16.msra.mxu0 %v12261_v54 }
 0xb02   :  { %9405 = vmatprep.subr.bf16.mxu1 %v12265_v58  ;;  %9437 = vmatprep.subr.bf16.mxu0 %v12267_v44 }
 0xb05   :  { %9407 = vmatpush1.bf16.msra.mxu1 %v12273_v32  ;;  %9439 = vmatpush1.bf16.msra.mxu0 %v12275_v21 }
 0xb06   :  { %9409 = vmatprep.subr.bf16.mxu1 %v12279_v51  ;;  %9441 = vmatprep.subr.bf16.mxu0 %v12281_v63 }
 0xb09   :  { %9411 = vmatpush1.bf16.msra.mxu1 %v12285_v24  ;;  %9443 = vmatpush1.bf16.msra.mxu0 %v12287_v5 }
 0xb0a   :  { %9413 = vmatprep.subr.bf16.mxu1 %v12291_v8  ;;  %9445 = vmatprep.subr.bf16.mxu0 %v12293_v45 }
 0xb0d   :  { %9415 = vmatpush1.bf16.msra.mxu1 %v12297_v53  ;;  %9447 = vmatpush1.bf16.msra.mxu0 %v12299_v42 }
 0xb0e   :  { %9417 = vmatprep.subr.bf16.mxu1 %v12303_v25  ;;  %9449 = vmatprep.subr.bf16.mxu0 %v12305_v39  ;;  %v13647_v39 = vsub.s32 2, %v13642_v37 }
 0xb10   :  { %v4087_v25 = vrot.slane %v4074_v7, %v13647_v39 }
 0xb11   :  { %9419 = vmatpush1.bf16.msra.mxu1 %v12309_v59  ;;  %9451 = vmatpush1.bf16.msra.mxu0 %v12311_v3 }
 0xb12   :  { %9421 = vmatprep.subr.bf16.mxu1 %v12315_v46  ;;  %9453 = vmatprep.subr.bf16.mxu0 %v12317_v16 }
 0xb15   :  { %9423 = vmatpush1.bf16.msra.mxu1 %v12321_v57  ;;  %9455 = vmatpush1.bf16.msra.mxu0 %v12323_v19 }
 0xb16   :  { %9425 = vmatprep.subr.bf16.mxu1 %v12327_v31  ;;  %9457 = vmatprep.subr.bf16.mxu0 %v12329_v29 }
 0xb19   :  { %9427 = vmatpush1.bf16.msra.mxu1 %v12333_v23  ;;  %9459 = vmatpush1.bf16.msra.mxu0 %v12335_v6  ;;  %v13643_v23 = vsub.s32 0, %v13642_v37 }
 0xb1a   :  { %9461 = vmatprep.subr.bf16.mxu1 %v12339_v0  ;;  %9493 = vmatprep.subr.bf16.mxu0 %v12341_v2  ;;  %v13644_v0 = vsub.s32 1, %v13642_v37 }
 0xb1b   :  { %v4079_v6 = vrot.slane %v4074_v7, %v13643_v23 }
 0xb1c   :  { %v4083_v29 = vrot.slane %v4074_v7, %v13644_v0  ;;  %v13648_v0 = vsub.s32 3, %v13642_v37 }
 0xb4f   :  { %v4182_v14 = vpop.f32.mrb[36].mxu1  ;;  %v4253_v10 = vpop.f32.mrb[38].mxu0 }
 0xb50   :  { %v4184_v38 = vpop.f32.mrb[37].mxu1  ;;  %v4255_v18 = vpop.f32.mrb[39].mxu0  ;;  %v12488_v2 = vadd.f32 %v4182_v14, %v4079_v6  ;;  %v4091_v6 = vrot.slane %v4074_v7, %v13648_v0  ;;  %v12498_v14 = vadd.f32 %v4253_v10, %v4087_v25  ;;  %v13651_v10 = vsub.s32 4, %v13642_v37 }
 0xb51   :  { %v12490_v31 = vadd.f32 %v4184_v38, %v4083_v29  ;;  %v13652_v0 = vsub.s32 5, %v13642_v37 }
 0xb52   :  { %13645 = vst [vmem:[#allocation55_spill] sm:$0xff] %v12488_v2  ;;  %13649 = vst [vmem:[#allocation53_spill] sm:$0xff] %v12498_v14  ;;  %v12501_v38 = vadd.f32 %v4255_v18, %v4091_v6 }
 0xb53   :  { %13646 = vst [vmem:[#allocation54_spill] sm:$0xff] %v12490_v31 }
 0xb54   :  { %13650 = vst [vmem:[#allocation52_spill] sm:$0xff] %v12501_v38 }
 0xb8f   :  { %v4324_v62 = vpop.f32.mrb[38].mxu1  ;;  %v4395_v30 = vpop.f32.mrb[40].mxu0 }
 0xb90   :  { %v4326_v4 = vpop.f32.mrb[39].mxu1  ;;  %v12479_v55 = vpop.f32.mrb[41].mxu0 }
 0xbaf   :  { %v4530_v19 = vpop.f32.mrb[40].mxu1  ;;  %v4601_v57 = vpop.f32.mrb[42].mxu0 }
 0xbb0   :  { %v4606_v16 = vadd.f32 %v4530_v19, %v12488_v2  ;;  %v4532_v46 = vpop.f32.mrb[41].mxu1  ;;  %v4603_v3 = vpop.f32.mrb[43].mxu0  ;;  %v4608_v29 = vadd.f32 %v4601_v57, %v12498_v14 }
 0xbb1   :  { %v4607_v59 = vadd.f32 %v4532_v46, %v12490_v31  ;;  %v4609_v19 = vadd.f32 %v4603_v3, %v12501_v38  ;;  %v4099_v3 = vrot.slane %v4074_v7, %v13652_v0  ;;  %v13654_v0 = vsub.s32 7, %v13642_v37 }
 0xbb2   :  { %v7700_v42 = vmul.f32 -1.442695, %v4606_v16  ;;  %v7702_v2 = vmul.f32 -1.442695, %v4608_v29 }
 0xbb3   :  { %v7701_v23 = vmul.f32 -1.442695, %v4607_v59  ;;  %v12512_v14 = vadd.f32 %v4326_v4, %v4099_v3 }
 0xbb4   :  { %10601 = vpow2.f32 %v7700_v42 }
 0xbb5   :  { %10603 = vpow2.f32 %v7701_v23  ;;  %v4095_v23 = vrot.slane %v4074_v7, %v13651_v10 }
 0xbb6   :  { %10605 = vtanh.f32 %v4609_v19 }
 0xbb7   :  { %10607 = vpow2.f32 %v7702_v2  ;;  %v12508_v38 = vadd.f32 %v4324_v62, %v4095_v23 }
 0xbbe   :  { %v10602_v46 = vpop.eup %10601 }
 0xbbf   :  { %v4619_v31 = vadd.f32 1.0, %v10602_v46  ;;  %v10604_v39 = vpop.eup %10603 }
 0xbc0   :  { %v4620_v42 = vadd.f32 1.0, %v10604_v39  ;;  %v10606_v59 = vpop.eup %10605 }
 0xbc1   :  { %10609 = vrcp.f32 %v4619_v31  ;;  %v10608_v16 = vpop.eup %10607 }
 0xbc2   :  { %10611 = vrcp.f32 %v4620_v42  ;;  %v4621_v6 = vadd.f32 1.0, %v10608_v16 }
 0xbc4   :  { %10613 = vrcp.f32 %v4621_v6 }
 0xbcb   :  { %v10610_v25 = vpop.eup %10609 }
 0xbcc   :  { %v4630_v57 = vmul.f32 %v10610_v25, %v10606_v59  ;;  %v10612_v18 = vpop.eup %10611  ;;  %v13653_v25 = vsub.s32 6, %v13642_v37 }
 0xbcd   :  { %v4629_v29 = vmul.f32 0.0, %v10612_v18 }
 0xbce   :  { %v4103_v18 = vrot.slane %v4074_v7, %v13653_v25  ;;  %v13658_v25 = vld [vmem:[#allocation44_spill] sm:$0xff] }
 0xbcf   :  { %v4764_v46 = vpop.f32.mrb[42].mxu1  ;;  %v4835_v19 = vpop.f32.mrb[44].mxu0  ;;  %v12510_v31 = vadd.f32 %v4630_v57, %v4629_v29  ;;  %v4107_v29 = vrot.slane %v4074_v7, %v13654_v0  ;;  %v13661_v0 = vld [vmem:[#allocation47_spill] sm:$0xff] }
 0xbd0   :  { %v4844_v2 = vrot.slane %v4764_v46, 1  ;;  %v4766_v39 = vpop.f32.mrb[43].mxu1  ;;  %v4837_v42 = vpop.f32.mrb[45].mxu0  ;;  %v4846_v57 = vrot.slane %v4835_v19, 1  ;;  %v12521_v4 = vadd.f32 %v4395_v30, %v4103_v18  ;;  %v13656_v19 = vld [vmem:[#allocation42_spill] sm:$0xff]  ;;  %v13659_v18 = vld [vmem:[#allocation45_spill] sm:$0xff] }
 0xbd1   :  { %v4845_v10 = vrot.slane %v4766_v39, 1  ;;  %10615 = vtanh.f32 %v12510_v31  ;;  %v4847_v3 = vrot.slane %v4837_v42, 1  ;;  %v10614_v46 = vpop.eup %10613  ;;  %v13657_v42 = vld [vmem:[#allocation43_spill] sm:$0xff] }
 0xbd2   :  { %v4852_v59 = vadd.f32 %v4844_v2, %v12508_v38  ;;  %v4854_v6 = vadd.f32 %v4846_v57, %v12521_v4  ;;  %v12525_v2 = vadd.f32 %v12479_v55, %v4107_v29  ;;  %v13662_v29 = vld [vmem:[#allocation48_spill] sm:$0xff] }
 0xbd3   :  { %v4853_v16 = vadd.f32 %v4845_v10, %v12512_v14 }
 0xbd4   :  { %v7703_v62 = vmul.f32 -1.442695, %v4852_v59  ;;  %v4855_v10 = vadd.f32 %v4847_v3, %v12525_v2 }
 0xbd5   :  { %v7704_v23 = vmul.f32 -1.442695, %v4853_v16  ;;  %v7705_v16 = vmul.f32 -1.442695, %v4854_v6  ;;  %v13663_v6 = vld [vmem:[#allocation49_spill] sm:$0xff] }
 0xbd6   :  { %10617 = vpow2.f32 %v7703_v62  ;;  %v13660_v62 = vld [vmem:[#allocation46_spill] sm:$0xff] }
 0xbd7   :  { %10619 = vpow2.f32 %v7704_v23 }
 0xbd8   :  { %10621 = vtanh.f32 %v4855_v10 }
 0xbd9   :  { %10623 = vpow2.f32 %v7705_v16 }
 0xbdb   :  { %v10616_v39 = vpop.eup %10615 }
 0xbdc   :  { %v12528_v59 = vmul.f32 %v10616_v39, %v10614_v46  ;;  %v13664_v46 = vld [vmem:[#allocation50_spill] sm:$0xff] }
 0xbde   :  { %13655 = vst [vmem:[#allocation62_spill] sm:$0xff] %v12528_v59  ;;  %4945 = vmatmul.mubr.f32.vlgmr.msra.gmra.mrb[44].mxu1 %v12528_v59  ;;  %5016 = vmatmul.mubr.f32.vlgmr.msra.gmra.mrb[46].mxu0 %v12528_v59  ;;  %v13675_v59 = vld [vmem:[#allocation34_spill] sm:$0xff] }
 0xbdf   :  { %9463 = vmatpush1.bf16.msra.mxu1 %v12345_v40  ;;  %9495 = vmatpush1.bf16.msra.mxu0 %v12347_v35 }
 0xbe0   :  { %v10618_v30 = vpop.eup %10617  ;;  %9465 = vmatprep.subr.bf16.mxu1 %v12351_v56  ;;  %9497 = vmatprep.subr.bf16.mxu0 %v12353_v48 }
 0xbe1   :  { %v4865_v7 = vadd.f32 1.0, %v10618_v30  ;;  %v10620_v55 = vpop.eup %10619  ;;  %5132 = vmatprep.mubr.f32.mxu1 %v13409_v34  ;;  %5203 = vmatprep.mubr.f32.mxu0 %v13409_v34 }
 0xbe2   :  { %v4866_v37 = vadd.f32 1.0, %v10620_v55  ;;  %v10622_v23 = vpop.eup %10621  ;;  %v13666_v55 = vld [vmem:[#allocation56_spill] sm:$0xff] }
 0xbe3   :  { %10625 = vrcp.f32 %v4865_v7  ;;  %9467 = vmatpush1.bf16.msra.mxu1 %v12359_v49  ;;  %9499 = vmatpush1.bf16.msra.mxu0 %v12361_v26  ;;  %v10624_v57 = vpop.eup %10623  ;;  %v13665_v7 = vld [vmem:[#allocation51_spill] sm:$0xff] }
 0xbe4   :  { %10627 = vrcp.f32 %v4866_v37  ;;  %9469 = vmatprep.subr.bf16.mxu1 %v12365_v60  ;;  %9501 = vmatprep.subr.bf16.mxu0 %v13656_v19  ;;  %v4867_v16 = vadd.f32 1.0, %v10624_v57 }
 0xbe6   :  { %10629 = vrcp.f32 %v4867_v16  ;;  %v13669_v16 = vld [vmem:[#allocation28_spill] sm:$0xff] }
 0xbe7   :  { %9471 = vmatpush1.bf16.msra.mxu1 %v13657_v42  ;;  %9503 = vmatpush1.bf16.msra.mxu0 %v13658_v25 }
 0xbe8   :  { %9473 = vmatprep.subr.bf16.mxu1 %v13659_v18  ;;  %9505 = vmatprep.subr.bf16.mxu0 %v13660_v62 }
 0xbeb   :  { %9475 = vmatpush1.bf16.msra.mxu1 %v13661_v0  ;;  %9507 = vmatpush1.bf16.msra.mxu0 %v13662_v29 }
 0xbec   :  { %9477 = vmatprep.subr.bf16.mxu1 %v13663_v6  ;;  %9509 = vmatprep.subr.bf16.mxu0 %v13664_v46 }
 0xbed   :  { %v10626_v3 = vpop.eup %10625 }
 0xbee   :  { %v4876_v39 = vmul.f32 %v10626_v3, %v10622_v23  ;;  %v10628_v10 = vpop.eup %10627 }
 0xbef   :  { %v4875_v30 = vmul.f32 0.0, %v10628_v10  ;;  %9479 = vmatpush1.bf16.msra.mxu1 %v13665_v7  ;;  %9511 = vmatpush1.bf16.msra.mxu0 %v13666_v55  ;;  %v13668_v10 = vld [vmem:[#allocation27_spill] sm:$0xff] }
 0xbf0   :  { %9481 = vmatprep.subr.bf16.mxu1 %v12403_v47  ;;  %9513 = vmatprep.subr.bf16.mxu0 %v12405_v28  ;;  %v10630_v23 = vpop.eup %10629 }
 0xbf1   :  { %v12554_v37 = vadd.f32 %v4876_v39, %v4875_v30  ;;  %v13670_v30 = vld [vmem:[#allocation29_spill] sm:$0xff] }
 0xbf3   :  { %10631 = vtanh.f32 %v12554_v37  ;;  %9483 = vmatpush1.bf16.msra.mxu1 %v12409_v50  ;;  %9515 = vmatpush1.bf16.msra.mxu0 %v12411_v13 }
 0xbf4   :  { %9485 = vmatprep.subr.bf16.mxu1 %v12415_v61  ;;  %9517 = vmatprep.subr.bf16.mxu0 %v12417_v52 }
 0xbf7   :  { %9487 = vmatpush1.bf16.msra.mxu1 %v12421_v1  ;;  %9519 = vmatpush1.bf16.msra.mxu0 %v12423_v9 }
 0xbf8   :  { %9489 = vmatprep.subr.bf16.mxu1 %v12427_v36  ;;  %9521 = vmatprep.subr.bf16.mxu0 %v12429_v20 }
 0xbfb   :  { %9491 = vmatpush1.bf16.msra.mxu1 %v12433_v27  ;;  %9523 = vmatpush1.bf16.msra.mxu0 %v12435_v17 }
 0xbfc   :  { %9525 = vmatprep.subr.bf16.mxu1 %v12241_v11  ;;  %9557 = vmatprep.subr.bf16.mxu0 %v12243_v41 }
 0xbfd   :  { %v10632_v57 = vpop.eup %10631 }
 0xbfe   :  { %v12569_v3 = vmul.f32 %v10632_v57, %v10630_v23  ;;  %v13671_v23 = vld [vmem:[#allocation30_spill] sm:$0xff]  ;;  %v13672_v57 = vld [vmem:[#allocation31_spill] sm:$0xff] }
 0xc00   :  { %13667 = vst [vmem:[#allocation42_spill] sm:$0xff] %v12569_v3  ;;  %v5066_v39 = vrot.slane %v12569_v3, 7  ;;  %v13674_v3 = vld [vmem:[#allocation33_spill] sm:$0xff] }
 0xc02   :  { %5133 = vmatmul.mubr.f32.vlgmr.msra.gmra.mrb[46].mxu1 %v5066_v39  ;;  %5204 = vmatmul.mubr.f32.vlgmr.msra.gmra.mrb[48].mxu0 %v5066_v39  ;;  %v13673_v39 = vld [vmem:[#allocation32_spill] sm:$0xff] }
 0xc03   :  { %9527 = vmatpush1.bf16.msra.mxu1 %v12245_v43  ;;  %9559 = vmatpush1.bf16.msra.mxu0 %v12247_v12 }
 0xc04   :  { %9529 = vmatprep.subr.bf16.mxu1 %v12251_v15  ;;  %9561 = vmatprep.subr.bf16.mxu0 %v12253_v33 }
 0xc05   :  { %5320 = vmatprep.mubr.f32.mxu1 %v13409_v34  ;;  %5391 = vmatprep.mubr.f32.mxu0 %v13409_v34 }
 0xc07   :  { %9531 = vmatpush1.bf16.msra.mxu1 %v12259_v22  ;;  %9563 = vmatpush1.bf16.msra.mxu0 %v12261_v54 }
 0xc08   :  { %9533 = vmatprep.subr.bf16.mxu1 %v12265_v58  ;;  %9565 = vmatprep.subr.bf16.mxu0 %v12267_v44  ;;  %v13686_v44 = vld [vmem:[#allocation52_spill] sm:$0xff] }
 0xc0b   :  { %9535 = vmatpush1.bf16.msra.mxu1 %v12273_v32  ;;  %9567 = vmatpush1.bf16.msra.mxu0 %v12275_v21  ;;  %v13685_v32 = vld [vmem:[#allocation53_spill] sm:$0xff] }
 0xc0c   :  { %9537 = vmatprep.subr.bf16.mxu1 %v12279_v51  ;;  %9569 = vmatprep.subr.bf16.mxu0 %v12281_v63  ;;  %v13683_v63 = vld [vmem:[#allocation55_spill] sm:$0xff]  ;;  %v13684_v51 = vld [vmem:[#allocation54_spill] sm:$0xff] }
 0xc0f   :  { %9539 = vmatpush1.bf16.msra.mxu1 %v12285_v24  ;;  %9571 = vmatpush1.bf16.msra.mxu0 %v12287_v5 }
 0xc10   :  { %9541 = vmatprep.subr.bf16.mxu1 %v12291_v8  ;;  %9573 = vmatprep.subr.bf16.mxu0 %v12293_v45  ;;  %v13676_v8 = vld [vmem:[#allocation35_spill] sm:$0xff]  ;;  %v13677_v45 = vld [vmem:[#allocation36_spill] sm:$0xff] }
 0xc13   :  { %9543 = vmatpush1.bf16.msra.mxu1 %v12297_v53  ;;  %9575 = vmatpush1.bf16.msra.mxu0 %v13668_v10  ;;  %v13678_v53 = vld [vmem:[#allocation37_spill] sm:$0xff]  ;;  %v13679_v10 = vld [vmem:[#allocation38_spill] sm:$0xff] }
 0xc14   :  { %9545 = vmatprep.subr.bf16.mxu1 %v13669_v16  ;;  %9577 = vmatprep.subr.bf16.mxu0 %v13670_v30  ;;  %v13680_v16 = vld [vmem:[#allocation39_spill] sm:$0xff]  ;;  %v13681_v30 = vld [vmem:[#allocation40_spill] sm:$0xff] }
 0xc17   :  { %9547 = vmatpush1.bf16.msra.mxu1 %v13671_v23  ;;  %9579 = vmatpush1.bf16.msra.mxu0 %v13672_v57  ;;  %v13682_v23 = vld [vmem:[#allocation41_spill] sm:$0xff] }
 0xc18   :  { %9549 = vmatprep.subr.bf16.mxu1 %v13673_v39  ;;  %9581 = vmatprep.subr.bf16.mxu0 %v13674_v3 }
 0xc1b   :  { %9551 = vmatpush1.bf16.msra.mxu1 %v13675_v59  ;;  %9583 = vmatpush1.bf16.msra.mxu0 %v13676_v8 }
 0xc1c   :  { %9553 = vmatprep.subr.bf16.mxu1 %v13677_v45  ;;  %9585 = vmatprep.subr.bf16.mxu0 %v13678_v53 }
 0xc1f   :  { %9555 = vmatpush1.bf16.msra.mxu1 %v13679_v10  ;;  %9587 = vmatpush1.bf16.msra.mxu0 %v13680_v16 }
 0xc20   :  { %9589 = vmatprep.subr.bf16.mxu1 %v13681_v30  ;;  %9621 = vmatprep.subr.bf16.mxu0 %v13682_v23 }
 0xcb1   :  { %v4946_v57 = vpop.f32.mrb[44].mxu1  ;;  %v5017_v39 = vpop.f32.mrb[46].mxu0 }
 0xcb2   :  { %v5026_v5 = vrot.slane %v4946_v57, 7  ;;  %v4948_v3 = vpop.f32.mrb[45].mxu1  ;;  %v5019_v24 = vpop.f32.mrb[47].mxu0  ;;  %v5028_v10 = vrot.slane %v5017_v39, 7 }
 0xcb3   :  { %v5027_v59 = vrot.slane %v4948_v3, 7  ;;  %v5029_v16 = vrot.slane %v5019_v24, 7 }
 0xcb4   :  { %v5034_v8 = vadd.f32 %v5026_v5, %v13683_v63  ;;  %v5036_v30 = vadd.f32 %v5028_v10, %v13685_v32 }
 0xcb5   :  { %v5035_v45 = vadd.f32 %v5027_v59, %v13684_v51  ;;  %v5037_v23 = vadd.f32 %v5029_v16, %v13686_v44 }
 0xcb6   :  { %v7706_v21 = vmul.f32 -1.442695, %v5034_v8  ;;  %v7708_v58 = vmul.f32 -1.442695, %v5036_v30 }
 0xcb7   :  { %v7707_v53 = vmul.f32 -1.442695, %v5035_v45 }
 0xcb8   :  { %10633 = vpow2.f32 %v7706_v21  ;;  %v5058_v21 = vrot.slane %v12510_v31, 7 }
 0xcb9   :  { %10635 = vpow2.f32 %v7707_v53 }
 0xcba   :  { %10637 = vtanh.f32 %v5037_v23 }
 0xcbb   :  { %10639 = vpow2.f32 %v7708_v58 }
 0xcc2   :  { %v10634_v54 = vpop.eup %10633 }
 0xcc3   :  { %v5047_v57 = vadd.f32 1.0, %v10634_v54  ;;  %v10636_v22 = vpop.eup %10635 }
 0xcc4   :  { %v5048_v5 = vadd.f32 1.0, %v10636_v22  ;;  %v10638_v59 = vpop.eup %10637 }
 0xcc5   :  { %10641 = vrcp.f32 %v5047_v57  ;;  %v10640_v8 = vpop.eup %10639 }
 0xcc6   :  { %10643 = vrcp.f32 %v5048_v5  ;;  %v5049_v3 = vadd.f32 1.0, %v10640_v8 }
 0xcc8   :  { %10645 = vrcp.f32 %v5049_v3 }
 0xccf   :  { %v10642_v45 = vpop.eup %10641 }
 0xcd0   :  { %v5061_v53 = vmul.f32 %v10642_v45, %v10638_v59  ;;  %v10644_v24 = vpop.eup %10643 }
 0xcd1   :  { %v5060_v10 = vmul.f32 %v10644_v24, %v5058_v21 }
 0xcd2   :  { %v10646_v45 = vpop.eup %10645 }
 0xcd3   :  { %v12611_v39 = vadd.f32 %v5061_v53, %v5060_v10 }
 0xcd5   :  { %v5134_v16 = vpop.f32.mrb[46].mxu1  ;;  %v5205_v54 = vpop.f32.mrb[48].mxu0  ;;  %10647 = vtanh.f32 %v12611_v39 }
 0xcd6   :  { %v5214_v58 = vrot.slane %v5134_v16, 2  ;;  %v5136_v30 = vpop.f32.mrb[47].mxu1  ;;  %v5207_v22 = vpop.f32.mrb[49].mxu0  ;;  %v5216_v8 = vrot.slane %v5205_v54, 2 }
 0xcd7   :  { %v5215_v23 = vrot.slane %v5136_v30, 2  ;;  %v5217_v21 = vrot.slane %v5207_v22, 2 }
 0xcd8   :  { %v5222_v57 = vadd.f32 %v5214_v58, %v12508_v38  ;;  %v5224_v24 = vadd.f32 %v5216_v8, %v12521_v4 }
 0xcd9   :  { %v5223_v5 = vadd.f32 %v5215_v23, %v12512_v14  ;;  %v5225_v10 = vadd.f32 %v5217_v21, %v12525_v2 }
 0xcda   :  { %v7709_v31 = vmul.f32 -1.442695, %v5222_v57  ;;  %v7711_v30 = vmul.f32 -1.442695, %v5224_v24 }
 0xcdb   :  { %v7710_v59 = vmul.f32 -1.442695, %v5223_v5 }
 0xcdc   :  { %10649 = vpow2.f32 %v7709_v31 }
 0xcdd   :  { %10651 = vpow2.f32 %v7710_v59  ;;  %v5246_v59 = vrot.slane %v12554_v37, 1 }
 0xcde   :  { %10653 = vtanh.f32 %v5225_v10 }
 0xcdf   :  { %v10648_v53 = vpop.eup %10647  ;;  %10655 = vpow2.f32 %v7711_v30 }
 0xce0   :  { %v12617_v3 = vmul.f32 %v10648_v53, %v10646_v45 }
 0xce2   :  { %v5254_v16 = vrot.slane %v12617_v3, 1 }
 0xce4   :  { %5321 = vmatmul.mubr.f32.vlgmr.msra.gmra.mrb[48].mxu1 %v5254_v16  ;;  %5392 = vmatmul.mubr.f32.vlgmr.msra.gmra.mrb[50].mxu0 %v5254_v16 }
 0xce5   :  { %9591 = vmatpush1.bf16.msra.mxu1 %v12345_v40  ;;  %9623 = vmatpush1.bf16.msra.mxu0 %v12347_v35 }
 0xce6   :  { %v10650_v58 = vpop.eup %10649  ;;  %9593 = vmatprep.subr.bf16.mxu1 %v12351_v56  ;;  %9625 = vmatprep.subr.bf16.mxu0 %v12353_v48 }
 0xce7   :  { %v5235_v54 = vadd.f32 1.0, %v10650_v58  ;;  %v10652_v22 = vpop.eup %10651  ;;  %5508 = vmatprep.mubr.f32.mxu1 %v13409_v34  ;;  %5579 = vmatprep.mubr.f32.mxu0 %v13409_v34  ;;  %v13688_v58 = vld [vmem:[#allocation58_spill] sm:$0xff] }
 0xce8   :  { %v5236_v23 = vadd.f32 1.0, %v10652_v22  ;;  %v10654_v57 = vpop.eup %10653  ;;  %v13690_v22 = vld [vmem:[#allocation60_spill] sm:$0xff] }
 0xce9   :  { %10657 = vrcp.f32 %v5235_v54  ;;  %9595 = vmatpush1.bf16.msra.mxu1 %v12359_v49  ;;  %9627 = vmatpush1.bf16.msra.mxu0 %v12361_v26  ;;  %v10656_v5 = vpop.eup %10655  ;;  %v13689_v54 = vld [vmem:[#allocation59_spill] sm:$0xff] }
 0xcea   :  { %10659 = vrcp.f32 %v5236_v23  ;;  %9597 = vmatprep.subr.bf16.mxu1 %v12365_v60  ;;  %9629 = vmatprep.subr.bf16.mxu0 %v13656_v19  ;;  %v5237_v21 = vadd.f32 1.0, %v10656_v5  ;;  %v13691_v23 = vld [vmem:[#allocation61_spill] sm:$0xff]  ;;  %v13693_v5 = vld [vmem:[#allocation64_spill] sm:$0xff] }
 0xcec   :  { %10661 = vrcp.f32 %v5237_v21  ;;  %v13698_v21 = vld [vmem:[#allocation24_spill] sm:$0xff] }
 0xced   :  { %9599 = vmatpush1.bf16.msra.mxu1 %v13657_v42  ;;  %9631 = vmatpush1.bf16.msra.mxu0 %v13658_v25 }
 0xcee   :  { %9601 = vmatprep.subr.bf16.mxu1 %v13659_v18  ;;  %9633 = vmatprep.subr.bf16.mxu0 %v13660_v62 }
 0xcf1   :  { %9603 = vmatpush1.bf16.msra.mxu1 %v13661_v0  ;;  %9635 = vmatpush1.bf16.msra.mxu0 %v13662_v29 }
 0xcf2   :  { %9605 = vmatprep.subr.bf16.mxu1 %v13663_v6  ;;  %9637 = vmatprep.subr.bf16.mxu0 %v13664_v46 }
 0xcf3   :  { %v10658_v31 = vpop.eup %10657 }
 0xcf4   :  { %v5249_v8 = vmul.f32 %v10658_v31, %v10654_v57  ;;  %v10660_v45 = vpop.eup %10659  ;;  %v13692_v57 = vld [vmem:[#allocation63_spill] sm:$0xff]  ;;  %v13694_v31 = vld [vmem:[#allocation65_spill] sm:$0xff] }
 0xcf5   :  { %v5248_v53 = vmul.f32 %v10660_v45, %v5246_v59  ;;  %9607 = vmatpush1.bf16.msra.mxu1 %v13665_v7  ;;  %9639 = vmatpush1.bf16.msra.mxu0 %v13666_v55  ;;  %v13695_v59 = vld [vmem:[#allocation66_spill] sm:$0xff]  ;;  %v13697_v45 = vld [vmem:[#allocation23_spill] sm:$0xff] }
 0xcf6   :  { %9609 = vmatprep.subr.bf16.mxu1 %v12403_v47  ;;  %9641 = vmatprep.subr.bf16.mxu0 %v12405_v28  ;;  %v10662_v37 = vpop.eup %10661 }
 0xcf7   :  { %v12644_v24 = vadd.f32 %v5249_v8, %v5248_v53  ;;  %v13696_v8 = vld [vmem:[#allocation67_spill] sm:$0xff]  ;;  %v13699_v53 = vld [vmem:[#allocation25_spill] sm:$0xff] }
 0xcf9   :  { %10663 = vtanh.f32 %v12644_v24  ;;  %9611 = vmatpush1.bf16.msra.mxu1 %v12409_v50  ;;  %9643 = vmatpush1.bf16.msra.mxu0 %v12411_v13 }
 0xcfa   :  { %9613 = vmatprep.subr.bf16.mxu1 %v12415_v61  ;;  %9645 = vmatprep.subr.bf16.mxu0 %v12417_v52 }
 0xcfd   :  { %9615 = vmatpush1.bf16.msra.mxu1 %v12421_v1  ;;  %9647 = vmatpush1.bf16.msra.mxu0 %v12423_v9 }
 0xcfe   :  { %9617 = vmatprep.subr.bf16.mxu1 %v12427_v36  ;;  %9649 = vmatprep.subr.bf16.mxu0 %v12429_v20 }
 0xd01   :  { %9619 = vmatpush1.bf16.msra.mxu1 %v12433_v27  ;;  %9651 = vmatpush1.bf16.msra.mxu0 %v12435_v17 }
 0xd02   :  { %9653 = vmatprep.subr.bf16.mxu1 %v12241_v11  ;;  %9685 = vmatprep.subr.bf16.mxu0 %v12243_v41 }
 0xd03   :  { %v10664_v10 = vpop.eup %10663 }
 0xd04   :  { %v12659_v16 = vmul.f32 %v10664_v10, %v10662_v37  ;;  %v13700_v37 = vld [vmem:[#allocation26_spill] sm:$0xff]  ;;  %v13701_v10 = vld [vmem:[#allocation27_spill] sm:$0xff] }
 0xd06   :  { %13687 = vst [vmem:[#allocation43_spill] sm:$0xff] %v12659_v16  ;;  %v5442_v30 = vrot.slane %v12659_v16, 6  ;;  %v13703_v16 = vld [vmem:[#allocation29_spill] sm:$0xff] }
 0xd08   :  { %5509 = vmatmul.mubr.f32.vlgmr.msra.gmra.mrb[50].mxu1 %v5442_v30  ;;  %5580 = vmatmul.mubr.f32.vlgmr.msra.gmra.mrb[52].mxu0 %v5442_v30  ;;  %v13702_v30 = vld [vmem:[#allocation28_spill] sm:$0xff] }
 0xd09   :  { %9655 = vmatpush1.bf16.msra.mxu1 %v12245_v43  ;;  %9687 = vmatpush1.bf16.msra.mxu0 %v12247_v12 }
 0xd0a   :  { %9657 = vmatprep.subr.bf16.mxu1 %v12251_v15  ;;  %9689 = vmatprep.subr.bf16.mxu0 %v12253_v33 }
 0xd0b   :  { %5696 = vmatprep.mubr.f32.mxu1 %v13409_v34  ;;  %5767 = vmatprep.mubr.f32.mxu0 %v13409_v34 }
 0xd0d   :  { %9659 = vmatpush1.bf16.msra.mxu1 %v13688_v58  ;;  %9691 = vmatpush1.bf16.msra.mxu0 %v13689_v54 }
 0xd0e   :  { %9661 = vmatprep.subr.bf16.mxu1 %v13690_v22  ;;  %9693 = vmatprep.subr.bf16.mxu0 %v13691_v23 }
 0xd11   :  { %9663 = vmatpush1.bf16.msra.mxu1 %v13692_v57  ;;  %9695 = vmatpush1.bf16.msra.mxu0 %v13693_v5  ;;  %v13704_v5 = vld [vmem:[#allocation30_spill] sm:$0xff] }
 0xd12   :  { %9665 = vmatprep.subr.bf16.mxu1 %v13694_v31  ;;  %9697 = vmatprep.subr.bf16.mxu0 %v13695_v59  ;;  %v13705_v31 = vld [vmem:[#allocation31_spill] sm:$0xff]  ;;  %v13706_v59 = vld [vmem:[#allocation32_spill] sm:$0xff] }
 0xd15   :  { %9667 = vmatpush1.bf16.msra.mxu1 %v13696_v8  ;;  %9699 = vmatpush1.bf16.msra.mxu0 %v13697_v45  ;;  %v13707_v8 = vld [vmem:[#allocation33_spill] sm:$0xff]  ;;  %v13708_v45 = vld [vmem:[#allocation34_spill] sm:$0xff] }
 0xd16   :  { %9669 = vmatprep.subr.bf16.mxu1 %v13698_v21  ;;  %9701 = vmatprep.subr.bf16.mxu0 %v13699_v53  ;;  %v13709_v21 = vld [vmem:[#allocation35_spill] sm:$0xff]  ;;  %v13710_v53 = vld [vmem:[#allocation36_spill] sm:$0xff] }
 0xd19   :  { %9671 = vmatpush1.bf16.msra.mxu1 %v13700_v37  ;;  %9703 = vmatpush1.bf16.msra.mxu0 %v13701_v10  ;;  %v13711_v37 = vld [vmem:[#allocation37_spill] sm:$0xff]  ;;  %v13712_v10 = vld [vmem:[#allocation38_spill] sm:$0xff] }
 0xd1a   :  { %9673 = vmatprep.subr.bf16.mxu1 %v13702_v30  ;;  %9705 = vmatprep.subr.bf16.mxu0 %v13703_v16  ;;  %v13713_v30 = vld [vmem:[#allocation39_spill] sm:$0xff]  ;;  %v13714_v16 = vld [vmem:[#allocation40_spill] sm:$0xff] }
 0xd1d   :  { %9675 = vmatpush1.bf16.msra.mxu1 %v13704_v5  ;;  %9707 = vmatpush1.bf16.msra.mxu0 %v13705_v31  ;;  %v13715_v5 = vld [vmem:[#allocation41_spill] sm:$0xff] }
 0xd1e   :  { %9677 = vmatprep.subr.bf16.mxu1 %v13706_v59  ;;  %9709 = vmatprep.subr.bf16.mxu0 %v13707_v8 }
 0xd21   :  { %9679 = vmatpush1.bf16.msra.mxu1 %v13708_v45  ;;  %9711 = vmatpush1.bf16.msra.mxu0 %v13709_v21 }
 0xd22   :  { %9681 = vmatprep.subr.bf16.mxu1 %v13710_v53  ;;  %9713 = vmatprep.subr.bf16.mxu0 %v13711_v37 }
 0xd25   :  { %9683 = vmatpush1.bf16.msra.mxu1 %v13712_v10  ;;  %9715 = vmatpush1.bf16.msra.mxu0 %v13713_v30 }
 0xd26   :  { %9717 = vmatprep.subr.bf16.mxu1 %v13714_v16  ;;  %9749 = vmatprep.subr.bf16.mxu0 %v13715_v5 }
 0xdb7   :  { %v5322_v31 = vpop.f32.mrb[48].mxu1  ;;  %v5393_v59 = vpop.f32.mrb[50].mxu0 }
 0xdb8   :  { %v5402_v57 = vrot.slane %v5322_v31, 6  ;;  %v5324_v8 = vpop.f32.mrb[49].mxu1  ;;  %v5395_v23 = vpop.f32.mrb[51].mxu0  ;;  %v5404_v10 = vrot.slane %v5393_v59, 6 }
 0xdb9   :  { %v5403_v45 = vrot.slane %v5324_v8, 6  ;;  %v5405_v30 = vrot.slane %v5395_v23, 6 }
 0xdba   :  { %v5410_v21 = vadd.f32 %v5402_v57, %v13683_v63  ;;  %v5412_v16 = vadd.f32 %v5404_v10, %v13685_v32 }
 0xdbb   :  { %v5411_v53 = vadd.f32 %v5403_v45, %v13684_v51  ;;  %v5413_v5 = vadd.f32 %v5405_v30, %v13686_v44 }
 0xdbc   :  { %v7712_v22 = vmul.f32 -1.442695, %v5410_v21  ;;  %v7714_v54 = vmul.f32 -1.442695, %v5412_v16 }
 0xdbd   :  { %v7713_v37 = vmul.f32 -1.442695, %v5411_v53 }
 0xdbe   :  { %10665 = vpow2.f32 %v7712_v22  ;;  %v5434_v22 = vrot.slane %v12611_v39, 7 }
 0xdbf   :  { %10667 = vpow2.f32 %v7713_v37 }
 0xdc0   :  { %10669 = vtanh.f32 %v5413_v5 }
 0xdc1   :  { %10671 = vpow2.f32 %v7714_v54 }
 0xdc8   :  { %v10666_v58 = vpop.eup %10665 }
 0xdc9   :  { %v5423_v31 = vadd.f32 1.0, %v10666_v58  ;;  %v10668_v33 = vpop.eup %10667 }
 0xdca   :  { %v5424_v57 = vadd.f32 1.0, %v10668_v33  ;;  %v10670_v8 = vpop.eup %10669 }
 0xdcb   :  { %10673 = vrcp.f32 %v5423_v31  ;;  %v10672_v45 = vpop.eup %10671 }
 0xdcc   :  { %10675 = vrcp.f32 %v5424_v57  ;;  %v5425_v53 = vadd.f32 1.0, %v10672_v45 }
 0xdce   :  { %10677 = vrcp.f32 %v5425_v53 }
 0xdd5   :  { %v10674_v21 = vpop.eup %10673 }
 0xdd6   :  { %v5437_v59 = vmul.f32 %v10674_v21, %v10670_v8  ;;  %v10676_v23 = vpop.eup %10675 }
 0xdd7   :  { %v5436_v37 = vmul.f32 %v10676_v23, %v5434_v22 }
 0xdd8   :  { %v10678_v21 = vpop.eup %10677 }
 0xdd9   :  { %v12701_v10 = vadd.f32 %v5437_v59, %v5436_v37  ;;  %v13716_v37 = vld [vmem:[#allocation62_spill] sm:$0xff] }
 0xddb   :  { %v5510_v16 = vpop.f32.mrb[50].mxu1  ;;  %v5581_v58 = vpop.f32.mrb[52].mxu0  ;;  %10679 = vtanh.f32 %v12701_v10 }
 0xddc   :  { %v5590_v54 = vrot.slane %v5510_v16, 3  ;;  %v5512_v5 = vpop.f32.mrb[51].mxu1  ;;  %v5583_v33 = vpop.f32.mrb[53].mxu0  ;;  %v5592_v45 = vrot.slane %v5581_v58, 3  ;;  %v7497_v16 = vsel %vm3797_vm2, %v13716_v37, %v12617_v3 }
 0xddd   :  { %v5591_v30 = vrot.slane %v5512_v5, 3  ;;  %v5593_v22 = vrot.slane %v5583_v33, 3 }
 0xdde   :  { %v5598_v31 = vadd.f32 %v5590_v54, %v12508_v38  ;;  %v5600_v23 = vadd.f32 %v5592_v45, %v12521_v4 }
 0xddf   :  { %v5599_v57 = vadd.f32 %v5591_v30, %v12512_v14  ;;  %v5601_v5 = vadd.f32 %v5593_v22, %v12525_v2 }
 0xde0   :  { %v7715_v39 = vmul.f32 -1.442695, %v5598_v31  ;;  %v7717_v31 = vmul.f32 -1.442695, %v5600_v23 }
 0xde1   :  { %v7716_v8 = vmul.f32 -1.442695, %v5599_v57 }
 0xde2   :  { %10681 = vpow2.f32 %v7715_v39 }
 0xde3   :  { %10683 = vpow2.f32 %v7716_v8 }
 0xde4   :  { %10685 = vtanh.f32 %v5601_v5 }
 0xde5   :  { %v10680_v59 = vpop.eup %10679  ;;  %10687 = vpow2.f32 %v7717_v31  ;;  %v13718_v31 = vld [vmem:[#allocation57_spill] sm:$0xff] }
 0xde6   :  { %v5440_v53 = vmul.f32 %v10680_v59, %v10678_v21  ;;  %v5622_v21 = vrot.slane %v12644_v24, 1 }
 0xde8   :  { %v5630_v54 = vrot.slane %v5440_v53, 2  ;;  %v12712_v30 = vsel %vm3799_vm3, %v7497_v16, %v5440_v53 }
 0xdea   :  { %5697 = vmatmul.mubr.f32.vlgmr.msra.gmra.mrb[52].mxu1 %v5630_v54  ;;  %5768 = vmatmul.mubr.f32.vlgmr.msra.gmra.mrb[54].mxu0 %v5630_v54 }
 0xdeb   :  { %9719 = vmatpush1.bf16.msra.mxu1 %v12345_v40  ;;  %9751 = vmatpush1.bf16.msra.mxu0 %v12347_v35 }
 0xdec   :  { %v10682_v58 = vpop.eup %10681  ;;  %9721 = vmatprep.subr.bf16.mxu1 %v12351_v56  ;;  %9753 = vmatprep.subr.bf16.mxu0 %v12353_v48 }
 0xded   :  { %v5611_v33 = vadd.f32 1.0, %v10682_v58  ;;  %v10684_v3 = vpop.eup %10683  ;;  %5884 = vmatprep.mubr.f32.mxu1 %v13409_v34  ;;  %5955 = vmatprep.mubr.f32.mxu0 %v13409_v34  ;;  %v13719_v58 = vld [vmem:[#allocation58_spill] sm:$0xff] }
 0xdee   :  { %v5612_v57 = vadd.f32 1.0, %v10684_v3  ;;  %v10686_v39 = vpop.eup %10685  ;;  %v13721_v3 = vld [vmem:[#allocation60_spill] sm:$0xff] }
 0xdef   :  { %10689 = vrcp.f32 %v5611_v33  ;;  %9723 = vmatpush1.bf16.msra.mxu1 %v12359_v49  ;;  %9755 = vmatpush1.bf16.msra.mxu0 %v12361_v26  ;;  %v10688_v8 = vpop.eup %10687  ;;  %v13720_v33 = vld [vmem:[#allocation59_spill] sm:$0xff] }
 0xdf0   :  { %10691 = vrcp.f32 %v5612_v57  ;;  %9725 = vmatprep.subr.bf16.mxu1 %v12365_v60  ;;  %9757 = vmatprep.subr.bf16.mxu0 %v13656_v19  ;;  %v5613_v23 = vadd.f32 1.0, %v10688_v8  ;;  %v13722_v57 = vld [vmem:[#allocation61_spill] sm:$0xff]  ;;  %v13724_v8 = vld [vmem:[#allocation64_spill] sm:$0xff] }
 0xdf2   :  { %10693 = vrcp.f32 %v5613_v23  ;;  %v13729_v23 = vld [vmem:[#allocation24_spill] sm:$0xff] }
 0xdf3   :  { %9727 = vmatpush1.bf16.msra.mxu1 %v13657_v42  ;;  %9759 = vmatpush1.bf16.msra.mxu0 %v13658_v25 }
 0xdf4   :  { %9729 = vmatprep.subr.bf16.mxu1 %v13659_v18  ;;  %9761 = vmatprep.subr.bf16.mxu0 %v13660_v62 }
 0xdf7   :  { %9731 = vmatpush1.bf16.msra.mxu1 %v13661_v0  ;;  %9763 = vmatpush1.bf16.msra.mxu0 %v13662_v29 }
 0xdf8   :  { %9733 = vmatprep.subr.bf16.mxu1 %v13663_v6  ;;  %9765 = vmatprep.subr.bf16.mxu0 %v13664_v46 }
 0xdf9   :  { %v10690_v45 = vpop.eup %10689 }
 0xdfa   :  { %v5625_v22 = vmul.f32 %v10690_v45, %v10686_v39  ;;  %v10692_v59 = vpop.eup %10691  ;;  %v13723_v39 = vld [vmem:[#allocation63_spill] sm:$0xff]  ;;  %v13725_v45 = vld [vmem:[#allocation65_spill] sm:$0xff] }
 0xdfb   :  { %v5624_v53 = vmul.f32 %v10692_v59, %v5622_v21  ;;  %9735 = vmatpush1.bf16.msra.mxu1 %v13665_v7  ;;  %9767 = vmatpush1.bf16.msra.mxu0 %v13666_v55  ;;  %v13726_v21 = vld [vmem:[#allocation66_spill] sm:$0xff]  ;;  %v13728_v59 = vld [vmem:[#allocation23_spill] sm:$0xff] }
 0xdfc   :  { %9737 = vmatprep.subr.bf16.mxu1 %v12403_v47  ;;  %9769 = vmatprep.subr.bf16.mxu0 %v12405_v28  ;;  %v10694_v24 = vpop.eup %10693 }
 0xdfd   :  { %v12737_v37 = vadd.f32 %v5625_v22, %v5624_v53  ;;  %v13727_v22 = vld [vmem:[#allocation67_spill] sm:$0xff]  ;;  %v13730_v53 = vld [vmem:[#allocation25_spill] sm:$0xff] }
 0xdff   :  { %10695 = vtanh.f32 %v12737_v37  ;;  %9739 = vmatpush1.bf16.msra.mxu1 %v12409_v50  ;;  %9771 = vmatpush1.bf16.msra.mxu0 %v12411_v13 }
 0xe00   :  { %9741 = vmatprep.subr.bf16.mxu1 %v12415_v61  ;;  %9773 = vmatprep.subr.bf16.mxu0 %v12417_v52 }
 0xe03   :  { %9743 = vmatpush1.bf16.msra.mxu1 %v12421_v1  ;;  %9775 = vmatpush1.bf16.msra.mxu0 %v12423_v9 }
 0xe04   :  { %9745 = vmatprep.subr.bf16.mxu1 %v12427_v36  ;;  %9777 = vmatprep.subr.bf16.mxu0 %v12429_v20 }
 0xe07   :  { %9747 = vmatpush1.bf16.msra.mxu1 %v12433_v27  ;;  %9779 = vmatpush1.bf16.msra.mxu0 %v12435_v17 }
 0xe08   :  { %9781 = vmatprep.subr.bf16.mxu1 %v12241_v11  ;;  %9813 = vmatprep.subr.bf16.mxu0 %v12243_v41 }
 0xe09   :  { %v10696_v16 = vpop.eup %10695 }
 0xe0a   :  { %v12752_v5 = vmul.f32 %v10696_v16, %v10694_v24  ;;  %v13731_v24 = vld [vmem:[#allocation26_spill] sm:$0xff]  ;;  %v13732_v16 = vld [vmem:[#allocation27_spill] sm:$0xff] }
 0xe0c   :  { %13717 = vst [vmem:[#allocation44_spill] sm:$0xff] %v12752_v5  ;;  %v5818_v54 = vrot.slane %v12752_v5, 5  ;;  %v13734_v5 = vld [vmem:[#allocation29_spill] sm:$0xff] }
 0xe0e   :  { %5885 = vmatmul.mubr.f32.vlgmr.msra.gmra.mrb[54].mxu1 %v5818_v54  ;;  %5956 = vmatmul.mubr.f32.vlgmr.msra.gmra.mrb[56].mxu0 %v5818_v54  ;;  %v13733_v54 = vld [vmem:[#allocation28_spill] sm:$0xff] }
 0xe0f   :  { %9783 = vmatpush1.bf16.msra.mxu1 %v12245_v43  ;;  %9815 = vmatpush1.bf16.msra.mxu0 %v12247_v12 }
 0xe10   :  { %9785 = vmatprep.subr.bf16.mxu1 %v12251_v15  ;;  %9817 = vmatprep.subr.bf16.mxu0 %v13718_v31 }
 0xe11   :  { %6072 = vmatprep.mubr.f32.mxu1 %v13409_v34  ;;  %6143 = vmatprep.mubr.f32.mxu0 %v13409_v34 }
 0xe13   :  { %9787 = vmatpush1.bf16.msra.mxu1 %v13719_v58  ;;  %9819 = vmatpush1.bf16.msra.mxu0 %v13720_v33 }
 0xe14   :  { %9789 = vmatprep.subr.bf16.mxu1 %v13721_v3  ;;  %9821 = vmatprep.subr.bf16.mxu0 %v13722_v57 }
 0xe17   :  { %9791 = vmatpush1.bf16.msra.mxu1 %v13723_v39  ;;  %9823 = vmatpush1.bf16.msra.mxu0 %v13724_v8  ;;  %v13735_v8 = vld [vmem:[#allocation30_spill] sm:$0xff] }
 0xe18   :  { %9793 = vmatprep.subr.bf16.mxu1 %v13725_v45  ;;  %9825 = vmatprep.subr.bf16.mxu0 %v13726_v21  ;;  %v13736_v45 = vld [vmem:[#allocation31_spill] sm:$0xff]  ;;  %v13737_v21 = vld [vmem:[#allocation32_spill] sm:$0xff] }
 0xe1b   :  { %9795 = vmatpush1.bf16.msra.mxu1 %v13727_v22  ;;  %9827 = vmatpush1.bf16.msra.mxu0 %v13728_v59  ;;  %v13738_v22 = vld [vmem:[#allocation33_spill] sm:$0xff]  ;;  %v13739_v59 = vld [vmem:[#allocation34_spill] sm:$0xff] }
 0xe1c   :  { %9797 = vmatprep.subr.bf16.mxu1 %v13729_v23  ;;  %9829 = vmatprep.subr.bf16.mxu0 %v13730_v53  ;;  %v13740_v23 = vld [vmem:[#allocation35_spill] sm:$0xff]  ;;  %v13741_v53 = vld [vmem:[#allocation36_spill] sm:$0xff] }
 0xe1f   :  { %9799 = vmatpush1.bf16.msra.mxu1 %v13731_v24  ;;  %9831 = vmatpush1.bf16.msra.mxu0 %v13732_v16  ;;  %v13742_v24 = vld [vmem:[#allocation37_spill] sm:$0xff]  ;;  %v13743_v16 = vld [vmem:[#allocation38_spill] sm:$0xff] }
 0xe20   :  { %9801 = vmatprep.subr.bf16.mxu1 %v13733_v54  ;;  %9833 = vmatprep.subr.bf16.mxu0 %v13734_v5  ;;  %v13744_v54 = vld [vmem:[#allocation39_spill] sm:$0xff]  ;;  %v13745_v5 = vld [vmem:[#allocation40_spill] sm:$0xff] }
 0xe23   :  { %9803 = vmatpush1.bf16.msra.mxu1 %v13735_v8  ;;  %9835 = vmatpush1.bf16.msra.mxu0 %v13736_v45  ;;  %v13746_v8 = vld [vmem:[#allocation41_spill] sm:$0xff] }
 0xe24   :  { %9805 = vmatprep.subr.bf16.mxu1 %v13737_v21  ;;  %9837 = vmatprep.subr.bf16.mxu0 %v13738_v22 }
 0xe27   :  { %9807 = vmatpush1.bf16.msra.mxu1 %v13739_v59  ;;  %9839 = vmatpush1.bf16.msra.mxu0 %v13740_v23 }
 0xe28   :  { %9809 = vmatprep.subr.bf16.mxu1 %v13741_v53  ;;  %9841 = vmatprep.subr.bf16.mxu0 %v13742_v24 }
 0xe2b   :  { %9811 = vmatpush1.bf16.msra.mxu1 %v13743_v16  ;;  %9843 = vmatpush1.bf16.msra.mxu0 %v13744_v54 }
 0xe2c   :  { %9845 = vmatprep.subr.bf16.mxu1 %v13745_v5  ;;  %9877 = vmatprep.subr.bf16.mxu0 %v13746_v8 }
 0xebd   :  { %v5698_v45 = vpop.f32.mrb[52].mxu1  ;;  %v5769_v21 = vpop.f32.mrb[54].mxu0 }
 0xebe   :  { %v5778_v39 = vrot.slane %v5698_v45, 5  ;;  %v5700_v22 = vpop.f32.mrb[53].mxu1  ;;  %v5771_v57 = vpop.f32.mrb[55].mxu0  ;;  %v5780_v16 = vrot.slane %v5769_v21, 5 }
 0xebf   :  { %v5779_v59 = vrot.slane %v5700_v22, 5  ;;  %v5781_v54 = vrot.slane %v5771_v57, 5 }
 0xec0   :  { %v5786_v23 = vadd.f32 %v5778_v39, %v13683_v63  ;;  %v5788_v5 = vadd.f32 %v5780_v16, %v13685_v32 }
 0xec1   :  { %v5787_v53 = vadd.f32 %v5779_v59, %v13684_v51  ;;  %v5789_v8 = vadd.f32 %v5781_v54, %v13686_v44 }
 0xec2   :  { %v7718_v3 = vmul.f32 -1.442695, %v5786_v23  ;;  %v7720_v33 = vmul.f32 -1.442695, %v5788_v5 }
 0xec3   :  { %v7719_v24 = vmul.f32 -1.442695, %v5787_v53 }
 0xec4   :  { %10697 = vpow2.f32 %v7718_v3  ;;  %v5810_v3 = vrot.slane %v12701_v10, 7 }
 0xec5   :  { %10699 = vpow2.f32 %v7719_v24 }
 0xec6   :  { %10701 = vtanh.f32 %v5789_v8 }
 0xec7   :  { %10703 = vpow2.f32 %v7720_v33 }
 0xece   :  { %v10698_v58 = vpop.eup %10697 }
 0xecf   :  { %v5799_v45 = vadd.f32 1.0, %v10698_v58  ;;  %v10700_v31 = vpop.eup %10699 }
 0xed0   :  { %v5800_v39 = vadd.f32 1.0, %v10700_v31  ;;  %v10702_v22 = vpop.eup %10701 }
 0xed1   :  { %10705 = vrcp.f32 %v5799_v45  ;;  %v10704_v59 = vpop.eup %10703 }
 0xed2   :  { %10707 = vrcp.f32 %v5800_v39  ;;  %v5801_v53 = vadd.f32 1.0, %v10704_v59 }
 0xed4   :  { %10709 = vrcp.f32 %v5801_v53 }
 0xedb   :  { %v10706_v23 = vpop.eup %10705 }
 0xedc   :  { %v5813_v21 = vmul.f32 %v10706_v23, %v10702_v22  ;;  %v10708_v57 = vpop.eup %10707 }
 0xedd   :  { %v5812_v24 = vmul.f32 %v10708_v57, %v5810_v3 }
 0xede   :  { %v10710_v23 = vpop.eup %10709 }
 0xedf   :  { %v12794_v16 = vadd.f32 %v5813_v21, %v5812_v24 }
 0xee1   :  { %v5886_v5 = vpop.f32.mrb[54].mxu1  ;;  %v5957_v58 = vpop.f32.mrb[56].mxu0  ;;  %10711 = vtanh.f32 %v12794_v16 }
 0xee2   :  { %v5966_v33 = vrot.slane %v5886_v5, 4  ;;  %v5888_v8 = vpop.f32.mrb[55].mxu1  ;;  %v5959_v31 = vpop.f32.mrb[57].mxu0  ;;  %v5968_v59 = vrot.slane %v5957_v58, 4 }
 0xee3   :  { %v5967_v54 = vrot.slane %v5888_v8, 4  ;;  %v5969_v3 = vrot.slane %v5959_v31, 4 }
 0xee4   :  { %v5974_v45 = vadd.f32 %v5966_v33, %v12508_v38  ;;  %v5976_v57 = vadd.f32 %v5968_v59, %v12521_v4 }
 0xee5   :  { %v5975_v39 = vadd.f32 %v5967_v54, %v12512_v14  ;;  %v5977_v24 = vadd.f32 %v5969_v3, %v12525_v2 }
 0xee6   :  { %v7721_v10 = vmul.f32 -1.442695, %v5974_v45  ;;  %v7723_v33 = vmul.f32 -1.442695, %v5976_v57 }
 0xee7   :  { %v7722_v22 = vmul.f32 -1.442695, %v5975_v39 }
 0xee8   :  { %10713 = vpow2.f32 %v7721_v10 }
 0xee9   :  { %10715 = vpow2.f32 %v7722_v22  ;;  %v5998_v22 = vrot.slane %v12737_v37, 1 }
 0xeea   :  { %10717 = vtanh.f32 %v5977_v24 }
 0xeeb   :  { %v10712_v21 = vpop.eup %10711  ;;  %10719 = vpow2.f32 %v7723_v33  ;;  %v13748_v33 = vld [vmem:[#allocation57_spill] sm:$0xff] }
 0xeec   :  { %v5816_v53 = vmul.f32 %v10712_v21, %v10710_v23 }
 0xeee   :  { %v6006_v5 = vrot.slane %v5816_v53, 3  ;;  %v12803_v8 = vsel %vm3801_vm4, %v12712_v30, %v5816_v53 }
 0xef0   :  { %6073 = vmatmul.mubr.f32.vlgmr.msra.gmra.mrb[56].mxu1 %v6006_v5  ;;  %6144 = vmatmul.mubr.f32.vlgmr.msra.gmra.mrb[58].mxu0 %v6006_v5 }
 0xef1   :  { %9847 = vmatpush1.bf16.msra.mxu1 %v12345_v40  ;;  %9879 = vmatpush1.bf16.msra.mxu0 %v12347_v35 }
 0xef2   :  { %v10714_v54 = vpop.eup %10713  ;;  %9849 = vmatprep.subr.bf16.mxu1 %v12351_v56  ;;  %9881 = vmatprep.subr.bf16.mxu0 %v12353_v48 }
 0xef3   :  { %v5987_v58 = vadd.f32 1.0, %v10714_v54  ;;  %v10716_v31 = vpop.eup %10715  ;;  %6260 = vmatprep.mubr.f32.mxu1 %v13409_v34  ;;  %6331 = vmatprep.mubr.f32.mxu0 %v13409_v34  ;;  %v13749_v54 = vld [vmem:[#allocation58_spill] sm:$0xff] }
 0xef4   :  { %v5988_v30 = vadd.f32 1.0, %v10716_v31  ;;  %v10718_v45 = vpop.eup %10717  ;;  %v13751_v31 = vld [vmem:[#allocation60_spill] sm:$0xff] }
 0xef5   :  { %10721 = vrcp.f32 %v5987_v58  ;;  %9851 = vmatpush1.bf16.msra.mxu1 %v12359_v49  ;;  %9883 = vmatpush1.bf16.msra.mxu0 %v12361_v26  ;;  %v10720_v39 = vpop.eup %10719  ;;  %v13750_v58 = vld [vmem:[#allocation59_spill] sm:$0xff] }
 0xef6   :  { %10723 = vrcp.f32 %v5988_v30  ;;  %9853 = vmatprep.subr.bf16.mxu1 %v12365_v60  ;;  %9885 = vmatprep.subr.bf16.mxu0 %v13656_v19  ;;  %v5989_v3 = vadd.f32 1.0, %v10720_v39  ;;  %v13752_v30 = vld [vmem:[#allocation61_spill] sm:$0xff]  ;;  %v13754_v39 = vld [vmem:[#allocation64_spill] sm:$0xff] }
 0xef8   :  { %10725 = vrcp.f32 %v5989_v3  ;;  %v13759_v3 = vld [vmem:[#allocation24_spill] sm:$0xff] }
 0xef9   :  { %9855 = vmatpush1.bf16.msra.mxu1 %v13657_v42  ;;  %9887 = vmatpush1.bf16.msra.mxu0 %v13658_v25 }
 0xefa   :  { %9857 = vmatprep.subr.bf16.mxu1 %v13659_v18  ;;  %9889 = vmatprep.subr.bf16.mxu0 %v13660_v62 }
 0xefd   :  { %9859 = vmatpush1.bf16.msra.mxu1 %v13661_v0  ;;  %9891 = vmatpush1.bf16.msra.mxu0 %v13662_v29 }
 0xefe   :  { %9861 = vmatprep.subr.bf16.mxu1 %v13663_v6  ;;  %9893 = vmatprep.subr.bf16.mxu0 %v13664_v46 }
 0xeff   :  { %v10722_v10 = vpop.eup %10721 }
 0xf00   :  { %v6001_v59 = vmul.f32 %v10722_v10, %v10718_v45  ;;  %v10724_v23 = vpop.eup %10723  ;;  %v13753_v45 = vld [vmem:[#allocation63_spill] sm:$0xff]  ;;  %v13755_v10 = vld [vmem:[#allocation65_spill] sm:$0xff] }
 0xf01   :  { %v6000_v21 = vmul.f32 %v10724_v23, %v5998_v22  ;;  %9863 = vmatpush1.bf16.msra.mxu1 %v13665_v7  ;;  %9895 = vmatpush1.bf16.msra.mxu0 %v13666_v55  ;;  %v13756_v22 = vld [vmem:[#allocation66_spill] sm:$0xff]  ;;  %v13758_v23 = vld [vmem:[#allocation23_spill] sm:$0xff] }
 0xf02   :  { %9865 = vmatprep.subr.bf16.mxu1 %v12403_v47  ;;  %9897 = vmatprep.subr.bf16.mxu0 %v12405_v28  ;;  %v10726_v37 = vpop.eup %10725 }
 0xf03   :  { %v12828_v57 = vadd.f32 %v6001_v59, %v6000_v21  ;;  %v13757_v59 = vld [vmem:[#allocation67_spill] sm:$0xff]  ;;  %v13760_v21 = vld [vmem:[#allocation25_spill] sm:$0xff] }
 0xf05   :  { %10727 = vtanh.f32 %v12828_v57  ;;  %9867 = vmatpush1.bf16.msra.mxu1 %v12409_v50  ;;  %9899 = vmatpush1.bf16.msra.mxu0 %v12411_v13 }
 0xf06   :  { %9869 = vmatprep.subr.bf16.mxu1 %v12415_v61  ;;  %9901 = vmatprep.subr.bf16.mxu0 %v12417_v52 }
 0xf09   :  { %9871 = vmatpush1.bf16.msra.mxu1 %v12421_v1  ;;  %9903 = vmatpush1.bf16.msra.mxu0 %v12423_v9 }
 0xf0a   :  { %9873 = vmatprep.subr.bf16.mxu1 %v12427_v36  ;;  %9905 = vmatprep.subr.bf16.mxu0 %v12429_v20 }
 0xf0d   :  { %9875 = vmatpush1.bf16.msra.mxu1 %v12433_v27  ;;  %9907 = vmatpush1.bf16.msra.mxu0 %v12435_v17 }
 0xf0e   :  { %9909 = vmatprep.subr.bf16.mxu1 %v12241_v11  ;;  %9941 = vmatprep.subr.bf16.mxu0 %v12243_v41 }
 0xf0f   :  { %v10728_v53 = vpop.eup %10727 }
 0xf10   :  { %v12843_v24 = vmul.f32 %v10728_v53, %v10726_v37  ;;  %v13761_v37 = vld [vmem:[#allocation26_spill] sm:$0xff]  ;;  %v13762_v53 = vld [vmem:[#allocation27_spill] sm:$0xff] }
 0xf12   :  { %13747 = vst [vmem:[#allocation45_spill] sm:$0xff] %v12843_v24  ;;  %v6194_v5 = vrot.slane %v12843_v24, 4  ;;  %v13764_v24 = vld [vmem:[#allocation29_spill] sm:$0xff] }
 0xf14   :  { %6261 = vmatmul.mubr.f32.vlgmr.msra.gmra.mrb[58].mxu1 %v6194_v5  ;;  %6332 = vmatmul.mubr.f32.vlgmr.msra.gmra.mrb[60].mxu0 %v6194_v5  ;;  %v13763_v5 = vld [vmem:[#allocation28_spill] sm:$0xff] }
 0xf15   :  { %9911 = vmatpush1.bf16.msra.mxu1 %v12245_v43  ;;  %9943 = vmatpush1.bf16.msra.mxu0 %v12247_v12 }
 0xf16   :  { %9913 = vmatprep.subr.bf16.mxu1 %v12251_v15  ;;  %9945 = vmatprep.subr.bf16.mxu0 %v13748_v33 }
 0xf17   :  { %6448 = vmatprep.mubr.f32.mxu1 %v13409_v34  ;;  %6519 = vmatprep.mubr.f32.mxu0 %v13409_v34 }
 0xf19   :  { %9915 = vmatpush1.bf16.msra.mxu1 %v13749_v54  ;;  %9947 = vmatpush1.bf16.msra.mxu0 %v13750_v58 }
 0xf1a   :  { %9917 = vmatprep.subr.bf16.mxu1 %v13751_v31  ;;  %9949 = vmatprep.subr.bf16.mxu0 %v13752_v30 }
 0xf1d   :  { %9919 = vmatpush1.bf16.msra.mxu1 %v13753_v45  ;;  %9951 = vmatpush1.bf16.msra.mxu0 %v13754_v39  ;;  %v13765_v39 = vld [vmem:[#allocation30_spill] sm:$0xff] }
 0xf1e   :  { %9921 = vmatprep.subr.bf16.mxu1 %v13755_v10  ;;  %9953 = vmatprep.subr.bf16.mxu0 %v13756_v22  ;;  %v13766_v10 = vld [vmem:[#allocation31_spill] sm:$0xff]  ;;  %v13767_v22 = vld [vmem:[#allocation32_spill] sm:$0xff] }
 0xf21   :  { %9923 = vmatpush1.bf16.msra.mxu1 %v13757_v59  ;;  %9955 = vmatpush1.bf16.msra.mxu0 %v13758_v23  ;;  %v13768_v59 = vld [vmem:[#allocation33_spill] sm:$0xff]  ;;  %v13769_v23 = vld [vmem:[#allocation34_spill] sm:$0xff] }
 0xf22   :  { %9925 = vmatprep.subr.bf16.mxu1 %v13759_v3  ;;  %9957 = vmatprep.subr.bf16.mxu0 %v13760_v21  ;;  %v13770_v3 = vld [vmem:[#allocation35_spill] sm:$0xff]  ;;  %v13771_v21 = vld [vmem:[#allocation36_spill] sm:$0xff] }
 0xf25   :  { %9927 = vmatpush1.bf16.msra.mxu1 %v13761_v37  ;;  %9959 = vmatpush1.bf16.msra.mxu0 %v13762_v53  ;;  %v13772_v37 = vld [vmem:[#allocation37_spill] sm:$0xff]  ;;  %v13773_v53 = vld [vmem:[#allocation38_spill] sm:$0xff] }
 0xf26   :  { %9929 = vmatprep.subr.bf16.mxu1 %v13763_v5  ;;  %9961 = vmatprep.subr.bf16.mxu0 %v13764_v24  ;;  %v13774_v5 = vld [vmem:[#allocation39_spill] sm:$0xff]  ;;  %v13775_v24 = vld [vmem:[#allocation40_spill] sm:$0xff] }
 0xf29   :  { %9931 = vmatpush1.bf16.msra.mxu1 %v13765_v39  ;;  %9963 = vmatpush1.bf16.msra.mxu0 %v13766_v10  ;;  %v13776_v39 = vld [vmem:[#allocation41_spill] sm:$0xff] }
 0xf2a   :  { %9933 = vmatprep.subr.bf16.mxu1 %v13767_v22  ;;  %9965 = vmatprep.subr.bf16.mxu0 %v13768_v59 }
 0xf2d   :  { %9935 = vmatpush1.bf16.msra.mxu1 %v13769_v23  ;;  %9967 = vmatpush1.bf16.msra.mxu0 %v13770_v3 }
 0xf2e   :  { %9937 = vmatprep.subr.bf16.mxu1 %v13771_v21  ;;  %9969 = vmatprep.subr.bf16.mxu0 %v13772_v37 }
 0xf31   :  { %9939 = vmatpush1.bf16.msra.mxu1 %v13773_v53  ;;  %9971 = vmatpush1.bf16.msra.mxu0 %v13774_v5 }
 0xf32   :  { %9973 = vmatprep.subr.bf16.mxu1 %v13775_v24  ;;  %10005 = vmatprep.subr.bf16.mxu0 %v13776_v39 }
 0xfc3   :  { %v6074_v10 = vpop.f32.mrb[56].mxu1  ;;  %v6145_v22 = vpop.f32.mrb[58].mxu0 }
 0xfc4   :  { %v6154_v45 = vrot.slane %v6074_v10, 4  ;;  %v6076_v59 = vpop.f32.mrb[57].mxu1  ;;  %v6147_v30 = vpop.f32.mrb[59].mxu0  ;;  %v6156_v53 = vrot.slane %v6145_v22, 4 }
 0xfc5   :  { %v6155_v23 = vrot.slane %v6076_v59, 4  ;;  %v6157_v5 = vrot.slane %v6147_v30, 4 }
 0xfc6   :  { %v6162_v3 = vadd.f32 %v6154_v45, %v13683_v63  ;;  %v6164_v24 = vadd.f32 %v6156_v53, %v13685_v32 }
 0xfc7   :  { %v6163_v21 = vadd.f32 %v6155_v23, %v13684_v51  ;;  %v6165_v39 = vadd.f32 %v6157_v5, %v13686_v44 }
 0xfc8   :  { %v7724_v31 = vmul.f32 -1.442695, %v6162_v3  ;;  %v7726_v58 = vmul.f32 -1.442695, %v6164_v24 }
 0xfc9   :  { %v7725_v37 = vmul.f32 -1.442695, %v6163_v21 }
 0xfca   :  { %10729 = vpow2.f32 %v7724_v31  ;;  %v6186_v31 = vrot.slane %v12794_v16, 7 }
 0xfcb   :  { %10731 = vpow2.f32 %v7725_v37 }
 0xfcc   :  { %10733 = vtanh.f32 %v6165_v39 }
 0xfcd   :  { %10735 = vpow2.f32 %v7726_v58 }
 0xfd4   :  { %v10730_v54 = vpop.eup %10729 }
 0xfd5   :  { %v6175_v10 = vadd.f32 1.0, %v10730_v54  ;;  %v10732_v33 = vpop.eup %10731 }
 0xfd6   :  { %v6176_v45 = vadd.f32 1.0, %v10732_v33  ;;  %v10734_v59 = vpop.eup %10733 }
 0xfd7   :  { %10737 = vrcp.f32 %v6175_v10  ;;  %v10736_v23 = vpop.eup %10735 }
 0xfd8   :  { %10739 = vrcp.f32 %v6176_v45  ;;  %v6177_v21 = vadd.f32 1.0, %v10736_v23 }
 0xfda   :  { %10741 = vrcp.f32 %v6177_v21 }
 0xfe1   :  { %v10738_v3 = vpop.eup %10737 }
 0xfe2   :  { %v6189_v22 = vmul.f32 %v10738_v3, %v10734_v59  ;;  %v10740_v30 = vpop.eup %10739 }
 0xfe3   :  { %v6188_v37 = vmul.f32 %v10740_v30, %v6186_v31 }
 0xfe4   :  { %v10742_v3 = vpop.eup %10741 }
 0xfe5   :  { %v12885_v53 = vadd.f32 %v6189_v22, %v6188_v37 }
 0xfe7   :  { %v6262_v24 = vpop.f32.mrb[58].mxu1  ;;  %v6333_v54 = vpop.f32.mrb[60].mxu0  ;;  %10743 = vtanh.f32 %v12885_v53 }
 0xfe8   :  { %v6342_v58 = vrot.slane %v6262_v24, 5  ;;  %v6264_v39 = vpop.f32.mrb[59].mxu1  ;;  %v6335_v33 = vpop.f32.mrb[61].mxu0  ;;  %v6344_v23 = vrot.slane %v6333_v54, 5 }
 0xfe9   :  { %v6343_v5 = vrot.slane %v6264_v39, 5  ;;  %v6345_v31 = vrot.slane %v6335_v33, 5 }
 0xfea   :  { %v6350_v10 = vadd.f32 %v6342_v58, %v12508_v38  ;;  %v6352_v30 = vadd.f32 %v6344_v23, %v12521_v4 }
 0xfeb   :  { %v6351_v45 = vadd.f32 %v6343_v5, %v12512_v14  ;;  %v6353_v37 = vadd.f32 %v6345_v31, %v12525_v2 }
 0xfec   :  { %v7727_v16 = vmul.f32 -1.442695, %v6350_v10  ;;  %v7729_v58 = vmul.f32 -1.442695, %v6352_v30 }
 0xfed   :  { %v7728_v59 = vmul.f32 -1.442695, %v6351_v45 }
 0xfee   :  { %10745 = vpow2.f32 %v7727_v16 }
 0xfef   :  { %10747 = vpow2.f32 %v7728_v59  ;;  %v6374_v59 = vrot.slane %v12828_v57, 1 }
 0xff0   :  { %10749 = vtanh.f32 %v6353_v37 }
 0xff1   :  { %v10744_v22 = vpop.eup %10743  ;;  %10751 = vpow2.f32 %v7729_v58  ;;  %v13778_v58 = vld [vmem:[#allocation57_spill] sm:$0xff] }
 0xff2   :  { %v6192_v21 = vmul.f32 %v10744_v22, %v10742_v3 }
 0xff4   :  { %v6382_v24 = vrot.slane %v6192_v21, 4  ;;  %v12894_v39 = vsel %vm3803_vm5, %v12803_v8, %v6192_v21 }
 0xff6   :  { %6449 = vmatmul.mubr.f32.vlgmr.msra.gmra.mrb[60].mxu1 %v6382_v24  ;;  %6520 = vmatmul.mubr.f32.vlgmr.msra.gmra.mrb[62].mxu0 %v6382_v24 }
 0xff7   :  { %9975 = vmatpush1.bf16.msra.mxu1 %v12345_v40  ;;  %10007 = vmatpush1.bf16.msra.mxu0 %v12347_v35 }
 0xff8   :  { %v10746_v5 = vpop.eup %10745  ;;  %9977 = vmatprep.subr.bf16.mxu1 %v12351_v56  ;;  %10009 = vmatprep.subr.bf16.mxu0 %v12353_v48 }
 0xff9   :  { %v6363_v54 = vadd.f32 1.0, %v10746_v5  ;;  %v10748_v33 = vpop.eup %10747  ;;  %6636 = vmatprep.mubr.f32.mxu1 %v13409_v34  ;;  %6707 = vmatprep.mubr.f32.mxu0 %v13409_v34  ;;  %v13779_v5 = vld [vmem:[#allocation58_spill] sm:$0xff] }
 0xffa   :  { %v6364_v8 = vadd.f32 1.0, %v10748_v33  ;;  %v10750_v10 = vpop.eup %10749  ;;  %v13781_v33 = vld [vmem:[#allocation60_spill] sm:$0xff] }
 0xffb   :  { %10753 = vrcp.f32 %v6363_v54  ;;  %9979 = vmatpush1.bf16.msra.mxu1 %v12359_v49  ;;  %10011 = vmatpush1.bf16.msra.mxu0 %v12361_v26  ;;  %v10752_v45 = vpop.eup %10751  ;;  %v13780_v54 = vld [vmem:[#allocation59_spill] sm:$0xff] }
 0xffc   :  { %10755 = vrcp.f32 %v6364_v8  ;;  %9981 = vmatprep.subr.bf16.mxu1 %v12365_v60  ;;  %10013 = vmatprep.subr.bf16.mxu0 %v13656_v19  ;;  %v6365_v31 = vadd.f32 1.0, %v10752_v45  ;;  %v13782_v8 = vld [vmem:[#allocation61_spill] sm:$0xff]  ;;  %v13784_v45 = vld [vmem:[#allocation64_spill] sm:$0xff] }
 0xffe   :  { %10757 = vrcp.f32 %v6365_v31  ;;  %v13789_v31 = vld [vmem:[#allocation24_spill] sm:$0xff] }
 0xfff   :  { %9983 = vmatpush1.bf16.msra.mxu1 %v13657_v42  ;;  %10015 = vmatpush1.bf16.msra.mxu0 %v13658_v25 }
0x1000   :  { %9985 = vmatprep.subr.bf16.mxu1 %v13659_v18  ;;  %10017 = vmatprep.subr.bf16.mxu0 %v13660_v62 }
0x1003   :  { %9987 = vmatpush1.bf16.msra.mxu1 %v13661_v0  ;;  %10019 = vmatpush1.bf16.msra.mxu0 %v13662_v29 }
0x1004   :  { %9989 = vmatprep.subr.bf16.mxu1 %v13663_v6  ;;  %10021 = vmatprep.subr.bf16.mxu0 %v13664_v46 }
0x1005   :  { %v10754_v16 = vpop.eup %10753 }
0x1006   :  { %v6377_v23 = vmul.f32 %v10754_v16, %v10750_v10  ;;  %v10756_v3 = vpop.eup %10755  ;;  %v13783_v10 = vld [vmem:[#allocation63_spill] sm:$0xff]  ;;  %v13785_v16 = vld [vmem:[#allocation65_spill] sm:$0xff] }
0x1007   :  { %v6376_v22 = vmul.f32 %v10756_v3, %v6374_v59  ;;  %9991 = vmatpush1.bf16.msra.mxu1 %v13665_v7  ;;  %10023 = vmatpush1.bf16.msra.mxu0 %v13666_v55  ;;  %v13786_v59 = vld [vmem:[#allocation66_spill] sm:$0xff]  ;;  %v13788_v3 = vld [vmem:[#allocation23_spill] sm:$0xff] }
0x1008   :  { %9993 = vmatprep.subr.bf16.mxu1 %v12403_v47  ;;  %10025 = vmatprep.subr.bf16.mxu0 %v12405_v28  ;;  %v10758_v57 = vpop.eup %10757 }
0x1009   :  { %v12919_v30 = vadd.f32 %v6377_v23, %v6376_v22  ;;  %v13787_v23 = vld [vmem:[#allocation67_spill] sm:$0xff]  ;;  %v13790_v22 = vld [vmem:[#allocation25_spill] sm:$0xff] }
0x100b   :  { %10759 = vtanh.f32 %v12919_v30  ;;  %9995 = vmatpush1.bf16.msra.mxu1 %v12409_v50  ;;  %10027 = vmatpush1.bf16.msra.mxu0 %v12411_v13 }
0x100c   :  { %9997 = vmatprep.subr.bf16.mxu1 %v12415_v61  ;;  %10029 = vmatprep.subr.bf16.mxu0 %v12417_v52 }
0x100f   :  { %9999 = vmatpush1.bf16.msra.mxu1 %v12421_v1  ;;  %10031 = vmatpush1.bf16.msra.mxu0 %v12423_v9 }
0x1010   :  { %10001 = vmatprep.subr.bf16.mxu1 %v12427_v36  ;;  %10033 = vmatprep.subr.bf16.mxu0 %v12429_v20 }
0x1013   :  { %10003 = vmatpush1.bf16.msra.mxu1 %v12433_v27  ;;  %10035 = vmatpush1.bf16.msra.mxu0 %v12435_v17 }
0x1014   :  { %10037 = vmatprep.subr.bf16.mxu1 %v12241_v11  ;;  %10069 = vmatprep.subr.bf16.mxu0 %v12243_v41 }
0x1015   :  { %v10760_v21 = vpop.eup %10759 }
0x1016   :  { %v12934_v37 = vmul.f32 %v10760_v21, %v10758_v57  ;;  %v13791_v57 = vld [vmem:[#allocation26_spill] sm:$0xff]  ;;  %v13792_v21 = vld [vmem:[#allocation27_spill] sm:$0xff] }
0x1018   :  { %13777 = vst [vmem:[#allocation46_spill] sm:$0xff] %v12934_v37  ;;  %v6570_v24 = vrot.slane %v12934_v37, 3  ;;  %v13794_v37 = vld [vmem:[#allocation29_spill] sm:$0xff] }
0x101a   :  { %6637 = vmatmul.mubr.f32.vlgmr.msra.gmra.mrb[62].mxu1 %v6570_v24  ;;  %6708 = vmatmul.mubr.f32.vlgmr.msra.gmra.mrb[64].mxu0 %v6570_v24  ;;  %v13793_v24 = vld [vmem:[#allocation28_spill] sm:$0xff] }
0x101b   :  { %10039 = vmatpush1.bf16.msra.mxu1 %v12245_v43  ;;  %10071 = vmatpush1.bf16.msra.mxu0 %v12247_v12 }
0x101c   :  { %10041 = vmatprep.subr.bf16.mxu1 %v12251_v15  ;;  %10073 = vmatprep.subr.bf16.mxu0 %v13778_v58 }
0x101d   :  { %6824 = vmatprep.mubr.f32.mxu1 %v13409_v34  ;;  %6895 = vmatprep.mubr.f32.mxu0 %v13409_v34 }
0x101f   :  { %10043 = vmatpush1.bf16.msra.mxu1 %v13779_v5  ;;  %10075 = vmatpush1.bf16.msra.mxu0 %v13780_v54 }
0x1020   :  { %10045 = vmatprep.subr.bf16.mxu1 %v13781_v33  ;;  %10077 = vmatprep.subr.bf16.mxu0 %v13782_v8 }
0x1023   :  { %10047 = vmatpush1.bf16.msra.mxu1 %v13783_v10  ;;  %10079 = vmatpush1.bf16.msra.mxu0 %v13784_v45  ;;  %v13795_v45 = vld [vmem:[#allocation30_spill] sm:$0xff] }
0x1024   :  { %10049 = vmatprep.subr.bf16.mxu1 %v13785_v16  ;;  %10081 = vmatprep.subr.bf16.mxu0 %v13786_v59  ;;  %v13796_v16 = vld [vmem:[#allocation31_spill] sm:$0xff]  ;;  %v13797_v59 = vld [vmem:[#allocation32_spill] sm:$0xff] }
0x1027   :  { %10051 = vmatpush1.bf16.msra.mxu1 %v13787_v23  ;;  %10083 = vmatpush1.bf16.msra.mxu0 %v13788_v3  ;;  %v13798_v23 = vld [vmem:[#allocation33_spill] sm:$0xff]  ;;  %v13799_v3 = vld [vmem:[#allocation34_spill] sm:$0xff] }
0x1028   :  { %10053 = vmatprep.subr.bf16.mxu1 %v13789_v31  ;;  %10085 = vmatprep.subr.bf16.mxu0 %v13790_v22  ;;  %v13800_v31 = vld [vmem:[#allocation35_spill] sm:$0xff]  ;;  %v13801_v22 = vld [vmem:[#allocation36_spill] sm:$0xff] }
0x102b   :  { %10055 = vmatpush1.bf16.msra.mxu1 %v13791_v57  ;;  %10087 = vmatpush1.bf16.msra.mxu0 %v13792_v21  ;;  %v13802_v57 = vld [vmem:[#allocation37_spill] sm:$0xff]  ;;  %v13803_v21 = vld [vmem:[#allocation38_spill] sm:$0xff] }
0x102c   :  { %10057 = vmatprep.subr.bf16.mxu1 %v13793_v24  ;;  %10089 = vmatprep.subr.bf16.mxu0 %v13794_v37  ;;  %v13804_v24 = vld [vmem:[#allocation39_spill] sm:$0xff]  ;;  %v13805_v37 = vld [vmem:[#allocation40_spill] sm:$0xff] }
0x102f   :  { %10059 = vmatpush1.bf16.msra.mxu1 %v13795_v45  ;;  %10091 = vmatpush1.bf16.msra.mxu0 %v13796_v16  ;;  %v13806_v45 = vld [vmem:[#allocation41_spill] sm:$0xff] }
0x1030   :  { %10061 = vmatprep.subr.bf16.mxu1 %v13797_v59  ;;  %10093 = vmatprep.subr.bf16.mxu0 %v13798_v23 }
0x1033   :  { %10063 = vmatpush1.bf16.msra.mxu1 %v13799_v3  ;;  %10095 = vmatpush1.bf16.msra.mxu0 %v13800_v31 }
0x1034   :  { %10065 = vmatprep.subr.bf16.mxu1 %v13801_v22  ;;  %10097 = vmatprep.subr.bf16.mxu0 %v13802_v57 }
0x1037   :  { %10067 = vmatpush1.bf16.msra.mxu1 %v13803_v21  ;;  %10099 = vmatpush1.bf16.msra.mxu0 %v13804_v24 }
0x1038   :  { %10101 = vmatprep.subr.bf16.mxu1 %v13805_v37  ;;  %10133 = vmatprep.subr.bf16.mxu0 %v13806_v45 }
0x10c9   :  { %v6450_v16 = vpop.f32.mrb[60].mxu1  ;;  %v6521_v59 = vpop.f32.mrb[62].mxu0 }
0x10ca   :  { %v6530_v10 = vrot.slane %v6450_v16, 3  ;;  %v6452_v23 = vpop.f32.mrb[61].mxu1  ;;  %v6523_v8 = vpop.f32.mrb[63].mxu0  ;;  %v6532_v21 = vrot.slane %v6521_v59, 3 }
0x10cb   :  { %v6531_v3 = vrot.slane %v6452_v23, 3  ;;  %v6533_v24 = vrot.slane %v6523_v8, 3 }
0x10cc   :  { %v6538_v31 = vadd.f32 %v6530_v10, %v13683_v63  ;;  %v6540_v37 = vadd.f32 %v6532_v21, %v13685_v32 }
0x10cd   :  { %v6539_v22 = vadd.f32 %v6531_v3, %v13684_v51  ;;  %v6541_v45 = vadd.f32 %v6533_v24, %v13686_v44 }
0x10ce   :  { %v7730_v33 = vmul.f32 -1.442695, %v6538_v31  ;;  %v7732_v54 = vmul.f32 -1.442695, %v6540_v37 }
0x10cf   :  { %v7731_v57 = vmul.f32 -1.442695, %v6539_v22 }
0x10d0   :  { %10761 = vpow2.f32 %v7730_v33  ;;  %v6562_v33 = vrot.slane %v12885_v53, 7 }
0x10d1   :  { %10763 = vpow2.f32 %v7731_v57 }
0x10d2   :  { %10765 = vtanh.f32 %v6541_v45 }
0x10d3   :  { %10767 = vpow2.f32 %v7732_v54 }
0x10da   :  { %v10762_v5 = vpop.eup %10761 }
0x10db   :  { %v6551_v16 = vadd.f32 1.0, %v10762_v5  ;;  %v10764_v58 = vpop.eup %10763 }
0x10dc   :  { %v6552_v10 = vadd.f32 1.0, %v10764_v58  ;;  %v10766_v23 = vpop.eup %10765 }
0x10dd   :  { %10769 = vrcp.f32 %v6551_v16  ;;  %v10768_v3 = vpop.eup %10767 }
0x10de   :  { %10771 = vrcp.f32 %v6552_v10  ;;  %v6553_v22 = vadd.f32 1.0, %v10768_v3 }
0x10e0   :  { %10773 = vrcp.f32 %v6553_v22 }
0x10e7   :  { %v10770_v31 = vpop.eup %10769 }
0x10e8   :  { %v6565_v59 = vmul.f32 %v10770_v31, %v10766_v23  ;;  %v10772_v8 = vpop.eup %10771 }
0x10e9   :  { %v6564_v57 = vmul.f32 %v10772_v8, %v6562_v33 }
0x10ea   :  { %v10774_v31 = vpop.eup %10773 }
0x10eb   :  { %v12976_v21 = vadd.f32 %v6565_v59, %v6564_v57 }
0x10ed   :  { %v6638_v37 = vpop.f32.mrb[62].mxu1  ;;  %v6709_v5 = vpop.f32.mrb[64].mxu0  ;;  %10775 = vtanh.f32 %v12976_v21 }
0x10ee   :  { %v6718_v54 = vrot.slane %v6638_v37, 6  ;;  %v6640_v45 = vpop.f32.mrb[63].mxu1  ;;  %v6711_v58 = vpop.f32.mrb[65].mxu0  ;;  %v6720_v3 = vrot.slane %v6709_v5, 6 }
0x10ef   :  { %v6719_v24 = vrot.slane %v6640_v45, 6  ;;  %v6721_v33 = vrot.slane %v6711_v58, 6 }
0x10f0   :  { %v6726_v16 = vadd.f32 %v6718_v54, %v12508_v38  ;;  %v6728_v8 = vadd.f32 %v6720_v3, %v12521_v4 }
0x10f1   :  { %v6727_v10 = vadd.f32 %v6719_v24, %v12512_v14  ;;  %v6729_v57 = vadd.f32 %v6721_v33, %v12525_v2 }
0x10f2   :  { %v7733_v53 = vmul.f32 -1.442695, %v6726_v16  ;;  %v7735_v54 = vmul.f32 -1.442695, %v6728_v8 }
0x10f3   :  { %v7734_v23 = vmul.f32 -1.442695, %v6727_v10 }
0x10f4   :  { %10777 = vpow2.f32 %v7733_v53 }
0x10f5   :  { %10779 = vpow2.f32 %v7734_v23  ;;  %v6750_v23 = vrot.slane %v12919_v30, 1 }
0x10f6   :  { %10781 = vtanh.f32 %v6729_v57 }
0x10f7   :  { %v10776_v59 = vpop.eup %10775  ;;  %10783 = vpow2.f32 %v7735_v54  ;;  %v13807_v54 = vld [vmem:[#allocation57_spill] sm:$0xff] }
0x10f8   :  { %v6568_v22 = vmul.f32 %v10776_v59, %v10774_v31 }
0x10fa   :  { %v6758_v37 = vrot.slane %v6568_v22, 5  ;;  %v12985_v45 = vsel %vm3805_vm6, %v12894_v39, %v6568_v22 }
0x10fc   :  { %6825 = vmatmul.mubr.f32.vlgmr.msra.gmra.mrb[64].mxu1 %v6758_v37  ;;  %6896 = vmatmul.mubr.f32.vlgmr.msra.gmra.mrb[66].mxu0 %v6758_v37 }
0x10fd   :  { %10103 = vmatpush1.bf16.msra.mxu1 %v12345_v40  ;;  %10135 = vmatpush1.bf16.msra.mxu0 %v12347_v35 }
0x10fe   :  { %v10778_v24 = vpop.eup %10777  ;;  %10105 = vmatprep.subr.bf16.mxu1 %v12351_v56  ;;  %10137 = vmatprep.subr.bf16.mxu0 %v12353_v48 }
0x10ff   :  { %v6739_v5 = vadd.f32 1.0, %v10778_v24  ;;  %v10780_v58 = vpop.eup %10779  ;;  %7012 = vmatprep.mubr.f32.mxu1 %v13409_v34  ;;  %7083 = vmatprep.mubr.f32.mxu0 %v13409_v34  ;;  %v13810_v24 = vld [vmem:[#allocation60_spill] sm:$0xff] }
0x1100   :  { %v6740_v39 = vadd.f32 1.0, %v10780_v58  ;;  %v10782_v16 = vpop.eup %10781  ;;  %v13812_v58 = vld [vmem:[#allocation63_spill] sm:$0xff] }
0x1101   :  { %10785 = vrcp.f32 %v6739_v5  ;;  %10107 = vmatpush1.bf16.msra.mxu1 %v12359_v49  ;;  %10139 = vmatpush1.bf16.msra.mxu0 %v12361_v26  ;;  %v10784_v10 = vpop.eup %10783  ;;  %v13811_v5 = vld [vmem:[#allocation61_spill] sm:$0xff] }
0x1102   :  { %10787 = vrcp.f32 %v6740_v39  ;;  %10109 = vmatprep.subr.bf16.mxu1 %v12365_v60  ;;  %10141 = vmatprep.subr.bf16.mxu0 %v13656_v19  ;;  %v6741_v33 = vadd.f32 1.0, %v10784_v10  ;;  %v13816_v39 = vld [vmem:[#allocation67_spill] sm:$0xff]  ;;  %v13818_v10 = vld [vmem:[#allocation24_spill] sm:$0xff] }
0x1104   :  { %10789 = vrcp.f32 %v6741_v33  ;;  %v13823_v33 = vld [vmem:[#allocation29_spill] sm:$0xff] }
0x1105   :  { %10111 = vmatpush1.bf16.msra.mxu1 %v13657_v42  ;;  %10143 = vmatpush1.bf16.msra.mxu0 %v13658_v25 }
0x1106   :  { %10113 = vmatprep.subr.bf16.mxu1 %v13659_v18  ;;  %10145 = vmatprep.subr.bf16.mxu0 %v13660_v62 }
0x1109   :  { %10115 = vmatpush1.bf16.msra.mxu1 %v13661_v0  ;;  %10147 = vmatpush1.bf16.msra.mxu0 %v13662_v29 }
0x110a   :  { %10117 = vmatprep.subr.bf16.mxu1 %v13663_v6  ;;  %10149 = vmatprep.subr.bf16.mxu0 %v13664_v46 }
0x110b   :  { %v10786_v53 = vpop.eup %10785 }
0x110c   :  { %v6753_v3 = vmul.f32 %v10786_v53, %v10782_v16  ;;  %v10788_v31 = vpop.eup %10787  ;;  %v13817_v16 = vld [vmem:[#allocation23_spill] sm:$0xff]  ;;  %v13819_v53 = vld [vmem:[#allocation25_spill] sm:$0xff] }
0x110d   :  { %v6752_v59 = vmul.f32 %v10788_v31, %v6750_v23  ;;  %10119 = vmatpush1.bf16.msra.mxu1 %v13665_v7  ;;  %10151 = vmatpush1.bf16.msra.mxu0 %v13666_v55  ;;  %v13820_v23 = vld [vmem:[#allocation26_spill] sm:$0xff]  ;;  %v13822_v31 = vld [vmem:[#allocation28_spill] sm:$0xff] }
0x110e   :  { %10121 = vmatprep.subr.bf16.mxu1 %v12403_v47  ;;  %10153 = vmatprep.subr.bf16.mxu0 %v12405_v28  ;;  %v10790_v30 = vpop.eup %10789 }
0x110f   :  { %v13010_v8 = vadd.f32 %v6753_v3, %v6752_v59  ;;  %v13821_v3 = vld [vmem:[#allocation27_spill] sm:$0xff]  ;;  %v13824_v59 = vld [vmem:[#allocation30_spill] sm:$0xff] }
0x1111   :  { %10791 = vtanh.f32 %v13010_v8  ;;  %10123 = vmatpush1.bf16.msra.mxu1 %v12409_v50  ;;  %10155 = vmatpush1.bf16.msra.mxu0 %v12411_v13 }
0x1112   :  { %10125 = vmatprep.subr.bf16.mxu1 %v12415_v61  ;;  %10157 = vmatprep.subr.bf16.mxu0 %v12417_v52 }
0x1115   :  { %10127 = vmatpush1.bf16.msra.mxu1 %v12421_v1  ;;  %10159 = vmatpush1.bf16.msra.mxu0 %v12423_v9 }
0x1116   :  { %10129 = vmatprep.subr.bf16.mxu1 %v12427_v36  ;;  %10161 = vmatprep.subr.bf16.mxu0 %v12429_v20 }
0x1119   :  { %10131 = vmatpush1.bf16.msra.mxu1 %v12433_v27  ;;  %10163 = vmatpush1.bf16.msra.mxu0 %v12435_v17 }
0x111a   :  { %10165 = vmatprep.subr.bf16.mxu1 %v12241_v11  ;;  %10197 = vmatprep.subr.bf16.mxu0 %v12243_v41  ;;  %v13808_v11 = vld [vmem:[#allocation58_spill] sm:$0xff]  ;;  %v13809_v41 = vld [vmem:[#allocation59_spill] sm:$0xff] }
0x111b   :  { %v10792_v22 = vpop.eup %10791 }
0x111c   :  { %v13025_v57 = vmul.f32 %v10792_v22, %v10790_v30  ;;  %v13825_v30 = vld [vmem:[#allocation31_spill] sm:$0xff]  ;;  %v13826_v22 = vld [vmem:[#allocation32_spill] sm:$0xff] }
0x111e   :  { %v6946_v37 = vrot.slane %v13025_v57, 2 }
0x1120   :  { %7013 = vmatmul.mubr.f32.vlgmr.msra.gmra.mrb[66].mxu1 %v6946_v37  ;;  %7084 = vmatmul.mubr.f32.vlgmr.msra.gmra.mrb[68].mxu0 %v6946_v37  ;;  %v13827_v37 = vld [vmem:[#allocation33_spill] sm:$0xff] }
0x1121   :  { %10167 = vmatpush1.bf16.msra.mxu1 %v12245_v43  ;;  %10199 = vmatpush1.bf16.msra.mxu0 %v12247_v12  ;;  %v13813_v43 = vld [vmem:[#allocation64_spill] sm:$0xff]  ;;  %v13814_v12 = vld [vmem:[#allocation65_spill] sm:$0xff] }
0x1122   :  { %10169 = vmatprep.subr.bf16.mxu1 %v12251_v15  ;;  %10201 = vmatprep.subr.bf16.mxu0 %v13807_v54  ;;  %v13815_v15 = vld [vmem:[#allocation66_spill] sm:$0xff] }
0x1123   :  { %7200 = vmatprep.mubr.f32.mxu1 %v13409_v34  ;;  %7271 = vmatprep.mubr.f32.mxu0 %v13409_v34  ;;  %v13828_v54 = vld [vmem:[#allocation34_spill] sm:$0xff] }
0x1125   :  { %10171 = vmatpush1.bf16.msra.mxu1 %v13808_v11  ;;  %10203 = vmatpush1.bf16.msra.mxu0 %v13809_v41  ;;  %v13829_v11 = vld [vmem:[#allocation35_spill] sm:$0xff]  ;;  %v13830_v41 = vld [vmem:[#allocation36_spill] sm:$0xff] }
0x1126   :  { %10173 = vmatprep.subr.bf16.mxu1 %v13810_v24  ;;  %10205 = vmatprep.subr.bf16.mxu0 %v13811_v5  ;;  %v13831_v24 = vld [vmem:[#allocation37_spill] sm:$0xff]  ;;  %v13832_v5 = vld [vmem:[#allocation38_spill] sm:$0xff] }
0x1129   :  { %10175 = vmatpush1.bf16.msra.mxu1 %v13812_v58  ;;  %10207 = vmatpush1.bf16.msra.mxu0 %v13813_v43  ;;  %v13833_v58 = vld [vmem:[#allocation39_spill] sm:$0xff]  ;;  %v13834_v43 = vld [vmem:[#allocation40_spill] sm:$0xff] }
0x112a   :  { %10177 = vmatprep.subr.bf16.mxu1 %v13814_v12  ;;  %10209 = vmatprep.subr.bf16.mxu0 %v13815_v15  ;;  %v13835_v12 = vld [vmem:[#allocation41_spill] sm:$0xff] }
0x112d   :  { %10179 = vmatpush1.bf16.msra.mxu1 %v13816_v39  ;;  %10211 = vmatpush1.bf16.msra.mxu0 %v13817_v16 }
0x112e   :  { %10181 = vmatprep.subr.bf16.mxu1 %v13818_v10  ;;  %10213 = vmatprep.subr.bf16.mxu0 %v13819_v53 }
0x1131   :  { %10183 = vmatpush1.bf16.msra.mxu1 %v13820_v23  ;;  %10215 = vmatpush1.bf16.msra.mxu0 %v13821_v3 }
0x1132   :  { %10185 = vmatprep.subr.bf16.mxu1 %v13822_v31  ;;  %10217 = vmatprep.subr.bf16.mxu0 %v13823_v33 }
0x1135   :  { %10187 = vmatpush1.bf16.msra.mxu1 %v13824_v59  ;;  %10219 = vmatpush1.bf16.msra.mxu0 %v13825_v30 }
0x1136   :  { %10189 = vmatprep.subr.bf16.mxu1 %v13826_v22  ;;  %10221 = vmatprep.subr.bf16.mxu0 %v13827_v37 }
0x1139   :  { %10191 = vmatpush1.bf16.msra.mxu1 %v13828_v54  ;;  %10223 = vmatpush1.bf16.msra.mxu0 %v13829_v11 }
0x113a   :  { %10193 = vmatprep.subr.bf16.mxu1 %v13830_v41  ;;  %10225 = vmatprep.subr.bf16.mxu0 %v13831_v24 }
0x113d   :  { %10195 = vmatpush1.bf16.msra.mxu1 %v13832_v5  ;;  %10227 = vmatpush1.bf16.msra.mxu0 %v13833_v58 }
0x113e   :  { %10229 = vmatprep.subr.bf16.mxu1 %v13834_v43  ;;  %10261 = vmatprep.subr.bf16.mxu0 %v13835_v12 }
0x11cf   :  { %v6826_v15 = vpop.f32.mrb[64].mxu1  ;;  %v6897_v39 = vpop.f32.mrb[66].mxu0 }
0x11d0   :  { %v6906_v16 = vrot.slane %v6826_v15, 2  ;;  %v6828_v10 = vpop.f32.mrb[65].mxu1  ;;  %v6899_v53 = vpop.f32.mrb[67].mxu0  ;;  %v6908_v30 = vrot.slane %v6897_v39, 2  ;;  %v6938_v39 = vrot.slane %v12976_v21, 7 }
0x11d1   :  { %v6907_v23 = vrot.slane %v6828_v10, 2  ;;  %v6909_v22 = vrot.slane %v6899_v53, 2 }
0x11d2   :  { %v6914_v3 = vadd.f32 %v6906_v16, %v13683_v63  ;;  %v6916_v37 = vadd.f32 %v6908_v30, %v13685_v32 }
0x11d3   :  { %v6915_v31 = vadd.f32 %v6907_v23, %v13684_v51  ;;  %v6917_v54 = vadd.f32 %v6909_v22, %v13686_v44 }
0x11d4   :  { %v7736_v33 = vmul.f32 -1.442695, %v6914_v3  ;;  %v7738_v11 = vmul.f32 -1.442695, %v6916_v37 }
0x11d5   :  { %v7737_v59 = vmul.f32 -1.442695, %v6915_v31 }
0x11d6   :  { %10793 = vpow2.f32 %v7736_v33 }
0x11d7   :  { %10795 = vpow2.f32 %v7737_v59 }
0x11d8   :  { %10797 = vtanh.f32 %v6917_v54 }
0x11d9   :  { %10799 = vpow2.f32 %v7738_v11 }
0x11e0   :  { %v10794_v41 = vpop.eup %10793 }
0x11e1   :  { %v6927_v24 = vadd.f32 1.0, %v10794_v41  ;;  %v10796_v5 = vpop.eup %10795 }
0x11e2   :  { %v6928_v58 = vadd.f32 1.0, %v10796_v5  ;;  %v10798_v43 = vpop.eup %10797 }
0x11e3   :  { %10801 = vrcp.f32 %v6927_v24  ;;  %v10800_v12 = vpop.eup %10799 }
0x11e4   :  { %10803 = vrcp.f32 %v6928_v58  ;;  %v6929_v53 = vadd.f32 1.0, %v10800_v12 }
0x11e6   :  { %10805 = vrcp.f32 %v6929_v53 }
0x11ed   :  { %v10802_v15 = vpop.eup %10801 }
0x11ee   :  { %v6941_v16 = vmul.f32 %v10802_v15, %v10798_v43  ;;  %v10804_v10 = vpop.eup %10803 }
0x11ef   :  { %v6940_v23 = vmul.f32 %v10804_v10, %v6938_v39 }
0x11f0   :  { %v10806_v5 = vpop.eup %10805 }
0x11f1   :  { %v13067_v3 = vadd.f32 %v6941_v16, %v6940_v23 }
0x11f3   :  { %v7014_v31 = vpop.f32.mrb[66].mxu1  ;;  %v7085_v33 = vpop.f32.mrb[68].mxu0  ;;  %10807 = vtanh.f32 %v13067_v3 }
0x11f4   :  { %v7094_v59 = vrot.slane %v7014_v31, 7  ;;  %v7016_v30 = vpop.f32.mrb[67].mxu1  ;;  %v7087_v22 = vpop.f32.mrb[69].mxu0  ;;  %v7096_v24 = vrot.slane %v7085_v33, 7 }
0x11f5   :  { %v7095_v37 = vrot.slane %v7016_v30, 7  ;;  %v7097_v58 = vrot.slane %v7087_v22, 7  ;;  %v7517_v22 = vld [vmem:[#allocation14 + $0x30] sm:$0xff] }
0x11f6   :  { %v7102_v54 = vadd.f32 %v7094_v59, %v12508_v38  ;;  %v7104_v12 = vadd.f32 %v7096_v24, %v12521_v4  ;;  %v7534_v59 = vld [vmem:[#allocation14 + $0xb8] sm:$0xff] }
0x11f7   :  { %v7103_v11 = vadd.f32 %v7095_v37, %v12512_v14  ;;  %v7105_v39 = vadd.f32 %v7097_v58, %v12525_v2  ;;  %v7518_v37 = vld [vmem:[#allocation14 + $0x38] sm:$0xff]  ;;  %v7537_v58 = vld [vmem:[#allocation14 + $0xd0] sm:$0xff] }
0x11f8   :  { %v7739_v21 = vmul.f32 -1.442695, %v7102_v54  ;;  %v7741_v53 = vmul.f32 -1.442695, %v7104_v12  ;;  %v10306_v54 = vpack.c.bf16 %v7518_v37, %v7517_v22 }
0x11f9   :  { %v7740_v41 = vmul.f32 -1.442695, %v7103_v11  ;;  %v7535_v11 = vld [vmem:[#allocation14 + $0xc0] sm:$0xff] }
0x11fa   :  { %10809 = vpow2.f32 %v7739_v21  ;;  %v7536_v21 = vld [vmem:[#allocation14 + $0xc8] sm:$0xff] }
0x11fb   :  { %10811 = vpow2.f32 %v7740_v41  ;;  %v7519_v41 = vld [vmem:[#allocation14 + $0x40] sm:$0xff]  ;;  %v10308_v24 = vpack.c.bf16 %v7536_v21, %v7535_v11 }
0x11fc   :  { %10813 = vtanh.f32 %v7105_v39  ;;  %v7521_v39 = vld [vmem:[#allocation14 + $0x50] sm:$0xff] }
0x11fd   :  { %v10808_v43 = vpop.eup %10807  ;;  %10815 = vpow2.f32 %v7741_v53  ;;  %v7539_v53 = vld [vmem:[#allocation14 + $0xe0] sm:$0xff] }
0x11fe   :  { %v6944_v15 = vmul.f32 %v10808_v43, %v10806_v5  ;;  %v7520_v5 = vld [vmem:[#allocation14 + $0x48] sm:$0xff]  ;;  %v7538_v43 = vld [vmem:[#allocation14 + $0xd8] sm:$0xff] }
0x11ff   :  { %v10310_v12 = vpack.c.bf16 %v7520_v5, %v7519_v41 }
0x1200   :  { %v7134_v16 = vrot.slane %v6944_v15, 6  ;;  %v13076_v10 = vsel %vm3807_vm7, %v12985_v45, %v6944_v15  ;;  %v10312_v15 = vpack.c.bf16 %v7538_v43, %v7537_v58 }
0x1202   :  { %7201 = vmatmul.mubr.f32.vlgmr.msra.gmra.mrb[68].mxu1 %v7134_v16  ;;  %7272 = vmatmul.mubr.f32.vlgmr.msra.gmra.mrb[70].mxu0 %v7134_v16  ;;  %v7522_v16 = vld [vmem:[#allocation14 + $0x58] sm:$0xff] }
0x1203   :  { %10231 = vmatpush1.bf16.msra.mxu1 %v12345_v40  ;;  %10263 = vmatpush1.bf16.msra.mxu0 %v12347_v35 }
0x1204   :  { %v10810_v23 = vpop.eup %10809  ;;  %10233 = vmatprep.subr.bf16.mxu1 %v12351_v56  ;;  %10265 = vmatprep.subr.bf16.mxu0 %v12353_v48  ;;  %v7126_v56 = vrot.slane %v13010_v8, 1  ;;  %v7533_v8 = vld [vmem:[#allocation14 + $0xb0] sm:$0xff] }
0x1205   :  { %v7115_v31 = vadd.f32 1.0, %v10810_v23  ;;  %v10812_v33 = vpop.eup %10811  ;;  %7388 = vmatprep.mubr.f32.mxu1 %v13409_v34  ;;  %7459 = vmatprep.mubr.f32.mxu0 %v13409_v34  ;;  %v10304_v30 = vpack.c.bf16 %v7534_v59, %v7533_v8  ;;  %v7540_v23 = vld [vmem:[#allocation14 + $0xe8] sm:$0xff] }
0x1206   :  { %v7116_v45 = vadd.f32 1.0, %v10812_v33  ;;  %v10814_v34 = vpop.eup %10813  ;;  %v10316_v33 = vpack.c.bf16 %v7540_v23, %v7539_v53 }
0x1207   :  { %10817 = vrcp.f32 %v7115_v31  ;;  %10235 = vmatpush1.bf16.msra.mxu1 %v12359_v49  ;;  %10267 = vmatpush1.bf16.msra.mxu0 %v12361_v26  ;;  %v10816_v40 = vpop.eup %10815  ;;  %v10314_v31 = vpack.c.bf16 %v7522_v16, %v7521_v39 }
0x1208   :  { %10819 = vrcp.f32 %v7116_v45  ;;  %10237 = vmatprep.subr.bf16.mxu1 %v12365_v60  ;;  %10269 = vmatprep.subr.bf16.mxu0 %v13656_v19  ;;  %v7117_v26 = vadd.f32 1.0, %v10816_v40  ;;  %v7523_v45 = vld [vmem:[#allocation14 + $0x60] sm:$0xff]  ;;  %v7541_v40 = vld [vmem:[#allocation14 + $0xf0] sm:$0xff] }
0x120a   :  { %10821 = vrcp.f32 %v7117_v26  ;;  %v7526_v26 = vld [vmem:[#allocation14 + $0x78] sm:$0xff] }
0x120b   :  { %10239 = vmatpush1.bf16.msra.mxu1 %v13657_v42  ;;  %10271 = vmatpush1.bf16.msra.mxu0 %v13658_v25  ;;  %v7512_v42 = vld [vmem:[#allocation14 + $0x8] sm:$0xff] }
0x120c   :  { %10241 = vmatprep.subr.bf16.mxu1 %v13659_v18  ;;  %10273 = vmatprep.subr.bf16.mxu0 %v13660_v62  ;;  %v7514_v18 = vld [vmem:[#allocation14 + $0x18] sm:$0xff] }
0x120f   :  { %10243 = vmatpush1.bf16.msra.mxu1 %v13661_v0  ;;  %10275 = vmatpush1.bf16.msra.mxu0 %v13662_v29  ;;  %v7531_v0 = vld [vmem:[#allocation14 + $0xa0] sm:$0xff]  ;;  %v7532_v29 = vld [vmem:[#allocation14 + $0xa8] sm:$0xff] }
0x1210   :  { %10245 = vmatprep.subr.bf16.mxu1 %v13663_v6  ;;  %10277 = vmatprep.subr.bf16.mxu0 %v13664_v46  ;;  %v10300_v6 = vpack.c.bf16 %v7532_v29, %v7531_v0  ;;  %v7515_v46 = vld [vmem:[#allocation14 + $0x20] sm:$0xff] }
0x1211   :  { %v10818_v35 = vpop.eup %10817 }
0x1212   :  { %v7129_v48 = vmul.f32 %v10818_v35, %v10814_v34  ;;  %v10820_v49 = vpop.eup %10819  ;;  %v7524_v34 = vld [vmem:[#allocation14 + $0x68] sm:$0xff]  ;;  %v7542_v35 = vld [vmem:[#allocation14 + $0xf8] sm:$0xff] }
0x1213   :  { %v7128_v60 = vmul.f32 %v10820_v49, %v7126_v56  ;;  %10247 = vmatpush1.bf16.msra.mxu1 %v13665_v7  ;;  %10279 = vmatpush1.bf16.msra.mxu0 %v13666_v55  ;;  %v7516_v7 = vld [vmem:[#allocation14 + $0x28] sm:$0xff]  ;;  %v10318_v56 = vpack.c.bf16 %v7524_v34, %v7523_v45  ;;  %v7525_v49 = vld [vmem:[#allocation14 + $0x70] sm:$0xff] }
0x1214   :  { %10249 = vmatprep.subr.bf16.mxu1 %v12403_v47  ;;  %10281 = vmatprep.subr.bf16.mxu0 %v12405_v28  ;;  %v10822_v47 = vpop.eup %10821  ;;  %v10302_v55 = vpack.c.bf16 %v7516_v7, %v7515_v46 }
0x1215   :  { %v13101_v19 = vadd.f32 %v7129_v48, %v7128_v60  ;;  %v10320_v48 = vpack.c.bf16 %v7542_v35, %v7541_v40  ;;  %v10322_v60 = vpack.c.bf16 %v7526_v26, %v7525_v49 }
0x1217   :  { %10823 = vtanh.f32 %v13101_v19  ;;  %10251 = vmatpush1.bf16.msra.mxu1 %v12409_v50  ;;  %10283 = vmatpush1.bf16.msra.mxu0 %v12411_v13  ;;  %v7490_v45 = vrot.slane %v13101_v19, 1  ;;  %v13837_v19 = vld [vmem:[#allocation45_spill] sm:$0xff] }
0x1218   :  { %10253 = vmatprep.subr.bf16.mxu1 %v12415_v61  ;;  %10285 = vmatprep.subr.bf16.mxu0 %v12417_v52  ;;  %v7527_v61 = vld [vmem:[#allocation14 + $0x80] sm:$0xff]  ;;  %v7528_v52 = vld [vmem:[#allocation14 + $0x88] sm:$0xff] }
0x121b   :  { %10255 = vmatpush1.bf16.msra.mxu1 %v12421_v1  ;;  %10287 = vmatpush1.bf16.msra.mxu0 %v12423_v9  ;;  %v10292_v1 = vpack.c.bf16 %v7528_v52, %v7527_v61  ;;  %v7511_v9 = vld [vmem:[#allocation14] sm:$0xff] }
0x121c   :  { %10257 = vmatprep.subr.bf16.mxu1 %v12427_v36  ;;  %10289 = vmatprep.subr.bf16.mxu0 %v12429_v20  ;;  %v10294_v36 = vpack.c.bf16 %v7512_v42, %v7511_v9  ;;  %v7529_v20 = vld [vmem:[#allocation14 + $0x90] sm:$0xff] }
0x121f   :  { %10259 = vmatpush1.bf16.msra.mxu1 %v12433_v27  ;;  %10291 = vmatpush1.bf16.msra.mxu0 %v12435_v17  ;;  %v7530_v27 = vld [vmem:[#allocation14 + $0x98] sm:$0xff]  ;;  %v7513_v17 = vld [vmem:[#allocation14 + $0x10] sm:$0xff] }
0x1220   :  { %10293 = vmatprep.subr.bf16.mxu1 %v10292_v1  ;;  %v10296_v25 = vpack.c.bf16 %v7530_v27, %v7529_v20  ;;  %v10298_v62 = vpack.c.bf16 %v7514_v18, %v7513_v17 }
0x1221   :  { %v10824_v28 = vpop.eup %10823 }
0x1222   :  { %v13114_v50 = vmul.f32 %v10824_v28, %v10822_v47 }
0x1224   :  { %v7322_v13 = vrot.slane %v13114_v50, 1 }
0x1226   :  { %7389 = vmatmul.mubr.f32.vlgmr.msra.gmra.mrb[70].mxu1 %v7322_v13  ;;  %7460 = vmatmul.mubr.f32.vlgmr.msra.gmra.mrb[72].mxu0 %v7322_v13 }
0x1227   :  { %10295 = vmatpush3.bf16.msra.mxu1 %v10294_v36 }
0x1228   :  { %10297 = vmatprep.subr.bf16.mxu1 %v10296_v25 }
0x122b   :  { %10299 = vmatpush3.bf16.msra.mxu1 %v10298_v62 }
0x122c   :  { %10301 = vmatprep.subr.bf16.mxu1 %v10300_v6 }
0x122f   :  { %10303 = vmatpush3.bf16.msra.mxu1 %v10302_v55  ;;  %v7314_v55 = vrot.slane %v13067_v3, 7 }
0x1230   :  { %10305 = vmatprep.subr.bf16.mxu1 %v10304_v30 }
0x1233   :  { %10307 = vmatpush3.bf16.msra.mxu1 %v10306_v54 }
0x1234   :  { %10309 = vmatprep.subr.bf16.mxu1 %v10308_v24 }
0x1237   :  { %10311 = vmatpush3.bf16.msra.mxu1 %v10310_v12 }
0x1238   :  { %10313 = vmatprep.subr.bf16.mxu1 %v10312_v15 }
0x123b   :  { %10315 = vmatpush3.bf16.msra.mxu1 %v10314_v31 }
0x123c   :  { %10317 = vmatprep.subr.bf16.mxu1 %v10316_v33 }
0x123f   :  { %10319 = vmatpush3.bf16.msra.mxu1 %v10318_v56 }
0x1240   :  { %10321 = vmatprep.subr.bf16.mxu1 %v10320_v48 }
0x1243   :  { %10323 = vmatpush3.bf16.msra.mxu1 %v10322_v60 }
0x12d5   :  { %v7202_v47 = vpop.f32.mrb[68].mxu1  ;;  %v7273_v28 = vpop.f32.mrb[70].mxu0 }
0x12d6   :  { %v7282_v13 = vrot.slane %v7202_v47, 1  ;;  %v7204_v61 = vpop.f32.mrb[69].mxu1  ;;  %v7275_v52 = vpop.f32.mrb[71].mxu0  ;;  %v7284_v27 = vrot.slane %v7273_v28, 1  ;;  %v13836_v47 = vld [vmem:[#allocation46_spill] sm:$0xff] }
0x12d7   :  { %v7283_v1 = vrot.slane %v7204_v61, 1  ;;  %v7285_v25 = vrot.slane %v7275_v52, 1  ;;  %v13838_v61 = vld [vmem:[#allocation44_spill] sm:$0xff] }
0x12d8   :  { %v7290_v9 = vadd.f32 %v7282_v13, %v13683_v63  ;;  %v7292_v17 = vadd.f32 %v7284_v27, %v13685_v32 }
0x12d9   :  { %v7291_v42 = vadd.f32 %v7283_v1, %v13684_v51  ;;  %v7293_v18 = vadd.f32 %v7285_v25, %v13686_v44  ;;  %v13839_v1 = vld [vmem:[#allocation43_spill] sm:$0xff] }
0x12da   :  { %v7742_v36 = vmul.f32 -1.442695, %v7290_v9  ;;  %v7744_v62 = vmul.f32 -1.442695, %v7292_v17 }
0x12db   :  { %v7743_v20 = vmul.f32 -1.442695, %v7291_v42  ;;  %v13840_v42 = vld [vmem:[#allocation42_spill] sm:$0xff] }
0x12dc   :  { %10825 = vpow2.f32 %v7742_v36 }
0x12dd   :  { %10827 = vpow2.f32 %v7743_v20 }
0x12de   :  { %10829 = vtanh.f32 %v7293_v18 }
0x12df   :  { %10831 = vpow2.f32 %v7744_v62 }
0x12e6   :  { %v10826_v0 = vpop.eup %10825 }
0x12e7   :  { %v7303_v29 = vadd.f32 1.0, %v10826_v0  ;;  %v10828_v6 = vpop.eup %10827 }
0x12e8   :  { %v7304_v63 = vadd.f32 1.0, %v10828_v6  ;;  %v10830_v51 = vpop.eup %10829 }
0x12e9   :  { %10833 = vrcp.f32 %v7303_v29  ;;  %v10832_v46 = vpop.eup %10831 }
0x12ea   :  { %10835 = vrcp.f32 %v7304_v63  ;;  %v7305_v30 = vadd.f32 1.0, %v10832_v46 }
0x12ec   :  { %10837 = vrcp.f32 %v7305_v30 }
0x12f3   :  { %v10834_v7 = vpop.eup %10833 }
0x12f4   :  { %v7317_v8 = vmul.f32 %v10834_v7, %v10830_v51  ;;  %v10836_v59 = vpop.eup %10835 }
0x12f5   :  { %v7316_v32 = vmul.f32 %v10836_v59, %v7314_v55 }
0x12f6   :  { %v10838_v58 = vpop.eup %10837 }
0x12f7   :  { %v7318_v22 = vadd.f32 %v7317_v8, %v7316_v32 }
0x12f9   :  { %v7390_v44 = vpop.f32.mrb[70].mxu1  ;;  %v7461_v37 = vpop.f32.mrb[72].mxu0  ;;  %10839 = vtanh.f32 %v7318_v22 }
0x12fa   :  { %v7466_v54 = vadd.f32 %v7390_v44, %v12508_v38  ;;  %v7392_v11 = vpop.f32.mrb[71].mxu1  ;;  %v7463_v21 = vpop.f32.mrb[73].mxu0  ;;  %v7468_v3 = vadd.f32 %v7461_v37, %v12521_v4 }
0x12fb   :  { %v7467_v41 = vadd.f32 %v7392_v11, %v12512_v14  ;;  %v7469_v12 = vadd.f32 %v7463_v21, %v12525_v2 }
0x12fc   :  { %v7745_v24 = vmul.f32 -1.442695, %v7466_v54  ;;  %v7747_v39 = vmul.f32 -1.442695, %v7468_v3 }
0x12fd   :  { %v7746_v5 = vmul.f32 -1.442695, %v7467_v41 }
0x12fe   :  { %10841 = vpow2.f32 %v7745_v24 }
0x12ff   :  { %10843 = vpow2.f32 %v7746_v5 }
0x1300   :  { %10845 = vtanh.f32 %v7469_v12 }
0x1301   :  { %10847 = vpow2.f32 %v7747_v39 }
0x1303   :  { %v10840_v43 = vpop.eup %10839 }
0x1304   :  { %v7320_v15 = vmul.f32 %v10840_v43, %v10838_v58 }
0x1306   :  { %v7503_v16 = vsel %vm3809_vm8, %v13076_v10, %v7320_v15 }
0x1308   :  { %v10842_v38 = vpop.eup %10841 }
0x1309   :  { %v7479_v53 = vadd.f32 1.0, %v10842_v38  ;;  %v10844_v23 = vpop.eup %10843 }
0x130a   :  { %v7480_v14 = vadd.f32 1.0, %v10844_v23  ;;  %v10846_v31 = vpop.eup %10845 }
0x130b   :  { %10849 = vrcp.f32 %v7479_v53  ;;  %v10848_v33 = vpop.eup %10847 }
0x130c   :  { %10851 = vrcp.f32 %v7480_v14  ;;  %v7481_v40 = vadd.f32 1.0, %v10848_v33 }
0x130e   :  { %10853 = vrcp.f32 %v7481_v40 }
0x1315   :  { %v10850_v4 = vpop.eup %10849 }
0x1316   :  { %v7493_v34 = vmul.f32 %v10850_v4, %v10846_v31  ;;  %v10852_v2 = vpop.eup %10851 }
0x1317   :  { %v7492_v35 = vmul.f32 %v10852_v2, %v7490_v45 }
0x1318   :  { %v10854_v10 = vpop.eup %10853 }
0x1319   :  { %v7494_v56 = vadd.f32 %v7493_v34, %v7492_v35 }
0x131b   :  { %10855 = vtanh.f32 %v7494_v56 }
0x1325   :  { %v10856_v48 = vpop.eup %10855 }
0x1326   :  { %v7496_v49 = vmul.f32 %v10856_v48, %v10854_v10 }
0x1328   :  { %v7504_v26 = vsel %vm3797_vm2, %v7496_v49, %v13114_v50 }
0x1329   :  { %v7505_v60 = vsel %vm3799_vm3, %v7504_v26, %v13025_v57  ;;  %v7748_v57 = vld [vmem:[%s13169_s11] ss:$0 sm:$0xff] }
0x132a   :  { %v7506_v28 = vsel %vm3801_vm4, %v7505_v60, %v13836_v47 }
0x132b   :  { %v7507_v13 = vsel %vm3803_vm5, %v7506_v28, %v13837_v19 }
0x132c   :  { %v7508_v52 = vsel %vm3805_vm6, %v7507_v13, %v13838_v61 }
0x132d   :  { %v7509_v9 = vsel %vm3807_vm7, %v7508_v52, %v13839_v1 }
0x132e   :  { %v7510_v36 = vsel %vm3809_vm8, %v7509_v9, %v13840_v42 }
0x132f   :  { %7614 = vmatprep.mubr.f32.mxu1 %v7510_v36 }
0x1330   :  { %7615 = vmatmul.mubr.f32.vlgmr.msra.gmra.mrb[72].mxu1 %v7503_v16 }
0x1403   :  { %v7798_v50 = vpop.f32.mrb[72].mxu1 }
0x1404   :  { %v7799_v20 = vpop.f32.mrb[73].mxu1 }
0x1405   :  { %v7800_v27 = vadd.f32 %v7799_v20, %v7798_v50 }
0x1407   :  { %v7617_v25 = vadd.f32 %v7800_v27, %v7748_v57 }
0x1409   :  { %7620 = vmax.xlane.f32.xlu0 %v7617_v25 }
0x1496   :  { %v7621_v17 = vpop.xlane.xlu0 %7620 }
0x1497   :  { %v7622_v18 = vsub.f32 %v7617_v25, %v7621_v17 }
0x1499   :  { %v7623_v62 = vmul.f32 1.442695, %v7622_v18 }
0x149b   :  { %10857 = vpow2.f32 %v7623_v62 }
0x14a5   :  { %v10858_v0 = vpop.eup %10857 }
0x14a6   :  { %7625 = vadd.xlane.f32.xlu1 %v10858_v0 }
0x1533   :  { %v7626_v29 = vpop.xlane.xlu1 %7625 }
0x1534   :  { %10859 = vlog2.f32 %v7626_v29 }
0x153e   :  { %v10860_v6 = vpop.eup %10859 }
0x153f   :  { %v7628_v63 = vmul.f32 0.6931472, %v10860_v6 }
0x1541   :  { %v7629_v51 = vsub.f32 %v7622_v18, %v7628_v63 }
0x1543   :  { %7630 = vst [vmem:[#allocation16] sm:$0xff] %v7629_v51 }
0x1544   :  { %11048 = shalt.err (!%p11045_p12)
}
0x1545   :  { %s11049_s25 = scalar_lea.hbm %s13170_s12, 128 }
0x1546   :  { %p11050_p13 = scmp.ne.s32.totalorder %s13170_s12, %s11049_s25  ;;  %p11053_p0 = scmp.lt.u32.totalorder %s11049_s25, %s13170_s12 }
0x1548   :  { %p11055_p1 = pnand %p11053_p0, %p11050_p13 }
0x154a   :  { %11058 = shalt.err (!%p11055_p1)
}
0x154b   :  { %7640 = dma.vmem_to_hbm [thread:$0]  %s7638_s28, 128, %s13170_s12, [#allocation4]  }
0x154c   :  { %11069 = dma.done.wait [#allocation4], 128  }
0x154d   :  { %11070 = vsyncadd [#allocation4], 4294967168 }
0x154e   :  { %7644 = vsyncpa [#allocation3], 1 }
0x154f   :  { %7645 = vsyncpa [#allocation6], 1 }
0x1550   :  { %7646 = vsyncpa [#allocation9], 1 }
0x1551   :  { %7647 = vsyncpa [#allocation12], 1 }
0x1552   :  { %7648 = vsyncpa [#allocation15], 1 }
0x1553   :  { %7649 = vsyncpa [#allocation4], 1 }

</bundles_post_ra>
